<compile_context>
chip_gen: v6e
topology: v6e:2x2x1
jax: 0.10.0
libtpu: 0.0.40
codegen_flags: <defaults>
</compile_context>

<pallas_src>
import jax
import jax.numpy as jnp
from jax.experimental import pallas as pl
from jax.experimental.pallas import tpu as pltpu

BN_EPS = 1e-5
TM_MAX = 512          # rows of the im2col matrix per grid step
LANE = 128            # lane-density target for output channel dims


# ----------------------------- Pallas kernels -------------------------------
def _mm_bn_relu_kernel(x_ref, w_ref, s_ref, b_ref, o_ref):
    # bf16 x bf16 -> f32 accumulator on the MXU; BN affine + ReLU in f32.
    y = jnp.dot(x_ref[...], w_ref[...], preferred_element_type=jnp.float32)
    y = y * s_ref[...] + b_ref[...]
    o_ref[...] = jnp.maximum(y, 0.0).astype(o_ref.dtype)


def _mm_bn_mask_kernel(x_ref, w_ref, s_ref, b_ref, m_ref, o_ref):
    # Fused conv1 + shortcut: per-channel mask selects ReLU (1.0) or identity
    # (0.0) so the ReLU'd conv1 half and the linear shortcut half share one
    # matmul.  relu(y) = y - min(y, 0).
    y = jnp.dot(x_ref[...], w_ref[...], preferred_element_type=jnp.float32)
    y = y * s_ref[...] + b_ref[...]
    o_ref[...] = (y - m_ref[...] * jnp.minimum(y, 0.0)).astype(o_ref.dtype)


def _mm_bn_res_kernel(x_ref, w_ref, s_ref, b_ref, r_ref, o_ref):
    # conv2 of BasicBlock: matmul + BN affine + residual add + ReLU, fused.
    y = jnp.dot(x_ref[...], w_ref[...], preferred_element_type=jnp.float32)
    y = y * s_ref[...] + b_ref[...] + r_ref[...].astype(jnp.float32)
    o_ref[...] = jnp.maximum(y, 0.0).astype(o_ref.dtype)


# ------------------------------ kernel wrapper -------------------------------
def _choose_tm(m, tm_max=TM_MAX):
    if m <= tm_max:
        return m
    tm = (tm_max // 8) * 8
    while tm >= 8 and m % tm:
        tm -= 8
    return tm if tm >= 8 and m % tm == 0 else m


def _mm_bn(cols, wmat, scale, shift, *, mask=None, residual=None):
    """(M,K)@(K,Cout) + per-channel affine (+ mask-ReLU | + residual+ReLU)."""
    M, K = cols.shape
    Cout = wmat.shape[1]
    TM = _choose_tm(M)
    grid = (M // TM,)

    base_specs = [
        pl.BlockSpec((TM, K), lambda i: (i, 0)),
        pl.BlockSpec((K, Cout), lambda i: (0, 0)),
        pl.BlockSpec((1, Cout), lambda i: (0, 0)),
        pl.BlockSpec((1, Cout), lambda i: (0, 0)),
    ]
    out_spec = pl.BlockSpec((TM, Cout), lambda i: (i, 0))
    out_shape = jax.ShapeDtypeStruct((M, Cout), jnp.bfloat16)
    cparams = pltpu.CompilerParams(dimension_semantics=("parallel",))

    flops = 2 * M * K * Cout
    bytes_accessed = M * K * 2 + K * Cout * 2 + M * Cout * 2 + 2 * Cout * 4
    if residual is not None:
        bytes_accessed += M * Cout * 2
    if mask is not None:
        bytes_accessed += Cout * 4
    ce = pl.CostEstimate(flops=flops, transcendentals=0,
                         bytes_accessed=bytes_accessed)

    if residual is not None:
        return pl.pallas_call(
            _mm_bn_res_kernel,
            out_shape=out_shape,
            grid=grid,
            in_specs=base_specs + [pl.BlockSpec((TM, Cout), lambda i: (i, 0))],
            out_specs=out_spec,
            compiler_params=cparams,
            cost_estimate=ce,
            input_output_aliases={4: 0},   # residual buffer reused as output
        )(cols, wmat, scale, shift, residual)

    if mask is not None:
        return pl.pallas_call(
            _mm_bn_mask_kernel,
            out_shape=out_shape,
            grid=grid,
            in_specs=base_specs + [pl.BlockSpec((1, Cout), lambda i: (0, 0))],
            out_specs=out_spec,
            compiler_params=cparams,
            cost_estimate=ce,
        )(cols, wmat, scale, shift, mask)

    return pl.pallas_call(
        _mm_bn_relu_kernel,
        out_shape=out_shape,
        grid=grid,
        in_specs=base_specs,
        out_specs=out_spec,
        compiler_params=cparams,
        cost_estimate=ce,
    )(cols, wmat, scale, shift)


# ------------------------------- glue (JAX) ---------------------------------
def _im2col_nhwc(x, kh, kw, stride, pad):
    """x: (N,H,W,C) -> (N*Ho*Wo, kh*kw*C) with (kh,kw) slow, C fastest (lanes)."""
    N, H, W, C = x.shape
    xp = jnp.pad(x, ((0, 0), (pad, pad), (pad, pad), (0, 0)))
    Ho = (H + 2 * pad - kh) // stride + 1
    Wo = (W + 2 * pad - kw) // stride + 1
    patches = []
    for i in range(kh):
        for j in range(kw):
            patches.append(xp[:, i:i + stride * Ho:stride,
                               j:j + stride * Wo:stride, :])     # (N,Ho,Wo,C)
    cols = jnp.concatenate(patches, axis=-1)                      # (N,Ho,Wo,kh*kw*C)
    return cols.reshape(N * Ho * Wo, kh * kw * C), (N, Ho, Wo)


def _round_up(c, m=LANE):
    return ((c + m - 1) // m) * m


def _weight_to_matrix(w, cin_pad):
    """OIHW -> (kh*kw*cin_pad, Cout), K ordered (kh, kw, cin) with cin fastest."""
    Cout, Cin, kh, kw = w.shape
    wt = jnp.transpose(w, (2, 3, 1, 0))                           # (kh,kw,Cin,Cout)
    if cin_pad > Cin:
        wt = jnp.pad(wt, ((0, 0), (0, 0), (0, cin_pad - Cin), (0, 0)))
    return wt.reshape(kh * kw * cin_pad, Cout)


def _embed_1x1_as_3x3(wsc):
    """Embed a 1x1 conv weight as the center tap of a zero 3x3 weight."""
    Cout, Cin, _, _ = wsc.shape
    w3 = jnp.zeros((Cout, Cin, 3, 3), wsc.dtype)
    return w3.at[:, :, 1, 1].set(wsc[:, :, 0, 0])


def _pad_cout(wmat, scale, shift, cout_pad):
    Cout = wmat.shape[1]
    if cout_pad > Cout:
        wmat = jnp.pad(wmat, ((0, 0), (0, cout_pad - Cout)))
        scale = jnp.pad(scale, (0, cout_pad - Cout), constant_values=1.0)
        shift = jnp.pad(shift, (0, cout_pad - Cout))
    return wmat, scale, shift


def _fold_bn(bn, conv_bias=None):
    gamma, beta, mean, var = bn
    scale = gamma / jnp.sqrt(var + BN_EPS)
    shift = beta - mean * scale
    if conv_bias is not None:
        shift = shift + conv_bias * scale
    return scale, shift


# --------------------- one-time parameter preparation -----------------------
def prepare_params(params):
    """Fold BN, reshape / pad / fuse weights into matmul-ready bf16 matrices."""
    prep = {}

    # f1: conv7x7(bias) + BN + ReLU; Cout padded 32 -> 128 for lane density.
    p = params["f1"]
    s, b = _fold_bn(p["bn"], p["cb"])
    cout_pad = _round_up(p["w"].shape[0])
    wmat = _weight_to_matrix(p["w"], p["w"].shape[1])
    wmat, s, b = _pad_cout(wmat, s, b, cout_pad)
    prep["f1"] = {
        "w": wmat.astype(jnp.bfloat16),
        "s": s.reshape(1, -1).astype(jnp.float32),
        "b": b.reshape(1, -1).astype(jnp.float32),
    }
    cin_pad = cout_pad

    for name in ["res1", "res2", "res3", "res4"]:
        p = params[name]
        cout = p["w1"].shape[0]
        s1, b1 = _fold_bn(p["bn1"])
        s2, b2 = _fold_bn(p["bn2"])
        ssc, bsc = _fold_bn(p["bnsc"])

        # fused conv1(3x3) + shortcut(1x1 as center tap): (9*cin_pad, 2*cout)
        w1m = _weight_to_matrix(p["w1"], cin_pad)
        wscm = _weight_to_matrix(_embed_1x1_as_3x3(p["wsc"]), cin_pad)
        wf = jnp.concatenate([w1m, wscm], axis=1)
        sf = jnp.concatenate([s1, ssc])
        bf = jnp.concatenate([b1, bsc])
        mask = jnp.concatenate([jnp.ones((cout,), jnp.float32),
                                jnp.zeros((cout,), jnp.float32)])

        # conv2: Cin = cout (unpadded h), Cout padded for lane-dense stores.
        cout_pad = _round_up(cout)
        w2m = _weight_to_matrix(p["w2"], cout)
        w2m, s2p, b2p = _pad_cout(w2m, s2, b2, cout_pad)

        prep[name] = {
            "wf": wf.astype(jnp.bfloat16),
            "sf": sf.reshape(1, -1).astype(jnp.float32),
            "bf": bf.reshape(1, -1).astype(jnp.float32),
            "mask": mask.reshape(1, -1),
            "w2": w2m.astype(jnp.bfloat16),
            "s2": s2p.reshape(1, -1).astype(jnp.float32),
            "b2": b2p.reshape(1, -1).astype(jnp.float32),
        }
        cin_pad = cout_pad
    return prep


# ------------------------------ parameters ----------------------------------
def _init_conv(key, cout, cin, kh, kw):
    fan_in = cin * kh * kw
    return jax.random.normal(key, (cout, cin, kh, kw), jnp.float32) / jnp.sqrt(
        jnp.float32(fan_in))


def _init_bn(key, c):
    k1, k2, k3, k4 = jax.random.split(key, 4)
    gamma = 1.0 + 0.1 * jax.random.normal(k1, (c,), jnp.float32)
    beta = 0.1 * jax.random.normal(k2, (c,), jnp.float32)
    mean = 0.1 * jax.random.normal(k3, (c,), jnp.float32)
    var = 1.0 + 0.1 * jax.random.uniform(k4, (c,), jnp.float32)
    return gamma, beta, mean, var


def make_params(key):
    keys = iter(jax.random.split(key, 32))
    params = {
        "f1": {
            "w": _init_conv(next(keys), 32, 1, 7, 7),
            "cb": 0.1 * jax.random.normal(next(keys), (32,), jnp.float32),
            "bn": _init_bn(next(keys), 32),
        }
    }

    def block(cin, cout):
        return {
            "w1": _init_conv(next(keys), cout, cin, 3, 3),
            "bn1": _init_bn(next(keys), cout),
            "w2": _init_conv(next(keys), cout, cout, 3, 3),
            "bn2": _init_bn(next(keys), cout),
            "wsc": _init_conv(next(keys), cout, cin, 1, 1),
            "bnsc": _init_bn(next(keys), cout),
        }

    params["res1"] = block(32, 64)
    params["res2"] = block(64, 128)
    params["res3"] = block(128, 128)
    params["res4"] = block(128, 256)
    return params


# ------------------------------ forward (Pallas) -----------------------------
def _basic_block(p, a, stride):
    """a: (N,H,W,Cp) bf16 NHWC with zero-padded channels. Returns bf16 NHWC."""
    cout = p["mask"].shape[1] // 2          # static
    cout_pad = p["w2"].shape[1]             # static

    # --- fused conv1(3x3, ReLU) + shortcut(1x1 as center tap, no ReLU) ------
    cols, (N, Ho, Wo) = _im2col_nhwc(a, 3, 3, stride, 1)
    fused = _mm_bn(cols, p["wf"], p["sf"], p["bf"], mask=p["mask"])  # (M, 2*cout)
    fused = fused.reshape(N, Ho, Wo, 2 * cout)
    h = fused[..., :cout]                                  # relu(bn1(conv1)), bf16
    sc = fused[..., cout:].reshape(N * Ho * Wo, cout)      # bn(shortcut), bf16
    if cout_pad > cout:
        sc = jnp.pad(sc, ((0, 0), (0, cout_pad - cout)))

    # --- conv2 + bn2 + residual add + ReLU (lane-dense padded Cout) ---------
    cols2, _ = _im2col_nhwc(h, 3, 3, 1, 1)
    out = _mm_bn(cols2, p["w2"], p["s2"], p["b2"], residual=sc)      # (M, cout_pad)
    return out.reshape(N, Ho, Wo, cout_pad), cout


def forward_pallas(prep, x):
    # NCHW -> NHWC bf16 once at the network boundary.
    a = jnp.transpose(x, (0, 2, 3, 1)).astype(jnp.bfloat16)          # (N,H,W,1)

    # f1: conv7x7(bias) + BN + ReLU.
    p = prep["f1"]
    cols, (N, Ho, Wo) = _im2col_nhwc(a, 7, 7, 1, 3)
    a = _mm_bn(cols, p["w"], p["s"], p["b"]).reshape(N, Ho, Wo, p["w"].shape[1])

    # Residual blocks (all stride 2). Padded channels stay exactly zero.
    c_real = 0
    for name in ["res1", "res2", "res3", "res4"]:
        a, c_real = _basic_block(prep[name], a, stride=2)

    # Strip channel padding, back to NCHW order, flatten (matches nn.Flatten).
    a = a[..., :c_real]
    a = jnp.transpose(a, (0, 3, 1, 2))
    return a.reshape(a.shape[0], -1).astype(jnp.float32)


# ----------------------------- reference (JAX) -------------------------------
def _conv_ref(x, w, stride, pad, bias=None):
    # Mirror the kernel's numerics: bf16 matmul operands, f32 accumulation.
    y = jax.lax.conv_general_dilated(
        x.astype(jnp.bfloat16), w.astype(jnp.bfloat16),
        (stride, stride), [(pad, pad), (pad, pad)],
        dimension_numbers=("NCHW", "OIHW", "NCHW"),
        preferred_element_type=jnp.float32)
    if bias is not None:
        y = y + bias[None, :, None, None]
    return y


def _bn_ref(x, bn):
    gamma, beta, mean, var = bn
    inv = gamma / jnp.sqrt(var + BN_EPS)
    return x * inv[None, :, None, None] + (beta - mean * inv)[None, :, None, None]


def forward_ref(params, x):
    o = jnp.maximum(
        _bn_ref(_conv_ref(x, params["f1"]["w"], 1, 3, params["f1"]["cb"]),
                params["f1"]["bn"]), 0.0)
    for name in ["res1", "res2", "res3", "res4"]:
        p = params[name]
        h = jnp.maximum(_bn_ref(_conv_ref(o, p["w1"], 2, 1), p["bn1"]), 0.0)
        out = _bn_ref(_conv_ref(h, p["w2"], 1, 1), p["bn2"])
        sc = _bn_ref(_conv_ref(o, p["wsc"], 2, 0), p["bnsc"])
        o = jnp.maximum(out + sc, 0.0)
    return o.reshape(o.shape[0], -1)


# ---------------------------------- main -------------------------------------
if __name__ == "__main__":
    key = jax.random.PRNGKey(0)
    kx, kp = jax.random.split(key)
    x = jax.random.normal(kx, (2, 1, 16, 16), jnp.float32)   # NCHW, like PyTorch
    params = make_params(kp)
    prep = prepare_params(params)                            # one-time weight prep

    y = jax.jit(forward_pallas)(prep, x)
    y = jax.block_until_ready(y)

    y_ref = jax.jit(forward_ref)(params, x)
    y_ref = jax.block_until_ready(y_ref)

    assert y.shape == (2, 256), y.shape
    rel_err = float(jnp.max(jnp.abs(y - y_ref)) / (jnp.max(jnp.abs(y_ref)) + 1e-6))
    assert rel_err < 3e-2, f"mismatch vs reference: rel_err={rel_err}"

    print("KERNEL_OK")
</pallas_src>

<mosaic_0001>
module attributes {stable_mosaic.version = 11 : i64} {
  func.func @_mm_bn_relu_kernel(%arg0: i32, %arg1: memref<512x49xbf16, #tpu.memory_space<vmem>>, %arg2: memref<49x128xbf16, #tpu.memory_space<vmem>>, %arg3: memref<1x128xf32, #tpu.memory_space<vmem>>, %arg4: memref<1x128xf32, #tpu.memory_space<vmem>>, %arg5: memref<512x128xbf16, #tpu.memory_space<vmem>>) attributes {dimension_semantics = [#tpu.dimension_semantics<parallel>], iteration_bounds = array<i64: 1>, scalar_prefetch = 0 : i64, scratch_operands = 0 : i64, tpu.core_type = #tpu.core_type<tc>, window_params = [{transform_indices = @transform_0, window_bounds = array<i64: 512, 49>}, {pipeline_mode = #tpu.pipeline_mode<synchronous>, transform_indices = @transform_1, window_bounds = array<i64: 49, 128>}, {pipeline_mode = #tpu.pipeline_mode<synchronous>, transform_indices = @transform_2, window_bounds = array<i64: 1, 128>}, {pipeline_mode = #tpu.pipeline_mode<synchronous>, transform_indices = @transform_3, window_bounds = array<i64: 1, 128>}, {transform_indices = @transform_4, window_bounds = array<i64: 512, 128>}]} {
    %c0 = arith.constant 0 : index
    %c0_0 = arith.constant 0 : index
    %0 = vector.load %arg1[%c0, %c0_0] : memref<512x49xbf16, #tpu.memory_space<vmem>>, vector<512x49xbf16>
    %c0_1 = arith.constant 0 : index
    %c0_2 = arith.constant 0 : index
    %1 = vector.load %arg2[%c0_1, %c0_2] : memref<49x128xbf16, #tpu.memory_space<vmem>>, vector<49x128xbf16>
    %cst = arith.constant dense<0.000000e+00> : vector<512x128xf32>
    %2 = tpu.matmul %0, %1, %cst {dimension_numbers = #tpu.dot_dimension_numbers<[1], [0], [0], [1], [0, 0, 1, 1], [], []>} : vector<512x49xbf16>, vector<49x128xbf16>, vector<512x128xf32> -> vector<512x128xf32>
    %c0_3 = arith.constant 0 : index
    %c0_4 = arith.constant 0 : index
    %3 = vector.load %arg3[%c0_3, %c0_4] : memref<1x128xf32, #tpu.memory_space<vmem>>, vector<1x128xf32>
    %4 = vector.broadcast %3 : vector<1x128xf32> to vector<512x128xf32>
    %5 = arith.mulf %2, %4 : vector<512x128xf32>
    %c0_5 = arith.constant 0 : index
    %c0_6 = arith.constant 0 : index
    %6 = vector.load %arg4[%c0_5, %c0_6] : memref<1x128xf32, #tpu.memory_space<vmem>>, vector<1x128xf32>
    %7 = vector.broadcast %6 : vector<1x128xf32> to vector<512x128xf32>
    %8 = arith.addf %5, %7 : vector<512x128xf32>
    %cst_7 = arith.constant 0.000000e+00 : f32
    %9 = vector.broadcast %cst_7 : f32 to vector<512x128xf32>
    %10 = arith.maximumf %8, %9 : vector<512x128xf32>
    %11 = arith.truncf %10 : vector<512x128xf32> to vector<512x128xbf16>
    %c0_8 = arith.constant 0 : index
    %c0_9 = arith.constant 0 : index
    %12 = vector.load %arg5[%c0_8, %c0_9] : memref<512x128xbf16, #tpu.memory_space<vmem>>, vector<512x128xbf16>
    tpu.vector_store %arg5[%c0_8, %c0_9], %11 {strides = array<i32>} : memref<512x128xbf16, #tpu.memory_space<vmem>>, vector<512x128xbf16>,
    return
  }
  func.func @transform_0(%arg0: i32) -> (i32, i32) {
    %c0_i32 = arith.constant 0 : i32
    %c0_i32_0 = arith.constant 0 : i32
    return %arg0, %c0_i32 : i32, i32
  }
  func.func @transform_1(%arg0: i32) -> (i32, i32) {
    %c0_i32 = arith.constant 0 : i32
    %c0_i32_0 = arith.constant 0 : i32
    %c0_i32_1 = arith.constant 0 : i32
    return %c0_i32, %c0_i32_0 : i32, i32
  }
  func.func @transform_2(%arg0: i32) -> (i32, i32) {
    %c0_i32 = arith.constant 0 : i32
    %c0_i32_0 = arith.constant 0 : i32
    %c0_i32_1 = arith.constant 0 : i32
    return %c0_i32, %c0_i32_0 : i32, i32
  }
  func.func @transform_3(%arg0: i32) -> (i32, i32) {
    %c0_i32 = arith.constant 0 : i32
    %c0_i32_0 = arith.constant 0 : i32
    %c0_i32_1 = arith.constant 0 : i32
    return %c0_i32, %c0_i32_0 : i32, i32
  }
  func.func @transform_4(%arg0: i32) -> (i32, i32) {
    %c0_i32 = arith.constant 0 : i32
    %c0_i32_0 = arith.constant 0 : i32
    return %arg0, %c0_i32 : i32, i32
  }
}

module attributes {stable_mosaic.version = 11 : i64} {
  func.func @_mm_bn_mask_kernel(%arg0: i32, %arg1: memref<128x1152xbf16, #tpu.memory_space<vmem>>, %arg2: memref<1152x128xbf16, #tpu.memory_space<vmem>>, %arg3: memref<1x128xf32, #tpu.memory_space<vmem>>, %arg4: memref<1x128xf32, #tpu.memory_space<vmem>>, %arg5: memref<1x128xf32, #tpu.memory_space<vmem>>, %arg6: memref<128x128xbf16, #tpu.memory_space<vmem>>) attributes {dimension_semantics = [#tpu.dimension_semantics<parallel>], iteration_bounds = array<i64: 1>, scalar_prefetch = 0 : i64, scratch_operands = 0 : i64, tpu.core_type = #tpu.core_type<tc>, window_params = [{transform_indices = @transform_0, window_bounds = array<i64: 128, 1152>}, {pipeline_mode = #tpu.pipeline_mode<synchronous>, transform_indices = @transform_1, window_bounds = array<i64: 1152, 128>}, {pipeline_mode = #tpu.pipeline_mode<synchronous>, transform_indices = @transform_2, window_bounds = array<i64: 1, 128>}, {pipeline_mode = #tpu.pipeline_mode<synchronous>, transform_indices = @transform_3, window_bounds = array<i64: 1, 128>}, {pipeline_mode = #tpu.pipeline_mode<synchronous>, transform_indices = @transform_4, window_bounds = array<i64: 1, 128>}, {transform_indices = @transform_5, window_bounds = array<i64: 128, 128>}]} {
    %c0 = arith.constant 0 : index
    %c0_0 = arith.constant 0 : index
    %0 = vector.load %arg1[%c0, %c0_0] : memref<128x1152xbf16, #tpu.memory_space<vmem>>, vector<128x1152xbf16>
    %c0_1 = arith.constant 0 : index
    %c0_2 = arith.constant 0 : index
    %1 = vector.load %arg2[%c0_1, %c0_2] : memref<1152x128xbf16, #tpu.memory_space<vmem>>, vector<1152x128xbf16>
    %cst = arith.constant dense<0.000000e+00> : vector<128x128xf32>
    %2 = tpu.matmul %0, %1, %cst {dimension_numbers = #tpu.dot_dimension_numbers<[1], [0], [0], [1], [0, 0, 1, 1], [], []>} : vector<128x1152xbf16>, vector<1152x128xbf16>, vector<128x128xf32> -> vector<128x128xf32>
    %c0_3 = arith.constant 0 : index
    %c0_4 = arith.constant 0 : index
    %3 = vector.load %arg3[%c0_3, %c0_4] : memref<1x128xf32, #tpu.memory_space<vmem>>, vector<1x128xf32>
    %4 = vector.broadcast %3 : vector<1x128xf32> to vector<128x128xf32>
    %5 = arith.mulf %2, %4 : vector<128x128xf32>
    %c0_5 = arith.constant 0 : index
    %c0_6 = arith.constant 0 : index
    %6 = vector.load %arg4[%c0_5, %c0_6] : memref<1x128xf32, #tpu.memory_space<vmem>>, vector<1x128xf32>
    %7 = vector.broadcast %6 : vector<1x128xf32> to vector<128x128xf32>
    %8 = arith.addf %5, %7 : vector<128x128xf32>
    %c0_7 = arith.constant 0 : index
    %c0_8 = arith.constant 0 : index
    %9 = vector.load %arg5[%c0_7, %c0_8] : memref<1x128xf32, #tpu.memory_space<vmem>>, vector<1x128xf32>
    %cst_9 = arith.constant 0.000000e+00 : f32
    %10 = vector.broadcast %cst_9 : f32 to vector<128x128xf32>
    %11 = arith.minimumf %8, %10 : vector<128x128xf32>
    %12 = vector.broadcast %9 : vector<1x128xf32> to vector<128x128xf32>
    %13 = arith.mulf %12, %11 : vector<128x128xf32>
    %14 = arith.subf %8, %13 : vector<128x128xf32>
    %15 = arith.truncf %14 : vector<128x128xf32> to vector<128x128xbf16>
    %c0_10 = arith.constant 0 : index
    %c0_11 = arith.constant 0 : index
    %16 = vector.load %arg6[%c0_10, %c0_11] : memref<128x128xbf16, #tpu.memory_space<vmem>>, vector<128x128xbf16>
    tpu.vector_store %arg6[%c0_10, %c0_11], %15 {strides = array<i32>} : memref<128x128xbf16, #tpu.memory_space<vmem>>, vector<128x128xbf16>,
    return
  }
  func.func @transform_0(%arg0: i32) -> (i32, i32) {
    %c0_i32 = arith.constant 0 : i32
    %c0_i32_0 = arith.constant 0 : i32
    return %arg0, %c0_i32 : i32, i32
  }
  func.func @transform_1(%arg0: i32) -> (i32, i32) {
    %c0_i32 = arith.constant 0 : i32
    %c0_i32_0 = arith.constant 0 : i32
    %c0_i32_1 = arith.constant 0 : i32
    return %c0_i32, %c0_i32_0 : i32, i32
  }
  func.func @transform_2(%arg0: i32) -> (i32, i32) {
    %c0_i32 = arith.constant 0 : i32
    %c0_i32_0 = arith.constant 0 : i32
    %c0_i32_1 = arith.constant 0 : i32
    return %c0_i32, %c0_i32_0 : i32, i32
  }
  func.func @transform_3(%arg0: i32) -> (i32, i32) {
    %c0_i32 = arith.constant 0 : i32
    %c0_i32_0 = arith.constant 0 : i32
    %c0_i32_1 = arith.constant 0 : i32
    return %c0_i32, %c0_i32_0 : i32, i32
  }
  func.func @transform_4(%arg0: i32) -> (i32, i32) {
    %c0_i32 = arith.constant 0 : i32
    %c0_i32_0 = arith.constant 0 : i32
    %c0_i32_1 = arith.constant 0 : i32
    return %c0_i32, %c0_i32_0 : i32, i32
  }
  func.func @transform_5(%arg0: i32) -> (i32, i32) {
    %c0_i32 = arith.constant 0 : i32
    %c0_i32_0 = arith.constant 0 : i32
    return %arg0, %c0_i32 : i32, i32
  }
}

module attributes {stable_mosaic.version = 11 : i64} {
  func.func @_mm_bn_res_kernel(%arg0: i32, %arg1: memref<128x576xbf16, #tpu.memory_space<vmem>>, %arg2: memref<576x128xbf16, #tpu.memory_space<vmem>>, %arg3: memref<1x128xf32, #tpu.memory_space<vmem>>, %arg4: memref<1x128xf32, #tpu.memory_space<vmem>>, %arg5: memref<128x128xbf16, #tpu.memory_space<vmem>>, %arg6: memref<128x128xbf16, #tpu.memory_space<vmem>>) attributes {dimension_semantics = [#tpu.dimension_semantics<parallel>], iteration_bounds = array<i64: 1>, scalar_prefetch = 0 : i64, scratch_operands = 0 : i64, tpu.core_type = #tpu.core_type<tc>, window_params = [{transform_indices = @transform_0, window_bounds = array<i64: 128, 576>}, {pipeline_mode = #tpu.pipeline_mode<synchronous>, transform_indices = @transform_1, window_bounds = array<i64: 576, 128>}, {pipeline_mode = #tpu.pipeline_mode<synchronous>, transform_indices = @transform_2, window_bounds = array<i64: 1, 128>}, {pipeline_mode = #tpu.pipeline_mode<synchronous>, transform_indices = @transform_3, window_bounds = array<i64: 1, 128>}, {transform_indices = @transform_4, window_bounds = array<i64: 128, 128>}, {transform_indices = @transform_5, window_bounds = array<i64: 128, 128>}]} {
    %c0 = arith.constant 0 : index
    %c0_0 = arith.constant 0 : index
    %0 = vector.load %arg1[%c0, %c0_0] : memref<128x576xbf16, #tpu.memory_space<vmem>>, vector<128x576xbf16>
    %c0_1 = arith.constant 0 : index
    %c0_2 = arith.constant 0 : index
    %1 = vector.load %arg2[%c0_1, %c0_2] : memref<576x128xbf16, #tpu.memory_space<vmem>>, vector<576x128xbf16>
    %cst = arith.constant dense<0.000000e+00> : vector<128x128xf32>
    %2 = tpu.matmul %0, %1, %cst {dimension_numbers = #tpu.dot_dimension_numbers<[1], [0], [0], [1], [0, 0, 1, 1], [], []>} : vector<128x576xbf16>, vector<576x128xbf16>, vector<128x128xf32> -> vector<128x128xf32>
    %c0_3 = arith.constant 0 : index
    %c0_4 = arith.constant 0 : index
    %3 = vector.load %arg3[%c0_3, %c0_4] : memref<1x128xf32, #tpu.memory_space<vmem>>, vector<1x128xf32>
    %4 = vector.broadcast %3 : vector<1x128xf32> to vector<128x128xf32>
    %5 = arith.mulf %2, %4 : vector<128x128xf32>
    %c0_5 = arith.constant 0 : index
    %c0_6 = arith.constant 0 : index
    %6 = vector.load %arg4[%c0_5, %c0_6] : memref<1x128xf32, #tpu.memory_space<vmem>>, vector<1x128xf32>
    %7 = vector.broadcast %6 : vector<1x128xf32> to vector<128x128xf32>
    %8 = arith.addf %5, %7 : vector<128x128xf32>
    %c0_7 = arith.constant 0 : index
    %c0_8 = arith.constant 0 : index
    %9 = vector.load %arg5[%c0_7, %c0_8] : memref<128x128xbf16, #tpu.memory_space<vmem>>, vector<128x128xbf16>
    %10 = arith.extf %9 : vector<128x128xbf16> to vector<128x128xf32>
    %11 = arith.addf %8, %10 : vector<128x128xf32>
    %cst_9 = arith.constant 0.000000e+00 : f32
    %12 = vector.broadcast %cst_9 : f32 to vector<128x128xf32>
    %13 = arith.maximumf %11, %12 : vector<128x128xf32>
    %14 = arith.truncf %13 : vector<128x128xf32> to vector<128x128xbf16>
    %c0_10 = arith.constant 0 : index
    %c0_11 = arith.constant 0 : index
    %15 = vector.load %arg6[%c0_10, %c0_11] : memref<128x128xbf16, #tpu.memory_space<vmem>>, vector<128x128xbf16>
    tpu.vector_store %arg6[%c0_10, %c0_11], %14 {strides = array<i32>} : memref<128x128xbf16, #tpu.memory_space<vmem>>, vector<128x128xbf16>,
    return
  }
  func.func @transform_0(%arg0: i32) -> (i32, i32) {
    %c0_i32 = arith.constant 0 : i32
    %c0_i32_0 = arith.constant 0 : i32
    return %arg0, %c0_i32 : i32, i32
  }
  func.func @transform_1(%arg0: i32) -> (i32, i32) {
    %c0_i32 = arith.constant 0 : i32
    %c0_i32_0 = arith.constant 0 : i32
    %c0_i32_1 = arith.constant 0 : i32
    return %c0_i32, %c0_i32_0 : i32, i32
  }
  func.func @transform_2(%arg0: i32) -> (i32, i32) {
    %c0_i32 = arith.constant 0 : i32
    %c0_i32_0 = arith.constant 0 : i32
    %c0_i32_1 = arith.constant 0 : i32
    return %c0_i32, %c0_i32_0 : i32, i32
  }
  func.func @transform_3(%arg0: i32) -> (i32, i32) {
    %c0_i32 = arith.constant 0 : i32
    %c0_i32_0 = arith.constant 0 : i32
    %c0_i32_1 = arith.constant 0 : i32
    return %c0_i32, %c0_i32_0 : i32, i32
  }
  func.func @transform_4(%arg0: i32) -> (i32, i32) {
    %c0_i32 = arith.constant 0 : i32
    %c0_i32_0 = arith.constant 0 : i32
    return %arg0, %c0_i32 : i32, i32
  }
  func.func @transform_5(%arg0: i32) -> (i32, i32) {
    %c0_i32 = arith.constant 0 : i32
    %c0_i32_0 = arith.constant 0 : i32
    return %arg0, %c0_i32 : i32, i32
  }
}

module attributes {stable_mosaic.version = 11 : i64} {
  func.func @_mm_bn_mask_kernel(%arg0: i32, %arg1: memref<32x1152xbf16, #tpu.memory_space<vmem>>, %arg2: memref<1152x256xbf16, #tpu.memory_space<vmem>>, %arg3: memref<1x256xf32, #tpu.memory_space<vmem>>, %arg4: memref<1x256xf32, #tpu.memory_space<vmem>>, %arg5: memref<1x256xf32, #tpu.memory_space<vmem>>, %arg6: memref<32x256xbf16, #tpu.memory_space<vmem>>) attributes {dimension_semantics = [#tpu.dimension_semantics<parallel>], iteration_bounds = array<i64: 1>, scalar_prefetch = 0 : i64, scratch_operands = 0 : i64, tpu.core_type = #tpu.core_type<tc>, window_params = [{transform_indices = @transform_0, window_bounds = array<i64: 32, 1152>}, {pipeline_mode = #tpu.pipeline_mode<synchronous>, transform_indices = @transform_1, window_bounds = array<i64: 1152, 256>}, {pipeline_mode = #tpu.pipeline_mode<synchronous>, transform_indices = @transform_2, window_bounds = array<i64: 1, 256>}, {pipeline_mode = #tpu.pipeline_mode<synchronous>, transform_indices = @transform_3, window_bounds = array<i64: 1, 256>}, {pipeline_mode = #tpu.pipeline_mode<synchronous>, transform_indices = @transform_4, window_bounds = array<i64: 1, 256>}, {transform_indices = @transform_5, window_bounds = array<i64: 32, 256>}]} {
    %c0 = arith.constant 0 : index
    %c0_0 = arith.constant 0 : index
    %0 = vector.load %arg1[%c0, %c0_0] : memref<32x1152xbf16, #tpu.memory_space<vmem>>, vector<32x1152xbf16>
    %c0_1 = arith.constant 0 : index
    %c0_2 = arith.constant 0 : index
    %1 = vector.load %arg2[%c0_1, %c0_2] : memref<1152x256xbf16, #tpu.memory_space<vmem>>, vector<1152x256xbf16>
    %cst = arith.constant dense<0.000000e+00> : vector<32x256xf32>
    %2 = tpu.matmul %0, %1, %cst {dimension_numbers = #tpu.dot_dimension_numbers<[1], [0], [0], [1], [0, 0, 1, 1], [], []>} : vector<32x1152xbf16>, vector<1152x256xbf16>, vector<32x256xf32> -> vector<32x256xf32>
    %c0_3 = arith.constant 0 : index
    %c0_4 = arith.constant 0 : index
    %3 = vector.load %arg3[%c0_3, %c0_4] : memref<1x256xf32, #tpu.memory_space<vmem>>, vector<1x256xf32>
    %4 = vector.broadcast %3 : vector<1x256xf32> to vector<32x256xf32>
    %5 = arith.mulf %2, %4 : vector<32x256xf32>
    %c0_5 = arith.constant 0 : index
    %c0_6 = arith.constant 0 : index
    %6 = vector.load %arg4[%c0_5, %c0_6] : memref<1x256xf32, #tpu.memory_space<vmem>>, vector<1x256xf32>
    %7 = vector.broadcast %6 : vector<1x256xf32> to vector<32x256xf32>
    %8 = arith.addf %5, %7 : vector<32x256xf32>
    %c0_7 = arith.constant 0 : index
    %c0_8 = arith.constant 0 : index
    %9 = vector.load %arg5[%c0_7, %c0_8] : memref<1x256xf32, #tpu.memory_space<vmem>>, vector<1x256xf32>
    %cst_9 = arith.constant 0.000000e+00 : f32
    %10 = vector.broadcast %cst_9 : f32 to vector<32x256xf32>
    %11 = arith.minimumf %8, %10 : vector<32x256xf32>
    %12 = vector.broadcast %9 : vector<1x256xf32> to vector<32x256xf32>
    %13 = arith.mulf %12, %11 : vector<32x256xf32>
    %14 = arith.subf %8, %13 : vector<32x256xf32>
    %15 = arith.truncf %14 : vector<32x256xf32> to vector<32x256xbf16>
    %c0_10 = arith.constant 0 : index
    %c0_11 = arith.constant 0 : index
    %16 = vector.load %arg6[%c0_10, %c0_11] : memref<32x256xbf16, #tpu.memory_space<vmem>>, vector<32x256xbf16>
    tpu.vector_store %arg6[%c0_10, %c0_11], %15 {strides = array<i32>} : memref<32x256xbf16, #tpu.memory_space<vmem>>, vector<32x256xbf16>,
    return
  }
  func.func @transform_0(%arg0: i32) -> (i32, i32) {
    %c0_i32 = arith.constant 0 : i32
    %c0_i32_0 = arith.constant 0 : i32
    return %arg0, %c0_i32 : i32, i32
  }
  func.func @transform_1(%arg0: i32) -> (i32, i32) {
    %c0_i32 = arith.constant 0 : i32
    %c0_i32_0 = arith.constant 0 : i32
    %c0_i32_1 = arith.constant 0 : i32
    return %c0_i32, %c0_i32_0 : i32, i32
  }
  func.func @transform_2(%arg0: i32) -> (i32, i32) {
    %c0_i32 = arith.constant 0 : i32
    %c0_i32_0 = arith.constant 0 : i32
    %c0_i32_1 = arith.constant 0 : i32
    return %c0_i32, %c0_i32_0 : i32, i32
  }
  func.func @transform_3(%arg0: i32) -> (i32, i32) {
    %c0_i32 = arith.constant 0 : i32
    %c0_i32_0 = arith.constant 0 : i32
    %c0_i32_1 = arith.constant 0 : i32
    return %c0_i32, %c0_i32_0 : i32, i32
  }
  func.func @transform_4(%arg0: i32) -> (i32, i32) {
    %c0_i32 = arith.constant 0 : i32
    %c0_i32_0 = arith.constant 0 : i32
    %c0_i32_1 = arith.constant 0 : i32
    return %c0_i32, %c0_i32_0 : i32, i32
  }
  func.func @transform_5(%arg0: i32) -> (i32, i32) {
    %c0_i32 = arith.constant 0 : i32
    %c0_i32_0 = arith.constant 0 : i32
    return %arg0, %c0_i32 : i32, i32
  }
}

module attributes {stable_mosaic.version = 11 : i64} {
  func.func @_mm_bn_res_kernel(%arg0: i32, %arg1: memref<32x1152xbf16, #tpu.memory_space<vmem>>, %arg2: memref<1152x128xbf16, #tpu.memory_space<vmem>>, %arg3: memref<1x128xf32, #tpu.memory_space<vmem>>, %arg4: memref<1x128xf32, #tpu.memory_space<vmem>>, %arg5: memref<32x128xbf16, #tpu.memory_space<vmem>>, %arg6: memref<32x128xbf16, #tpu.memory_space<vmem>>) attributes {dimension_semantics = [#tpu.dimension_semantics<parallel>], iteration_bounds = array<i64: 1>, scalar_prefetch = 0 : i64, scratch_operands = 0 : i64, tpu.core_type = #tpu.core_type<tc>, window_params = [{transform_indices = @transform_0, window_bounds = array<i64: 32, 1152>}, {pipeline_mode = #tpu.pipeline_mode<synchronous>, transform_indices = @transform_1, window_bounds = array<i64: 1152, 128>}, {pipeline_mode = #tpu.pipeline_mode<synchronous>, transform_indices = @transform_2, window_bounds = array<i64: 1, 128>}, {pipeline_mode = #tpu.pipeline_mode<synchronous>, transform_indices = @transform_3, window_bounds = array<i64: 1, 128>}, {transform_indices = @transform_4, window_bounds = array<i64: 32, 128>}, {transform_indices = @transform_5, window_bounds = array<i64: 32, 128>}]} {
    %c0 = arith.constant 0 : index
    %c0_0 = arith.constant 0 : index
    %0 = vector.load %arg1[%c0, %c0_0] : memref<32x1152xbf16, #tpu.memory_space<vmem>>, vector<32x1152xbf16>
    %c0_1 = arith.constant 0 : index
    %c0_2 = arith.constant 0 : index
    %1 = vector.load %arg2[%c0_1, %c0_2] : memref<1152x128xbf16, #tpu.memory_space<vmem>>, vector<1152x128xbf16>
    %cst = arith.constant dense<0.000000e+00> : vector<32x128xf32>
    %2 = tpu.matmul %0, %1, %cst {dimension_numbers = #tpu.dot_dimension_numbers<[1], [0], [0], [1], [0, 0, 1, 1], [], []>} : vector<32x1152xbf16>, vector<1152x128xbf16>, vector<32x128xf32> -> vector<32x128xf32>
    %c0_3 = arith.constant 0 : index
    %c0_4 = arith.constant 0 : index
    %3 = vector.load %arg3[%c0_3, %c0_4] : memref<1x128xf32, #tpu.memory_space<vmem>>, vector<1x128xf32>
    %4 = vector.broadcast %3 : vector<1x128xf32> to vector<32x128xf32>
    %5 = arith.mulf %2, %4 : vector<32x128xf32>
    %c0_5 = arith.constant 0 : index
    %c0_6 = arith.constant 0 : index
    %6 = vector.load %arg4[%c0_5, %c0_6] : memref<1x128xf32, #tpu.memory_space<vmem>>, vector<1x128xf32>
    %7 = vector.broadcast %6 : vector<1x128xf32> to vector<32x128xf32>
    %8 = arith.addf %5, %7 : vector<32x128xf32>
    %c0_7 = arith.constant 0 : index
    %c0_8 = arith.constant 0 : index
    %9 = vector.load %arg5[%c0_7, %c0_8] : memref<32x128xbf16, #tpu.memory_space<vmem>>, vector<32x128xbf16>
    %10 = arith.extf %9 : vector<32x128xbf16> to vector<32x128xf32>
    %11 = arith.addf %8, %10 : vector<32x128xf32>
    %cst_9 = arith.constant 0.000000e+00 : f32
    %12 = vector.broadcast %cst_9 : f32 to vector<32x128xf32>
    %13 = arith.maximumf %11, %12 : vector<32x128xf32>
    %14 = arith.truncf %13 : vector<32x128xf32> to vector<32x128xbf16>
    %c0_10 = arith.constant 0 : index
    %c0_11 = arith.constant 0 : index
    %15 = vector.load %arg6[%c0_10, %c0_11] : memref<32x128xbf16, #tpu.memory_space<vmem>>, vector<32x128xbf16>
    tpu.vector_store %arg6[%c0_10, %c0_11], %14 {strides = array<i32>} : memref<32x128xbf16, #tpu.memory_space<vmem>>, vector<32x128xbf16>,
    return
  }
  func.func @transform_0(%arg0: i32) -> (i32, i32) {
    %c0_i32 = arith.constant 0 : i32
    %c0_i32_0 = arith.constant 0 : i32
    return %arg0, %c0_i32 : i32, i32
  }
  func.func @transform_1(%arg0: i32) -> (i32, i32) {
    %c0_i32 = arith.constant 0 : i32
    %c0_i32_0 = arith.constant 0 : i32
    %c0_i32_1 = arith.constant 0 : i32
    return %c0_i32, %c0_i32_0 : i32, i32
  }
  func.func @transform_2(%arg0: i32) -> (i32, i32) {
    %c0_i32 = arith.constant 0 : i32
    %c0_i32_0 = arith.constant 0 : i32
    %c0_i32_1 = arith.constant 0 : i32
    return %c0_i32, %c0_i32_0 : i32, i32
  }
  func.func @transform_3(%arg0: i32) -> (i32, i32) {
    %c0_i32 = arith.constant 0 : i32
    %c0_i32_0 = arith.constant 0 : i32
    %c0_i32_1 = arith.constant 0 : i32
    return %c0_i32, %c0_i32_0 : i32, i32
  }
  func.func @transform_4(%arg0: i32) -> (i32, i32) {
    %c0_i32 = arith.constant 0 : i32
    %c0_i32_0 = arith.constant 0 : i32
    return %arg0, %c0_i32 : i32, i32
  }
  func.func @transform_5(%arg0: i32) -> (i32, i32) {
    %c0_i32 = arith.constant 0 : i32
    %c0_i32_0 = arith.constant 0 : i32
    return %arg0, %c0_i32 : i32, i32
  }
}

module attributes {stable_mosaic.version = 11 : i64} {
  func.func @_mm_bn_mask_kernel(%arg0: i32, %arg1: memref<8x1152xbf16, #tpu.memory_space<vmem>>, %arg2: memref<1152x256xbf16, #tpu.memory_space<vmem>>, %arg3: memref<1x256xf32, #tpu.memory_space<vmem>>, %arg4: memref<1x256xf32, #tpu.memory_space<vmem>>, %arg5: memref<1x256xf32, #tpu.memory_space<vmem>>, %arg6: memref<8x256xbf16, #tpu.memory_space<vmem>>) attributes {dimension_semantics = [#tpu.dimension_semantics<parallel>], iteration_bounds = array<i64: 1>, scalar_prefetch = 0 : i64, scratch_operands = 0 : i64, tpu.core_type = #tpu.core_type<tc>, window_params = [{transform_indices = @transform_0, window_bounds = array<i64: 8, 1152>}, {pipeline_mode = #tpu.pipeline_mode<synchronous>, transform_indices = @transform_1, window_bounds = array<i64: 1152, 256>}, {pipeline_mode = #tpu.pipeline_mode<synchronous>, transform_indices = @transform_2, window_bounds = array<i64: 1, 256>}, {pipeline_mode = #tpu.pipeline_mode<synchronous>, transform_indices = @transform_3, window_bounds = array<i64: 1, 256>}, {pipeline_mode = #tpu.pipeline_mode<synchronous>, transform_indices = @transform_4, window_bounds = array<i64: 1, 256>}, {transform_indices = @transform_5, window_bounds = array<i64: 8, 256>}]} {
    %c0 = arith.constant 0 : index
    %c0_0 = arith.constant 0 : index
    %0 = vector.load %arg1[%c0, %c0_0] : memref<8x1152xbf16, #tpu.memory_space<vmem>>, vector<8x1152xbf16>
    %c0_1 = arith.constant 0 : index
    %c0_2 = arith.constant 0 : index
    %1 = vector.load %arg2[%c0_1, %c0_2] : memref<1152x256xbf16, #tpu.memory_space<vmem>>, vector<1152x256xbf16>
    %cst = arith.constant dense<0.000000e+00> : vector<8x256xf32>
    %2 = tpu.matmul %0, %1, %cst {dimension_numbers = #tpu.dot_dimension_numbers<[1], [0], [0], [1], [0, 0, 1, 1], [], []>} : vector<8x1152xbf16>, vector<1152x256xbf16>, vector<8x256xf32> -> vector<8x256xf32>
    %c0_3 = arith.constant 0 : index
    %c0_4 = arith.constant 0 : index
    %3 = vector.load %arg3[%c0_3, %c0_4] : memref<1x256xf32, #tpu.memory_space<vmem>>, vector<1x256xf32>
    %4 = vector.broadcast %3 : vector<1x256xf32> to vector<8x256xf32>
    %5 = arith.mulf %2, %4 : vector<8x256xf32>
    %c0_5 = arith.constant 0 : index
    %c0_6 = arith.constant 0 : index
    %6 = vector.load %arg4[%c0_5, %c0_6] : memref<1x256xf32, #tpu.memory_space<vmem>>, vector<1x256xf32>
    %7 = vector.broadcast %6 : vector<1x256xf32> to vector<8x256xf32>
    %8 = arith.addf %5, %7 : vector<8x256xf32>
    %c0_7 = arith.constant 0 : index
    %c0_8 = arith.constant 0 : index
    %9 = vector.load %arg5[%c0_7, %c0_8] : memref<1x256xf32, #tpu.memory_space<vmem>>, vector<1x256xf32>
    %cst_9 = arith.constant 0.000000e+00 : f32
    %10 = vector.broadcast %cst_9 : f32 to vector<8x256xf32>
    %11 = arith.minimumf %8, %10 : vector<8x256xf32>
    %12 = vector.broadcast %9 : vector<1x256xf32> to vector<8x256xf32>
    %13 = arith.mulf %12, %11 : vector<8x256xf32>
    %14 = arith.subf %8, %13 : vector<8x256xf32>
    %15 = arith.truncf %14 : vector<8x256xf32> to vector<8x256xbf16>
    %c0_10 = arith.constant 0 : index
    %c0_11 = arith.constant 0 : index
    %16 = vector.load %arg6[%c0_10, %c0_11] : memref<8x256xbf16, #tpu.memory_space<vmem>>, vector<8x256xbf16>
    tpu.vector_store %arg6[%c0_10, %c0_11], %15 {strides = array<i32>} : memref<8x256xbf16, #tpu.memory_space<vmem>>, vector<8x256xbf16>,
    return
  }
  func.func @transform_0(%arg0: i32) -> (i32, i32) {
    %c0_i32 = arith.constant 0 : i32
    %c0_i32_0 = arith.constant 0 : i32
    return %arg0, %c0_i32 : i32, i32
  }
  func.func @transform_1(%arg0: i32) -> (i32, i32) {
    %c0_i32 = arith.constant 0 : i32
    %c0_i32_0 = arith.constant 0 : i32
    %c0_i32_1 = arith.constant 0 : i32
    return %c0_i32, %c0_i32_0 : i32, i32
  }
  func.func @transform_2(%arg0: i32) -> (i32, i32) {
    %c0_i32 = arith.constant 0 : i32
    %c0_i32_0 = arith.constant 0 : i32
    %c0_i32_1 = arith.constant 0 : i32
    return %c0_i32, %c0_i32_0 : i32, i32
  }
  func.func @transform_3(%arg0: i32) -> (i32, i32) {
    %c0_i32 = arith.constant 0 : i32
    %c0_i32_0 = arith.constant 0 : i32
    %c0_i32_1 = arith.constant 0 : i32
    return %c0_i32, %c0_i32_0 : i32, i32
  }
  func.func @transform_4(%arg0: i32) -> (i32, i32) {
    %c0_i32 = arith.constant 0 : i32
    %c0_i32_0 = arith.constant 0 : i32
    %c0_i32_1 = arith.constant 0 : i32
    return %c0_i32, %c0_i32_0 : i32, i32
  }
  func.func @transform_5(%arg0: i32) -> (i32, i32) {
    %c0_i32 = arith.constant 0 : i32
    %c0_i32_0 = arith.constant 0 : i32
    return %arg0, %c0_i32 : i32, i32
  }
}

module attributes {stable_mosaic.version = 11 : i64} {
  func.func @_mm_bn_res_kernel(%arg0: i32, %arg1: memref<8x1152xbf16, #tpu.memory_space<vmem>>, %arg2: memref<1152x128xbf16, #tpu.memory_space<vmem>>, %arg3: memref<1x128xf32, #tpu.memory_space<vmem>>, %arg4: memref<1x128xf32, #tpu.memory_space<vmem>>, %arg5: memref<8x128xbf16, #tpu.memory_space<vmem>>, %arg6: memref<8x128xbf16, #tpu.memory_space<vmem>>) attributes {dimension_semantics = [#tpu.dimension_semantics<parallel>], iteration_bounds = array<i64: 1>, scalar_prefetch = 0 : i64, scratch_operands = 0 : i64, tpu.core_type = #tpu.core_type<tc>, window_params = [{transform_indices = @transform_0, window_bounds = array<i64: 8, 1152>}, {pipeline_mode = #tpu.pipeline_mode<synchronous>, transform_indices = @transform_1, window_bounds = array<i64: 1152, 128>}, {pipeline_mode = #tpu.pipeline_mode<synchronous>, transform_indices = @transform_2, window_bounds = array<i64: 1, 128>}, {pipeline_mode = #tpu.pipeline_mode<synchronous>, transform_indices = @transform_3, window_bounds = array<i64: 1, 128>}, {transform_indices = @transform_4, window_bounds = array<i64: 8, 128>}, {transform_indices = @transform_5, window_bounds = array<i64: 8, 128>}]} {
    %c0 = arith.constant 0 : index
    %c0_0 = arith.constant 0 : index
    %0 = vector.load %arg1[%c0, %c0_0] : memref<8x1152xbf16, #tpu.memory_space<vmem>>, vector<8x1152xbf16>
    %c0_1 = arith.constant 0 : index
    %c0_2 = arith.constant 0 : index
    %1 = vector.load %arg2[%c0_1, %c0_2] : memref<1152x128xbf16, #tpu.memory_space<vmem>>, vector<1152x128xbf16>
    %cst = arith.constant dense<0.000000e+00> : vector<8x128xf32>
    %2 = tpu.matmul %0, %1, %cst {dimension_numbers = #tpu.dot_dimension_numbers<[1], [0], [0], [1], [0, 0, 1, 1], [], []>} : vector<8x1152xbf16>, vector<1152x128xbf16>, vector<8x128xf32> -> vector<8x128xf32>
    %c0_3 = arith.constant 0 : index
    %c0_4 = arith.constant 0 : index
    %3 = vector.load %arg3[%c0_3, %c0_4] : memref<1x128xf32, #tpu.memory_space<vmem>>, vector<1x128xf32>
    %4 = vector.broadcast %3 : vector<1x128xf32> to vector<8x128xf32>
    %5 = arith.mulf %2, %4 : vector<8x128xf32>
    %c0_5 = arith.constant 0 : index
    %c0_6 = arith.constant 0 : index
    %6 = vector.load %arg4[%c0_5, %c0_6] : memref<1x128xf32, #tpu.memory_space<vmem>>, vector<1x128xf32>
    %7 = vector.broadcast %6 : vector<1x128xf32> to vector<8x128xf32>
    %8 = arith.addf %5, %7 : vector<8x128xf32>
    %c0_7 = arith.constant 0 : index
    %c0_8 = arith.constant 0 : index
    %9 = vector.load %arg5[%c0_7, %c0_8] : memref<8x128xbf16, #tpu.memory_space<vmem>>, vector<8x128xbf16>
    %10 = arith.extf %9 : vector<8x128xbf16> to vector<8x128xf32>
    %11 = arith.addf %8, %10 : vector<8x128xf32>
    %cst_9 = arith.constant 0.000000e+00 : f32
    %12 = vector.broadcast %cst_9 : f32 to vector<8x128xf32>
    %13 = arith.maximumf %11, %12 : vector<8x128xf32>
    %14 = arith.truncf %13 : vector<8x128xf32> to vector<8x128xbf16>
    %c0_10 = arith.constant 0 : index
    %c0_11 = arith.constant 0 : index
    %15 = vector.load %arg6[%c0_10, %c0_11] : memref<8x128xbf16, #tpu.memory_space<vmem>>, vector<8x128xbf16>
    tpu.vector_store %arg6[%c0_10, %c0_11], %14 {strides = array<i32>} : memref<8x128xbf16, #tpu.memory_space<vmem>>, vector<8x128xbf16>,
    return
  }
  func.func @transform_0(%arg0: i32) -> (i32, i32) {
    %c0_i32 = arith.constant 0 : i32
    %c0_i32_0 = arith.constant 0 : i32
    return %arg0, %c0_i32 : i32, i32
  }
  func.func @transform_1(%arg0: i32) -> (i32, i32) {
    %c0_i32 = arith.constant 0 : i32
    %c0_i32_0 = arith.constant 0 : i32
    %c0_i32_1 = arith.constant 0 : i32
    return %c0_i32, %c0_i32_0 : i32, i32
  }
  func.func @transform_2(%arg0: i32) -> (i32, i32) {
    %c0_i32 = arith.constant 0 : i32
    %c0_i32_0 = arith.constant 0 : i32
    %c0_i32_1 = arith.constant 0 : i32
    return %c0_i32, %c0_i32_0 : i32, i32
  }
  func.func @transform_3(%arg0: i32) -> (i32, i32) {
    %c0_i32 = arith.constant 0 : i32
    %c0_i32_0 = arith.constant 0 : i32
    %c0_i32_1 = arith.constant 0 : i32
    return %c0_i32, %c0_i32_0 : i32, i32
  }
  func.func @transform_4(%arg0: i32) -> (i32, i32) {
    %c0_i32 = arith.constant 0 : i32
    %c0_i32_0 = arith.constant 0 : i32
    return %arg0, %c0_i32 : i32, i32
  }
  func.func @transform_5(%arg0: i32) -> (i32, i32) {
    %c0_i32 = arith.constant 0 : i32
    %c0_i32_0 = arith.constant 0 : i32
    return %arg0, %c0_i32 : i32, i32
  }
}

module attributes {stable_mosaic.version = 11 : i64} {
  func.func @_mm_bn_res_kernel(%arg0: i32, %arg1: memref<2x2304xbf16, #tpu.memory_space<vmem>>, %arg2: memref<2304x256xbf16, #tpu.memory_space<vmem>>, %arg3: memref<1x256xf32, #tpu.memory_space<vmem>>, %arg4: memref<1x256xf32, #tpu.memory_space<vmem>>, %arg5: memref<2x256xbf16, #tpu.memory_space<vmem>>, %arg6: memref<2x256xbf16, #tpu.memory_space<vmem>>) attributes {dimension_semantics = [#tpu.dimension_semantics<parallel>], iteration_bounds = array<i64: 1>, scalar_prefetch = 0 : i64, scratch_operands = 0 : i64, tpu.core_type = #tpu.core_type<tc>, window_params = [{transform_indices = @transform_0, window_bounds = array<i64: 2, 2304>}, {pipeline_mode = #tpu.pipeline_mode<synchronous>, transform_indices = @transform_1, window_bounds = array<i64: 2304, 256>}, {pipeline_mode = #tpu.pipeline_mode<synchronous>, transform_indices = @transform_2, window_bounds = array<i64: 1, 256>}, {pipeline_mode = #tpu.pipeline_mode<synchronous>, transform_indices = @transform_3, window_bounds = array<i64: 1, 256>}, {transform_indices = @transform_4, window_bounds = array<i64: 2, 256>}, {transform_indices = @transform_5, window_bounds = array<i64: 2, 256>}]} {
    %c0 = arith.constant 0 : index
    %c0_0 = arith.constant 0 : index
    %0 = vector.load %arg1[%c0, %c0_0] : memref<2x2304xbf16, #tpu.memory_space<vmem>>, vector<2x2304xbf16>
    %c0_1 = arith.constant 0 : index
    %c0_2 = arith.constant 0 : index
    %1 = vector.load %arg2[%c0_1, %c0_2] : memref<2304x256xbf16, #tpu.memory_space<vmem>>, vector<2304x256xbf16>
    %cst = arith.constant dense<0.000000e+00> : vector<2x256xf32>
    %2 = tpu.matmul %0, %1, %cst {dimension_numbers = #tpu.dot_dimension_numbers<[1], [0], [0], [1], [0, 0, 1, 1], [], []>} : vector<2x2304xbf16>, vector<2304x256xbf16>, vector<2x256xf32> -> vector<2x256xf32>
    %c0_3 = arith.constant 0 : index
    %c0_4 = arith.constant 0 : index
    %3 = vector.load %arg3[%c0_3, %c0_4] : memref<1x256xf32, #tpu.memory_space<vmem>>, vector<1x256xf32>
    %4 = vector.broadcast %3 : vector<1x256xf32> to vector<2x256xf32>
    %5 = arith.mulf %2, %4 : vector<2x256xf32>
    %c0_5 = arith.constant 0 : index
    %c0_6 = arith.constant 0 : index
    %6 = vector.load %arg4[%c0_5, %c0_6] : memref<1x256xf32, #tpu.memory_space<vmem>>, vector<1x256xf32>
    %7 = vector.broadcast %6 : vector<1x256xf32> to vector<2x256xf32>
    %8 = arith.addf %5, %7 : vector<2x256xf32>
    %c0_7 = arith.constant 0 : index
    %c0_8 = arith.constant 0 : index
    %9 = vector.load %arg5[%c0_7, %c0_8] : memref<2x256xbf16, #tpu.memory_space<vmem>>, vector<2x256xbf16>
    %10 = arith.extf %9 : vector<2x256xbf16> to vector<2x256xf32>
    %11 = arith.addf %8, %10 : vector<2x256xf32>
    %cst_9 = arith.constant 0.000000e+00 : f32
    %12 = vector.broadcast %cst_9 : f32 to vector<2x256xf32>
    %13 = arith.maximumf %11, %12 : vector<2x256xf32>
    %14 = arith.truncf %13 : vector<2x256xf32> to vector<2x256xbf16>
    %c0_10 = arith.constant 0 : index
    %c0_11 = arith.constant 0 : index
    %15 = vector.load %arg6[%c0_10, %c0_11] : memref<2x256xbf16, #tpu.memory_space<vmem>>, vector<2x256xbf16>
    tpu.vector_store %arg6[%c0_10, %c0_11], %14 {strides = array<i32>} : memref<2x256xbf16, #tpu.memory_space<vmem>>, vector<2x256xbf16>,
    return
  }
  func.func @transform_0(%arg0: i32) -> (i32, i32) {
    %c0_i32 = arith.constant 0 : i32
    %c0_i32_0 = arith.constant 0 : i32
    return %arg0, %c0_i32 : i32, i32
  }
  func.func @transform_1(%arg0: i32) -> (i32, i32) {
    %c0_i32 = arith.constant 0 : i32
    %c0_i32_0 = arith.constant 0 : i32
    %c0_i32_1 = arith.constant 0 : i32
    return %c0_i32, %c0_i32_0 : i32, i32
  }
  func.func @transform_2(%arg0: i32) -> (i32, i32) {
    %c0_i32 = arith.constant 0 : i32
    %c0_i32_0 = arith.constant 0 : i32
    %c0_i32_1 = arith.constant 0 : i32
    return %c0_i32, %c0_i32_0 : i32, i32
  }
  func.func @transform_3(%arg0: i32) -> (i32, i32) {
    %c0_i32 = arith.constant 0 : i32
    %c0_i32_0 = arith.constant 0 : i32
    %c0_i32_1 = arith.constant 0 : i32
    return %c0_i32, %c0_i32_0 : i32, i32
  }
  func.func @transform_4(%arg0: i32) -> (i32, i32) {
    %c0_i32 = arith.constant 0 : i32
    %c0_i32_0 = arith.constant 0 : i32
    return %arg0, %c0_i32 : i32, i32
  }
  func.func @transform_5(%arg0: i32) -> (i32, i32) {
    %c0_i32 = arith.constant 0 : i32
    %c0_i32_0 = arith.constant 0 : i32
    return %arg0, %c0_i32 : i32, i32
  }
}

module attributes {stable_mosaic.version = 11 : i64} {
  func.func @_mm_bn_mask_kernel(%arg0: i32, %arg1: memref<2x1152xbf16, #tpu.memory_space<vmem>>, %arg2: memref<1152x512xbf16, #tpu.memory_space<vmem>>, %arg3: memref<1x512xf32, #tpu.memory_space<vmem>>, %arg4: memref<1x512xf32, #tpu.memory_space<vmem>>, %arg5: memref<1x512xf32, #tpu.memory_space<vmem>>, %arg6: memref<2x512xbf16, #tpu.memory_space<vmem>>) attributes {dimension_semantics = [#tpu.dimension_semantics<parallel>], iteration_bounds = array<i64: 1>, scalar_prefetch = 0 : i64, scratch_operands = 0 : i64, tpu.core_type = #tpu.core_type<tc>, window_params = [{transform_indices = @transform_0, window_bounds = array<i64: 2, 1152>}, {pipeline_mode = #tpu.pipeline_mode<synchronous>, transform_indices = @transform_1, window_bounds = array<i64: 1152, 512>}, {pipeline_mode = #tpu.pipeline_mode<synchronous>, transform_indices = @transform_2, window_bounds = array<i64: 1, 512>}, {pipeline_mode = #tpu.pipeline_mode<synchronous>, transform_indices = @transform_3, window_bounds = array<i64: 1, 512>}, {pipeline_mode = #tpu.pipeline_mode<synchronous>, transform_indices = @transform_4, window_bounds = array<i64: 1, 512>}, {transform_indices = @transform_5, window_bounds = array<i64: 2, 512>}]} {
    %c0 = arith.constant 0 : index
    %c0_0 = arith.constant 0 : index
    %0 = vector.load %arg1[%c0, %c0_0] : memref<2x1152xbf16, #tpu.memory_space<vmem>>, vector<2x1152xbf16>
    %c0_1 = arith.constant 0 : index
    %c0_2 = arith.constant 0 : index
    %1 = vector.load %arg2[%c0_1, %c0_2] : memref<1152x512xbf16, #tpu.memory_space<vmem>>, vector<1152x512xbf16>
    %cst = arith.constant dense<0.000000e+00> : vector<2x512xf32>
    %2 = tpu.matmul %0, %1, %cst {dimension_numbers = #tpu.dot_dimension_numbers<[1], [0], [0], [1], [0, 0, 1, 1], [], []>} : vector<2x1152xbf16>, vector<1152x512xbf16>, vector<2x512xf32> -> vector<2x512xf32>
    %c0_3 = arith.constant 0 : index
    %c0_4 = arith.constant 0 : index
    %3 = vector.load %arg3[%c0_3, %c0_4] : memref<1x512xf32, #tpu.memory_space<vmem>>, vector<1x512xf32>
    %4 = vector.broadcast %3 : vector<1x512xf32> to vector<2x512xf32>
    %5 = arith.mulf %2, %4 : vector<2x512xf32>
    %c0_5 = arith.constant 0 : index
    %c0_6 = arith.constant 0 : index
    %6 = vector.load %arg4[%c0_5, %c0_6] : memref<1x512xf32, #tpu.memory_space<vmem>>, vector<1x512xf32>
    %7 = vector.broadcast %6 : vector<1x512xf32> to vector<2x512xf32>
    %8 = arith.addf %5, %7 : vector<2x512xf32>
    %c0_7 = arith.constant 0 : index
    %c0_8 = arith.constant 0 : index
    %9 = vector.load %arg5[%c0_7, %c0_8] : memref<1x512xf32, #tpu.memory_space<vmem>>, vector<1x512xf32>
    %cst_9 = arith.constant 0.000000e+00 : f32
    %10 = vector.broadcast %cst_9 : f32 to vector<2x512xf32>
    %11 = arith.minimumf %8, %10 : vector<2x512xf32>
    %12 = vector.broadcast %9 : vector<1x512xf32> to vector<2x512xf32>
    %13 = arith.mulf %12, %11 : vector<2x512xf32>
    %14 = arith.subf %8, %13 : vector<2x512xf32>
    %15 = arith.truncf %14 : vector<2x512xf32> to vector<2x512xbf16>
    %c0_10 = arith.constant 0 : index
    %c0_11 = arith.constant 0 : index
    %16 = vector.load %arg6[%c0_10, %c0_11] : memref<2x512xbf16, #tpu.memory_space<vmem>>, vector<2x512xbf16>
    tpu.vector_store %arg6[%c0_10, %c0_11], %15 {strides = array<i32>} : memref<2x512xbf16, #tpu.memory_space<vmem>>, vector<2x512xbf16>,
    return
  }
  func.func @transform_0(%arg0: i32) -> (i32, i32) {
    %c0_i32 = arith.constant 0 : i32
    %c0_i32_0 = arith.constant 0 : i32
    return %arg0, %c0_i32 : i32, i32
  }
  func.func @transform_1(%arg0: i32) -> (i32, i32) {
    %c0_i32 = arith.constant 0 : i32
    %c0_i32_0 = arith.constant 0 : i32
    %c0_i32_1 = arith.constant 0 : i32
    return %c0_i32, %c0_i32_0 : i32, i32
  }
  func.func @transform_2(%arg0: i32) -> (i32, i32) {
    %c0_i32 = arith.constant 0 : i32
    %c0_i32_0 = arith.constant 0 : i32
    %c0_i32_1 = arith.constant 0 : i32
    return %c0_i32, %c0_i32_0 : i32, i32
  }
  func.func @transform_3(%arg0: i32) -> (i32, i32) {
    %c0_i32 = arith.constant 0 : i32
    %c0_i32_0 = arith.constant 0 : i32
    %c0_i32_1 = arith.constant 0 : i32
    return %c0_i32, %c0_i32_0 : i32, i32
  }
  func.func @transform_4(%arg0: i32) -> (i32, i32) {
    %c0_i32 = arith.constant 0 : i32
    %c0_i32_0 = arith.constant 0 : i32
    %c0_i32_1 = arith.constant 0 : i32
    return %c0_i32, %c0_i32_0 : i32, i32
  }
  func.func @transform_5(%arg0: i32) -> (i32, i32) {
    %c0_i32 = arith.constant 0 : i32
    %c0_i32_0 = arith.constant 0 : i32
    return %arg0, %c0_i32 : i32, i32
  }
}

</mosaic_0001>

<bundles_post_ra>
// kernel: forward_pallas.9
= control target key start
LH: loop header
LB: loop body
LE: loop exit
PB: predicated region body
PF: predicated region fallthrough
CT: control target
= control target key end

     0   :  { %vm367_vm0 = vcmask 1040384   ;;  %v1734_v1 = vmov 0   ;;  %vm270_vm1 = vcmask 400384   ;;  %s2134_s1 = inlined_call_operand.vmem [shape: bf16[49,128], index: 1, kind: input, shape index: {}]   ;;  %s2135_s0 = inlined_call_operand.vmem [shape: bf16[512,49], index: 0, kind: input, shape index: {}]   ;;  %s2136_s2 = inlined_call_operand.vmem [shape: f32[1,128], index: 2, kind: input, shape index: {}]   ;;  %s2137_s3 = inlined_call_operand.vmem [shape: f32[1,128], index: 3, kind: input, shape index: {}]   ;;  %s2138_s4 = inlined_call_operand.vmem [shape: bf16[512,128], index: 4, kind: output, shape index: {}]  }
   0x1   :  { %v1698_v0 = vld [vmem:[%s2134_s1 + $0x18] ss:$0 sps:$4 sm:$0x11]   ;;  %v369_v2 = vsel %vm367_vm0, 65535, %v1734_v1  ;;  %v1699_v4 = vld [vmem:[%s2134_s1 + $0x10] sm:$0xff]   ;;  %v1702_v5 = vld [vmem:[%s2135_s0] sm:$0xff]  }
   0x2   :  { %v371_v3 = vand.u32 %v1698_v0, %v369_v2  ;;  %v1703_v6 = vld [vmem:[%s2135_s0 + $0x80] sm:$0xff]   ;;  %v1700_v7 = vld [vmem:[%s2134_s1 + $0x8] sm:$0xff]   ;;  %1625 = vmatprep.mubr.msk.bf16.mxu0 %vm270_vm1, %v1702_v5  ;;  %v1706_v11 = vld [vmem:[%s2135_s0 + $0x10] sm:$0xff]  }
   0x3   :  { %1657 = vmatprep.mubr.msk.bf16.mxu1 %vm270_vm1, %v1703_v6  ;;  %v1701_v8 = vld [vmem:[%s2134_s1] sm:$0xff]   ;;  %v1704_v9 = vld [vmem:[%s2135_s0 + $0x8] sm:$0xff]   ;;  %v1707_v12 = vld [vmem:[%s2135_s0 + $0x90] sm:$0xff]  }
   0x4   :  { %1617 = vmatprep.subr.bf16.mxu0 %v371_v3  ;;  %1689 = vmatprep.subr.bf16.mxu1 %v371_v3  ;;  %v1705_v10 = vld [vmem:[%s2135_s0 + $0x88] sm:$0xff]   ;;  %v1708_v13 = vld [vmem:[%s2135_s0 + $0x18] sm:$0xff]   ;;  %v1710_v15 = vld [vmem:[%s2135_s0 + $0x20] sm:$0xff]  }
   0x5   :  { %1618 = vmatpush3.bf16.msra.mxu0 %v371_v3  ;;  %1693 = vmatpush3.bf16.msra.mxu1 %v371_v3  ;;  %v1709_v14 = vld [vmem:[%s2135_s0 + $0x98] sm:$0xff]   ;;  %v1711_v16 = vld [vmem:[%s2135_s0 + $0xa0] sm:$0xff]   ;;  %v1712_v17 = vld [vmem:[%s2135_s0 + $0x28] sm:$0xff]  }
   0x6   :  { %1619 = vmatprep.subr.bf16.mxu0 %v1699_v4  ;;  %1690 = vmatprep.subr.bf16.mxu1 %v1699_v4  ;;  %v1713_v18 = vld [vmem:[%s2135_s0 + $0xa8] sm:$0xff]   ;;  %v1714_v19 = vld [vmem:[%s2135_s0 + $0x30] sm:$0xff]   ;;  %v1716_v21 = vld [vmem:[%s2135_s0 + $0x38] sm:$0xff]  }
   0x7   :  { %v1715_v20 = vld [vmem:[%s2135_s0 + $0xb0] sm:$0xff]   ;;  %v1717_v22 = vld [vmem:[%s2135_s0 + $0xb8] sm:$0xff]   ;;  %v1718_v23 = vld [vmem:[%s2135_s0 + $0x40] sm:$0xff]  }
   0x8   :  { %v1719_v24 = vld [vmem:[%s2135_s0 + $0xc0] sm:$0xff]   ;;  %v1720_v25 = vld [vmem:[%s2135_s0 + $0x48] sm:$0xff]   ;;  %v1722_v27 = vld [vmem:[%s2135_s0 + $0x50] sm:$0xff]  }
   0x9   :  { %1620 = vmatpush3.bf16.msra.mxu0 %v1699_v4  ;;  %1694 = vmatpush3.bf16.msra.mxu1 %v1699_v4  ;;  %v1721_v26 = vld [vmem:[%s2135_s0 + $0xc8] sm:$0xff]   ;;  %v1723_v28 = vld [vmem:[%s2135_s0 + $0xd0] sm:$0xff]   ;;  %v1724_v29 = vld [vmem:[%s2135_s0 + $0x58] sm:$0xff]  }
   0xa   :  { %1621 = vmatprep.subr.bf16.mxu0 %v1700_v7  ;;  %1691 = vmatprep.subr.bf16.mxu1 %v1700_v7  ;;  %v1725_v30 = vld [vmem:[%s2135_s0 + $0xd8] sm:$0xff]   ;;  %v1726_v31 = vld [vmem:[%s2135_s0 + $0x60] sm:$0xff]   ;;  %v1728_v33 = vld [vmem:[%s2135_s0 + $0x68] sm:$0xff]  }
   0xb   :  { %v1727_v32 = vld [vmem:[%s2135_s0 + $0xe0] sm:$0xff]   ;;  %v1729_v34 = vld [vmem:[%s2135_s0 + $0xe8] sm:$0xff]   ;;  %v1730_v35 = vld [vmem:[%s2135_s0 + $0x70] sm:$0xff]  }
   0xc   :  { %v1731_v36 = vld [vmem:[%s2135_s0 + $0xf0] sm:$0xff]   ;;  %v1732_v37 = vld [vmem:[%s2135_s0 + $0x78] sm:$0xff]   ;;  %v1903_v39 = vld [vmem:[%s2136_s2] ss:$0 sm:$0xff] }
   0xd   :  { %1622 = vmatpush3.bf16.msra.mxu0 %v1700_v7  ;;  %1695 = vmatpush3.bf16.msra.mxu1 %v1700_v7  ;;  %v1733_v38 = vld [vmem:[%s2135_s0 + $0xf8] sm:$0xff]   ;;  %v1910_v44 = vld [vmem:[%s2137_s3] ss:$0 sm:$0xff] }
   0xe   :  { %1623 = vmatprep.subr.bf16.mxu0 %v1701_v8  ;;  %1692 = vmatprep.subr.bf16.mxu1 %v1701_v8 }
  0x11   :  { %1624 = vmatpush3.bf16.msra.mxu0 %v1701_v8  ;;  %1696 = vmatpush3.bf16.msra.mxu1 %v1701_v8 }
  0x14   :  { %1626 = vmatmul.mubr.msk.bf16.vlgmr.msra.gmra.mxu0 %vm270_vm1, %v1704_v9  ;;  %1658 = vmatmul.mubr.msk.bf16.vlgmr.msra.gmra.mxu1 %vm270_vm1, %v1705_v10 }
  0x15   :  { %1629 = vmatprep.mubr.msk.bf16.mxu0 %vm270_vm1, %v1706_v11  ;;  %1661 = vmatprep.mubr.msk.bf16.mxu1 %vm270_vm1, %v1707_v12 }
  0x1c   :  { %1630 = vmatmul.mubr.msk.bf16.gmra.mxu0 %vm270_vm1, %v1708_v13  ;;  %1662 = vmatmul.mubr.msk.bf16.gmra.mxu1 %vm270_vm1, %v1709_v14 }
  0x1d   :  { %1633 = vmatprep.mubr.msk.bf16.mxu0 %vm270_vm1, %v1710_v15  ;;  %1665 = vmatprep.mubr.msk.bf16.mxu1 %vm270_vm1, %v1711_v16 }
  0x24   :  { %1634 = vmatmul.mubr.msk.bf16.gmra.mxu0 %vm270_vm1, %v1712_v17  ;;  %1666 = vmatmul.mubr.msk.bf16.gmra.mxu1 %vm270_vm1, %v1713_v18 }
  0x25   :  { %1637 = vmatprep.mubr.msk.bf16.mxu0 %vm270_vm1, %v1714_v19  ;;  %1669 = vmatprep.mubr.msk.bf16.mxu1 %vm270_vm1, %v1715_v20 }
  0x2c   :  { %1638 = vmatmul.mubr.msk.bf16.gmra.mxu0 %vm270_vm1, %v1716_v21  ;;  %1670 = vmatmul.mubr.msk.bf16.gmra.mxu1 %vm270_vm1, %v1717_v22 }
  0x2d   :  { %1641 = vmatprep.mubr.msk.bf16.mxu0 %vm270_vm1, %v1718_v23  ;;  %1673 = vmatprep.mubr.msk.bf16.mxu1 %vm270_vm1, %v1719_v24 }
  0x34   :  { %1642 = vmatmul.mubr.msk.bf16.gmra.mxu0 %vm270_vm1, %v1720_v25  ;;  %1674 = vmatmul.mubr.msk.bf16.gmra.mxu1 %vm270_vm1, %v1721_v26 }
  0x35   :  { %1645 = vmatprep.mubr.msk.bf16.mxu0 %vm270_vm1, %v1722_v27  ;;  %1677 = vmatprep.mubr.msk.bf16.mxu1 %vm270_vm1, %v1723_v28 }
  0x3c   :  { %1646 = vmatmul.mubr.msk.bf16.gmra.mxu0 %vm270_vm1, %v1724_v29  ;;  %1678 = vmatmul.mubr.msk.bf16.gmra.mxu1 %vm270_vm1, %v1725_v30 }
  0x3d   :  { %1649 = vmatprep.mubr.msk.bf16.mxu0 %vm270_vm1, %v1726_v31  ;;  %1681 = vmatprep.mubr.msk.bf16.mxu1 %vm270_vm1, %v1727_v32 }
  0x44   :  { %1650 = vmatmul.mubr.msk.bf16.gmra.mxu0 %vm270_vm1, %v1728_v33  ;;  %1682 = vmatmul.mubr.msk.bf16.gmra.mxu1 %vm270_vm1, %v1729_v34 }
  0x45   :  { %1653 = vmatprep.mubr.msk.bf16.mxu0 %vm270_vm1, %v1730_v35  ;;  %1685 = vmatprep.mubr.msk.bf16.mxu1 %vm270_vm1, %v1731_v36 }
  0x4c   :  { %1654 = vmatmul.mubr.msk.bf16.gmra.mxu0 %vm270_vm1, %v1732_v37  ;;  %1686 = vmatmul.mubr.msk.bf16.gmra.mxu1 %vm270_vm1, %v1733_v38 }
  0xd4   :  { %v1627_v40 = vpop.f32.mrf.mxu0  ;;  %v1659_v41 = vpop.f32.mrf.mxu1 }
  0xd5   :  { %v671_v42 = vmul.f32 %v1627_v40, %v1903_v39  ;;  %v703_v43 = vmul.f32 %v1659_v41, %v1903_v39 }
  0xd6   :  { %v407_v45 = vpop.f32.mrf.mxu0  ;;  %v535_v46 = vpop.f32.mrf.mxu1 }
  0xd7   :  { %v669_v47 = vmul.f32 %v1903_v39, %v407_v45  ;;  %v701_v48 = vmul.f32 %v1903_v39, %v535_v46  ;;  %v742_v51 = vadd.f32 %v1910_v44, %v671_v42  ;;  %v774_v52 = vadd.f32 %v1910_v44, %v703_v43 }
  0xd8   :  { %v1628_v49 = vpop.f32.mrf.mxu0  ;;  %v1660_v50 = vpop.f32.mrf.mxu1 }
  0xd9   :  { %v672_v53 = vmul.f32 %v1628_v49, %v1903_v39  ;;  %v704_v54 = vmul.f32 %v1660_v50, %v1903_v39  ;;  %v740_v57 = vadd.f32 %v1910_v44, %v669_v47  ;;  %v772_v58 = vadd.f32 %v1910_v44, %v701_v48 }
  0xda   :  { %v410_v55 = vpop.f32.mrf.mxu0  ;;  %v538_v56 = vpop.f32.mrf.mxu1  ;;  %v806_v1 = vmax.f32 %v742_v51, 0.0  ;;  %v838_v2 = vmax.f32 %v774_v52, 0.0 }
  0xdb   :  { %v670_v59 = vmul.f32 %v1903_v39, %v410_v55  ;;  %v702_v60 = vmul.f32 %v1903_v39, %v538_v56  ;;  %v743_v61 = vadd.f32 %v1910_v44, %v672_v53  ;;  %v775_v62 = vadd.f32 %v1910_v44, %v704_v54 }
  0xdc   :  { %v1631_v63 = vpop.f32.mrf.mxu0  ;;  %v1663_v0 = vpop.f32.mrf.mxu1  ;;  %v804_v11 = vmax.f32 %v740_v57, 0.0  ;;  %v836_v12 = vmax.f32 %v772_v58, 0.0 }
  0xdd   :  { %v741_v3 = vadd.f32 %v1910_v44, %v670_v59  ;;  %v773_v4 = vadd.f32 %v1910_v44, %v702_v60  ;;  %v807_v5 = vmax.f32 %v743_v61, 0.0  ;;  %v839_v6 = vmax.f32 %v775_v62, 0.0 }
  0xde   :  { %v675_v7 = vmul.f32 %v1631_v63, %v1903_v39  ;;  %v707_v8 = vmul.f32 %v1663_v0, %v1903_v39  ;;  %v423_v9 = vpop.f32.mrf.mxu0  ;;  %v551_v10 = vpop.f32.mrf.mxu1 }
  0xdf   :  { %v805_v13 = vmax.f32 %v741_v3, 0.0  ;;  %v837_v14 = vmax.f32 %v773_v4, 0.0  ;;  %v1398_v15 = vpack.c.bf16 %v807_v5, %v806_v1  ;;  %v1478_v16 = vpack.c.bf16 %v839_v6, %v838_v2 }
  0xe0   :  { %v673_v17 = vmul.f32 %v1903_v39, %v423_v9  ;;  %v705_v18 = vmul.f32 %v1903_v39, %v551_v10  ;;  %v1632_v19 = vpop.f32.mrf.mxu0  ;;  %v1664_v20 = vpop.f32.mrf.mxu1  ;;  %v746_v23 = vadd.f32 %v1910_v44, %v675_v7  ;;  %v778_v24 = vadd.f32 %v1910_v44, %v707_v8 }
  0xe1   :  { %v1393_v21 = vpack.c.bf16 %v805_v13, %v804_v11  ;;  %v1473_v22 = vpack.c.bf16 %v837_v14, %v836_v12  ;;  %1550 = vst [vmem:[%s2138_s4 + $0x8] sm:$0xff] %v1398_v15   ;;  %1566 = vst [vmem:[%s2138_s4 + $0x88] sm:$0xff] %v1478_v16   ;;  %v676_v25 = vmul.f32 %v1632_v19, %v1903_v39 }
  0xe2   :  { %v708_v26 = vmul.f32 %v1664_v20, %v1903_v39  ;;  %v426_v27 = vpop.f32.mrf.mxu0  ;;  %v554_v28 = vpop.f32.mrf.mxu1  ;;  %v744_v29 = vadd.f32 %v1910_v44, %v673_v17  ;;  %v776_v30 = vadd.f32 %v1910_v44, %v705_v18  ;;  %v810_v42 = vmax.f32 %v746_v23, 0.0 }
  0xe3   :  { %1394 = vst [vmem:[%s2138_s4] sm:$0xff] %v1393_v21   ;;  %1565 = vst [vmem:[%s2138_s4 + $0x80] sm:$0xff] %v1473_v22   ;;  %v674_v31 = vmul.f32 %v1903_v39, %v426_v27  ;;  %v706_v32 = vmul.f32 %v1903_v39, %v554_v28  ;;  %v747_v33 = vadd.f32 %v1910_v44, %v676_v25  ;;  %v842_v43 = vmax.f32 %v778_v24, 0.0 }
  0xe4   :  { %v779_v34 = vadd.f32 %v1910_v44, %v708_v26  ;;  %v1635_v35 = vpop.f32.mrf.mxu0  ;;  %v1667_v36 = vpop.f32.mrf.mxu1  ;;  %v808_v49 = vmax.f32 %v744_v29, 0.0  ;;  %v840_v50 = vmax.f32 %v776_v30, 0.0 }
  0xe5   :  { %v745_v37 = vadd.f32 %v1910_v44, %v674_v31  ;;  %v777_v38 = vadd.f32 %v1910_v44, %v706_v32  ;;  %v679_v40 = vmul.f32 %v1635_v35, %v1903_v39  ;;  %v711_v41 = vmul.f32 %v1667_v36, %v1903_v39 }
  0xe6   :  { %v811_v45 = vmax.f32 %v747_v33, 0.0  ;;  %v843_v46 = vmax.f32 %v779_v34, 0.0  ;;  %v439_v47 = vpop.f32.mrf.mxu0  ;;  %v567_v48 = vpop.f32.mrf.mxu1 }
  0xe7   :  { %v809_v51 = vmax.f32 %v745_v37, 0.0  ;;  %v841_v52 = vmax.f32 %v777_v38, 0.0  ;;  %v677_v55 = vmul.f32 %v1903_v39, %v439_v47  ;;  %v709_v56 = vmul.f32 %v1903_v39, %v567_v48 }
  0xe8   :  { %v1408_v53 = vpack.c.bf16 %v811_v45, %v810_v42  ;;  %v1488_v54 = vpack.c.bf16 %v843_v46, %v842_v43  ;;  %v1636_v57 = vpop.f32.mrf.mxu0  ;;  %v1668_v58 = vpop.f32.mrf.mxu1  ;;  %v750_v61 = vadd.f32 %v1910_v44, %v679_v40  ;;  %v782_v62 = vadd.f32 %v1910_v44, %v711_v41 }
  0xe9   :  { %v1403_v59 = vpack.c.bf16 %v809_v51, %v808_v49  ;;  %v1483_v60 = vpack.c.bf16 %v841_v52, %v840_v50  ;;  %v680_v63 = vmul.f32 %v1636_v57, %v1903_v39  ;;  %v712_v0 = vmul.f32 %v1668_v58, %v1903_v39 }
  0xea   :  { %1552 = vst [vmem:[%s2138_s4 + $0x18] sm:$0xff] %v1408_v53   ;;  %1568 = vst [vmem:[%s2138_s4 + $0x98] sm:$0xff] %v1488_v54   ;;  %v442_v1 = vpop.f32.mrf.mxu0  ;;  %v570_v2 = vpop.f32.mrf.mxu1  ;;  %v748_v3 = vadd.f32 %v1910_v44, %v677_v55  ;;  %v780_v4 = vadd.f32 %v1910_v44, %v709_v56  ;;  %v814_v11 = vmax.f32 %v750_v61, 0.0  ;;  %v846_v12 = vmax.f32 %v782_v62, 0.0 }
  0xeb   :  { %1551 = vst [vmem:[%s2138_s4 + $0x10] sm:$0xff] %v1403_v59   ;;  %1567 = vst [vmem:[%s2138_s4 + $0x90] sm:$0xff] %v1483_v60   ;;  %v678_v5 = vmul.f32 %v1903_v39, %v442_v1  ;;  %v710_v6 = vmul.f32 %v1903_v39, %v570_v2  ;;  %v751_v7 = vadd.f32 %v1910_v44, %v680_v63 }
  0xec   :  { %v783_v8 = vadd.f32 %v1910_v44, %v712_v0  ;;  %v1639_v9 = vpop.f32.mrf.mxu0  ;;  %v1671_v10 = vpop.f32.mrf.mxu1  ;;  %v812_v21 = vmax.f32 %v748_v3, 0.0  ;;  %v844_v22 = vmax.f32 %v780_v4, 0.0 }
  0xed   :  { %v749_v13 = vadd.f32 %v1910_v44, %v678_v5  ;;  %v781_v14 = vadd.f32 %v1910_v44, %v710_v6  ;;  %v815_v15 = vmax.f32 %v751_v7, 0.0  ;;  %v683_v17 = vmul.f32 %v1639_v9, %v1903_v39 }
  0xee   :  { %v847_v16 = vmax.f32 %v783_v8, 0.0  ;;  %v715_v18 = vmul.f32 %v1671_v10, %v1903_v39  ;;  %v455_v19 = vpop.f32.mrf.mxu0  ;;  %v583_v20 = vpop.f32.mrf.mxu1 }
  0xef   :  { %v813_v23 = vmax.f32 %v749_v13, 0.0  ;;  %v845_v24 = vmax.f32 %v781_v14, 0.0  ;;  %v1418_v25 = vpack.c.bf16 %v815_v15, %v814_v11  ;;  %v681_v27 = vmul.f32 %v1903_v39, %v455_v19 }
  0xf0   :  { %v1498_v26 = vpack.c.bf16 %v847_v16, %v846_v12  ;;  %v713_v28 = vmul.f32 %v1903_v39, %v583_v20  ;;  %v1640_v29 = vpop.f32.mrf.mxu0  ;;  %v1672_v30 = vpop.f32.mrf.mxu1  ;;  %v754_v33 = vadd.f32 %v1910_v44, %v683_v17  ;;  %v786_v34 = vadd.f32 %v1910_v44, %v715_v18 }
  0xf1   :  { %v1413_v31 = vpack.c.bf16 %v813_v23, %v812_v21  ;;  %v1493_v32 = vpack.c.bf16 %v845_v24, %v844_v22  ;;  %1554 = vst [vmem:[%s2138_s4 + $0x28] sm:$0xff] %v1418_v25   ;;  %v684_v35 = vmul.f32 %v1640_v29, %v1903_v39  ;;  %v716_v36 = vmul.f32 %v1672_v30, %v1903_v39 }
  0xf2   :  { %1570 = vst [vmem:[%s2138_s4 + $0xa8] sm:$0xff] %v1498_v26   ;;  %v458_v37 = vpop.f32.mrf.mxu0  ;;  %v586_v38 = vpop.f32.mrf.mxu1  ;;  %v752_v40 = vadd.f32 %v1910_v44, %v681_v27  ;;  %v784_v41 = vadd.f32 %v1910_v44, %v713_v28  ;;  %v818_v53 = vmax.f32 %v754_v33, 0.0  ;;  %v850_v54 = vmax.f32 %v786_v34, 0.0 }
  0xf3   :  { %1553 = vst [vmem:[%s2138_s4 + $0x20] sm:$0xff] %v1413_v31   ;;  %1569 = vst [vmem:[%s2138_s4 + $0xa0] sm:$0xff] %v1493_v32   ;;  %v682_v42 = vmul.f32 %v1903_v39, %v458_v37  ;;  %v714_v43 = vmul.f32 %v1903_v39, %v586_v38  ;;  %v755_v45 = vadd.f32 %v1910_v44, %v684_v35 }
  0xf4   :  { %v787_v46 = vadd.f32 %v1910_v44, %v716_v36  ;;  %v1643_v47 = vpop.f32.mrf.mxu0  ;;  %v1675_v48 = vpop.f32.mrf.mxu1  ;;  %v816_v59 = vmax.f32 %v752_v40, 0.0  ;;  %v848_v60 = vmax.f32 %v784_v41, 0.0 }
  0xf5   :  { %v753_v49 = vadd.f32 %v1910_v44, %v682_v42  ;;  %v785_v50 = vadd.f32 %v1910_v44, %v714_v43  ;;  %v687_v51 = vmul.f32 %v1643_v47, %v1903_v39  ;;  %v719_v52 = vmul.f32 %v1675_v48, %v1903_v39 }
  0xf6   :  { %v819_v55 = vmax.f32 %v755_v45, 0.0  ;;  %v851_v56 = vmax.f32 %v787_v46, 0.0  ;;  %v471_v57 = vpop.f32.mrf.mxu0  ;;  %v599_v58 = vpop.f32.mrf.mxu1 }
  0xf7   :  { %v817_v61 = vmax.f32 %v753_v49, 0.0  ;;  %v849_v62 = vmax.f32 %v785_v50, 0.0  ;;  %v685_v1 = vmul.f32 %v1903_v39, %v471_v57  ;;  %v717_v2 = vmul.f32 %v1903_v39, %v599_v58 }
  0xf8   :  { %v1428_v63 = vpack.c.bf16 %v819_v55, %v818_v53  ;;  %v1508_v0 = vpack.c.bf16 %v851_v56, %v850_v54  ;;  %v1644_v3 = vpop.f32.mrf.mxu0  ;;  %v1676_v4 = vpop.f32.mrf.mxu1  ;;  %v758_v7 = vadd.f32 %v1910_v44, %v687_v51  ;;  %v790_v8 = vadd.f32 %v1910_v44, %v719_v52 }
  0xf9   :  { %v1423_v5 = vpack.c.bf16 %v817_v61, %v816_v59  ;;  %v1503_v6 = vpack.c.bf16 %v849_v62, %v848_v60  ;;  %v688_v9 = vmul.f32 %v1644_v3, %v1903_v39  ;;  %v720_v10 = vmul.f32 %v1676_v4, %v1903_v39 }
  0xfa   :  { %1556 = vst [vmem:[%s2138_s4 + $0x38] sm:$0xff] %v1428_v63   ;;  %1572 = vst [vmem:[%s2138_s4 + $0xb8] sm:$0xff] %v1508_v0   ;;  %v474_v11 = vpop.f32.mrf.mxu0  ;;  %v602_v12 = vpop.f32.mrf.mxu1  ;;  %v756_v13 = vadd.f32 %v1910_v44, %v685_v1  ;;  %v788_v14 = vadd.f32 %v1910_v44, %v717_v2  ;;  %v822_v21 = vmax.f32 %v758_v7, 0.0  ;;  %v854_v22 = vmax.f32 %v790_v8, 0.0 }
  0xfb   :  { %1555 = vst [vmem:[%s2138_s4 + $0x30] sm:$0xff] %v1423_v5   ;;  %1571 = vst [vmem:[%s2138_s4 + $0xb0] sm:$0xff] %v1503_v6   ;;  %v686_v15 = vmul.f32 %v1903_v39, %v474_v11  ;;  %v718_v16 = vmul.f32 %v1903_v39, %v602_v12  ;;  %v759_v17 = vadd.f32 %v1910_v44, %v688_v9 }
  0xfc   :  { %v791_v18 = vadd.f32 %v1910_v44, %v720_v10  ;;  %v1647_v19 = vpop.f32.mrf.mxu0  ;;  %v1679_v20 = vpop.f32.mrf.mxu1  ;;  %v820_v31 = vmax.f32 %v756_v13, 0.0  ;;  %v852_v32 = vmax.f32 %v788_v14, 0.0 }
  0xfd   :  { %v757_v23 = vadd.f32 %v1910_v44, %v686_v15  ;;  %v789_v24 = vadd.f32 %v1910_v44, %v718_v16  ;;  %v823_v25 = vmax.f32 %v759_v17, 0.0  ;;  %v691_v27 = vmul.f32 %v1647_v19, %v1903_v39 }
  0xfe   :  { %v855_v26 = vmax.f32 %v791_v18, 0.0  ;;  %v723_v28 = vmul.f32 %v1679_v20, %v1903_v39  ;;  %v487_v29 = vpop.f32.mrf.mxu0  ;;  %v615_v30 = vpop.f32.mrf.mxu1 }
  0xff   :  { %v821_v33 = vmax.f32 %v757_v23, 0.0  ;;  %v853_v34 = vmax.f32 %v789_v24, 0.0  ;;  %v1438_v35 = vpack.c.bf16 %v823_v25, %v822_v21  ;;  %v689_v37 = vmul.f32 %v1903_v39, %v487_v29 }
 0x100   :  { %v1518_v36 = vpack.c.bf16 %v855_v26, %v854_v22  ;;  %v721_v38 = vmul.f32 %v1903_v39, %v615_v30  ;;  %v1648_v40 = vpop.f32.mrf.mxu0  ;;  %v1680_v41 = vpop.f32.mrf.mxu1  ;;  %v762_v45 = vadd.f32 %v1910_v44, %v691_v27  ;;  %v794_v46 = vadd.f32 %v1910_v44, %v723_v28 }
 0x101   :  { %v1433_v42 = vpack.c.bf16 %v821_v33, %v820_v31  ;;  %v1513_v43 = vpack.c.bf16 %v853_v34, %v852_v32  ;;  %1558 = vst [vmem:[%s2138_s4 + $0x48] sm:$0xff] %v1438_v35   ;;  %v692_v47 = vmul.f32 %v1648_v40, %v1903_v39  ;;  %v724_v48 = vmul.f32 %v1680_v41, %v1903_v39 }
 0x102   :  { %1574 = vst [vmem:[%s2138_s4 + $0xc8] sm:$0xff] %v1518_v36   ;;  %v490_v49 = vpop.f32.mrf.mxu0  ;;  %v618_v50 = vpop.f32.mrf.mxu1  ;;  %v760_v51 = vadd.f32 %v1910_v44, %v689_v37  ;;  %v792_v52 = vadd.f32 %v1910_v44, %v721_v38  ;;  %v826_v63 = vmax.f32 %v762_v45, 0.0  ;;  %v858_v0 = vmax.f32 %v794_v46, 0.0 }
 0x103   :  { %1557 = vst [vmem:[%s2138_s4 + $0x40] sm:$0xff] %v1433_v42   ;;  %1573 = vst [vmem:[%s2138_s4 + $0xc0] sm:$0xff] %v1513_v43   ;;  %v690_v53 = vmul.f32 %v1903_v39, %v490_v49  ;;  %v722_v54 = vmul.f32 %v1903_v39, %v618_v50  ;;  %v763_v55 = vadd.f32 %v1910_v44, %v692_v47 }
 0x104   :  { %v795_v56 = vadd.f32 %v1910_v44, %v724_v48  ;;  %v1651_v57 = vpop.f32.mrf.mxu0  ;;  %v1683_v58 = vpop.f32.mrf.mxu1  ;;  %v824_v5 = vmax.f32 %v760_v51, 0.0  ;;  %v856_v6 = vmax.f32 %v792_v52, 0.0 }
 0x105   :  { %v761_v59 = vadd.f32 %v1910_v44, %v690_v53  ;;  %v793_v60 = vadd.f32 %v1910_v44, %v722_v54  ;;  %v695_v61 = vmul.f32 %v1651_v57, %v1903_v39  ;;  %v727_v62 = vmul.f32 %v1683_v58, %v1903_v39 }
 0x106   :  { %v827_v1 = vmax.f32 %v763_v55, 0.0  ;;  %v859_v2 = vmax.f32 %v795_v56, 0.0  ;;  %v503_v3 = vpop.f32.mrf.mxu0  ;;  %v631_v4 = vpop.f32.mrf.mxu1 }
 0x107   :  { %v825_v7 = vmax.f32 %v761_v59, 0.0  ;;  %v857_v8 = vmax.f32 %v793_v60, 0.0  ;;  %v693_v11 = vmul.f32 %v1903_v39, %v503_v3  ;;  %v725_v12 = vmul.f32 %v1903_v39, %v631_v4 }
 0x108   :  { %v1448_v9 = vpack.c.bf16 %v827_v1, %v826_v63  ;;  %v1528_v10 = vpack.c.bf16 %v859_v2, %v858_v0  ;;  %v1652_v13 = vpop.f32.mrf.mxu0  ;;  %v1684_v14 = vpop.f32.mrf.mxu1  ;;  %v766_v17 = vadd.f32 %v1910_v44, %v695_v61  ;;  %v798_v18 = vadd.f32 %v1910_v44, %v727_v62 }
 0x109   :  { %v1443_v15 = vpack.c.bf16 %v825_v7, %v824_v5  ;;  %v1523_v16 = vpack.c.bf16 %v857_v8, %v856_v6  ;;  %v696_v19 = vmul.f32 %v1652_v13, %v1903_v39  ;;  %v728_v20 = vmul.f32 %v1684_v14, %v1903_v39 }
 0x10a   :  { %1560 = vst [vmem:[%s2138_s4 + $0x58] sm:$0xff] %v1448_v9   ;;  %1576 = vst [vmem:[%s2138_s4 + $0xd8] sm:$0xff] %v1528_v10   ;;  %v506_v21 = vpop.f32.mrf.mxu0  ;;  %v634_v22 = vpop.f32.mrf.mxu1  ;;  %v764_v23 = vadd.f32 %v1910_v44, %v693_v11  ;;  %v796_v24 = vadd.f32 %v1910_v44, %v725_v12  ;;  %v830_v31 = vmax.f32 %v766_v17, 0.0  ;;  %v862_v32 = vmax.f32 %v798_v18, 0.0 }
 0x10b   :  { %1559 = vst [vmem:[%s2138_s4 + $0x50] sm:$0xff] %v1443_v15   ;;  %1575 = vst [vmem:[%s2138_s4 + $0xd0] sm:$0xff] %v1523_v16   ;;  %v694_v25 = vmul.f32 %v1903_v39, %v506_v21  ;;  %v726_v26 = vmul.f32 %v1903_v39, %v634_v22  ;;  %v767_v27 = vadd.f32 %v1910_v44, %v696_v19 }
 0x10c   :  { %v799_v28 = vadd.f32 %v1910_v44, %v728_v20  ;;  %v1655_v29 = vpop.f32.mrf.mxu0  ;;  %v1687_v30 = vpop.f32.mrf.mxu1  ;;  %v828_v42 = vmax.f32 %v764_v23, 0.0  ;;  %v860_v43 = vmax.f32 %v796_v24, 0.0 }
 0x10d   :  { %v765_v33 = vadd.f32 %v1910_v44, %v694_v25  ;;  %v797_v34 = vadd.f32 %v1910_v44, %v726_v26  ;;  %v831_v35 = vmax.f32 %v767_v27, 0.0  ;;  %v699_v37 = vmul.f32 %v1655_v29, %v1903_v39 }
 0x10e   :  { %v863_v36 = vmax.f32 %v799_v28, 0.0  ;;  %v731_v38 = vmul.f32 %v1687_v30, %v1903_v39  ;;  %v519_v40 = vpop.f32.mrf.mxu0  ;;  %v647_v41 = vpop.f32.mrf.mxu1 }
 0x10f   :  { %v829_v45 = vmax.f32 %v765_v33, 0.0  ;;  %v861_v46 = vmax.f32 %v797_v34, 0.0  ;;  %v1458_v47 = vpack.c.bf16 %v831_v35, %v830_v31  ;;  %v697_v49 = vmul.f32 %v1903_v39, %v519_v40 }
 0x110   :  { %v1538_v48 = vpack.c.bf16 %v863_v36, %v862_v32  ;;  %v729_v50 = vmul.f32 %v1903_v39, %v647_v41  ;;  %v1656_v51 = vpop.f32.mrf.mxu0  ;;  %v1688_v52 = vpop.f32.mrf.mxu1  ;;  %v770_v55 = vadd.f32 %v1910_v44, %v699_v37  ;;  %v802_v56 = vadd.f32 %v1910_v44, %v731_v38 }
 0x111   :  { %v1453_v53 = vpack.c.bf16 %v829_v45, %v828_v42  ;;  %v1533_v54 = vpack.c.bf16 %v861_v46, %v860_v43  ;;  %1562 = vst [vmem:[%s2138_s4 + $0x68] sm:$0xff] %v1458_v47   ;;  %v700_v57 = vmul.f32 %v1656_v51, %v1903_v39  ;;  %v732_v58 = vmul.f32 %v1688_v52, %v1903_v39 }
 0x112   :  { %1578 = vst [vmem:[%s2138_s4 + $0xe8] sm:$0xff] %v1538_v48   ;;  %v522_v59 = vpop.f32.mrf.mxu0  ;;  %v650_v60 = vpop.f32.mrf.mxu1  ;;  %v768_v61 = vadd.f32 %v1910_v44, %v697_v49  ;;  %v800_v62 = vadd.f32 %v1910_v44, %v729_v50  ;;  %v834_v5 = vmax.f32 %v770_v55, 0.0  ;;  %v866_v6 = vmax.f32 %v802_v56, 0.0 }
 0x113   :  { %1561 = vst [vmem:[%s2138_s4 + $0x60] sm:$0xff] %v1453_v53   ;;  %1577 = vst [vmem:[%s2138_s4 + $0xe0] sm:$0xff] %v1533_v54   ;;  %v698_v63 = vmul.f32 %v1903_v39, %v522_v59  ;;  %v730_v0 = vmul.f32 %v1903_v39, %v650_v60  ;;  %v771_v1 = vadd.f32 %v1910_v44, %v700_v57 }
 0x114   :  { %v803_v2 = vadd.f32 %v1910_v44, %v732_v58  ;;  %v832_v9 = vmax.f32 %v768_v61, 0.0  ;;  %v864_v10 = vmax.f32 %v800_v62, 0.0 }
 0x115   :  { %v769_v3 = vadd.f32 %v1910_v44, %v698_v63  ;;  %v801_v4 = vadd.f32 %v1910_v44, %v730_v0  ;;  %v835_v7 = vmax.f32 %v771_v1, 0.0 }
 0x116   :  { %v867_v8 = vmax.f32 %v803_v2, 0.0 }
 0x117   :  { %v833_v11 = vmax.f32 %v769_v3, 0.0  ;;  %v865_v12 = vmax.f32 %v801_v4, 0.0  ;;  %v1468_v13 = vpack.c.bf16 %v835_v7, %v834_v5 }
 0x118   :  { %v1548_v14 = vpack.c.bf16 %v867_v8, %v866_v6 }
 0x119   :  { %v1463_v15 = vpack.c.bf16 %v833_v11, %v832_v9  ;;  %v1543_v39 = vpack.c.bf16 %v865_v12, %v864_v10  ;;  %1564 = vst [vmem:[%s2138_s4 + $0x78] sm:$0xff] %v1468_v13  }
 0x11a   :  { %1580 = vst [vmem:[%s2138_s4 + $0xf8] sm:$0xff] %v1548_v14  }
 0x11b   :  { %1563 = vst [vmem:[%s2138_s4 + $0x70] sm:$0xff] %v1463_v15   ;;  %1579 = vst [vmem:[%s2138_s4 + $0xf0] sm:$0xff] %v1543_v39  }

// kernel: forward_pallas.10
= control target key start
LH: loop header
LB: loop body
LE: loop exit
PB: predicated region body
PF: predicated region fallthrough
CT: control target
= control target key end

     0   :  { %s3094_s1 = inlined_call_operand.vmem [shape: bf16[1152,128], index: 1, kind: input, shape index: {}]   ;;  %s3095_s0 = inlined_call_operand.vmem [shape: bf16[128,1152], index: 0, kind: input, shape index: {}]   ;;  %s3096_s2 = inlined_call_operand.vmem [shape: f32[1,128], index: 2, kind: input, shape index: {}]   ;;  %s3097_s3 = inlined_call_operand.vmem [shape: f32[1,128], index: 3, kind: input, shape index: {}]   ;;  %s3098_s4 = inlined_call_operand.vmem [shape: f32[1,128], index: 4, kind: input, shape index: {}]   ;;  %s3099_s5 = inlined_call_operand.vmem [shape: bf16[128,128], index: 5, kind: output, shape index: {}]  }
   0x1   :  { %v2261_v0 = vld [vmem:[%s3094_s1 + $0x78] sm:$0xff]   ;;  %v2265_v4 = vld [vmem:[%s3094_s1 + $0x70] sm:$0xff]   ;;  %v2269_v8 = vld [vmem:[%s3094_s1 + $0x68] sm:$0xff]  }
   0x2   :  { %v2262_v1 = vld [vmem:[%s3094_s1 + $0xf8] sm:$0xff]   ;;  %1941 = vmatprep.subr.bf16.mxu0 %v2261_v0  ;;  %v2266_v5 = vld [vmem:[%s3094_s1 + $0xf0] sm:$0xff]   ;;  %v2270_v9 = vld [vmem:[%s3094_s1 + $0xe8] sm:$0xff]  }
   0x3   :  { %v2263_v2 = vld [vmem:[%s3094_s1 + $0x38] sm:$0xff]   ;;  %2005 = vmatprep.subr.bf16.mxu1 %v2262_v1  ;;  %v2267_v6 = vld [vmem:[%s3094_s1 + $0x30] sm:$0xff]   ;;  %v2271_v10 = vld [vmem:[%s3094_s1 + $0x28] sm:$0xff]  }
   0x4   :  { %v2264_v3 = vld [vmem:[%s3094_s1 + $0xb8] sm:$0xff]   ;;  %1942 = vmatpush3.bf16.msra.mxu0 %v2263_v2  ;;  %v2268_v7 = vld [vmem:[%s3094_s1 + $0xb0] sm:$0xff]   ;;  %v2272_v11 = vld [vmem:[%s3094_s1 + $0xa8] sm:$0xff]  }
   0x5   :  { %2006 = vmatpush3.bf16.msra.mxu1 %v2264_v3  ;;  %1943 = vmatprep.subr.bf16.mxu0 %v2265_v4  ;;  %v2273_v12 = vld [vmem:[%s3094_s1 + $0x60] sm:$0xff]   ;;  %v2277_v16 = vld [vmem:[%s3094_s1 + $0x58] sm:$0xff]   ;;  %v2281_v20 = vld [vmem:[%s3094_s1 + $0x50] sm:$0xff]  }
   0x6   :  { %2007 = vmatprep.subr.bf16.mxu1 %v2266_v5  ;;  %v2274_v13 = vld [vmem:[%s3094_s1 + $0xe0] sm:$0xff]   ;;  %v2278_v17 = vld [vmem:[%s3094_s1 + $0xd8] sm:$0xff]   ;;  %v2282_v21 = vld [vmem:[%s3094_s1 + $0xd0] sm:$0xff]  }
   0x7   :  { %v2275_v14 = vld [vmem:[%s3094_s1 + $0x20] sm:$0xff]   ;;  %v2279_v18 = vld [vmem:[%s3094_s1 + $0x18] sm:$0xff]   ;;  %v2283_v22 = vld [vmem:[%s3094_s1 + $0x10] sm:$0xff]  }
   0x8   :  { %1944 = vmatpush3.bf16.msra.mxu0 %v2267_v6  ;;  %v2276_v15 = vld [vmem:[%s3094_s1 + $0xa0] sm:$0xff]   ;;  %v2280_v19 = vld [vmem:[%s3094_s1 + $0x98] sm:$0xff]   ;;  %v2284_v23 = vld [vmem:[%s3094_s1 + $0x90] sm:$0xff]  }
   0x9   :  { %2008 = vmatpush3.bf16.msra.mxu1 %v2268_v7  ;;  %1945 = vmatprep.subr.bf16.mxu0 %v2269_v8  ;;  %v2285_v24 = vld [vmem:[%s3094_s1 + $0x48] sm:$0xff]   ;;  %v2289_v28 = vld [vmem:[%s3094_s1 + $0x40] sm:$0xff]   ;;  %v2299_v36 = vld [vmem:[%s3094_s1 + $0x178] sm:$0xff]  }
   0xa   :  { %2009 = vmatprep.subr.bf16.mxu1 %v2270_v9  ;;  %v2286_v25 = vld [vmem:[%s3094_s1 + $0xc8] sm:$0xff]   ;;  %v2290_v29 = vld [vmem:[%s3094_s1 + $0xc0] sm:$0xff]   ;;  %v2300_v37 = vld [vmem:[%s3094_s1 + $0x1f8] sm:$0xff]  }
   0xb   :  { %v2287_v26 = vld [vmem:[%s3094_s1 + $0x8] sm:$0xff]   ;;  %v2291_v30 = vld [vmem:[%s3094_s1] sm:$0xff]   ;;  %v2301_v38 = vld [vmem:[%s3094_s1 + $0x138] sm:$0xff]  }
   0xc   :  { %1946 = vmatpush3.bf16.msra.mxu0 %v2271_v10  ;;  %v2288_v27 = vld [vmem:[%s3094_s1 + $0x88] sm:$0xff]   ;;  %v2292_v31 = vld [vmem:[%s3094_s1 + $0x80] sm:$0xff]   ;;  %v2302_v39 = vld [vmem:[%s3094_s1 + $0x1b8] sm:$0xff]  }
   0xd   :  { %2010 = vmatpush3.bf16.msra.mxu1 %v2272_v11  ;;  %1947 = vmatprep.subr.bf16.mxu0 %v2273_v12  ;;  %v2293_v32 = vld [vmem:[%s3095_s0] ss:$36 sps:$4 sm:$0xff]   ;;  %v2296_v34 = vld [vmem:[%s3095_s0 + $0x8] ss:$36 sps:$4 sm:$0xff]   ;;  %v2305_v41 = vld [vmem:[%s3095_s0 + $0x54] ss:$36 sps:$4 sm:$0xff]  }
   0xe   :  { %2011 = vmatprep.subr.bf16.mxu1 %v2274_v13  ;;  %v2295_v33 = vld [vmem:[%s3095_s0 + $0x4] ss:$36 sps:$4 sm:$0xff]   ;;  %v2298_v35 = vld [vmem:[%s3095_s0 + $0xc] ss:$36 sps:$4 sm:$0xff]   ;;  %v2313_v48 = vld [vmem:[%s3095_s0 + $0x94] ss:$36 sps:$4 sm:$0xff]  }
   0xf   :  { %1077 = vmatprep.mubr.bf16.mxu0 %v2295_v33  ;;  %1174 = vmatprep.mubr.bf16.mxu1 %v2298_v35  ;;  %v2303_v40 = vld [vmem:[%s3095_s0 + $0x4c] ss:$36 sps:$4 sm:$0xff]   ;;  %v2315_v49 = vld [vmem:[%s3095_s0 + $0x9c] ss:$36 sps:$4 sm:$0xff]   ;;  %v2325_v57 = vld [vmem:[%s3095_s0 + $0xe4] ss:$36 sps:$4 sm:$0xff]  }
  0x10   :  { %1948 = vmatpush3.bf16.msra.mxu0 %v2275_v14  ;;  %v2307_v42 = vld [vmem:[%s3095_s0 + $0x48] ss:$36 sps:$4 sm:$0xff]   ;;  %v2308_v43 = vld [vmem:[%s3095_s0 + $0x50] ss:$36 sps:$4 sm:$0xff]   ;;  %v2318_v51 = vld [vmem:[%s3095_s0 + $0x98] ss:$36 sps:$4 sm:$0xff]  }
  0x11   :  { %2012 = vmatpush3.bf16.msra.mxu1 %v2276_v15  ;;  %1949 = vmatprep.subr.bf16.mxu0 %v2277_v16  ;;  %v2309_v44 = vld [vmem:[%s3094_s1 + $0x170] sm:$0xff]   ;;  %v2319_v52 = vld [vmem:[%s3094_s1 + $0x168] sm:$0xff]   ;;  %v2323_v56 = vld [vmem:[%s3095_s0 + $0xdc] ss:$36 sps:$4 sm:$0xff]  }
  0x12   :  { %2013 = vmatprep.subr.bf16.mxu1 %v2278_v17  ;;  %v2310_v45 = vld [vmem:[%s3094_s1 + $0x1f0] sm:$0xff]   ;;  %v2320_v53 = vld [vmem:[%s3094_s1 + $0x1e8] sm:$0xff]   ;;  %v2327_v58 = vld [vmem:[%s3095_s0 + $0xd8] ss:$36 sps:$4 sm:$0xff]  }
  0x13   :  { %v2311_v46 = vld [vmem:[%s3094_s1 + $0x130] sm:$0xff]   ;;  %v2321_v54 = vld [vmem:[%s3094_s1 + $0x128] sm:$0xff]   ;;  %v2328_v59 = vld [vmem:[%s3095_s0 + $0xe0] ss:$36 sps:$4 sm:$0xff]  }
  0x14   :  { %1950 = vmatpush3.bf16.msra.mxu0 %v2279_v18  ;;  %v2312_v47 = vld [vmem:[%s3094_s1 + $0x1b0] sm:$0xff]   ;;  %v2322_v55 = vld [vmem:[%s3094_s1 + $0x1a8] sm:$0xff]   ;;  %v2329_v60 = vld [vmem:[%s3094_s1 + $0x160] sm:$0xff]  }
  0x15   :  { %2014 = vmatpush3.bf16.msra.mxu1 %v2280_v19  ;;  %1951 = vmatprep.subr.bf16.mxu0 %v2281_v20  ;;  %v2317_v50 = vld [vmem:[%s3095_s0 + $0x90] ss:$36 sps:$4 sm:$0xff]   ;;  %v2330_v61 = vld [vmem:[%s3094_s1 + $0x1e0] sm:$0xff]   ;;  %v2339_v3 = vld [vmem:[%s3094_s1 + $0x158] sm:$0xff]  }
  0x16   :  { %2015 = vmatprep.subr.bf16.mxu1 %v2282_v21  ;;  %v2331_v62 = vld [vmem:[%s3094_s1 + $0x120] sm:$0xff]   ;;  %v2335_v1 = vld [vmem:[%s3095_s0 + $0x12c] ss:$36 sps:$4 sm:$0xff]   ;;  %v2340_v5 = vld [vmem:[%s3094_s1 + $0x1d8] sm:$0xff]  }
  0x17   :  { %v2332_v63 = vld [vmem:[%s3094_s1 + $0x1a0] sm:$0xff]   ;;  %v2338_v4 = vld [vmem:[%s3095_s0 + $0x128] ss:$36 sps:$4 sm:$0xff]   ;;  %v2341_v6 = vld [vmem:[%s3094_s1 + $0x118] sm:$0xff]  }
  0x18   :  { %1952 = vmatpush3.bf16.msra.mxu0 %v2283_v22  ;;  %v2333_v0 = vld [vmem:[%s3095_s0 + $0x124] ss:$36 sps:$4 sm:$0xff]   ;;  %v2342_v7 = vld [vmem:[%s3094_s1 + $0x198] sm:$0xff]   ;;  %v2343_v8 = vld [vmem:[%s3095_s0 + $0x16c] ss:$36 sps:$4 sm:$0xff]  }
  0x19   :  { %2016 = vmatpush3.bf16.msra.mxu1 %v2284_v23  ;;  %1953 = vmatprep.subr.bf16.mxu0 %v2285_v24  ;;  %v2337_v2 = vld [vmem:[%s3095_s0 + $0x120] ss:$36 sps:$4 sm:$0xff]   ;;  %v2345_v9 = vld [vmem:[%s3095_s0 + $0x174] ss:$36 sps:$4 sm:$0xff]   ;;  %v2347_v12 = vld [vmem:[%s3095_s0 + $0x168] ss:$36 sps:$4 sm:$0xff]  }
  0x1a   :  { %2017 = vmatprep.subr.bf16.mxu1 %v2286_v25  ;;  %v2349_v10 = vld [vmem:[%s3094_s1 + $0x150] sm:$0xff]   ;;  %v2355_v17 = vld [vmem:[%s3095_s0 + $0x1bc] ss:$36 sps:$4 sm:$0xff]   ;;  %v2359_v18 = vld [vmem:[%s3094_s1 + $0x148] sm:$0xff]  }
  0x1b   :  { %v2350_v11 = vld [vmem:[%s3094_s1 + $0x1d0] sm:$0xff]   ;;  %v2360_v19 = vld [vmem:[%s3094_s1 + $0x1c8] sm:$0xff]   ;;  %v2358_v23 = vld [vmem:[%s3095_s0 + $0x1b8] ss:$36 sps:$4 sm:$0xff]  }
  0x1c   :  { %1954 = vmatpush3.bf16.msra.mxu0 %v2287_v26  ;;  %v2351_v13 = vld [vmem:[%s3094_s1 + $0x110] sm:$0xff]   ;;  %v2361_v20 = vld [vmem:[%s3094_s1 + $0x108] sm:$0xff]   ;;  %v2363_v24 = vld [vmem:[%s3095_s0 + $0x1fc] ss:$36 sps:$4 sm:$0xff]  }
  0x1d   :  { %2018 = vmatpush3.bf16.msra.mxu1 %v2288_v27  ;;  %1955 = vmatprep.subr.bf16.mxu0 %v2289_v28  ;;  %v2352_v14 = vld [vmem:[%s3094_s1 + $0x190] sm:$0xff]   ;;  %v2362_v21 = vld [vmem:[%s3094_s1 + $0x188] sm:$0xff]   ;;  %v2369_v26 = vld [vmem:[%s3094_s1 + $0x140] sm:$0xff]  }
  0x1e   :  { %2019 = vmatprep.subr.bf16.mxu1 %v2290_v29  ;;  %v2348_v15 = vld [vmem:[%s3095_s0 + $0x170] ss:$36 sps:$4 sm:$0xff]   ;;  %v2365_v25 = vld [vmem:[%s3095_s0 + $0x204] ss:$36 sps:$4 sm:$0xff]  }
  0x1f   :  { %v2353_v16 = vld [vmem:[%s3095_s0 + $0x1b4] ss:$36 sps:$4 sm:$0xff]   ;;  %v2370_v27 = vld [vmem:[%s3094_s1 + $0x1c0] sm:$0xff]  }
  0x20   :  { %1956 = vmatpush3.bf16.msra.mxu0 %v2291_v30  ;;  %v2357_v22 = vld [vmem:[%s3095_s0 + $0x1b0] ss:$36 sps:$4 sm:$0xff]   ;;  %v2371_v28 = vld [vmem:[%s3094_s1 + $0x100] sm:$0xff]   ;;  %v2367_v30 = vld [vmem:[%s3095_s0 + $0x1f8] ss:$36 sps:$4 sm:$0xff]  }
  0x21   :  { %2020 = vmatpush3.bf16.msra.mxu1 %v2292_v31  ;;  %2069 = vmatprep.subr.bf16.mxu0 %v2299_v36  ;;  %v2372_v29 = vld [vmem:[%s3094_s1 + $0x180] sm:$0xff]   ;;  %v2375_v33 = vld [vmem:[%s3095_s0 + $0x14] ss:$36 sps:$4 sm:$0xff]  }
  0x22   :  { %2133 = vmatprep.subr.bf16.mxu1 %v2300_v37  ;;  %v2368_v31 = vld [vmem:[%s3095_s0 + $0x200] ss:$36 sps:$4 sm:$0xff]   ;;  %v2373_v35 = vld [vmem:[%s3095_s0 + $0x10] ss:$36 sps:$4 sm:$0xff]   ;;  %v2376_v36 = vld [vmem:[%s3095_s0 + $0x18] ss:$36 sps:$4 sm:$0xff]  }
  0x23   :  { %1078 = vmatmul.mubr.bf16.vlgmr.msra.gmra.mxu0 %v2293_v32  ;;  %v2379_v32 = vld [vmem:[%s3094_s1 + $0x238] sm:$0xff]  }
  0x24   :  { %1175 = vmatmul.mubr.bf16.vlgmr.msra.gmra.mxu1 %v2296_v34  ;;  %2070 = vmatpush3.bf16.msra.mxu0 %v2301_v38  ;;  %v2378_v34 = vld [vmem:[%s3095_s0 + $0x1c] ss:$36 sps:$4 sm:$0xff]   ;;  %v2382_v38 = vld [vmem:[%s3095_s0 + $0x64] ss:$36 sps:$4 sm:$0xff]  }
  0x25   :  { %2134 = vmatpush3.bf16.msra.mxu1 %v2302_v39  ;;  %1085 = vmatprep.mubr.bf16.mxu0 %v2303_v40  ;;  %v2380_v37 = vld [vmem:[%s3095_s0 + $0x5c] ss:$36 sps:$4 sm:$0xff]   ;;  %v2386_v39 = vld [vmem:[%s3094_s1 + $0x230] sm:$0xff]   ;;  %v2393_v40 = vld [vmem:[%s3094_s1 + $0x228] sm:$0xff]  }
  0x26   :  { %1182 = vmatprep.mubr.bf16.mxu1 %v2305_v41  ;;  %2071 = vmatprep.subr.bf16.mxu0 %v2309_v44  ;;  %v2384_v41 = vld [vmem:[%s3095_s0 + $0x58] ss:$36 sps:$4 sm:$0xff]   ;;  %v2389_v44 = vld [vmem:[%s3095_s0 + $0xac] ss:$36 sps:$4 sm:$0xff]  }
  0x27   :  { %2135 = vmatprep.subr.bf16.mxu1 %v2310_v45  ;;  %v2400_v45 = vld [vmem:[%s3094_s1 + $0x220] sm:$0xff]  }
  0x28   :  { %2072 = vmatpush3.bf16.msra.mxu0 %v2311_v46  ;;  %v2407_v46 = vld [vmem:[%s3094_s1 + $0x218] sm:$0xff]  }
  0x29   :  { %2136 = vmatpush3.bf16.msra.mxu1 %v2312_v47  ;;  %2073 = vmatprep.subr.bf16.mxu0 %v2319_v52  ;;  %v2391_v47 = vld [vmem:[%s3095_s0 + $0xa0] ss:$36 sps:$4 sm:$0xff]   ;;  %v2398_v52 = vld [vmem:[%s3095_s0 + $0xe8] ss:$36 sps:$4 sm:$0xff]  }
  0x2a   :  { %2137 = vmatprep.subr.bf16.mxu1 %v2320_v53  ;;  %v2421_v53 = vld [vmem:[%s3094_s1 + $0x208] sm:$0xff]  }
  0x2b   :  { %1086 = vmatmul.mubr.bf16.gmra.mxu0 %v2307_v42  ;;  %v2385_v42 = vld [vmem:[%s3095_s0 + $0x60] ss:$36 sps:$4 sm:$0xff]  }
  0x2c   :  { %1183 = vmatmul.mubr.bf16.gmra.mxu1 %v2308_v43  ;;  %1093 = vmatprep.mubr.bf16.mxu0 %v2313_v48  ;;  %v2387_v43 = vld [vmem:[%s3095_s0 + $0xa4] ss:$36 sps:$4 sm:$0xff]  }
  0x2d   :  { %1190 = vmatprep.mubr.bf16.mxu1 %v2315_v49  ;;  %2074 = vmatpush3.bf16.msra.mxu0 %v2321_v54  ;;  %v2392_v48 = vld [vmem:[%s3095_s0 + $0xa8] ss:$36 sps:$4 sm:$0xff]   ;;  %v2399_v54 = vld [vmem:[%s3095_s0 + $0xf0] ss:$36 sps:$4 sm:$0xff]  }
  0x2e   :  { %2138 = vmatpush3.bf16.msra.mxu1 %v2322_v55  ;;  %2075 = vmatprep.subr.bf16.mxu0 %v2329_v60  ;;  %v2394_v49 = vld [vmem:[%s3095_s0 + $0xec] ss:$36 sps:$4 sm:$0xff]   ;;  %v2401_v55 = vld [vmem:[%s3095_s0 + $0x134] ss:$36 sps:$4 sm:$0xff]   ;;  %v2408_v60 = vld [vmem:[%s3095_s0 + $0x17c] ss:$36 sps:$4 sm:$0xff]  }
  0x2f   :  { %2139 = vmatprep.subr.bf16.mxu1 %v2330_v61  ;;  %v2410_v61 = vld [vmem:[%s3095_s0 + $0x184] ss:$36 sps:$4 sm:$0xff]  }
  0x31   :  { %2076 = vmatpush3.bf16.msra.mxu0 %v2331_v62  ;;  %v2412_v62 = vld [vmem:[%s3095_s0 + $0x178] ss:$36 sps:$4 sm:$0xff]  }
  0x32   :  { %2140 = vmatpush3.bf16.msra.mxu1 %v2332_v63  ;;  %2077 = vmatprep.subr.bf16.mxu0 %v2339_v3  ;;  %v2413_v63 = vld [vmem:[%s3095_s0 + $0x180] ss:$36 sps:$4 sm:$0xff]   ;;  %v2420_v3 = vld [vmem:[%s3095_s0 + $0x1c8] ss:$36 sps:$4 sm:$0xff]  }
  0x33   :  { %1094 = vmatmul.mubr.bf16.gmra.mxu0 %v2317_v50  ;;  %2141 = vmatprep.subr.bf16.mxu1 %v2340_v5  ;;  %v2396_v50 = vld [vmem:[%s3095_s0 + $0xf4] ss:$36 sps:$4 sm:$0xff]  }
  0x34   :  { %1191 = vmatmul.mubr.bf16.gmra.mxu1 %v2318_v51  ;;  %1101 = vmatprep.mubr.bf16.mxu0 %v2323_v56  ;;  %v2414_v51 = vld [vmem:[%s3094_s1 + $0x210] sm:$0xff]   ;;  %v2403_v56 = vld [vmem:[%s3095_s0 + $0x13c] ss:$36 sps:$4 sm:$0xff]  }
  0x35   :  { %1198 = vmatprep.mubr.bf16.mxu1 %v2325_v57  ;;  %2078 = vmatpush3.bf16.msra.mxu0 %v2341_v6  ;;  %v2428_v57 = vld [vmem:[%s3094_s1 + $0x200] sm:$0xff]   ;;  %v2424_v5 = vld [vmem:[%s3095_s0 + $0x214] ss:$36 sps:$4 sm:$0xff]   ;;  %v2426_v6 = vld [vmem:[%s3095_s0 + $0x208] ss:$36 sps:$4 sm:$0xff]  }
  0x36   :  { %2142 = vmatpush3.bf16.msra.mxu1 %v2342_v7  ;;  %2079 = vmatprep.subr.bf16.mxu0 %v2349_v10  ;;  %v2427_v7 = vld [vmem:[%s3095_s0 + $0x210] ss:$36 sps:$4 sm:$0xff]   ;;  %v2431_v10 = vld [vmem:[%s3095_s0 + $0x68] ss:$36 sps:$4 sm:$0xff]  }
  0x37   :  { %2143 = vmatprep.subr.bf16.mxu1 %v2350_v11  ;;  %v2432_v11 = vld [vmem:[%s3095_s0 + $0x188] ss:$36 sps:$4 sm:$0xff]  }
  0x39   :  { %2080 = vmatpush3.bf16.msra.mxu0 %v2351_v13  ;;  %v2434_v13 = vld [vmem:[%s3095_s0 + $0x1d0] ss:$36 sps:$4 sm:$0xff]  }
  0x3a   :  { %2144 = vmatpush3.bf16.msra.mxu1 %v2352_v14  ;;  %2081 = vmatprep.subr.bf16.mxu0 %v2359_v18  ;;  %v2435_v14 = vld [vmem:[%s3095_s0 + $0xf8] ss:$36 sps:$4 sm:$0xff]  }
  0x3b   :  { %1102 = vmatmul.mubr.bf16.gmra.mxu0 %v2327_v58  ;;  %2145 = vmatprep.subr.bf16.mxu1 %v2360_v19  ;;  %v2405_v58 = vld [vmem:[%s3095_s0 + $0x130] ss:$36 sps:$4 sm:$0xff]  }
  0x3c   :  { %1199 = vmatmul.mubr.bf16.gmra.mxu1 %v2328_v59  ;;  %1109 = vmatprep.mubr.bf16.mxu0 %v2333_v0  ;;  %v2406_v59 = vld [vmem:[%s3095_s0 + $0x138] ss:$36 sps:$4 sm:$0xff]   ;;  %v2415_v0 = vld [vmem:[%s3095_s0 + $0x1c4] ss:$36 sps:$4 sm:$0xff]  }
  0x3d   :  { %1206 = vmatprep.mubr.bf16.mxu1 %v2335_v1  ;;  %2082 = vmatpush3.bf16.msra.mxu0 %v2361_v20  ;;  %v2417_v1 = vld [vmem:[%s3095_s0 + $0x1cc] ss:$36 sps:$4 sm:$0xff]  }
  0x3e   :  { %2146 = vmatpush3.bf16.msra.mxu1 %v2362_v21  ;;  %2083 = vmatprep.subr.bf16.mxu0 %v2369_v26 }
  0x3f   :  { %2147 = vmatprep.subr.bf16.mxu1 %v2370_v27 }
  0x41   :  { %2084 = vmatpush3.bf16.msra.mxu0 %v2371_v28 }
  0x42   :  { %2148 = vmatpush3.bf16.msra.mxu1 %v2372_v29  ;;  %2213 = vmatprep.subr.bf16.mxu0 %v2379_v32 }
  0x43   :  { %1110 = vmatmul.mubr.bf16.gmra.mxu0 %v2337_v2  ;;  %2245 = vmatprep.subr.bf16.mxu1 %v2379_v32  ;;  %v2419_v2 = vld [vmem:[%s3095_s0 + $0x1c0] ss:$36 sps:$4 sm:$0xff]  }
  0x44   :  { %1207 = vmatmul.mubr.bf16.gmra.mxu1 %v2338_v4  ;;  %1117 = vmatprep.mubr.bf16.mxu0 %v2343_v8  ;;  %v2422_v4 = vld [vmem:[%s3095_s0 + $0x20c] ss:$36 sps:$4 sm:$0xff]   ;;  %v2429_v8 = vld [vmem:[%s3095_s0 + $0x20] ss:$36 sps:$4 sm:$0xff]  }
  0x45   :  { %1214 = vmatprep.mubr.bf16.mxu1 %v2345_v9  ;;  %v2430_v9 = vld [vmem:[%s3095_s0 + $0x140] ss:$36 sps:$4 sm:$0xff]  }
  0x4b   :  { %1118 = vmatmul.mubr.bf16.gmra.mxu0 %v2347_v12  ;;  %v2433_v12 = vld [vmem:[%s3095_s0 + $0xb0] ss:$36 sps:$4 sm:$0xff]  }
  0x4c   :  { %1215 = vmatmul.mubr.bf16.gmra.mxu1 %v2348_v15  ;;  %1125 = vmatprep.mubr.bf16.mxu0 %v2353_v16  ;;  %v2436_v15 = vld [vmem:[%s3095_s0 + $0x218] ss:$36 sps:$4 sm:$0xff]  }
  0x4d   :  { %1222 = vmatprep.mubr.bf16.mxu1 %v2355_v17 }
  0x53   :  { %1126 = vmatmul.mubr.bf16.gmra.mxu0 %v2357_v22 }
  0x54   :  { %1223 = vmatmul.mubr.bf16.gmra.mxu1 %v2358_v23  ;;  %1133 = vmatprep.mubr.bf16.mxu0 %v2363_v24 }
  0x55   :  { %1230 = vmatprep.mubr.bf16.mxu1 %v2365_v25 }
  0x5b   :  { %1134 = vmatmul.mubr.bf16.gmra.mxu0 %v2367_v30 }
  0x5c   :  { %1231 = vmatmul.mubr.bf16.gmra.mxu1 %v2368_v31  ;;  %1271 = vmatprep.mubr.bf16.mxu0 %v2375_v33 }
  0x5d   :  { %1368 = vmatprep.mubr.bf16.mxu1 %v2378_v34 }
  0x63   :  { %1272 = vmatmul.mubr.bf16.vlgmr.msra.gmra.mxu0 %v2373_v35 }
  0x64   :  { %1369 = vmatmul.mubr.bf16.vlgmr.msra.gmra.mxu1 %v2376_v36  ;;  %2214 = vmatpush3.bf16.msra.mxu0 %v2379_v32 }
  0x65   :  { %2253 = vmatpush3.bf16.msra.mxu1 %v2379_v32  ;;  %1279 = vmatprep.mubr.bf16.mxu0 %v2380_v37 }
  0x66   :  { %1376 = vmatprep.mubr.bf16.mxu1 %v2382_v38  ;;  %2215 = vmatprep.subr.bf16.mxu0 %v2386_v39 }
  0x67   :  { %2246 = vmatprep.subr.bf16.mxu1 %v2386_v39 }
  0x68   :  { %2216 = vmatpush3.bf16.msra.mxu0 %v2386_v39 }
  0x69   :  { %2254 = vmatpush3.bf16.msra.mxu1 %v2386_v39  ;;  %2217 = vmatprep.subr.bf16.mxu0 %v2393_v40 }
  0x6a   :  { %2247 = vmatprep.subr.bf16.mxu1 %v2393_v40 }
  0x6b   :  { %1280 = vmatmul.mubr.bf16.gmra.mxu0 %v2384_v41 }
  0x6c   :  { %1377 = vmatmul.mubr.bf16.gmra.mxu1 %v2385_v42  ;;  %1287 = vmatprep.mubr.bf16.mxu0 %v2387_v43 }
  0x6d   :  { %1384 = vmatprep.mubr.bf16.mxu1 %v2389_v44  ;;  %2218 = vmatpush3.bf16.msra.mxu0 %v2393_v40 }
  0x6e   :  { %2255 = vmatpush3.bf16.msra.mxu1 %v2393_v40  ;;  %2219 = vmatprep.subr.bf16.mxu0 %v2400_v45 }
  0x6f   :  { %2248 = vmatprep.subr.bf16.mxu1 %v2400_v45 }
  0x71   :  { %2220 = vmatpush3.bf16.msra.mxu0 %v2400_v45 }
  0x72   :  { %2256 = vmatpush3.bf16.msra.mxu1 %v2400_v45  ;;  %2221 = vmatprep.subr.bf16.mxu0 %v2407_v46 }
  0x73   :  { %1288 = vmatmul.mubr.bf16.gmra.mxu0 %v2391_v47  ;;  %2249 = vmatprep.subr.bf16.mxu1 %v2407_v46 }
  0x74   :  { %1385 = vmatmul.mubr.bf16.gmra.mxu1 %v2392_v48  ;;  %1295 = vmatprep.mubr.bf16.mxu0 %v2394_v49 }
  0x75   :  { %1392 = vmatprep.mubr.bf16.mxu1 %v2396_v50  ;;  %2222 = vmatpush3.bf16.msra.mxu0 %v2407_v46 }
  0x76   :  { %2257 = vmatpush3.bf16.msra.mxu1 %v2407_v46  ;;  %2223 = vmatprep.subr.bf16.mxu0 %v2414_v51 }
  0x77   :  { %2250 = vmatprep.subr.bf16.mxu1 %v2414_v51 }
  0x79   :  { %2224 = vmatpush3.bf16.msra.mxu0 %v2414_v51 }
  0x7a   :  { %2258 = vmatpush3.bf16.msra.mxu1 %v2414_v51  ;;  %2225 = vmatprep.subr.bf16.mxu0 %v2421_v53 }
  0x7b   :  { %1296 = vmatmul.mubr.bf16.gmra.mxu0 %v2398_v52  ;;  %2251 = vmatprep.subr.bf16.mxu1 %v2421_v53 }
  0x7c   :  { %1393 = vmatmul.mubr.bf16.gmra.mxu1 %v2399_v54  ;;  %1303 = vmatprep.mubr.bf16.mxu0 %v2401_v55 }
  0x7d   :  { %1400 = vmatprep.mubr.bf16.mxu1 %v2403_v56  ;;  %2226 = vmatpush3.bf16.msra.mxu0 %v2421_v53 }
  0x7e   :  { %2259 = vmatpush3.bf16.msra.mxu1 %v2421_v53  ;;  %2227 = vmatprep.subr.bf16.mxu0 %v2428_v57 }
  0x7f   :  { %2252 = vmatprep.subr.bf16.mxu1 %v2428_v57 }
  0x81   :  { %2228 = vmatpush3.bf16.msra.mxu0 %v2428_v57 }
  0x82   :  { %2260 = vmatpush3.bf16.msra.mxu1 %v2428_v57 }
  0x83   :  { %1304 = vmatmul.mubr.bf16.gmra.mxu0 %v2405_v58 }
  0x84   :  { %1401 = vmatmul.mubr.bf16.gmra.mxu1 %v2406_v59  ;;  %1311 = vmatprep.mubr.bf16.mxu0 %v2408_v60 }
  0x85   :  { %1408 = vmatprep.mubr.bf16.mxu1 %v2410_v61 }
  0x8b   :  { %1312 = vmatmul.mubr.bf16.gmra.mxu0 %v2412_v62 }
  0x8c   :  { %1409 = vmatmul.mubr.bf16.gmra.mxu1 %v2413_v63  ;;  %1319 = vmatprep.mubr.bf16.mxu0 %v2415_v0 }
  0x8d   :  { %1416 = vmatprep.mubr.bf16.mxu1 %v2417_v1 }
  0x93   :  { %1320 = vmatmul.mubr.bf16.gmra.mxu0 %v2419_v2 }
  0x94   :  { %1417 = vmatmul.mubr.bf16.gmra.mxu1 %v2420_v3  ;;  %1327 = vmatprep.mubr.bf16.mxu0 %v2422_v4 }
  0x95   :  { %1424 = vmatprep.mubr.bf16.mxu1 %v2424_v5 }
  0x9b   :  { %1328 = vmatmul.mubr.bf16.gmra.mxu0 %v2426_v6 }
  0x9c   :  { %1425 = vmatmul.mubr.bf16.gmra.mxu1 %v2427_v7  ;;  %2229 = vmatprep.mubr.bf16.mxu0 %v2429_v8 }
  0x9d   :  { %2237 = vmatprep.mubr.bf16.mxu1 %v2430_v9 }
  0xa3   :  { %2230 = vmatmul.mubr.bf16.vlgmr.msra.gmra.mxu0 %v2431_v10 }
  0xa4   :  { %2238 = vmatmul.mubr.bf16.vlgmr.msra.gmra.mxu1 %v2432_v11  ;;  %2233 = vmatprep.mubr.bf16.mxu0 %v2433_v12 }
  0xa5   :  { %2241 = vmatprep.mubr.bf16.mxu1 %v2434_v13 }
  0xab   :  { %2234 = vmatmul.mubr.bf16.gmra.mxu0 %v2435_v14 }
  0xac   :  { %2242 = vmatmul.mubr.bf16.gmra.mxu1 %v2436_v15 }
  0xe3   :  { %v1957_v16 = vpop.f32.mrf.mxu0 }
  0xe4   :  { %v2021_v17 = vpop.f32.mrf.mxu1 }
  0xe5   :  { %v1958_v18 = vpop.f32.mrf.mxu0 }
  0xe6   :  { %v1959_v19 = vadd.f32 %v1958_v18, %v1957_v16  ;;  %v2022_v20 = vpop.f32.mrf.mxu1 }
  0xe7   :  { %v2023_v21 = vadd.f32 %v2022_v20, %v2021_v17  ;;  %v1960_v22 = vpop.f32.mrf.mxu0 }
  0xe8   :  { %v2024_v23 = vpop.f32.mrf.mxu1 }
  0xe9   :  { %v2899_v24 = vadd.f32 %v2023_v21, %v1959_v19  ;;  %v1961_v25 = vpop.f32.mrf.mxu0 }
  0xea   :  { %v1962_v26 = vadd.f32 %v1961_v25, %v1960_v22  ;;  %v2025_v27 = vpop.f32.mrf.mxu1 }
  0xeb   :  { %v2026_v28 = vadd.f32 %v2025_v27, %v2024_v23  ;;  %v1963_v29 = vpop.f32.mrf.mxu0 }
  0xec   :  { %v2027_v30 = vpop.f32.mrf.mxu1 }
  0xed   :  { %v2901_v31 = vadd.f32 %v2026_v28, %v1962_v26  ;;  %v1964_v32 = vpop.f32.mrf.mxu0 }
  0xee   :  { %v1965_v33 = vadd.f32 %v1964_v32, %v1963_v29  ;;  %v2028_v34 = vpop.f32.mrf.mxu1 }
  0xef   :  { %v2029_v35 = vadd.f32 %v2028_v34, %v2027_v30  ;;  %v1966_v36 = vpop.f32.mrf.mxu0 }
  0xf0   :  { %v2030_v37 = vpop.f32.mrf.mxu1 }
  0xf1   :  { %v2903_v38 = vadd.f32 %v2029_v35, %v1965_v33  ;;  %v1967_v39 = vpop.f32.mrf.mxu0 }
  0xf2   :  { %v1968_v40 = vadd.f32 %v1967_v39, %v1966_v36  ;;  %v2031_v41 = vpop.f32.mrf.mxu1 }
  0xf3   :  { %v2032_v42 = vadd.f32 %v2031_v41, %v2030_v37  ;;  %v1969_v43 = vpop.f32.mrf.mxu0 }
  0xf4   :  { %v2033_v44 = vpop.f32.mrf.mxu1 }
  0xf5   :  { %v2905_v45 = vadd.f32 %v2032_v42, %v1968_v40  ;;  %v1970_v46 = vpop.f32.mrf.mxu0 }
  0xf6   :  { %v1971_v47 = vadd.f32 %v1970_v46, %v1969_v43  ;;  %v2034_v48 = vpop.f32.mrf.mxu1 }
  0xf7   :  { %v2035_v49 = vadd.f32 %v2034_v48, %v2033_v44  ;;  %v1972_v50 = vpop.f32.mrf.mxu0 }
  0xf8   :  { %v2036_v51 = vpop.f32.mrf.mxu1 }
  0xf9   :  { %v2907_v52 = vadd.f32 %v2035_v49, %v1971_v47  ;;  %v1973_v53 = vpop.f32.mrf.mxu0 }
  0xfa   :  { %v1974_v54 = vadd.f32 %v1973_v53, %v1972_v50  ;;  %v2037_v55 = vpop.f32.mrf.mxu1 }
  0xfb   :  { %v2038_v56 = vadd.f32 %v2037_v55, %v2036_v51  ;;  %v1975_v57 = vpop.f32.mrf.mxu0 }
  0xfc   :  { %v2039_v58 = vpop.f32.mrf.mxu1 }
  0xfd   :  { %v2909_v59 = vadd.f32 %v2038_v56, %v1974_v54  ;;  %v1976_v60 = vpop.f32.mrf.mxu0 }
  0xfe   :  { %v1977_v61 = vadd.f32 %v1976_v60, %v1975_v57  ;;  %v2040_v62 = vpop.f32.mrf.mxu1 }
  0xff   :  { %v2041_v63 = vadd.f32 %v2040_v62, %v2039_v58  ;;  %v1978_v0 = vpop.f32.mrf.mxu0 }
 0x100   :  { %v2042_v1 = vpop.f32.mrf.mxu1 }
 0x101   :  { %v2911_v2 = vadd.f32 %v2041_v63, %v1977_v61  ;;  %v1979_v3 = vpop.f32.mrf.mxu0 }
 0x102   :  { %v1980_v4 = vadd.f32 %v1979_v3, %v1978_v0  ;;  %v2043_v5 = vpop.f32.mrf.mxu1 }
 0x103   :  { %v2044_v6 = vadd.f32 %v2043_v5, %v2042_v1  ;;  %v1981_v7 = vpop.f32.mrf.mxu0 }
 0x104   :  { %v2045_v8 = vpop.f32.mrf.mxu1 }
 0x105   :  { %v2913_v9 = vadd.f32 %v2044_v6, %v1980_v4  ;;  %v1982_v10 = vpop.f32.mrf.mxu0 }
 0x106   :  { %v1983_v11 = vadd.f32 %v1982_v10, %v1981_v7  ;;  %v2046_v12 = vpop.f32.mrf.mxu1 }
 0x107   :  { %v2047_v13 = vadd.f32 %v2046_v12, %v2045_v8  ;;  %v1984_v14 = vpop.f32.mrf.mxu0 }
 0x108   :  { %v2048_v15 = vpop.f32.mrf.mxu1 }
 0x109   :  { %v2915_v16 = vadd.f32 %v2047_v13, %v1983_v11  ;;  %v1985_v17 = vpop.f32.mrf.mxu0 }
 0x10a   :  { %v1986_v18 = vadd.f32 %v1985_v17, %v1984_v14  ;;  %v2049_v19 = vpop.f32.mrf.mxu1 }
 0x10b   :  { %3100 = vst [vmem:[#allocation2_spill] sm:$0xff] %v2915_v16  ;;  %v2050_v20 = vadd.f32 %v2049_v19, %v2048_v15  ;;  %v1987_v21 = vpop.f32.mrf.mxu0 }
 0x10c   :  { %v2051_v22 = vpop.f32.mrf.mxu1 }
 0x10d   :  { %v2917_v23 = vadd.f32 %v2050_v20, %v1986_v18  ;;  %v1988_v25 = vpop.f32.mrf.mxu0 }
 0x10e   :  { %v1989_v26 = vadd.f32 %v1988_v25, %v1987_v21  ;;  %v2052_v27 = vpop.f32.mrf.mxu1 }
 0x10f   :  { %3101 = vst [vmem:[#allocation3_spill] sm:$0xff] %v2917_v23  ;;  %v2053_v28 = vadd.f32 %v2052_v27, %v2051_v22  ;;  %v1990_v29 = vpop.f32.mrf.mxu0 }
 0x110   :  { %v2054_v30 = vpop.f32.mrf.mxu1 }
 0x111   :  { %v2919_v32 = vadd.f32 %v2053_v28, %v1989_v26  ;;  %v1991_v33 = vpop.f32.mrf.mxu0 }
 0x112   :  { %v1992_v34 = vadd.f32 %v1991_v33, %v1990_v29  ;;  %v2055_v35 = vpop.f32.mrf.mxu1 }
 0x113   :  { %3102 = vst [vmem:[#allocation4_spill] sm:$0xff] %v2919_v32  ;;  %v2056_v36 = vadd.f32 %v2055_v35, %v2054_v30  ;;  %v1993_v37 = vpop.f32.mrf.mxu0 }
 0x114   :  { %v2057_v39 = vpop.f32.mrf.mxu1 }
 0x115   :  { %v2921_v40 = vadd.f32 %v2056_v36, %v1992_v34  ;;  %v1994_v41 = vpop.f32.mrf.mxu0 }
 0x116   :  { %v1995_v42 = vadd.f32 %v1994_v41, %v1993_v37  ;;  %v2058_v43 = vpop.f32.mrf.mxu1 }
 0x117   :  { %3103 = vst [vmem:[#allocation5_spill] sm:$0xff] %v2921_v40  ;;  %v2059_v44 = vadd.f32 %v2058_v43, %v2057_v39  ;;  %v1996_v46 = vpop.f32.mrf.mxu0 }
 0x118   :  { %v2060_v47 = vpop.f32.mrf.mxu1 }
 0x119   :  { %v2923_v48 = vadd.f32 %v2059_v44, %v1995_v42  ;;  %v1997_v49 = vpop.f32.mrf.mxu0 }
 0x11a   :  { %v1998_v50 = vadd.f32 %v1997_v49, %v1996_v46  ;;  %v2061_v51 = vpop.f32.mrf.mxu1 }
 0x11b   :  { %3104 = vst [vmem:[#allocation6_spill] sm:$0xff] %v2923_v48  ;;  %v2062_v53 = vadd.f32 %v2061_v51, %v2060_v47  ;;  %v1999_v54 = vpop.f32.mrf.mxu0 }
 0x11c   :  { %v2063_v55 = vpop.f32.mrf.mxu1 }
 0x11d   :  { %v2925_v56 = vadd.f32 %v2062_v53, %v1998_v50  ;;  %v2000_v57 = vpop.f32.mrf.mxu0 }
 0x11e   :  { %v2001_v58 = vadd.f32 %v2000_v57, %v1999_v54  ;;  %v2064_v60 = vpop.f32.mrf.mxu1 }
 0x11f   :  { %3105 = vst [vmem:[#allocation7_spill] sm:$0xff] %v2925_v56  ;;  %v2065_v61 = vadd.f32 %v2064_v60, %v2063_v55  ;;  %v2002_v62 = vpop.f32.mrf.mxu0 }
 0x120   :  { %v2066_v63 = vpop.f32.mrf.mxu1 }
 0x121   :  { %v2927_v0 = vadd.f32 %v2065_v61, %v2001_v58  ;;  %v2003_v1 = vpop.f32.mrf.mxu0 }
 0x122   :  { %v2004_v3 = vadd.f32 %v2003_v1, %v2002_v62  ;;  %v2067_v4 = vpop.f32.mrf.mxu1 }
 0x123   :  { %3106 = vst [vmem:[#allocation8_spill] sm:$0xff] %v2927_v0  ;;  %v2068_v5 = vadd.f32 %v2067_v4, %v2066_v63  ;;  %v2085_v6 = vpop.f32.mrf.mxu0 }
 0x124   :  { %v2149_v7 = vpop.f32.mrf.mxu1 }
 0x125   :  { %v2929_v8 = vadd.f32 %v2068_v5, %v2004_v3  ;;  %v2086_v10 = vpop.f32.mrf.mxu0 }
 0x126   :  { %v2087_v11 = vadd.f32 %v2086_v10, %v2085_v6  ;;  %v2150_v12 = vpop.f32.mrf.mxu1 }
 0x127   :  { %3107 = vst [vmem:[#allocation9_spill] sm:$0xff] %v2929_v8  ;;  %v2088_v13 = vpop.f32.mrf.mxu0  ;;  %v2151_v15 = vadd.f32 %v2150_v12, %v2149_v7 }
 0x128   :  { %v1274_v14 = vadd.f32 %v2087_v11, %v2899_v24  ;;  %v2152_v17 = vpop.f32.mrf.mxu1 }
 0x129   :  { %v2089_v18 = vpop.f32.mrf.mxu0 }
 0x12a   :  { %v2153_v19 = vpop.f32.mrf.mxu1  ;;  %v2932_v20 = vadd.f32 %v2151_v15, %v1274_v14  ;;  %v2090_v14 = vadd.f32 %v2089_v18, %v2088_v13 }
 0x12b   :  { %v2091_v21 = vpop.f32.mrf.mxu0  ;;  %v2154_v18 = vadd.f32 %v2153_v19, %v2152_v17 }
 0x12c   :  { %3108 = vst [vmem:[#allocation10_spill] sm:$0xff] %v2932_v20  ;;  %v2155_v22 = vpop.f32.mrf.mxu1 }
 0x12d   :  { %v2092_v25 = vpop.f32.mrf.mxu0 }
 0x12e   :  { %v2156_v26 = vpop.f32.mrf.mxu1  ;;  %v2093_v56 = vadd.f32 %v2092_v25, %v2091_v21 }
 0x12f   :  { %v2094_v27 = vpop.f32.mrf.mxu0  ;;  %v2157_v21 = vadd.f32 %v2156_v26, %v2155_v22 }
 0x130   :  { %v2158_v28 = vpop.f32.mrf.mxu1  ;;  %v1282_v40 = vadd.f32 %v2093_v56, %v2903_v38 }
 0x131   :  { %v2095_v29 = vpop.f32.mrf.mxu0 }
 0x132   :  { %v2159_v30 = vpop.f32.mrf.mxu1  ;;  %v2096_v20 = vadd.f32 %v2095_v29, %v2094_v27  ;;  %v1379_v17 = vadd.f32 %v2157_v21, %v1282_v40 }
 0x133   :  { %v2097_v33 = vpop.f32.mrf.mxu0 }
 0x134   :  { %v2161_v34 = vpop.f32.mrf.mxu1 }
 0x135   :  { %v2098_v35 = vpop.f32.mrf.mxu0 }
 0x136   :  { %v2162_v36 = vpop.f32.mrf.mxu1  ;;  %v2099_v8 = vadd.f32 %v2098_v35, %v2097_v33  ;;  %v2160_v33 = vadd.f32 %v2159_v30, %v2158_v28  ;;  %v3115_v28 = vld [vmem:[#allocation4_spill] sm:$0xff] }
 0x137   :  { %v2100_v37 = vpop.f32.mrf.mxu0  ;;  %v2163_v35 = vadd.f32 %v2162_v36, %v2161_v34 }
 0x138   :  { %v2934_v24 = vpop.f32.mrf.mxu1  ;;  %v1290_v23 = vadd.f32 %v2099_v8, %v2907_v52 }
 0x139   :  { %v2101_v39 = vpop.f32.mrf.mxu0 }
 0x13a   :  { %v2936_v41 = vpop.f32.mrf.mxu1  ;;  %v2102_v25 = vadd.f32 %v2101_v39, %v2100_v37  ;;  %v3116_v37 = vld [vmem:[#allocation2_spill] sm:$0xff] }
 0x13b   :  { %v2103_v42 = vpop.f32.mrf.mxu0  ;;  %v2967_v26 = vadd.f32 %v2936_v41, %v2934_v24 }
 0x13c   :  { %v2938_v43 = vpop.f32.mrf.mxu1  ;;  %v2963_v22 = vadd.f32 %v2102_v25, %v2909_v59  ;;  %v3126_v25 = vld [vmem:[#allocation9_spill] sm:$0xff] }
 0x13d   :  { %v2104_v44 = vpop.f32.mrf.mxu0 }
 0x13e   :  { %v2168_v46 = vpop.f32.mrf.mxu1 }
 0x13f   :  { %v2106_v47 = vpop.f32.mrf.mxu0 }
 0x140   :  { %v2170_v49 = vpop.f32.mrf.mxu1 }
 0x141   :  { %v2107_v50 = vpop.f32.mrf.mxu0 }
 0x142   :  { %v2171_v51 = vpop.f32.mrf.mxu1  ;;  %v2108_v16 = vadd.f32 %v2107_v50, %v2106_v47  ;;  %v3118_v50 = vld [vmem:[#allocation5_spill] sm:$0xff] }
 0x143   :  { %v2109_v53 = vpop.f32.mrf.mxu0  ;;  %v2172_v36 = vadd.f32 %v2171_v51, %v2170_v49 }
 0x144   :  { %v2940_v54 = vpop.f32.mrf.mxu1  ;;  %v1301_v52 = vadd.f32 %v2108_v16, %v2913_v9  ;;  %v3117_v16 = vld [vmem:[#allocation3_spill] sm:$0xff] }
 0x145   :  { %3109 = vst [vmem:[#allocation11_spill] sm:$0xff] %v2940_v54  ;;  %v2110_v55 = vpop.f32.mrf.mxu0  ;;  %v2105_v54 = vadd.f32 %v2104_v44, %v2103_v42 }
 0x146   :  { %v2942_v57 = vpop.f32.mrf.mxu1 }
 0x147   :  { %3110 = vst [vmem:[#allocation12_spill] sm:$0xff] %v2942_v57  ;;  %v2112_v58 = vpop.f32.mrf.mxu0  ;;  %v1298_v42 = vadd.f32 %v2105_v54, %v2911_v2  ;;  %v2169_v2 = vadd.f32 %v2168_v46, %v2938_v43 }
 0x148   :  { %v2944_v60 = vpop.f32.mrf.mxu1 }
 0x149   :  { %3111 = vst [vmem:[#allocation13_spill] sm:$0xff] %v2944_v60  ;;  %v2113_v61 = vpop.f32.mrf.mxu0  ;;  %v2975_v24 = vadd.f32 %v2169_v2, %v1298_v42 }
 0x14a   :  { %v2946_v62 = vpop.f32.mrf.mxu1  ;;  %v2114_v32 = vadd.f32 %v2113_v61, %v2112_v58 }
 0x14b   :  { %3112 = vst [vmem:[#allocation14_spill] sm:$0xff] %v2946_v62  ;;  %v2115_v63 = vpop.f32.mrf.mxu0  ;;  %v1277_v62 = vadd.f32 %v2090_v14, %v2901_v31 }
 0x14c   :  { %v2179_v1 = vpop.f32.mrf.mxu1  ;;  %v1309_v40 = vadd.f32 %v2114_v32, %v3117_v16  ;;  %v3120_v41 = vld [vmem:[#allocation11_spill] sm:$0xff] }
 0x14d   :  { %v2116_v3 = vpop.f32.mrf.mxu0 }
 0x14e   :  { %v2180_v4 = vpop.f32.mrf.mxu1  ;;  %v2117_v27 = vadd.f32 %v2116_v3, %v2115_v63  ;;  %v3121_v43 = vld [vmem:[#allocation12_spill] sm:$0xff] }
 0x14f   :  { %v2118_v5 = vpop.f32.mrf.mxu0  ;;  %v2181_v47 = vadd.f32 %v2180_v4, %v2179_v1  ;;  %v2175_v46 = vadd.f32 %v3121_v43, %v3120_v41 }
 0x150   :  { %v2948_v6 = vpop.f32.mrf.mxu1  ;;  %v1314_v30 = vadd.f32 %v2117_v27, %v3115_v28  ;;  %v3122_v58 = vld [vmem:[#allocation13_spill] sm:$0xff] }
 0x151   :  { %3113 = vst [vmem:[#allocation15_spill] sm:$0xff] %v2948_v6  ;;  %v2119_v7 = vpop.f32.mrf.mxu0  ;;  %v1285_v6 = vadd.f32 %v2096_v20, %v2905_v45  ;;  %v2957_v45 = vadd.f32 %v2154_v18, %v1277_v62  ;;  %v2960_v20 = vadd.f32 %v2163_v35, %v1290_v23  ;;  %v2981_v62 = vadd.f32 %v2172_v36, %v1301_v52  ;;  %v3129_v52 = vld [vmem:[#allocation7_spill] sm:$0xff] }
 0x152   :  { %v2183_v10 = vpop.f32.mrf.mxu1  ;;  %v2120_v44 = vadd.f32 %v2119_v7, %v2118_v5  ;;  %v3123_v61 = vld [vmem:[#allocation14_spill] sm:$0xff]  ;;  %v3125_v7 = vld [vmem:[#allocation8_spill] sm:$0xff] }
 0x153   :  { %v2121_v11 = vpop.f32.mrf.mxu0  ;;  %v1382_v19 = vadd.f32 %v2160_v33, %v1285_v6  ;;  %v2178_v49 = vadd.f32 %v3123_v61, %v3122_v58  ;;  %v2987_v5 = vld [vmem:[%s3096_s2] ss:$0 sm:$0xff]  ;;  %v1411_v6 = vadd.f32 %v2181_v47, %v1314_v30 }
 0x154   :  { %v2185_v12 = vpop.f32.mrf.mxu1  ;;  %v1317_v59 = vadd.f32 %v2120_v44, %v3118_v50  ;;  %v3128_v44 = vld [vmem:[#allocation10_spill] sm:$0xff] }
 0x155   :  { %v2122_v15 = vpop.f32.mrf.mxu0  ;;  %v1406_v21 = vadd.f32 %v2178_v49, %v1309_v40 }
 0x156   :  { %v2186_v0 = vpop.f32.mrf.mxu1  ;;  %v2123_v38 = vadd.f32 %v2122_v15, %v2121_v11 }
 0x157   :  { %v2124_v60 = vpop.f32.mrf.mxu0  ;;  %v2187_v1 = vadd.f32 %v2186_v0, %v2185_v12  ;;  %v2994_v0 = vld [vmem:[%s3097_s3] ss:$0 sm:$0xff] }
 0x158   :  { %v2950_v57 = vpop.f32.mrf.mxu1  ;;  %v3124_v32 = vld [vmem:[#allocation15_spill] sm:$0xff] }
 0x159   :  { %3114 = vst [vmem:[#allocation16_spill] sm:$0xff] %v2950_v57  ;;  %v2125_v48 = vpop.f32.mrf.mxu0  ;;  %v2111_v57 = vadd.f32 %v2110_v55, %v2109_v53  ;;  %v3119_v53 = vld [vmem:[#allocation6_spill] sm:$0xff]  ;;  %v2184_v63 = vadd.f32 %v2183_v10, %v3124_v32 }
 0x15a   :  { %v2189_v13 = vpop.f32.mrf.mxu1  ;;  %v1322_v54 = vadd.f32 %v2123_v38, %v3119_v53  ;;  %v2126_v3 = vadd.f32 %v2125_v48, %v2124_v60 }
 0x15b   :  { %v2127_v29 = vpop.f32.mrf.mxu0  ;;  %v1306_v9 = vadd.f32 %v2111_v57, %v3116_v37  ;;  %v1414_v10 = vadd.f32 %v2184_v63, %v1317_v59 }
 0x15c   :  { %v2191_v31 = vpop.f32.mrf.mxu1  ;;  %v2996_v12 = vadd.f32 %v2187_v1, %v1322_v54 }
 0x15d   :  { %v2128_v56 = vpop.f32.mrf.mxu0  ;;  %v1403_v18 = vadd.f32 %v2175_v46, %v1306_v9 }
 0x15e   :  { %v2192_v8 = vpop.f32.mrf.mxu1  ;;  %v2129_v39 = vadd.f32 %v2128_v56, %v2127_v29 }
 0x15f   :  { %v2130_v34 = vpop.f32.mrf.mxu0  ;;  %v2193_v35 = vadd.f32 %v2192_v8, %v2191_v31  ;;  %v3012_v8 = vld [vmem:[%s3098_s4] ss:$0 sm:$0xff] }
 0x160   :  { %v2194_v23 = vpop.f32.mrf.mxu1  ;;  %v1330_v11 = vadd.f32 %v2129_v39, %v3125_v7  ;;  %v3127_v29 = vld [vmem:[#allocation16_spill] sm:$0xff] }
 0x161   :  { %v2131_v55 = vpop.f32.mrf.mxu0  ;;  %v2999_v33 = vadd.f32 %v2189_v13, %v3127_v29 }
 0x162   :  { %v2132_v51 = vadd.f32 %v2131_v55, %v2130_v34  ;;  %v2195_v57 = vpop.f32.mrf.mxu1  ;;  %v1427_v31 = vadd.f32 %v2193_v35, %v1330_v11 }
 0x163   :  { %v2231_v4 = vpop.f32.mrf.mxu0  ;;  %v2196_v2 = vadd.f32 %v2195_v57, %v2194_v23 }
 0x164   :  { %v1476_v14 = vadd.f32 %v2231_v4, %v1379_v17  ;;  %v2239_v15 = vpop.f32.mrf.mxu1  ;;  %v1333_v27 = vadd.f32 %v2132_v51, %v3126_v25  ;;  %v3004_v17 = vadd.f32 %v2126_v3, %v3129_v52 }
 0x165   :  { %v1508_v48 = vadd.f32 %v2239_v15, %v1411_v6  ;;  %v1467_v60 = vpop.f32.mrf.mxu0 }
 0x166   :  { %v1539_v42 = vmul.f32 %v2987_v5, %v1476_v14  ;;  %v1468_v38 = vadd.f32 %v1467_v60, %v3128_v44  ;;  %v1499_v56 = vpop.f32.mrf.mxu1  ;;  %v3016_v47 = vadd.f32 %v2196_v2, %v1333_v27 }
 0x167   :  { %v1547_v28 = vmul.f32 %v2987_v5, %v1508_v48  ;;  %v1500_v30 = vadd.f32 %v1499_v56, %v1403_v18  ;;  %v2232_v34 = vpop.f32.mrf.mxu0 }
 0x168   :  { %v1562_v36 = vadd.f32 %v2994_v0, %v1539_v42  ;;  %v1537_v37 = vmul.f32 %v2987_v5, %v1468_v38  ;;  %v1479_v13 = vadd.f32 %v2232_v34, %v1382_v19  ;;  %v2240_v9 = vpop.f32.mrf.mxu1 }
 0x169   :  { %v1570_v16 = vadd.f32 %v2994_v0, %v1547_v28  ;;  %v1545_v40 = vmul.f32 %v2987_v5, %v1500_v30  ;;  %v1511_v39 = vadd.f32 %v2240_v9, %v1414_v10  ;;  %v1470_v23 = vpop.f32.mrf.mxu0 }
 0x16a   :  { %v1579_v50 = vmin.f32 %v1562_v36, 0.0  ;;  %v1560_v59 = vadd.f32 %v2994_v0, %v1537_v37  ;;  %v1540_v19 = vmul.f32 %v2987_v5, %v1479_v13  ;;  %v1471_v53 = vadd.f32 %v1470_v23, %v2957_v45  ;;  %v1502_v54 = vpop.f32.mrf.mxu1 }
 0x16b   :  { %v1587_v55 = vmin.f32 %v1570_v16, 0.0  ;;  %v1568_v41 = vadd.f32 %v2994_v0, %v1545_v40  ;;  %v1548_v43 = vmul.f32 %v2987_v5, %v1511_v39  ;;  %v1503_v46 = vadd.f32 %v1502_v54, %v1406_v21  ;;  %v2235_v58 = vpop.f32.mrf.mxu0 }
 0x16c   :  { %v1601_v61 = vmul.f32 %v3012_v8, %v1579_v50  ;;  %v1577_v49 = vmin.f32 %v1560_v59, 0.0  ;;  %v1563_v51 = vadd.f32 %v2994_v0, %v1540_v19  ;;  %v1538_v57 = vmul.f32 %v2987_v5, %v1471_v53  ;;  %v2243_v32 = vpop.f32.mrf.mxu1 }
 0x16d   :  { %v1609_v63 = vmul.f32 %v3012_v8, %v1587_v55  ;;  %v1585_v1 = vmin.f32 %v1568_v41, 0.0  ;;  %v1571_v45 = vadd.f32 %v2994_v0, %v1548_v43  ;;  %v1546_v3 = vmul.f32 %v2987_v5, %v1503_v46  ;;  %v1483_v4 = vpop.f32.mrf.mxu0 }
 0x16e   :  { %v1617_v6 = vsub.f32 %v1562_v36, %v1601_v61  ;;  %v1599_v7 = vmul.f32 %v3012_v8, %v1577_v49  ;;  %v1580_v11 = vmin.f32 %v1563_v51, 0.0  ;;  %v1561_v14 = vadd.f32 %v2994_v0, %v1538_v57  ;;  %v1515_v15 = vpop.f32.mrf.mxu1 }
 0x16f   :  { %v1625_v18 = vsub.f32 %v1570_v16, %v1609_v63  ;;  %v1607_v21 = vmul.f32 %v3012_v8, %v1585_v1  ;;  %v1588_v25 = vmin.f32 %v1571_v45, 0.0  ;;  %v1569_v27 = vadd.f32 %v2994_v0, %v1546_v3  ;;  %v2236_v56 = vpop.f32.mrf.mxu0 }
 0x170   :  { %v1615_v48 = vsub.f32 %v1560_v59, %v1599_v7  ;;  %v1602_v60 = vmul.f32 %v3012_v8, %v1580_v11  ;;  %v1578_v10 = vmin.f32 %v1561_v14, 0.0  ;;  %v1492_v29 = vadd.f32 %v2235_v58, %v2975_v24  ;;  %v2244_v34 = vpop.f32.mrf.mxu1 }
 0x171   :  { %v1623_v35 = vsub.f32 %v1568_v41, %v1607_v21  ;;  %v1610_v42 = vmul.f32 %v3012_v8, %v1588_v25  ;;  %v1586_v44 = vmin.f32 %v1569_v27, 0.0  ;;  %v1524_v38 = vadd.f32 %v2243_v32, %v1427_v31  ;;  %v1486_v59 = vpop.f32.mrf.mxu0 }
 0x172   :  { %v1618_v52 = vsub.f32 %v1563_v51, %v1602_v60  ;;  %v1600_v2 = vmul.f32 %v3012_v8, %v1578_v10  ;;  %v1543_v28 = vmul.f32 %v2987_v5, %v1492_v29  ;;  %v1484_v30 = vadd.f32 %v1483_v4, %v2960_v20  ;;  %v1518_v55 = vpop.f32.mrf.mxu1 }
 0x173   :  { %v1626_v36 = vsub.f32 %v1571_v45, %v1610_v42  ;;  %v1608_v37 = vmul.f32 %v3012_v8, %v1586_v44  ;;  %v1551_v13 = vmul.f32 %v2987_v5, %v1524_v38  ;;  %v1516_v24 = vadd.f32 %v1515_v15, %v2996_v12 }
 0x174   :  { %v1902_v9 = vpack.c.bf16 %v1618_v52, %v1617_v6  ;;  %v1616_v16 = vsub.f32 %v1561_v14, %v1600_v2  ;;  %v1566_v31 = vadd.f32 %v2994_v0, %v1543_v28  ;;  %v1541_v40 = vmul.f32 %v2987_v5, %v1484_v30 }
 0x175   :  { %v1922_v39 = vpack.c.bf16 %v1626_v36, %v1625_v18  ;;  %v1624_v23 = vsub.f32 %v1569_v27, %v1608_v37  ;;  %v1574_v50 = vadd.f32 %v2994_v0, %v1551_v13  ;;  %v1549_v20 = vmul.f32 %v2987_v5, %v1516_v24 }
 0x176   :  { %1934 = vst [vmem:[%s3099_s5 + $0x8] sm:$0xff] %v1902_v9   ;;  %v1897_v19 = vpack.c.bf16 %v1616_v16, %v1615_v48  ;;  %v1564_v12 = vadd.f32 %v2994_v0, %v1541_v40  ;;  %v1495_v53 = vadd.f32 %v2236_v56, %v2981_v62  ;;  %v1390_v54 = vadd.f32 %v2967_v26, %v2963_v22 }
 0x177   :  { %1938 = vst [vmem:[%s3099_s5 + $0x28] sm:$0xff] %v1922_v39   ;;  %v1917_v41 = vpack.c.bf16 %v1624_v23, %v1623_v35  ;;  %v1572_v43 = vadd.f32 %v2994_v0, %v1549_v20  ;;  %v1527_v46 = vadd.f32 %v2244_v34, %v3016_v47  ;;  %v1422_v58 = vadd.f32 %v2999_v33, %v3004_v17 }
 0x178   :  { %1898 = vst [vmem:[%s3099_s5] sm:$0xff] %v1897_v19   ;;  %v1583_v62 = vmin.f32 %v1566_v31, 0.0  ;;  %v1544_v22 = vmul.f32 %v2987_v5, %v1495_v53  ;;  %v1487_v26 = vadd.f32 %v1486_v59, %v1390_v54  ;;  %v1591_v61 = vmin.f32 %v1574_v50, 0.0 }
 0x179   :  { %1937 = vst [vmem:[%s3099_s5 + $0x20] sm:$0xff] %v1917_v41   ;;  %v1552_v49 = vmul.f32 %v2987_v5, %v1527_v46  ;;  %v1519_v51 = vadd.f32 %v1518_v55, %v1422_v58  ;;  %v1581_v47 = vmin.f32 %v1564_v12, 0.0  ;;  %v1589_v17 = vmin.f32 %v1572_v43, 0.0 }
 0x17a   :  { %v1567_v57 = vadd.f32 %v2994_v0, %v1544_v22  ;;  %v1542_v33 = vmul.f32 %v2987_v5, %v1487_v26  ;;  %v1605_v1 = vmul.f32 %v3012_v8, %v1583_v62  ;;  %v1613_v4 = vmul.f32 %v3012_v8, %v1591_v61 }
 0x17b   :  { %v1575_v32 = vadd.f32 %v2994_v0, %v1552_v49  ;;  %v1550_v63 = vmul.f32 %v2987_v5, %v1519_v51  ;;  %v1603_v11 = vmul.f32 %v3012_v8, %v1581_v47  ;;  %v1611_v18 = vmul.f32 %v3012_v8, %v1589_v17 }
 0x17c   :  { %v1584_v45 = vmin.f32 %v1567_v57, 0.0  ;;  %v1565_v3 = vadd.f32 %v2994_v0, %v1542_v33  ;;  %v1621_v25 = vsub.f32 %v1566_v31, %v1605_v1  ;;  %v1629_v60 = vsub.f32 %v1574_v50, %v1613_v4 }
 0x17d   :  { %v1592_v6 = vmin.f32 %v1575_v32, 0.0  ;;  %v1573_v7 = vadd.f32 %v2994_v0, %v1550_v63  ;;  %v1619_v35 = vsub.f32 %v1564_v12, %v1603_v11  ;;  %v1627_v44 = vsub.f32 %v1572_v43, %v1611_v18 }
 0x17e   :  { %v1606_v14 = vmul.f32 %v3012_v8, %v1584_v45  ;;  %v1582_v15 = vmin.f32 %v1565_v3, 0.0 }
 0x17f   :  { %v1614_v21 = vmul.f32 %v3012_v8, %v1592_v6  ;;  %v1590_v5 = vmin.f32 %v1573_v7, 0.0 }
 0x180   :  { %v1622_v27 = vsub.f32 %v1567_v57, %v1606_v14  ;;  %v1604_v48 = vmul.f32 %v3012_v8, %v1582_v15 }
 0x181   :  { %v1630_v10 = vsub.f32 %v1575_v32, %v1614_v21  ;;  %v1612_v29 = vmul.f32 %v3012_v8, %v1590_v5 }
 0x182   :  { %v1912_v0 = vpack.c.bf16 %v1622_v27, %v1621_v25  ;;  %v1620_v42 = vsub.f32 %v1565_v3, %v1604_v48 }
 0x183   :  { %v1932_v38 = vpack.c.bf16 %v1630_v10, %v1629_v60  ;;  %v1628_v56 = vsub.f32 %v1573_v7, %v1612_v29 }
 0x184   :  { %1936 = vst [vmem:[%s3099_s5 + $0x18] sm:$0xff] %v1912_v0   ;;  %v1907_v52 = vpack.c.bf16 %v1620_v42, %v1619_v35 }
 0x185   :  { %1940 = vst [vmem:[%s3099_s5 + $0x38] sm:$0xff] %v1932_v38   ;;  %v1927_v2 = vpack.c.bf16 %v1628_v56, %v1627_v44 }
 0x186   :  { %1935 = vst [vmem:[%s3099_s5 + $0x10] sm:$0xff] %v1907_v52  }
 0x187   :  { %1939 = vst [vmem:[%s3099_s5 + $0x30] sm:$0xff] %v1927_v2  }

// kernel: forward_pallas.11
= control target key start
LH: loop header
LB: loop body
LE: loop exit
PB: predicated region body
PF: predicated region fallthrough
CT: control target
= control target key end

     0   :  { %vm557_vm0 = vcmask 523264   ;;  %s2046_s1 = inlined_call_operand.vmem [shape: bf16[576,128], index: 1, kind: input, shape index: {}]   ;;  %s2047_s0 = inlined_call_operand.vmem [shape: bf16[128,576], index: 0, kind: input, shape index: {}]   ;;  %s2048_s4 = inlined_call_operand.vmem [shape: bf16[128,128], index: 4, kind: input, shape index: {}, may-alias: {4,5}]   ;;  %s2049_s2 = inlined_call_operand.vmem [shape: f32[1,128], index: 2, kind: input, shape index: {}]   ;;  %s2050_s3 = inlined_call_operand.vmem [shape: f32[1,128], index: 3, kind: input, shape index: {}]   ;;  %s2051_s5 = inlined_call_operand.vmem [shape: bf16[128,128], index: 5, kind: output, shape index: {}, may-alias: {4,5}]  }
   0x1   :  { %v1443_v0 = vld [vmem:[%s2046_s1 + $0x78] sm:$0xff]   ;;  %v1447_v4 = vld [vmem:[%s2046_s1 + $0x70] sm:$0xff]   ;;  %v1451_v8 = vld [vmem:[%s2046_s1 + $0x68] sm:$0xff]  }
   0x2   :  { %v1444_v1 = vld [vmem:[%s2046_s1 + $0xf8] sm:$0xff]   ;;  %1271 = vmatprep.subr.bf16.mxu0 %v1443_v0  ;;  %v1448_v5 = vld [vmem:[%s2046_s1 + $0xf0] sm:$0xff]   ;;  %v1452_v9 = vld [vmem:[%s2046_s1 + $0xe8] sm:$0xff]  }
   0x3   :  { %v1445_v2 = vld [vmem:[%s2046_s1 + $0x38] sm:$0xff]   ;;  %1335 = vmatprep.subr.bf16.mxu1 %v1444_v1  ;;  %v1449_v6 = vld [vmem:[%s2046_s1 + $0x30] sm:$0xff]   ;;  %v1453_v10 = vld [vmem:[%s2046_s1 + $0x28] sm:$0xff]  }
   0x4   :  { %v1446_v3 = vld [vmem:[%s2046_s1 + $0xb8] sm:$0xff]   ;;  %1272 = vmatpush3.bf16.msra.mxu0 %v1445_v2  ;;  %v1450_v7 = vld [vmem:[%s2046_s1 + $0xb0] sm:$0xff]   ;;  %v1454_v11 = vld [vmem:[%s2046_s1 + $0xa8] sm:$0xff]  }
   0x5   :  { %1336 = vmatpush3.bf16.msra.mxu1 %v1446_v3  ;;  %1273 = vmatprep.subr.bf16.mxu0 %v1447_v4  ;;  %v1455_v12 = vld [vmem:[%s2046_s1 + $0x60] sm:$0xff]   ;;  %v1459_v16 = vld [vmem:[%s2046_s1 + $0x58] sm:$0xff]   ;;  %v1463_v20 = vld [vmem:[%s2046_s1 + $0x50] sm:$0xff]  }
   0x6   :  { %1337 = vmatprep.subr.bf16.mxu1 %v1448_v5  ;;  %v1456_v13 = vld [vmem:[%s2046_s1 + $0xe0] sm:$0xff]   ;;  %v1460_v17 = vld [vmem:[%s2046_s1 + $0xd8] sm:$0xff]   ;;  %v1464_v21 = vld [vmem:[%s2046_s1 + $0xd0] sm:$0xff]  }
   0x7   :  { %v1457_v14 = vld [vmem:[%s2046_s1 + $0x20] sm:$0xff]   ;;  %v1461_v18 = vld [vmem:[%s2046_s1 + $0x18] sm:$0xff]   ;;  %v1465_v22 = vld [vmem:[%s2046_s1 + $0x10] sm:$0xff]  }
   0x8   :  { %1274 = vmatpush3.bf16.msra.mxu0 %v1449_v6  ;;  %v1458_v15 = vld [vmem:[%s2046_s1 + $0xa0] sm:$0xff]   ;;  %v1462_v19 = vld [vmem:[%s2046_s1 + $0x98] sm:$0xff]   ;;  %v1466_v23 = vld [vmem:[%s2046_s1 + $0x90] sm:$0xff]  }
   0x9   :  { %1338 = vmatpush3.bf16.msra.mxu1 %v1450_v7  ;;  %1275 = vmatprep.subr.bf16.mxu0 %v1451_v8  ;;  %v1467_v24 = vld [vmem:[%s2046_s1 + $0x48] sm:$0xff]   ;;  %v1471_v28 = vld [vmem:[%s2046_s1 + $0x40] sm:$0xff]   ;;  %v1481_v36 = vld [vmem:[%s2046_s1 + $0x118] sm:$0xff]  }
   0xa   :  { %1339 = vmatprep.subr.bf16.mxu1 %v1452_v9  ;;  %v1468_v25 = vld [vmem:[%s2046_s1 + $0xc8] sm:$0xff]   ;;  %v1472_v29 = vld [vmem:[%s2046_s1 + $0xc0] sm:$0xff]   ;;  %v1494_v42 = vld [vmem:[%s2046_s1 + $0x110] sm:$0xff]  }
   0xb   :  { %v1469_v26 = vld [vmem:[%s2046_s1 + $0x8] sm:$0xff]   ;;  %v1473_v30 = vld [vmem:[%s2046_s1] sm:$0xff]   ;;  %v1490_v43 = vld [vmem:[%s2047_s0 + $0x5c] ss:$20 sps:$4 sm:$0xff]  }
   0xc   :  { %1276 = vmatpush3.bf16.msra.mxu0 %v1453_v10  ;;  %v1470_v27 = vld [vmem:[%s2046_s1 + $0x88] sm:$0xff]   ;;  %v1474_v31 = vld [vmem:[%s2046_s1 + $0x80] sm:$0xff]   ;;  %v1495_v47 = vld [vmem:[%s2047_s0 + $0x7c] ss:$20 sps:$4 sm:$0xff]  }
   0xd   :  { %1340 = vmatpush3.bf16.msra.mxu1 %v1454_v11  ;;  %1277 = vmatprep.subr.bf16.mxu0 %v1455_v12  ;;  %v1475_v32 = vld [vmem:[%s2047_s0] ss:$20 sps:$4 sm:$0xff]   ;;  %v1477_v33 = vld [vmem:[%s2047_s0 + $0x4] ss:$20 sps:$4 sm:$0xff]   ;;  %v1478_v34 = vld [vmem:[%s2047_s0 + $0x8] ss:$20 sps:$4 sm:$0xff]  }
   0xe   :  { %1341 = vmatprep.subr.bf16.mxu1 %v1456_v13  ;;  %v1480_v35 = vld [vmem:[%s2047_s0 + $0xc] ss:$20 sps:$4 sm:$0xff]   ;;  %614 = vmatprep.mubr.bf16.mxu0 %v1477_v33  ;;  %v1484_v38 = vld [vmem:[%s2047_s0 + $0x34] ss:$20 sps:$4 sm:$0xff]   ;;  %v1487_v40 = vld [vmem:[%s2047_s0 + $0x30] ss:$20 sps:$4 sm:$0xff]  }
   0xf   :  { %711 = vmatprep.mubr.bf16.mxu1 %v1480_v35  ;;  %v1482_v37 = vld [vmem:[%s2047_s0 + $0x2c] ss:$20 sps:$4 sm:$0xff]   ;;  %v1486_v39 = vld [vmem:[%s2047_s0 + $0x28] ss:$20 sps:$4 sm:$0xff]   ;;  %v1492_v44 = vld [vmem:[%s2047_s0 + $0x50] ss:$20 sps:$4 sm:$0xff]  }
  0x10   :  { %1278 = vmatpush3.bf16.msra.mxu0 %v1457_v14  ;;  %v1488_v41 = vld [vmem:[%s2047_s0 + $0x54] ss:$20 sps:$4 sm:$0xff]   ;;  %v1493_v45 = vld [vmem:[%s2047_s0 + $0x58] ss:$20 sps:$4 sm:$0xff]   ;;  %v1520_v49 = vld [vmem:[%s2046_s1 + $0x100] sm:$0xff]  }
  0x11   :  { %1342 = vmatpush3.bf16.msra.mxu1 %v1458_v15  ;;  %1279 = vmatprep.subr.bf16.mxu0 %v1459_v16  ;;  %v1507_v46 = vld [vmem:[%s2046_s1 + $0x108] sm:$0xff]   ;;  %v1497_v48 = vld [vmem:[%s2047_s0 + $0x84] ss:$20 sps:$4 sm:$0xff]   ;;  %v1500_v51 = vld [vmem:[%s2047_s0 + $0x80] ss:$20 sps:$4 sm:$0xff]  }
  0x12   :  { %1343 = vmatprep.subr.bf16.mxu1 %v1460_v17  ;;  %v1499_v50 = vld [vmem:[%s2047_s0 + $0x78] ss:$20 sps:$4 sm:$0xff]   ;;  %v1505_v54 = vld [vmem:[%s2047_s0 + $0xa0] ss:$20 sps:$4 sm:$0xff]   ;;  %v1506_v55 = vld [vmem:[%s2047_s0 + $0xa8] ss:$20 sps:$4 sm:$0xff]  }
  0x13   :  { %v1501_v52 = vld [vmem:[%s2047_s0 + $0xa4] ss:$20 sps:$4 sm:$0xff]   ;;  %v1503_v53 = vld [vmem:[%s2047_s0 + $0xac] ss:$20 sps:$4 sm:$0xff]   ;;  %v1510_v57 = vld [vmem:[%s2047_s0 + $0xd4] ss:$20 sps:$4 sm:$0xff]  }
  0x14   :  { %1280 = vmatpush3.bf16.msra.mxu0 %v1461_v18  ;;  %v1508_v56 = vld [vmem:[%s2047_s0 + $0xcc] ss:$20 sps:$4 sm:$0xff]   ;;  %v1512_v58 = vld [vmem:[%s2047_s0 + $0xc8] ss:$20 sps:$4 sm:$0xff]   ;;  %v1513_v59 = vld [vmem:[%s2047_s0 + $0xd0] ss:$20 sps:$4 sm:$0xff]  }
  0x15   :  { %1344 = vmatpush3.bf16.msra.mxu1 %v1462_v19  ;;  %1281 = vmatprep.subr.bf16.mxu0 %v1463_v20  ;;  %v1514_v60 = vld [vmem:[%s2047_s0 + $0xf4] ss:$20 sps:$4 sm:$0xff]   ;;  %v1516_v61 = vld [vmem:[%s2047_s0 + $0xfc] ss:$20 sps:$4 sm:$0xff]   ;;  %v1519_v63 = vld [vmem:[%s2047_s0 + $0xf8] ss:$20 sps:$4 sm:$0xff]  }
  0x16   :  { %1345 = vmatprep.subr.bf16.mxu1 %v1464_v21  ;;  %v1518_v62 = vld [vmem:[%s2047_s0 + $0xf0] ss:$20 sps:$4 sm:$0xff]   ;;  %v1525_v2 = vld [vmem:[%s2047_s0 + $0x118] ss:$20 sps:$4 sm:$0xff]   ;;  %v1526_v3 = vld [vmem:[%s2047_s0 + $0x120] ss:$20 sps:$4 sm:$0xff]  }
  0x17   :  { %v1521_v0 = vld [vmem:[%s2047_s0 + $0x11c] ss:$20 sps:$4 sm:$0xff]   ;;  %v1523_v1 = vld [vmem:[%s2047_s0 + $0x124] ss:$20 sps:$4 sm:$0xff]   ;;  %v1531_v8 = vld [vmem:[%s2047_s0 + $0x60] ss:$20 sps:$4 sm:$0xff]  }
  0x18   :  { %1282 = vmatpush3.bf16.msra.mxu0 %v1465_v22  ;;  %v1527_v4 = vld [vmem:[%s2047_s0 + $0x10] ss:$20 sps:$4 sm:$0xff]   ;;  %v1529_v6 = vld [vmem:[%s2047_s0 + $0x38] ss:$20 sps:$4 sm:$0xff]   ;;  %v1532_v9 = vld [vmem:[%s2047_s0 + $0x100] ss:$20 sps:$4 sm:$0xff]  }
  0x19   :  { %1346 = vmatpush3.bf16.msra.mxu1 %v1466_v23  ;;  %1283 = vmatprep.subr.bf16.mxu0 %v1467_v24  ;;  %v1528_v5 = vld [vmem:[%s2047_s0 + $0xb0] ss:$20 sps:$4 sm:$0xff]   ;;  %v1530_v7 = vld [vmem:[%s2047_s0 + $0xd8] ss:$20 sps:$4 sm:$0xff]   ;;  %v1533_v10 = vld [vmem:[%s2047_s0 + $0x88] ss:$20 sps:$4 sm:$0xff]  }
  0x1a   :  { %1347 = vmatprep.subr.bf16.mxu1 %v1468_v25  ;;  %v1534_v11 = vld [vmem:[%s2047_s0 + $0x128] ss:$20 sps:$4 sm:$0xff]  }
  0x1c   :  { %1284 = vmatpush3.bf16.msra.mxu0 %v1469_v26 }
  0x1d   :  { %1348 = vmatpush3.bf16.msra.mxu1 %v1470_v27  ;;  %1285 = vmatprep.subr.bf16.mxu0 %v1471_v28 }
  0x1e   :  { %1349 = vmatprep.subr.bf16.mxu1 %v1472_v29 }
  0x20   :  { %1286 = vmatpush3.bf16.msra.mxu0 %v1473_v30 }
  0x21   :  { %1350 = vmatpush3.bf16.msra.mxu1 %v1474_v31  ;;  %1411 = vmatprep.subr.bf16.mxu0 %v1481_v36 }
  0x22   :  { %1435 = vmatprep.subr.bf16.mxu1 %v1481_v36 }
  0x23   :  { %615 = vmatmul.mubr.bf16.vlgmr.msra.gmra.mxu0 %v1475_v32 }
  0x24   :  { %712 = vmatmul.mubr.bf16.vlgmr.msra.gmra.mxu1 %v1478_v34  ;;  %1412 = vmatpush3.bf16.msra.mxu0 %v1481_v36 }
  0x25   :  { %1439 = vmatpush3.bf16.msra.mxu1 %v1481_v36  ;;  %622 = vmatprep.mubr.bf16.mxu0 %v1482_v37 }
  0x26   :  { %719 = vmatprep.mubr.bf16.mxu1 %v1484_v38  ;;  %1413 = vmatprep.subr.bf16.mxu0 %v1494_v42 }
  0x27   :  { %1436 = vmatprep.subr.bf16.mxu1 %v1494_v42 }
  0x28   :  { %1414 = vmatpush3.bf16.msra.mxu0 %v1494_v42 }
  0x29   :  { %1440 = vmatpush3.bf16.msra.mxu1 %v1494_v42  ;;  %1415 = vmatprep.subr.bf16.mxu0 %v1507_v46 }
  0x2a   :  { %1437 = vmatprep.subr.bf16.mxu1 %v1507_v46 }
  0x2b   :  { %623 = vmatmul.mubr.bf16.gmra.mxu0 %v1486_v39 }
  0x2c   :  { %720 = vmatmul.mubr.bf16.gmra.mxu1 %v1487_v40  ;;  %630 = vmatprep.mubr.bf16.mxu0 %v1488_v41 }
  0x2d   :  { %727 = vmatprep.mubr.bf16.mxu1 %v1490_v43  ;;  %1416 = vmatpush3.bf16.msra.mxu0 %v1507_v46 }
  0x2e   :  { %1441 = vmatpush3.bf16.msra.mxu1 %v1507_v46  ;;  %1417 = vmatprep.subr.bf16.mxu0 %v1520_v49 }
  0x2f   :  { %1438 = vmatprep.subr.bf16.mxu1 %v1520_v49 }
  0x31   :  { %1418 = vmatpush3.bf16.msra.mxu0 %v1520_v49 }
  0x32   :  { %1442 = vmatpush3.bf16.msra.mxu1 %v1520_v49 }
  0x33   :  { %631 = vmatmul.mubr.bf16.gmra.mxu0 %v1492_v44 }
  0x34   :  { %728 = vmatmul.mubr.bf16.gmra.mxu1 %v1493_v45  ;;  %638 = vmatprep.mubr.bf16.mxu0 %v1495_v47 }
  0x35   :  { %735 = vmatprep.mubr.bf16.mxu1 %v1497_v48 }
  0x3b   :  { %639 = vmatmul.mubr.bf16.gmra.mxu0 %v1499_v50 }
  0x3c   :  { %736 = vmatmul.mubr.bf16.gmra.mxu1 %v1500_v51  ;;  %646 = vmatprep.mubr.bf16.mxu0 %v1501_v52 }
  0x3d   :  { %743 = vmatprep.mubr.bf16.mxu1 %v1503_v53 }
  0x43   :  { %647 = vmatmul.mubr.bf16.gmra.mxu0 %v1505_v54 }
  0x44   :  { %744 = vmatmul.mubr.bf16.gmra.mxu1 %v1506_v55  ;;  %654 = vmatprep.mubr.bf16.mxu0 %v1508_v56 }
  0x45   :  { %751 = vmatprep.mubr.bf16.mxu1 %v1510_v57 }
  0x4b   :  { %655 = vmatmul.mubr.bf16.gmra.mxu0 %v1512_v58 }
  0x4c   :  { %752 = vmatmul.mubr.bf16.gmra.mxu1 %v1513_v59  ;;  %662 = vmatprep.mubr.bf16.mxu0 %v1514_v60 }
  0x4d   :  { %759 = vmatprep.mubr.bf16.mxu1 %v1516_v61 }
  0x53   :  { %663 = vmatmul.mubr.bf16.gmra.mxu0 %v1518_v62 }
  0x54   :  { %760 = vmatmul.mubr.bf16.gmra.mxu1 %v1519_v63  ;;  %670 = vmatprep.mubr.bf16.mxu0 %v1521_v0 }
  0x55   :  { %767 = vmatprep.mubr.bf16.mxu1 %v1523_v1 }
  0x5b   :  { %671 = vmatmul.mubr.bf16.gmra.mxu0 %v1525_v2 }
  0x5c   :  { %768 = vmatmul.mubr.bf16.gmra.mxu1 %v1526_v3  ;;  %1419 = vmatprep.mubr.msk.bf16.mxu0 %vm557_vm0, %v1527_v4  ;;  %v1850_v3 = vld [vmem:[%s2048_s4 + $0x8] sm:$0xff]  }
  0x5d   :  { %1427 = vmatprep.mubr.msk.bf16.mxu1 %vm557_vm0, %v1528_v5  ;;  %v1857_v5 = vld [vmem:[%s2048_s4 + $0x28] sm:$0xff]  }
  0x63   :  { %1420 = vmatmul.mubr.msk.bf16.vlgmr.msra.gmra.mxu0 %vm557_vm0, %v1529_v6  ;;  %v1862_v6 = vld [vmem:[%s2048_s4] sm:$0xff]  }
  0x64   :  { %1428 = vmatmul.mubr.msk.bf16.vlgmr.msra.gmra.mxu1 %vm557_vm0, %v1530_v7  ;;  %1423 = vmatprep.mubr.msk.bf16.mxu0 %vm557_vm0, %v1531_v8  ;;  %v1867_v7 = vld [vmem:[%s2048_s4 + $0x20] sm:$0xff]  }
  0x65   :  { %1431 = vmatprep.mubr.msk.bf16.mxu1 %vm557_vm0, %v1532_v9  ;;  %v1874_v9 = vld [vmem:[%s2048_s4 + $0x18] sm:$0xff]  }
  0x6b   :  { %1424 = vmatmul.mubr.msk.bf16.gmra.mxu0 %vm557_vm0, %v1533_v10 }
  0x6c   :  { %1432 = vmatmul.mubr.msk.bf16.gmra.mxu1 %vm557_vm0, %v1534_v11 }
  0xe3   :  { %v1287_v12 = vpop.f32.mrf.mxu0 }
  0xe4   :  { %v1351_v13 = vpop.f32.mrf.mxu1 }
  0xe5   :  { %v1288_v14 = vpop.f32.mrf.mxu0 }
  0xe6   :  { %v1289_v15 = vadd.f32 %v1288_v14, %v1287_v12  ;;  %v1352_v16 = vpop.f32.mrf.mxu1  ;;  %v1882_v12 = vld [vmem:[%s2048_s4 + $0x38] sm:$0xff]  }
  0xe7   :  { %v1353_v17 = vadd.f32 %v1352_v16, %v1351_v13  ;;  %v1801_v18 = vpop.f32.mrf.mxu0  ;;  %v1887_v13 = vld [vmem:[%s2048_s4 + $0x10] sm:$0xff]  }
  0xe8   :  { %v1803_v19 = vpop.f32.mrf.mxu1  ;;  %2059 = vst [vmem:[#allocation7_spill] sm:$0xff] %v1887_v13 }
  0xe9   :  { %v1805_v20 = vpop.f32.mrf.mxu0  ;;  %v1807_v21 = vadd.f32 %v1353_v17, %v1289_v15 }
  0xea   :  { %v1809_v22 = vpop.f32.mrf.mxu1 }
  0xeb   :  { %2054 = vst [vmem:[#allocation2_spill] sm:$0xff] %v1807_v21  ;;  %v1811_v23 = vpop.f32.mrf.mxu0  ;;  %v1356_v15 = vadd.f32 %v1809_v22, %v1803_v19 }
  0xec   :  { %v1813_v24 = vpop.f32.mrf.mxu1 }
  0xed   :  { %v1815_v25 = vpop.f32.mrf.mxu0 }
  0xee   :  { %v1817_v26 = vpop.f32.mrf.mxu1  ;;  %v1295_v21 = vadd.f32 %v1815_v25, %v1811_v23 }
  0xef   :  { %v1819_v27 = vpop.f32.mrf.mxu0 }
  0xf0   :  { %v1821_v28 = vpop.f32.mrf.mxu1 }
  0xf1   :  { %v1823_v29 = vpop.f32.mrf.mxu0 }
  0xf2   :  { %v1825_v30 = vpop.f32.mrf.mxu1 }
  0xf3   :  { %v1827_v31 = vpop.f32.mrf.mxu0 }
  0xf4   :  { %v1829_v32 = vpop.f32.mrf.mxu1 }
  0xf5   :  { %v1831_v33 = vpop.f32.mrf.mxu0 }
  0xf6   :  { %v1833_v34 = vpop.f32.mrf.mxu1  ;;  %v1301_v19 = vadd.f32 %v1831_v33, %v1827_v31 }
  0xf7   :  { %v1835_v35 = vpop.f32.mrf.mxu0  ;;  %v1365_v22 = vadd.f32 %v1833_v34, %v1829_v32 }
  0xf8   :  { %v1837_v36 = vpop.f32.mrf.mxu1 }
  0xf9   :  { %v1839_v37 = vpop.f32.mrf.mxu0 }
  0xfa   :  { %v1841_v38 = vpop.f32.mrf.mxu1 }
  0xfb   :  { %2055 = vst [vmem:[#allocation3_spill] sm:$0xff] %v1841_v38  ;;  %v1305_v39 = vpop.f32.mrf.mxu0  ;;  %v1298_v38 = vadd.f32 %v1823_v29, %v1819_v27  ;;  %v1920_v27 = vld [vmem:[%s2048_s4 + $0x30] sm:$0xff]  }
  0xfc   :  { %v1369_v40 = vpop.f32.mrf.mxu1 }
  0xfd   :  { %v1306_v41 = vpop.f32.mrf.mxu0 }
  0xfe   :  { %v1370_v42 = vpop.f32.mrf.mxu1  ;;  %v1307_v11 = vadd.f32 %v1306_v41, %v1305_v39 }
  0xff   :  { %v1308_v43 = vpop.f32.mrf.mxu0  ;;  %v1371_v17 = vadd.f32 %v1370_v42, %v1369_v40 }
 0x100   :  { %v1372_v44 = vpop.f32.mrf.mxu1 }
 0x101   :  { %v1309_v45 = vpop.f32.mrf.mxu0 }
 0x102   :  { %v1373_v46 = vpop.f32.mrf.mxu1  ;;  %v1310_v23 = vadd.f32 %v1309_v45, %v1308_v43 }
 0x103   :  { %v1843_v47 = vpop.f32.mrf.mxu0  ;;  %v1374_v25 = vadd.f32 %v1373_v46, %v1372_v44  ;;  %v1211_v46 = vunpack.c.l.bf16 %v1920_v27 }
 0x104   :  { %v1845_v48 = vpop.f32.mrf.mxu1 }
 0x105   :  { %v1312_v49 = vpop.f32.mrf.mxu0 }
 0x106   :  { %v1376_v50 = vpop.f32.mrf.mxu1 }
 0x107   :  { %v1314_v51 = vpop.f32.mrf.mxu0  ;;  %v1377_v29 = vadd.f32 %v1376_v50, %v1845_v48  ;;  %v1936_v50 = vld [vmem:[%s2049_s2] ss:$0 sm:$0xff] }
 0x108   :  { %v1378_v52 = vpop.f32.mrf.mxu1 }
 0x109   :  { %v1315_v53 = vpop.f32.mrf.mxu0 }
 0x10a   :  { %v1379_v54 = vpop.f32.mrf.mxu1 }
 0x10b   :  { %v1317_v55 = vpop.f32.mrf.mxu0  ;;  %v1380_v31 = vadd.f32 %v1379_v54, %v1378_v52  ;;  %v738_v54 = vadd.f32 %v1371_v17, %v1307_v11 }
 0x10c   :  { %v1381_v56 = vpop.f32.mrf.mxu1 }
 0x10d   :  { %v1318_v57 = vpop.f32.mrf.mxu0 }
 0x10e   :  { %v1382_v58 = vpop.f32.mrf.mxu1  ;;  %v1319_v13 = vadd.f32 %v1318_v57, %v1317_v55  ;;  %v1927_v55 = vadd.f32 %v1839_v37, %v1835_v35  ;;  %v1945_v35 = vld [vmem:[%s2050_s3] ss:$0 sm:$0xff] }
 0x10f   :  { %v1320_v59 = vpop.f32.mrf.mxu0 }
 0x110   :  { %v1384_v60 = vpop.f32.mrf.mxu1 }
 0x111   :  { %v1321_v61 = vpop.f32.mrf.mxu0 }
 0x112   :  { %v1385_v62 = vpop.f32.mrf.mxu1  ;;  %v1322_v33 = vadd.f32 %v1321_v61, %v1320_v59 }
 0x113   :  { %v1323_v63 = vpop.f32.mrf.mxu0  ;;  %v1386_v34 = vadd.f32 %v1385_v62, %v1384_v60 }
 0x114   :  { %v1387_v0 = vpop.f32.mrf.mxu1 }
 0x115   :  { %v1324_v1 = vpop.f32.mrf.mxu0  ;;  %v757_v57 = vadd.f32 %v1386_v34, %v1322_v33 }
 0x116   :  { %v1388_v2 = vpop.f32.mrf.mxu1  ;;  %v1325_v39 = vadd.f32 %v1324_v1, %v1323_v63  ;;  %v2064_v1 = vld [vmem:[#allocation2_spill] sm:$0xff] }
 0x117   :  { %v1852_v4 = vpop.f32.mrf.mxu0  ;;  %v1389_v40 = vadd.f32 %v1388_v2, %v1387_v0 }
 0x118   :  { %2056 = vst [vmem:[#allocation4_spill] sm:$0xff] %v1852_v4  ;;  %v1869_v8 = vpop.f32.mrf.mxu1 }
 0x119   :  { %2057 = vst [vmem:[#allocation5_spill] sm:$0xff] %v1869_v8  ;;  %v1876_v10 = vpop.f32.mrf.mxu0  ;;  %v762_v59 = vadd.f32 %v1389_v40, %v1325_v39  ;;  %v2068_v39 = vunpack.c.l.bf16 %v1857_v5 }
 0x11a   :  { %2058 = vst [vmem:[#allocation6_spill] sm:$0xff] %v1876_v10  ;;  %v1889_v14 = vpop.f32.mrf.mxu1  ;;  %v1359_v10 = vadd.f32 %v1817_v26, %v1813_v24  ;;  %v1383_v24 = vadd.f32 %v1382_v58, %v1381_v56  ;;  %v1940_v56 = vadd.f32 %v1374_v25, %v1310_v23 }
 0x11b   :  { %2060 = vst [vmem:[#allocation8_spill] sm:$0xff] %v1889_v14  ;;  %v1329_v8 = vpop.f32.mrf.mxu0  ;;  %v1292_v14 = vadd.f32 %v1805_v20, %v1801_v18  ;;  %v1362_v18 = vadd.f32 %v1825_v30, %v1821_v28  ;;  %v1313_v28 = vadd.f32 %v1312_v49, %v1843_v47  ;;  %v1316_v30 = vadd.f32 %v1315_v53, %v1314_v51  ;;  %v2061_v47 = vld [vmem:[#allocation3_spill] sm:$0xff] }
 0x11c   :  { %v1393_v16 = vpop.f32.mrf.mxu1  ;;  %v722_v43 = vadd.f32 %v1359_v10, %v1295_v21  ;;  %v1931_v48 = vadd.f32 %v2061_v47, %v1837_v36  ;;  %v754_v51 = vadd.f32 %v1383_v24, %v1319_v13  ;;  %v1938_v21 = vadd.f32 %v1365_v22, %v1301_v19 }
 0x11d   :  { %v1330_v20 = vpop.f32.mrf.mxu0  ;;  %v725_v44 = vadd.f32 %v1362_v18, %v1298_v38  ;;  %v717_v45 = vadd.f32 %v1356_v15, %v1292_v14  ;;  %v746_v53 = vadd.f32 %v1377_v29, %v1313_v28  ;;  %v749_v58 = vadd.f32 %v1380_v31, %v1316_v30 }
 0x11e   :  { %v1394_v4 = vpop.f32.mrf.mxu1  ;;  %v1331_v63 = vadd.f32 %v1330_v20, %v1329_v8  ;;  %v2067_v29 = vunpack.c.l.bf16 %v1850_v3 }
 0x11f   :  { %v1332_v26 = vpop.f32.mrf.mxu0  ;;  %v2062_v60 = vld [vmem:[#allocation4_spill] sm:$0xff]  ;;  %v1395_v11 = vadd.f32 %v1394_v4, %v1393_v16 }
 0x120   :  { %v1396_v32 = vpop.f32.mrf.mxu1  ;;  %v2065_v24 = vld [vmem:[#allocation5_spill] sm:$0xff] }
 0x121   :  { %v1333_v41 = vpop.f32.mrf.mxu0  ;;  %v2063_v61 = vld [vmem:[#allocation6_spill] sm:$0xff] }
 0x122   :  { %v1397_v42 = vpop.f32.mrf.mxu1  ;;  %v1949_v62 = vadd.f32 %v2063_v61, %v2062_v60  ;;  %v1334_v13 = vadd.f32 %v1333_v41, %v1332_v26  ;;  %v2066_v8 = vld [vmem:[#allocation8_spill] sm:$0xff] }
 0x123   :  { %v1421_v49 = vpop.f32.mrf.mxu0  ;;  %v1398_v18 = vadd.f32 %v1397_v42, %v1396_v32  ;;  %v1958_v20 = vadd.f32 %v2066_v8, %v2065_v24  ;;  %v2074_v8 = vunpack.c.h.bf16 %v1867_v7 }
 0x124   :  { %v819_v38 = vadd.f32 %v1421_v49, %v722_v43  ;;  %v1429_v52 = vpop.f32.mrf.mxu1 }
 0x125   :  { %v851_v36 = vadd.f32 %v1429_v52, %v754_v51  ;;  %v810_v37 = vpop.f32.mrf.mxu0  ;;  %v770_v51 = vadd.f32 %v1395_v11, %v1331_v63  ;;  %v773_v52 = vadd.f32 %v1398_v18, %v1334_v13  ;;  %v2071_v63 = vunpack.c.l.bf16 %v1867_v7 }
 0x126   :  { %v882_v0 = vmul.f32 %v1936_v50, %v819_v38  ;;  %v811_v2 = vadd.f32 %v810_v37, %v2064_v1  ;;  %v842_v10 = vpop.f32.mrf.mxu1  ;;  %v2072_v13 = vunpack.c.h.bf16 %v1857_v5 }
 0x127   :  { %v890_v14 = vmul.f32 %v1936_v50, %v851_v36  ;;  %v843_v15 = vadd.f32 %v842_v10, %v746_v53  ;;  %v1422_v17 = vpop.f32.mrf.mxu0 }
 0x128   :  { %v905_v19 = vadd.f32 %v1945_v35, %v882_v0  ;;  %v880_v22 = vmul.f32 %v1936_v50, %v811_v2  ;;  %v822_v23 = vadd.f32 %v1422_v17, %v725_v44  ;;  %v1430_v25 = vpop.f32.mrf.mxu1 }
 0x129   :  { %v913_v28 = vadd.f32 %v1945_v35, %v890_v14  ;;  %v888_v4 = vmul.f32 %v1936_v50, %v843_v15  ;;  %v854_v16 = vadd.f32 %v1430_v25, %v757_v57  ;;  %v813_v26 = vpop.f32.mrf.mxu0 }
 0x12a   :  { %v953_v30 = vadd.f32 %v2067_v29, %v905_v19  ;;  %v903_v31 = vadd.f32 %v1945_v35, %v880_v22  ;;  %v883_v32 = vmul.f32 %v1936_v50, %v822_v23  ;;  %v814_v33 = vadd.f32 %v813_v26, %v717_v45  ;;  %v845_v34 = vpop.f32.mrf.mxu1 }
 0x12b   :  { %v961_v40 = vadd.f32 %v2068_v39, %v913_v28  ;;  %v911_v41 = vadd.f32 %v1945_v35, %v888_v4  ;;  %v891_v42 = vmul.f32 %v1936_v50, %v854_v16  ;;  %v846_v43 = vadd.f32 %v845_v34, %v749_v58  ;;  %v1425_v44 = vpop.f32.mrf.mxu0 }
 0x12c   :  { %v906_v47 = vadd.f32 %v1945_v35, %v883_v32  ;;  %v881_v49 = vmul.f32 %v1936_v50, %v814_v33  ;;  %v1433_v38 = vpop.f32.mrf.mxu1  ;;  %v969_v53 = vmax.f32 %v953_v30, 0.0  ;;  %v2069_v45 = vunpack.c.l.bf16 %v1862_v6 }
 0x12d   :  { %v914_v37 = vadd.f32 %v1945_v35, %v891_v42  ;;  %v889_v57 = vmul.f32 %v1936_v50, %v846_v43  ;;  %v826_v60 = vpop.f32.mrf.mxu0  ;;  %v977_v61 = vmax.f32 %v961_v40, 0.0  ;;  %v2070_v58 = vunpack.c.h.bf16 %v1850_v3 }
 0x12e   :  { %v951_v36 = vadd.f32 %v2069_v45, %v903_v31  ;;  %v904_v1 = vadd.f32 %v1945_v35, %v881_v49  ;;  %v835_v2 = vadd.f32 %v1425_v44, %v738_v54  ;;  %v858_v10 = vpop.f32.mrf.mxu1  ;;  %v959_v11 = vadd.f32 %v2071_v63, %v911_v41 }
 0x12f   :  { %v954_v0 = vadd.f32 %v2070_v58, %v906_v47  ;;  %v962_v14 = vadd.f32 %v2072_v13, %v914_v37  ;;  %v912_v15 = vadd.f32 %v1945_v35, %v889_v57  ;;  %v867_v17 = vadd.f32 %v1433_v38, %v770_v51  ;;  %v1426_v18 = vpop.f32.mrf.mxu0 }
 0x130   :  { %v2073_v22 = vunpack.c.h.bf16 %v1862_v6  ;;  %v886_v3 = vmul.f32 %v1936_v50, %v835_v2  ;;  %v827_v25 = vadd.f32 %v826_v60, %v1938_v21  ;;  %v1434_v54 = vpop.f32.mrf.mxu1  ;;  %v859_v4 = vadd.f32 %v858_v10, %v762_v59 }
 0x131   :  { %v970_v19 = vmax.f32 %v954_v0, 0.0  ;;  %v978_v24 = vmax.f32 %v962_v14, 0.0  ;;  %v960_v28 = vadd.f32 %v2074_v8, %v912_v15  ;;  %v894_v5 = vmul.f32 %v1936_v50, %v867_v17  ;;  %v829_v34 = vpop.f32.mrf.mxu0 }
 0x132   :  { %v952_v23 = vadd.f32 %v2073_v22, %v904_v1  ;;  %v967_v16 = vmax.f32 %v951_v36, 0.0  ;;  %v884_v30 = vmul.f32 %v1936_v50, %v827_v25  ;;  %v975_v31 = vmax.f32 %v959_v11, 0.0  ;;  %v861_v40 = vpop.f32.mrf.mxu1  ;;  %v2076_v36 = vld [vmem:[#allocation7_spill] sm:$0xff] }
 0x133   :  { %v1225_v26 = vpack.c.bf16 %v970_v19, %v969_v53  ;;  %v1245_v6 = vpack.c.bf16 %v978_v24, %v977_v61  ;;  %v976_v32 = vmax.f32 %v960_v28, 0.0  ;;  %v892_v33 = vmul.f32 %v1936_v50, %v859_v4 }
 0x134   :  { %v968_v29 = vmax.f32 %v952_v23, 0.0  ;;  %v909_v21 = vadd.f32 %v1945_v35, %v886_v3  ;;  %v838_v59 = vadd.f32 %v1426_v18, %v1940_v56  ;;  %v733_v39 = vadd.f32 %v1931_v48, %v1927_v55 }
 0x135   :  { %1264 = vst [vmem:[%s2051_s5 + $0x8] sm:$0xff] %v1225_v26   ;;  %1268 = vst [vmem:[%s2051_s5 + $0x28] sm:$0xff] %v1245_v6   ;;  %v1240_v41 = vpack.c.bf16 %v976_v32, %v975_v31  ;;  %v917_v42 = vadd.f32 %v1945_v35, %v894_v5  ;;  %v870_v43 = vadd.f32 %v1434_v54, %v773_v52  ;;  %v1200_v48 = vunpack.c.h.bf16 %v1874_v9 }
 0x136   :  { %v1220_v7 = vpack.c.bf16 %v968_v29, %v967_v16  ;;  %v765_v44 = vadd.f32 %v1958_v20, %v1949_v62  ;;  %v907_v56 = vadd.f32 %v1945_v35, %v884_v30  ;;  %v887_v55 = vmul.f32 %v1936_v50, %v838_v59 }
 0x137   :  { %v830_v47 = vadd.f32 %v829_v34, %v733_v39  ;;  %1267 = vst [vmem:[%s2051_s5 + $0x20] sm:$0xff] %v1240_v41   ;;  %v915_v49 = vadd.f32 %v1945_v35, %v892_v33  ;;  %v895_v51 = vmul.f32 %v1936_v50, %v870_v43  ;;  %v1216_v62 = vunpack.c.h.bf16 %v1882_v12 }
 0x138   :  { %1221 = vst [vmem:[%s2051_s5] sm:$0xff] %v1220_v7   ;;  %v862_v20 = vadd.f32 %v861_v40, %v765_v44  ;;  %v2075_v38 = vunpack.c.l.bf16 %v1874_v9  ;;  %v910_v53 = vadd.f32 %v1945_v35, %v887_v55  ;;  %v1196_v37 = vunpack.c.h.bf16 %v2076_v36 }
 0x139   :  { %v885_v45 = vmul.f32 %v1936_v50, %v830_v47  ;;  %v2077_v57 = vunpack.c.l.bf16 %v1882_v12  ;;  %v918_v61 = vadd.f32 %v1945_v35, %v895_v51  ;;  %v1212_v0 = vunpack.c.h.bf16 %v1920_v27 }
 0x13a   :  { %v957_v52 = vadd.f32 %v2075_v38, %v909_v21  ;;  %v893_v58 = vmul.f32 %v1936_v50, %v862_v20  ;;  %v2078_v1 = vunpack.c.l.bf16 %v2076_v36  ;;  %v958_v9 = vadd.f32 %v1200_v48, %v910_v53 }
 0x13b   :  { %v965_v60 = vadd.f32 %v2077_v57, %v917_v42  ;;  %v908_v10 = vadd.f32 %v1945_v35, %v885_v45  ;;  %v963_v63 = vadd.f32 %v1211_v46, %v915_v49  ;;  %v966_v11 = vadd.f32 %v1216_v62, %v918_v61 }
 0x13c   :  { %v955_v2 = vadd.f32 %v2078_v1, %v907_v56  ;;  %v916_v13 = vadd.f32 %v1945_v35, %v893_v58  ;;  %v973_v12 = vmax.f32 %v957_v52, 0.0  ;;  %v974_v14 = vmax.f32 %v958_v9, 0.0 }
 0x13d   :  { %v956_v15 = vadd.f32 %v1196_v37, %v908_v10  ;;  %v981_v17 = vmax.f32 %v965_v60, 0.0  ;;  %v982_v18 = vmax.f32 %v966_v11, 0.0  ;;  %v979_v3 = vmax.f32 %v963_v63, 0.0 }
 0x13e   :  { %v964_v50 = vadd.f32 %v1212_v0, %v916_v13  ;;  %v971_v19 = vmax.f32 %v955_v2, 0.0  ;;  %v1235_v22 = vpack.c.bf16 %v974_v14, %v973_v12 }
 0x13f   :  { %v972_v23 = vmax.f32 %v956_v15, 0.0  ;;  %v1255_v25 = vpack.c.bf16 %v982_v18, %v981_v17 }
 0x140   :  { %v980_v54 = vmax.f32 %v964_v50, 0.0  ;;  %1266 = vst [vmem:[%s2051_s5 + $0x18] sm:$0xff] %v1235_v22  }
 0x141   :  { %v1230_v27 = vpack.c.bf16 %v972_v23, %v971_v19  ;;  %1270 = vst [vmem:[%s2051_s5 + $0x38] sm:$0xff] %v1255_v25  }
 0x142   :  { %v1250_v46 = vpack.c.bf16 %v980_v54, %v979_v3 }
 0x143   :  { %1265 = vst [vmem:[%s2051_s5 + $0x10] sm:$0xff] %v1230_v27  }
 0x144   :  { %1269 = vst [vmem:[%s2051_s5 + $0x30] sm:$0xff] %v1250_v46  }

// kernel: forward_pallas.12
= control target key start
LH: loop header
LB: loop body
LE: loop exit
PB: predicated region body
PF: predicated region fallthrough
CT: control target
= control target key end

     0   :  { %s2340_s1 = inlined_call_operand.vmem [shape: bf16[1152,256], index: 1, kind: input, shape index: {}]   ;;  %s2341_s0 = inlined_call_operand.vmem [shape: bf16[32,1152], index: 0, kind: input, shape index: {}]   ;;  %s2342_s2 = inlined_call_operand.vmem [shape: f32[1,256], index: 2, kind: input, shape index: {}]   ;;  %s2343_s3 = inlined_call_operand.vmem [shape: f32[1,256], index: 3, kind: input, shape index: {}]   ;;  %s2344_s4 = inlined_call_operand.vmem [shape: f32[1,256], index: 4, kind: input, shape index: {}]   ;;  %s2345_s5 = inlined_call_operand.vmem [shape: bf16[32,256], index: 5, kind: output, shape index: {}]  }
   0x1   :  { %v1557_v0 = vld [vmem:[%s2340_s1 + $0x74] ss:$8 sps:$4 sm:$0xff]   ;;  %v1561_v2 = vld [vmem:[%s2340_s1 + $0x70] ss:$8 sps:$4 sm:$0xff]   ;;  %v1563_v4 = vld [vmem:[%s2340_s1 + $0x64] ss:$8 sps:$4 sm:$0xff]  }
   0x2   :  { %v1559_v1 = vld [vmem:[%s2340_s1 + $0x174] ss:$8 sps:$4 sm:$0xff]   ;;  %997 = vmatprep.subr.bf16.mxu0 %v1557_v0  ;;  %v1562_v3 = vld [vmem:[%s2340_s1 + $0x170] ss:$8 sps:$4 sm:$0xff]   ;;  %v1565_v5 = vld [vmem:[%s2340_s1 + $0x164] ss:$8 sps:$4 sm:$0xff]  }
   0x3   :  { %1050 = vmatprep.subr.bf16.mxu1 %v1559_v1  ;;  %998 = vmatpush1.bf16.msra.mxu0 %v1561_v2  ;;  %v1567_v6 = vld [vmem:[%s2340_s1 + $0x60] ss:$8 sps:$4 sm:$0xff]   ;;  %v1569_v8 = vld [vmem:[%s2340_s1 + $0x54] ss:$8 sps:$4 sm:$0xff]   ;;  %v1573_v10 = vld [vmem:[%s2340_s1 + $0x50] ss:$8 sps:$4 sm:$0xff]  }
   0x4   :  { %1051 = vmatpush1.bf16.msra.mxu1 %v1562_v3  ;;  %999 = vmatprep.subr.bf16.mxu0 %v1563_v4  ;;  %v1568_v7 = vld [vmem:[%s2340_s1 + $0x160] ss:$8 sps:$4 sm:$0xff]   ;;  %v1571_v9 = vld [vmem:[%s2340_s1 + $0x154] ss:$8 sps:$4 sm:$0xff]   ;;  %v1574_v11 = vld [vmem:[%s2340_s1 + $0x150] ss:$8 sps:$4 sm:$0xff]  }
   0x5   :  { %1052 = vmatprep.subr.bf16.mxu1 %v1565_v5  ;;  %v1575_v12 = vld [vmem:[%s2340_s1 + $0x44] ss:$8 sps:$4 sm:$0xff]   ;;  %v1579_v14 = vld [vmem:[%s2340_s1 + $0x40] ss:$8 sps:$4 sm:$0xff]   ;;  %v1581_v16 = vld [vmem:[%s2340_s1 + $0x34] ss:$8 sps:$4 sm:$0xff]  }
   0x6   :  { %v1577_v13 = vld [vmem:[%s2340_s1 + $0x144] ss:$8 sps:$4 sm:$0xff]   ;;  %v1580_v15 = vld [vmem:[%s2340_s1 + $0x140] ss:$8 sps:$4 sm:$0xff]   ;;  %v1583_v17 = vld [vmem:[%s2340_s1 + $0x134] ss:$8 sps:$4 sm:$0xff]  }
   0x7   :  { %1000 = vmatpush1.bf16.msra.mxu0 %v1567_v6  ;;  %v1585_v18 = vld [vmem:[%s2340_s1 + $0x30] ss:$8 sps:$4 sm:$0xff]   ;;  %v1587_v20 = vld [vmem:[%s2340_s1 + $0x24] ss:$8 sps:$4 sm:$0xff]   ;;  %v1591_v22 = vld [vmem:[%s2340_s1 + $0x20] ss:$8 sps:$4 sm:$0xff]  }
   0x8   :  { %1053 = vmatpush1.bf16.msra.mxu1 %v1568_v7  ;;  %1001 = vmatprep.subr.bf16.mxu0 %v1569_v8  ;;  %v1586_v19 = vld [vmem:[%s2340_s1 + $0x130] ss:$8 sps:$4 sm:$0xff]   ;;  %v1589_v21 = vld [vmem:[%s2340_s1 + $0x124] ss:$8 sps:$4 sm:$0xff]   ;;  %v1592_v23 = vld [vmem:[%s2340_s1 + $0x120] ss:$8 sps:$4 sm:$0xff]  }
   0x9   :  { %1054 = vmatprep.subr.bf16.mxu1 %v1571_v9  ;;  %v1593_v24 = vld [vmem:[%s2340_s1 + $0x14] ss:$8 sps:$4 sm:$0xff]   ;;  %v1597_v26 = vld [vmem:[%s2340_s1 + $0x10] ss:$8 sps:$4 sm:$0xff]   ;;  %v1599_v28 = vld [vmem:[%s2340_s1 + $0x4] ss:$8 sps:$4 sm:$0xff]  }
   0xa   :  { %v1595_v25 = vld [vmem:[%s2340_s1 + $0x114] ss:$8 sps:$4 sm:$0xff]   ;;  %v1598_v27 = vld [vmem:[%s2340_s1 + $0x110] ss:$8 sps:$4 sm:$0xff]   ;;  %v1601_v29 = vld [vmem:[%s2340_s1 + $0x104] ss:$8 sps:$4 sm:$0xff]  }
   0xb   :  { %1002 = vmatpush1.bf16.msra.mxu0 %v1573_v10  ;;  %v1603_v30 = vld [vmem:[%s2340_s1] ss:$8 sps:$4 sm:$0xff]   ;;  %v1605_v32 = vld [vmem:[%s2340_s1 + $0xf4] ss:$8 sps:$4 sm:$0xff]   ;;  %v1609_v34 = vld [vmem:[%s2340_s1 + $0xf0] ss:$8 sps:$4 sm:$0xff]  }
   0xc   :  { %1055 = vmatpush1.bf16.msra.mxu1 %v1574_v11  ;;  %1003 = vmatprep.subr.bf16.mxu0 %v1575_v12  ;;  %v1604_v31 = vld [vmem:[%s2340_s1 + $0x100] ss:$8 sps:$4 sm:$0xff]   ;;  %v1607_v33 = vld [vmem:[%s2340_s1 + $0x1f4] ss:$8 sps:$4 sm:$0xff]   ;;  %v1610_v35 = vld [vmem:[%s2340_s1 + $0x1f0] ss:$8 sps:$4 sm:$0xff]  }
   0xd   :  { %1056 = vmatprep.subr.bf16.mxu1 %v1577_v13  ;;  %v1611_v36 = vld [vmem:[%s2340_s1 + $0xe4] ss:$8 sps:$4 sm:$0xff]   ;;  %v1615_v38 = vld [vmem:[%s2340_s1 + $0xe0] ss:$8 sps:$4 sm:$0xff]   ;;  %v1617_v40 = vld [vmem:[%s2340_s1 + $0xd4] ss:$8 sps:$4 sm:$0xff]  }
   0xe   :  { %v1613_v37 = vld [vmem:[%s2340_s1 + $0x1e4] ss:$8 sps:$4 sm:$0xff]   ;;  %v1616_v39 = vld [vmem:[%s2340_s1 + $0x1e0] ss:$8 sps:$4 sm:$0xff]   ;;  %v1619_v41 = vld [vmem:[%s2340_s1 + $0x1d4] ss:$8 sps:$4 sm:$0xff]  }
   0xf   :  { %1004 = vmatpush1.bf16.msra.mxu0 %v1579_v14  ;;  %v1621_v42 = vld [vmem:[%s2340_s1 + $0xd0] ss:$8 sps:$4 sm:$0xff]   ;;  %v1623_v44 = vld [vmem:[%s2340_s1 + $0xc4] ss:$8 sps:$4 sm:$0xff]   ;;  %v1627_v46 = vld [vmem:[%s2340_s1 + $0xc0] ss:$8 sps:$4 sm:$0xff]  }
  0x10   :  { %1057 = vmatpush1.bf16.msra.mxu1 %v1580_v15  ;;  %1005 = vmatprep.subr.bf16.mxu0 %v1581_v16  ;;  %v1622_v43 = vld [vmem:[%s2340_s1 + $0x1d0] ss:$8 sps:$4 sm:$0xff]   ;;  %v1625_v45 = vld [vmem:[%s2340_s1 + $0x1c4] ss:$8 sps:$4 sm:$0xff]   ;;  %v1628_v47 = vld [vmem:[%s2340_s1 + $0x1c0] ss:$8 sps:$4 sm:$0xff]  }
  0x11   :  { %1058 = vmatprep.subr.bf16.mxu1 %v1583_v17  ;;  %v1629_v48 = vld [vmem:[%s2340_s1 + $0xb4] ss:$8 sps:$4 sm:$0xff]   ;;  %v1655_v49 = vld [vmem:[%s2341_s0 + $0x4] ss:$36 sps:$4 sm:$0xff]   ;;  %v1658_v51 = vld [vmem:[%s2341_s0 + $0xc] ss:$36 sps:$4 sm:$0xff]  }
  0x12   :  { %v1631_v50 = vld [vmem:[%s2340_s1 + $0x1b4] ss:$8 sps:$4 sm:$0xff]   ;;  %1029 = vmatprep.mubr.bf16.mxu0 %v1655_v49  ;;  %v1633_v52 = vld [vmem:[%s2340_s1 + $0xb0] ss:$8 sps:$4 sm:$0xff]   ;;  %1082 = vmatprep.mubr.bf16.mxu1 %v1658_v51  ;;  %v1635_v54 = vld [vmem:[%s2340_s1 + $0xa4] ss:$8 sps:$4 sm:$0xff]  }
  0x13   :  { %1006 = vmatpush1.bf16.msra.mxu0 %v1585_v18  ;;  %v1634_v53 = vld [vmem:[%s2340_s1 + $0x1b0] ss:$8 sps:$4 sm:$0xff]   ;;  %v1637_v55 = vld [vmem:[%s2340_s1 + $0x1a4] ss:$8 sps:$4 sm:$0xff]   ;;  %v1639_v56 = vld [vmem:[%s2340_s1 + $0xa0] ss:$8 sps:$4 sm:$0xff]  }
  0x14   :  { %1059 = vmatpush1.bf16.msra.mxu1 %v1586_v19  ;;  %1007 = vmatprep.subr.bf16.mxu0 %v1587_v20  ;;  %v1640_v57 = vld [vmem:[%s2340_s1 + $0x1a0] ss:$8 sps:$4 sm:$0xff]   ;;  %v1641_v58 = vld [vmem:[%s2340_s1 + $0x94] ss:$8 sps:$4 sm:$0xff]   ;;  %v1645_v60 = vld [vmem:[%s2340_s1 + $0x90] ss:$8 sps:$4 sm:$0xff]  }
  0x15   :  { %1060 = vmatprep.subr.bf16.mxu1 %v1589_v21  ;;  %v1643_v59 = vld [vmem:[%s2340_s1 + $0x194] ss:$8 sps:$4 sm:$0xff]   ;;  %v1646_v61 = vld [vmem:[%s2340_s1 + $0x190] ss:$8 sps:$4 sm:$0xff]   ;;  %v1647_v62 = vld [vmem:[%s2340_s1 + $0x84] ss:$8 sps:$4 sm:$0xff]  }
  0x16   :  { %v1649_v63 = vld [vmem:[%s2340_s1 + $0x184] ss:$8 sps:$4 sm:$0xff]   ;;  %v1651_v0 = vld [vmem:[%s2340_s1 + $0x80] ss:$8 sps:$4 sm:$0xff]   ;;  %v1661_v2 = vld [vmem:[%s2340_s1 + $0x274] ss:$8 sps:$4 sm:$0xff]  }
  0x17   :  { %1008 = vmatpush1.bf16.msra.mxu0 %v1591_v22  ;;  %v1652_v1 = vld [vmem:[%s2340_s1 + $0x180] ss:$8 sps:$4 sm:$0xff]   ;;  %v1664_v3 = vld [vmem:[%s2340_s1 + $0x374] ss:$8 sps:$4 sm:$0xff]   ;;  %v1659_v6 = vld [vmem:[%s2340_s1 + $0x270] ss:$8 sps:$4 sm:$0xff]  }
  0x18   :  { %1061 = vmatpush1.bf16.msra.mxu1 %v1592_v23  ;;  %1009 = vmatprep.subr.bf16.mxu0 %v1593_v24  ;;  %v1653_v4 = vld [vmem:[%s2341_s0] ss:$36 sps:$4 sm:$0xff]   ;;  %v1656_v5 = vld [vmem:[%s2341_s0 + $0x8] ss:$36 sps:$4 sm:$0xff]   ;;  %v1662_v7 = vld [vmem:[%s2340_s1 + $0x370] ss:$8 sps:$4 sm:$0xff]  }
  0x19   :  { %1062 = vmatprep.subr.bf16.mxu1 %v1595_v25  ;;  %v1667_v8 = vld [vmem:[%s2340_s1 + $0x264] ss:$8 sps:$4 sm:$0xff]   ;;  %v1665_v10 = vld [vmem:[%s2340_s1 + $0x260] ss:$8 sps:$4 sm:$0xff]   ;;  %v1673_v12 = vld [vmem:[%s2340_s1 + $0x254] ss:$8 sps:$4 sm:$0xff]  }
  0x1a   :  { %v1670_v9 = vld [vmem:[%s2340_s1 + $0x364] ss:$8 sps:$4 sm:$0xff]   ;;  %v1668_v11 = vld [vmem:[%s2340_s1 + $0x360] ss:$8 sps:$4 sm:$0xff]   ;;  %v1676_v13 = vld [vmem:[%s2340_s1 + $0x354] ss:$8 sps:$4 sm:$0xff]  }
  0x1b   :  { %1010 = vmatpush1.bf16.msra.mxu0 %v1597_v26  ;;  %v1671_v14 = vld [vmem:[%s2340_s1 + $0x250] ss:$8 sps:$4 sm:$0xff]   ;;  %v1679_v16 = vld [vmem:[%s2340_s1 + $0x244] ss:$8 sps:$4 sm:$0xff]   ;;  %v1677_v18 = vld [vmem:[%s2340_s1 + $0x240] ss:$8 sps:$4 sm:$0xff]  }
  0x1c   :  { %1063 = vmatpush1.bf16.msra.mxu1 %v1598_v27  ;;  %1011 = vmatprep.subr.bf16.mxu0 %v1599_v28  ;;  %v1674_v15 = vld [vmem:[%s2340_s1 + $0x350] ss:$8 sps:$4 sm:$0xff]   ;;  %v1682_v17 = vld [vmem:[%s2340_s1 + $0x344] ss:$8 sps:$4 sm:$0xff]   ;;  %v1680_v19 = vld [vmem:[%s2340_s1 + $0x340] ss:$8 sps:$4 sm:$0xff]  }
  0x1d   :  { %1064 = vmatprep.subr.bf16.mxu1 %v1601_v29  ;;  %v1685_v20 = vld [vmem:[%s2340_s1 + $0x234] ss:$8 sps:$4 sm:$0xff]   ;;  %v1683_v22 = vld [vmem:[%s2340_s1 + $0x230] ss:$8 sps:$4 sm:$0xff]   ;;  %v1691_v24 = vld [vmem:[%s2340_s1 + $0x224] ss:$8 sps:$4 sm:$0xff]  }
  0x1e   :  { %v1688_v21 = vld [vmem:[%s2340_s1 + $0x334] ss:$8 sps:$4 sm:$0xff]   ;;  %v1686_v23 = vld [vmem:[%s2340_s1 + $0x330] ss:$8 sps:$4 sm:$0xff]   ;;  %v1694_v25 = vld [vmem:[%s2340_s1 + $0x324] ss:$8 sps:$4 sm:$0xff]  }
  0x1f   :  { %1012 = vmatpush1.bf16.msra.mxu0 %v1603_v30  ;;  %v1737_v26 = vld [vmem:[%s2341_s0 + $0x4c] ss:$36 sps:$4 sm:$0xff]   ;;  %v1739_v27 = vld [vmem:[%s2341_s0 + $0x54] ss:$36 sps:$4 sm:$0xff]   ;;  %v1689_v30 = vld [vmem:[%s2340_s1 + $0x220] ss:$8 sps:$4 sm:$0xff]  }
  0x20   :  { %1065 = vmatpush1.bf16.msra.mxu1 %v1604_v31  ;;  %1013 = vmatprep.subr.bf16.mxu0 %v1605_v32  ;;  %v1741_v28 = vld [vmem:[%s2341_s0 + $0x48] ss:$36 sps:$4 sm:$0xff]   ;;  %v1742_v29 = vld [vmem:[%s2341_s0 + $0x50] ss:$36 sps:$4 sm:$0xff]  }
  0x21   :  { %1066 = vmatprep.subr.bf16.mxu1 %v1607_v33  ;;  %v1692_v31 = vld [vmem:[%s2340_s1 + $0x320] ss:$8 sps:$4 sm:$0xff]   ;;  %v1697_v32 = vld [vmem:[%s2340_s1 + $0x214] ss:$8 sps:$4 sm:$0xff]  }
  0x22   :  { %v1700_v33 = vld [vmem:[%s2340_s1 + $0x314] ss:$8 sps:$4 sm:$0xff]   ;;  %v1716_v49 = vld [vmem:[%s2340_s1 + $0x3e0] ss:$8 sps:$4 sm:$0xff]  }
  0x23   :  { %1014 = vmatpush2.bf16.msra.mxu0 %v1609_v34  ;;  %v1695_v34 = vld [vmem:[%s2340_s1 + $0x210] ss:$8 sps:$4 sm:$0xff]   ;;  %v1724_v51 = vld [vmem:[%s2340_s1 + $0x3d4] ss:$8 sps:$4 sm:$0xff]  }
  0x24   :  { %1067 = vmatpush2.bf16.msra.mxu1 %v1610_v35  ;;  %1015 = vmatprep.subr.bf16.mxu0 %v1611_v36  ;;  %v1698_v35 = vld [vmem:[%s2340_s1 + $0x310] ss:$8 sps:$4 sm:$0xff]   ;;  %v1703_v36 = vld [vmem:[%s2340_s1 + $0x204] ss:$8 sps:$4 sm:$0xff]  }
  0x25   :  { %1068 = vmatprep.subr.bf16.mxu1 %v1613_v37  ;;  %v1706_v37 = vld [vmem:[%s2340_s1 + $0x304] ss:$8 sps:$4 sm:$0xff]  }
  0x27   :  { %1016 = vmatpush2.bf16.msra.mxu0 %v1615_v38  ;;  %v1701_v38 = vld [vmem:[%s2340_s1 + $0x200] ss:$8 sps:$4 sm:$0xff]  }
  0x28   :  { %1069 = vmatpush2.bf16.msra.mxu1 %v1616_v39  ;;  %1017 = vmatprep.subr.bf16.mxu0 %v1617_v40  ;;  %v1704_v39 = vld [vmem:[%s2340_s1 + $0x300] ss:$8 sps:$4 sm:$0xff]   ;;  %v1709_v40 = vld [vmem:[%s2340_s1 + $0x2f4] ss:$8 sps:$4 sm:$0xff]  }
  0x29   :  { %1070 = vmatprep.subr.bf16.mxu1 %v1619_v41  ;;  %v1763_v41 = vld [vmem:[%s2341_s0 + $0x14] ss:$36 sps:$4 sm:$0xff]  }
  0x2b   :  { %1018 = vmatpush2.bf16.msra.mxu0 %v1621_v42  ;;  %v1712_v42 = vld [vmem:[%s2340_s1 + $0x3f4] ss:$8 sps:$4 sm:$0xff]  }
  0x2c   :  { %1071 = vmatpush2.bf16.msra.mxu1 %v1622_v43  ;;  %1019 = vmatprep.subr.bf16.mxu0 %v1623_v44  ;;  %v1766_v43 = vld [vmem:[%s2341_s0 + $0x1c] ss:$36 sps:$4 sm:$0xff]   ;;  %v1707_v44 = vld [vmem:[%s2340_s1 + $0x2f0] ss:$8 sps:$4 sm:$0xff]  }
  0x2d   :  { %1072 = vmatprep.subr.bf16.mxu1 %v1625_v45  ;;  %v1710_v45 = vld [vmem:[%s2340_s1 + $0x3f0] ss:$8 sps:$4 sm:$0xff]  }
  0x2f   :  { %1020 = vmatpush2.bf16.msra.mxu0 %v1627_v46  ;;  %v1715_v46 = vld [vmem:[%s2340_s1 + $0x2e4] ss:$8 sps:$4 sm:$0xff]  }
  0x30   :  { %1073 = vmatpush2.bf16.msra.mxu1 %v1628_v47  ;;  %1021 = vmatprep.subr.bf16.mxu0 %v1629_v48  ;;  %v1718_v47 = vld [vmem:[%s2340_s1 + $0x3e4] ss:$8 sps:$4 sm:$0xff]   ;;  %v1713_v48 = vld [vmem:[%s2340_s1 + $0x2e0] ss:$8 sps:$4 sm:$0xff]  }
  0x31   :  { %1074 = vmatprep.subr.bf16.mxu1 %v1631_v50  ;;  %v1721_v50 = vld [vmem:[%s2340_s1 + $0x2d4] ss:$8 sps:$4 sm:$0xff]  }
  0x33   :  { %1022 = vmatpush2.bf16.msra.mxu0 %v1633_v52  ;;  %v1719_v52 = vld [vmem:[%s2340_s1 + $0x2d0] ss:$8 sps:$4 sm:$0xff]  }
  0x34   :  { %1075 = vmatpush2.bf16.msra.mxu1 %v1634_v53  ;;  %1023 = vmatprep.subr.bf16.mxu0 %v1635_v54  ;;  %v1722_v53 = vld [vmem:[%s2340_s1 + $0x3d0] ss:$8 sps:$4 sm:$0xff]   ;;  %v1727_v54 = vld [vmem:[%s2340_s1 + $0x2c4] ss:$8 sps:$4 sm:$0xff]  }
  0x35   :  { %1076 = vmatprep.subr.bf16.mxu1 %v1637_v55  ;;  %v1730_v55 = vld [vmem:[%s2340_s1 + $0x3c4] ss:$8 sps:$4 sm:$0xff]  }
  0x37   :  { %1024 = vmatpush2.bf16.msra.mxu0 %v1639_v56  ;;  %v1725_v56 = vld [vmem:[%s2340_s1 + $0x2c0] ss:$8 sps:$4 sm:$0xff]  }
  0x38   :  { %1077 = vmatpush2.bf16.msra.mxu1 %v1640_v57  ;;  %1025 = vmatprep.subr.bf16.mxu0 %v1641_v58  ;;  %v1728_v57 = vld [vmem:[%s2340_s1 + $0x3c0] ss:$8 sps:$4 sm:$0xff]   ;;  %v1733_v58 = vld [vmem:[%s2340_s1 + $0x2b4] ss:$8 sps:$4 sm:$0xff]  }
  0x39   :  { %1078 = vmatprep.subr.bf16.mxu1 %v1643_v59  ;;  %v1736_v59 = vld [vmem:[%s2340_s1 + $0x3b4] ss:$8 sps:$4 sm:$0xff]  }
  0x3b   :  { %1026 = vmatpush2.bf16.msra.mxu0 %v1645_v60  ;;  %v1731_v60 = vld [vmem:[%s2340_s1 + $0x2b0] ss:$8 sps:$4 sm:$0xff]  }
  0x3c   :  { %1079 = vmatpush2.bf16.msra.mxu1 %v1646_v61  ;;  %1027 = vmatprep.subr.bf16.mxu0 %v1647_v62  ;;  %v1734_v61 = vld [vmem:[%s2340_s1 + $0x3b0] ss:$8 sps:$4 sm:$0xff]   ;;  %v1745_v62 = vld [vmem:[%s2340_s1 + $0x2a4] ss:$8 sps:$4 sm:$0xff]  }
  0x3d   :  { %1080 = vmatprep.subr.bf16.mxu1 %v1649_v63  ;;  %v1748_v63 = vld [vmem:[%s2340_s1 + $0x3a4] ss:$8 sps:$4 sm:$0xff]  }
  0x3f   :  { %1028 = vmatpush2.bf16.msra.mxu0 %v1651_v0  ;;  %v1743_v0 = vld [vmem:[%s2340_s1 + $0x2a0] ss:$8 sps:$4 sm:$0xff]  }
  0x40   :  { %1081 = vmatpush2.bf16.msra.mxu1 %v1652_v1  ;;  %1103 = vmatprep.subr.bf16.mxu0 %v1661_v2  ;;  %v1746_v1 = vld [vmem:[%s2340_s1 + $0x3a0] ss:$8 sps:$4 sm:$0xff]   ;;  %v1751_v2 = vld [vmem:[%s2340_s1 + $0x294] ss:$8 sps:$4 sm:$0xff]  }
  0x41   :  { %1156 = vmatprep.subr.bf16.mxu1 %v1664_v3  ;;  %v1754_v3 = vld [vmem:[%s2340_s1 + $0x394] ss:$8 sps:$4 sm:$0xff]  }
  0x42   :  { %1030 = vmatmul.mubr.bf16.vlgmr.msra.gmra.mxu0 %v1653_v4  ;;  %v1749_v4 = vld [vmem:[%s2340_s1 + $0x290] ss:$8 sps:$4 sm:$0xff]  }
  0x43   :  { %1083 = vmatmul.mubr.bf16.vlgmr.msra.gmra.mxu1 %v1656_v5  ;;  %1104 = vmatpush1.bf16.msra.mxu0 %v1659_v6  ;;  %v1752_v5 = vld [vmem:[%s2340_s1 + $0x390] ss:$8 sps:$4 sm:$0xff]   ;;  %v1757_v6 = vld [vmem:[%s2340_s1 + $0x284] ss:$8 sps:$4 sm:$0xff]  }
  0x44   :  { %1157 = vmatpush1.bf16.msra.mxu1 %v1662_v7  ;;  %1105 = vmatprep.subr.bf16.mxu0 %v1667_v8  ;;  %v1760_v7 = vld [vmem:[%s2340_s1 + $0x384] ss:$8 sps:$4 sm:$0xff]   ;;  %v1755_v8 = vld [vmem:[%s2340_s1 + $0x280] ss:$8 sps:$4 sm:$0xff]  }
  0x45   :  { %1158 = vmatprep.subr.bf16.mxu1 %v1670_v9  ;;  %1039 = vmatprep.mubr.bf16.mxu0 %v1737_v26  ;;  %v1758_v9 = vld [vmem:[%s2340_s1 + $0x380] ss:$8 sps:$4 sm:$0xff]   ;;  %v1785_v26 = vld [vmem:[%s2340_s1 + $0x430] ss:$8 sps:$4 sm:$0xff]  }
  0x46   :  { %1092 = vmatprep.mubr.bf16.mxu1 %v1739_v27  ;;  %v1790_v27 = vld [vmem:[%s2340_s1 + $0x424] ss:$8 sps:$4 sm:$0xff]  }
  0x47   :  { %1106 = vmatpush1.bf16.msra.mxu0 %v1665_v10  ;;  %v1769_v10 = vld [vmem:[%s2340_s1 + $0x474] ss:$8 sps:$4 sm:$0xff]  }
  0x48   :  { %1159 = vmatpush1.bf16.msra.mxu1 %v1668_v11  ;;  %1107 = vmatprep.subr.bf16.mxu0 %v1673_v12  ;;  %v1761_v11 = vld [vmem:[%s2341_s0 + $0x10] ss:$36 sps:$4 sm:$0xff]   ;;  %v1764_v12 = vld [vmem:[%s2341_s0 + $0x18] ss:$36 sps:$4 sm:$0xff]  }
  0x49   :  { %1160 = vmatprep.subr.bf16.mxu1 %v1676_v13  ;;  %v1767_v13 = vld [vmem:[%s2340_s1 + $0x470] ss:$8 sps:$4 sm:$0xff]  }
  0x4a   :  { %1040 = vmatmul.mubr.bf16.gmra.mxu0 %v1741_v28  ;;  %v1788_v28 = vld [vmem:[%s2340_s1 + $0x420] ss:$8 sps:$4 sm:$0xff]  }
  0x4b   :  { %1108 = vmatpush1.bf16.msra.mxu0 %v1671_v14  ;;  %1093 = vmatmul.mubr.bf16.gmra.mxu1 %v1742_v29  ;;  %v1772_v14 = vld [vmem:[%s2340_s1 + $0x464] ss:$8 sps:$4 sm:$0xff]   ;;  %v1793_v29 = vld [vmem:[%s2340_s1 + $0x414] ss:$8 sps:$4 sm:$0xff]  }
  0x4c   :  { %1161 = vmatpush1.bf16.msra.mxu1 %v1674_v15  ;;  %1109 = vmatprep.subr.bf16.mxu0 %v1679_v16  ;;  %v1773_v15 = vld [vmem:[%s2341_s0 + $0x5c] ss:$36 sps:$4 sm:$0xff]   ;;  %v1779_v16 = vld [vmem:[%s2341_s0 + $0x64] ss:$36 sps:$4 sm:$0xff]  }
  0x4d   :  { %1162 = vmatprep.subr.bf16.mxu1 %v1682_v17  ;;  %1135 = vmatprep.mubr.bf16.mxu0 %v1763_v41  ;;  %v1770_v17 = vld [vmem:[%s2340_s1 + $0x460] ss:$8 sps:$4 sm:$0xff]  }
  0x4e   :  { %1188 = vmatprep.mubr.bf16.mxu1 %v1766_v43 }
  0x4f   :  { %1110 = vmatpush1.bf16.msra.mxu0 %v1677_v18  ;;  %v1778_v18 = vld [vmem:[%s2340_s1 + $0x454] ss:$8 sps:$4 sm:$0xff]  }
  0x50   :  { %1163 = vmatpush1.bf16.msra.mxu1 %v1680_v19  ;;  %1111 = vmatprep.subr.bf16.mxu0 %v1685_v20  ;;  %v1775_v19 = vld [vmem:[%s2341_s0 + $0x58] ss:$36 sps:$4 sm:$0xff]   ;;  %v1781_v20 = vld [vmem:[%s2341_s0 + $0x60] ss:$36 sps:$4 sm:$0xff]  }
  0x51   :  { %1164 = vmatprep.subr.bf16.mxu1 %v1688_v21  ;;  %v1776_v21 = vld [vmem:[%s2340_s1 + $0x450] ss:$8 sps:$4 sm:$0xff]  }
  0x53   :  { %1112 = vmatpush1.bf16.msra.mxu0 %v1683_v22  ;;  %v1784_v22 = vld [vmem:[%s2340_s1 + $0x444] ss:$8 sps:$4 sm:$0xff]  }
  0x54   :  { %1165 = vmatpush1.bf16.msra.mxu1 %v1686_v23  ;;  %1113 = vmatprep.subr.bf16.mxu0 %v1691_v24  ;;  %v1782_v23 = vld [vmem:[%s2340_s1 + $0x440] ss:$8 sps:$4 sm:$0xff]   ;;  %v1787_v24 = vld [vmem:[%s2340_s1 + $0x434] ss:$8 sps:$4 sm:$0xff]  }
  0x55   :  { %1166 = vmatprep.subr.bf16.mxu1 %v1694_v25  ;;  %v1799_v25 = vmov 0  }
  0x57   :  { %1114 = vmatpush1.bf16.msra.mxu0 %v1689_v30  ;;  %v1791_v30 = vld [vmem:[%s2340_s1 + $0x410] ss:$8 sps:$4 sm:$0xff]  }
  0x58   :  { %1167 = vmatpush1.bf16.msra.mxu1 %v1692_v31  ;;  %1115 = vmatprep.subr.bf16.mxu0 %v1697_v32  ;;  %v1796_v31 = vld [vmem:[%s2340_s1 + $0x404] ss:$8 sps:$4 sm:$0xff]   ;;  %v1794_v32 = vld [vmem:[%s2340_s1 + $0x400] ss:$8 sps:$4 sm:$0xff]  }
  0x59   :  { %1168 = vmatprep.subr.bf16.mxu1 %v1700_v33  ;;  %v1797_v33 = vld [vmem:[%s2341_s0 + $0x20] ss:$36 sps:$4 sm:$0xff]  }
  0x5b   :  { %1116 = vmatpush1.bf16.msra.mxu0 %v1695_v34  ;;  %v1798_v34 = vld [vmem:[%s2341_s0 + $0x68] ss:$36 sps:$4 sm:$0xff]  }
  0x5c   :  { %1169 = vmatpush1.bf16.msra.mxu1 %v1698_v35  ;;  %1117 = vmatprep.subr.bf16.mxu0 %v1703_v36 }
  0x5d   :  { %1170 = vmatprep.subr.bf16.mxu1 %v1706_v37 }
  0x5f   :  { %1118 = vmatpush1.bf16.msra.mxu0 %v1701_v38 }
  0x60   :  { %1171 = vmatpush1.bf16.msra.mxu1 %v1704_v39  ;;  %1119 = vmatprep.subr.bf16.mxu0 %v1709_v40 }
  0x61   :  { %1172 = vmatprep.subr.bf16.mxu1 %v1712_v42 }
  0x63   :  { %1120 = vmatpush2.bf16.msra.mxu0 %v1707_v44 }
  0x64   :  { %1173 = vmatpush2.bf16.msra.mxu1 %v1710_v45  ;;  %1121 = vmatprep.subr.bf16.mxu0 %v1715_v46 }
  0x65   :  { %1174 = vmatprep.subr.bf16.mxu1 %v1718_v47 }
  0x67   :  { %1122 = vmatpush2.bf16.msra.mxu0 %v1713_v48 }
  0x68   :  { %1175 = vmatpush2.bf16.msra.mxu1 %v1716_v49  ;;  %1123 = vmatprep.subr.bf16.mxu0 %v1721_v50 }
  0x69   :  { %1176 = vmatprep.subr.bf16.mxu1 %v1724_v51 }
  0x6b   :  { %1124 = vmatpush2.bf16.msra.mxu0 %v1719_v52 }
  0x6c   :  { %1177 = vmatpush2.bf16.msra.mxu1 %v1722_v53  ;;  %1125 = vmatprep.subr.bf16.mxu0 %v1727_v54 }
  0x6d   :  { %1178 = vmatprep.subr.bf16.mxu1 %v1730_v55 }
  0x6f   :  { %1126 = vmatpush2.bf16.msra.mxu0 %v1725_v56 }
  0x70   :  { %1179 = vmatpush2.bf16.msra.mxu1 %v1728_v57  ;;  %1127 = vmatprep.subr.bf16.mxu0 %v1733_v58 }
  0x71   :  { %1180 = vmatprep.subr.bf16.mxu1 %v1736_v59 }
  0x73   :  { %1128 = vmatpush2.bf16.msra.mxu0 %v1731_v60 }
  0x74   :  { %1181 = vmatpush2.bf16.msra.mxu1 %v1734_v61  ;;  %1129 = vmatprep.subr.bf16.mxu0 %v1745_v62  ;;  %v1264_v61 = vlaneseq }
  0x75   :  { %1182 = vmatprep.subr.bf16.mxu1 %v1748_v63 }
  0x77   :  { %1130 = vmatpush2.bf16.msra.mxu0 %v1743_v0  ;;  %v1265_v0 = vshrl.u32 %v1264_v61, 7 }
  0x78   :  { %1183 = vmatpush2.bf16.msra.mxu1 %v1746_v1  ;;  %1131 = vmatprep.subr.bf16.mxu0 %v1751_v2 }
  0x79   :  { %1184 = vmatprep.subr.bf16.mxu1 %v1754_v3 }
  0x7b   :  { %1132 = vmatpush2.bf16.msra.mxu0 %v1749_v4 }
  0x7c   :  { %1185 = vmatpush2.bf16.msra.mxu1 %v1752_v5  ;;  %1133 = vmatprep.subr.bf16.mxu0 %v1757_v6  ;;  %v1266_v5 = vsub.s32 0, %v1265_v0  ;;  %v1270_v6 = vsub.s32 1, %v1265_v0 }
  0x7d   :  { %1186 = vmatprep.subr.bf16.mxu1 %v1760_v7 }
  0x7f   :  { %1134 = vmatpush2.bf16.msra.mxu0 %v1755_v8 }
  0x80   :  { %1187 = vmatpush2.bf16.msra.mxu1 %v1758_v9  ;;  %1209 = vmatprep.subr.bf16.mxu0 %v1769_v10 }
  0x81   :  { %1540 = vmatprep.subr.bf16.mxu1 %v1769_v10 }
  0x82   :  { %1136 = vmatmul.mubr.bf16.vlgmr.msra.gmra.mxu0 %v1761_v11  ;;  %v1262_v11 = vld [vmem:[%s2342_s2] sm:$0x3] }
  0x83   :  { %1189 = vmatmul.mubr.bf16.vlgmr.msra.gmra.mxu1 %v1764_v12  ;;  %1210 = vmatpush1.bf16.msra.mxu0 %v1767_v13  ;;  %v1282_v12 = vld [vmem:[%s2343_s3] sm:$0x3] }
  0x84   :  { %1548 = vmatpush1.bf16.msra.mxu1 %v1767_v13  ;;  %1211 = vmatprep.subr.bf16.mxu0 %v1772_v14 }
  0x85   :  { %1541 = vmatprep.subr.bf16.mxu1 %v1772_v14  ;;  %1145 = vmatprep.mubr.bf16.mxu0 %v1773_v15 }
  0x86   :  { %1198 = vmatprep.mubr.bf16.mxu1 %v1779_v16 }
  0x87   :  { %1212 = vmatpush1.bf16.msra.mxu0 %v1770_v17 }
  0x88   :  { %1549 = vmatpush1.bf16.msra.mxu1 %v1770_v17  ;;  %1213 = vmatprep.subr.bf16.mxu0 %v1778_v18 }
  0x89   :  { %1542 = vmatprep.subr.bf16.mxu1 %v1778_v18 }
  0x8a   :  { %1146 = vmatmul.mubr.bf16.gmra.mxu0 %v1775_v19  ;;  %v1267_v19 = vrot.slane %v1262_v11, %v1266_v5 }
  0x8b   :  { %1199 = vmatmul.mubr.bf16.gmra.mxu1 %v1781_v20  ;;  %1214 = vmatpush1.bf16.msra.mxu0 %v1776_v21 }
  0x8c   :  { %1550 = vmatpush1.bf16.msra.mxu1 %v1776_v21  ;;  %1215 = vmatprep.subr.bf16.mxu0 %v1784_v22 }
  0x8d   :  { %1543 = vmatprep.subr.bf16.mxu1 %v1784_v22  ;;  %1241 = vmatprep.mubr.bf16.mxu0 %v1799_v25  ;;  %v1287_v22 = vrot.slane %v1282_v12, %v1266_v5 }
  0x8e   :  { %1251 = vmatprep.mubr.bf16.mxu1 %v1799_v25 }
  0x8f   :  { %1216 = vmatpush1.bf16.msra.mxu0 %v1782_v23 }
  0x90   :  { %1551 = vmatpush1.bf16.msra.mxu1 %v1782_v23  ;;  %1217 = vmatprep.subr.bf16.mxu0 %v1787_v24  ;;  %v1271_v23 = vrot.slane %v1262_v11, %v1270_v6 }
  0x91   :  { %1544 = vmatprep.subr.bf16.mxu1 %v1787_v24 }
  0x93   :  { %1218 = vmatpush1.bf16.msra.mxu0 %v1785_v26 }
  0x94   :  { %1552 = vmatpush1.bf16.msra.mxu1 %v1785_v26  ;;  %1219 = vmatprep.subr.bf16.mxu0 %v1790_v27 }
  0x95   :  { %1545 = vmatprep.subr.bf16.mxu1 %v1790_v27 }
  0x97   :  { %1220 = vmatpush1.bf16.msra.mxu0 %v1788_v28 }
  0x98   :  { %1553 = vmatpush1.bf16.msra.mxu1 %v1788_v28  ;;  %1221 = vmatprep.subr.bf16.mxu0 %v1793_v29 }
  0x99   :  { %1546 = vmatprep.subr.bf16.mxu1 %v1793_v29 }
  0x9b   :  { %1222 = vmatpush1.bf16.msra.mxu0 %v1791_v30 }
  0x9c   :  { %1554 = vmatpush1.bf16.msra.mxu1 %v1791_v30  ;;  %1223 = vmatprep.subr.bf16.mxu0 %v1796_v31 }
  0x9d   :  { %1547 = vmatprep.subr.bf16.mxu1 %v1796_v31 }
  0x9f   :  { %1224 = vmatpush1.bf16.msra.mxu0 %v1794_v32 }
  0xa0   :  { %1555 = vmatpush1.bf16.msra.mxu1 %v1794_v32 }
  0xa2   :  { %1242 = vmatmul.mubr.bf16.vlgmr.msra.gmra.mxu0 %v1797_v33  ;;  %v1302_v33 = vld [vmem:[%s2344_s4] sm:$0x3] }
  0xa3   :  { %1252 = vmatmul.mubr.bf16.vlgmr.msra.gmra.mxu1 %v1798_v34 }
 0x102   :  { %v1031_v35 = vpop.f32.mrf.mxu0 }
 0x103   :  { %v1084_v36 = vpop.f32.mrf.mxu1 }
 0x104   :  { %v1033_v37 = vpop.f32.mrf.mxu0  ;;  %v1085_v1 = vadd.f32 %v1084_v36, %v1031_v35 }
 0x105   :  { %v1086_v38 = vpop.f32.mrf.mxu1 }
 0x106   :  { %v1035_v39 = vpop.f32.mrf.mxu0  ;;  %v1087_v7 = vadd.f32 %v1086_v38, %v1033_v37  ;;  %v1291_v38 = vrot.slane %v1282_v12, %v1270_v6 }
 0x107   :  { %v1088_v40 = vpop.f32.mrf.mxu1 }
 0x108   :  { %v1037_v41 = vpop.f32.mrf.mxu0  ;;  %v1089_v15 = vadd.f32 %v1088_v40, %v1035_v39 }
 0x109   :  { %v1090_v42 = vpop.f32.mrf.mxu1 }
 0x10a   :  { %v1041_v43 = vpop.f32.mrf.mxu0  ;;  %v1091_v24 = vadd.f32 %v1090_v42, %v1037_v41 }
 0x10b   :  { %v1094_v44 = vpop.f32.mrf.mxu1 }
 0x10c   :  { %v1043_v45 = vpop.f32.mrf.mxu0  ;;  %v1095_v2 = vadd.f32 %v1094_v44, %v1041_v43 }
 0x10d   :  { %v1096_v46 = vpop.f32.mrf.mxu1 }
 0x10e   :  { %v1045_v47 = vpop.f32.mrf.mxu0  ;;  %v1097_v8 = vadd.f32 %v1096_v46, %v1043_v45  ;;  %v1315_v46 = vrot.slane %v1302_v33, %v1266_v5 }
 0x10f   :  { %v1098_v48 = vpop.f32.mrf.mxu1 }
 0x110   :  { %v1047_v49 = vpop.f32.mrf.mxu0  ;;  %v1099_v16 = vadd.f32 %v1098_v48, %v1045_v47  ;;  %v1319_v47 = vrot.slane %v1302_v33, %v1270_v6 }
 0x111   :  { %v1100_v50 = vpop.f32.mrf.mxu1 }
 0x112   :  { %v1101_v25 = vadd.f32 %v1100_v50, %v1047_v49 }
 0x142   :  { %v1137_v51 = vpop.f32.mrf.mxu0 }
 0x143   :  { %v1190_v52 = vpop.f32.mrf.mxu1  ;;  %v1138_v9 = vadd.f32 %v1137_v51, %v1085_v1 }
 0x144   :  { %v1139_v53 = vpop.f32.mrf.mxu0 }
 0x145   :  { %v1192_v54 = vpop.f32.mrf.mxu1  ;;  %v1140_v13 = vadd.f32 %v1139_v53, %v1087_v7  ;;  %v1191_v20 = vadd.f32 %v1190_v52, %v1138_v9 }
 0x146   :  { %v1141_v55 = vpop.f32.mrf.mxu0 }
 0x147   :  { %v1194_v56 = vpop.f32.mrf.mxu1  ;;  %v1142_v26 = vadd.f32 %v1141_v55, %v1089_v15  ;;  %v1193_v30 = vadd.f32 %v1192_v54, %v1140_v13 }
 0x148   :  { %v1143_v57 = vpop.f32.mrf.mxu0 }
 0x149   :  { %v2316_v58 = vpop.f32.mrf.mxu1  ;;  %v1144_v35 = vadd.f32 %v1143_v57, %v1091_v24  ;;  %v1195_v44 = vadd.f32 %v1194_v56, %v1142_v26 }
 0x14a   :  { %v1147_v59 = vpop.f32.mrf.mxu0 }
 0x14b   :  { %v1200_v60 = vpop.f32.mrf.mxu1  ;;  %v1148_v10 = vadd.f32 %v1147_v59, %v1095_v2  ;;  %v1197_v54 = vadd.f32 %v2316_v58, %v1144_v35 }
 0x14c   :  { %v1149_v62 = vpop.f32.mrf.mxu0 }
 0x14d   :  { %v1202_v63 = vpop.f32.mrf.mxu1  ;;  %v1150_v14 = vadd.f32 %v1149_v62, %v1097_v8  ;;  %v1201_v21 = vadd.f32 %v1200_v60, %v1148_v10 }
 0x14e   :  { %v1151_v3 = vpop.f32.mrf.mxu0 }
 0x14f   :  { %v1204_v4 = vpop.f32.mrf.mxu1  ;;  %v1152_v27 = vadd.f32 %v1151_v3, %v1099_v16  ;;  %v1203_v31 = vadd.f32 %v1202_v63, %v1150_v14 }
 0x150   :  { %v1153_v17 = vpop.f32.mrf.mxu0 }
 0x151   :  { %v1206_v18 = vpop.f32.mrf.mxu1  ;;  %v1154_v36 = vadd.f32 %v1153_v17, %v1101_v25  ;;  %v1205_v45 = vadd.f32 %v1204_v4, %v1152_v27 }
 0x153   :  { %v1207_v55 = vadd.f32 %v1206_v18, %v1154_v36 }
 0x162   :  { %v1243_v28 = vpop.f32.mrf.mxu0 }
 0x163   :  { %v1253_v29 = vpop.f32.mrf.mxu1  ;;  %v1244_v32 = vadd.f32 %v1243_v28, %v1191_v20 }
 0x164   :  { %v1254_v34 = vadd.f32 %v1253_v29, %v1201_v21  ;;  %v1245_v37 = vpop.f32.mrf.mxu0 }
 0x165   :  { %v1255_v39 = vpop.f32.mrf.mxu1  ;;  %v1274_v40 = vmul.f32 %v1267_v19, %v1244_v32  ;;  %v1246_v42 = vadd.f32 %v1245_v37, %v1193_v30 }
 0x166   :  { %v1278_v41 = vmul.f32 %v1267_v19, %v1254_v34  ;;  %v1256_v43 = vadd.f32 %v1255_v39, %v1203_v31  ;;  %v1247_v48 = vpop.f32.mrf.mxu0 }
 0x167   :  { %v1257_v49 = vpop.f32.mrf.mxu1  ;;  %v1294_v50 = vadd.f32 %v1287_v22, %v1274_v40  ;;  %v1275_v52 = vmul.f32 %v1271_v23, %v1246_v42  ;;  %v1248_v57 = vadd.f32 %v1247_v48, %v1195_v44 }
 0x168   :  { %v1298_v51 = vadd.f32 %v1287_v22, %v1278_v41  ;;  %v1279_v53 = vmul.f32 %v1271_v23, %v1256_v43  ;;  %v1258_v59 = vadd.f32 %v1257_v49, %v1205_v45  ;;  %v1249_v60 = vpop.f32.mrf.mxu0 }
 0x169   :  { %v1259_v61 = vpop.f32.mrf.mxu1  ;;  %v1303_v62 = vmin.f32 %v1294_v50, 0.0  ;;  %v1295_v0 = vadd.f32 %v1291_v38, %v1275_v52  ;;  %v1276_v1 = vmul.f32 %v1267_v19, %v1248_v57  ;;  %v1250_v3 = vadd.f32 %v1249_v60, %v1197_v54 }
 0x16a   :  { %v1307_v63 = vmin.f32 %v1298_v51, 0.0  ;;  %v1299_v56 = vadd.f32 %v1291_v38, %v1279_v53  ;;  %v1280_v2 = vmul.f32 %v1267_v19, %v1258_v59  ;;  %v1260_v4 = vadd.f32 %v1259_v61, %v1207_v55 }
 0x16b   :  { %v1322_v5 = vmul.f32 %v1315_v46, %v1303_v62  ;;  %v1304_v7 = vmin.f32 %v1295_v0, 0.0  ;;  %v1296_v9 = vadd.f32 %v1287_v22, %v1276_v1  ;;  %v1277_v58 = vmul.f32 %v1271_v23, %v1250_v3 }
 0x16c   :  { %v1326_v6 = vmul.f32 %v1315_v46, %v1307_v63  ;;  %v1308_v8 = vmin.f32 %v1299_v56, 0.0  ;;  %v1300_v10 = vadd.f32 %v1287_v22, %v1280_v2  ;;  %v1281_v11 = vmul.f32 %v1271_v23, %v1260_v4 }
 0x16d   :  { %v1323_v12 = vmul.f32 %v1319_v47, %v1304_v7  ;;  %v1305_v14 = vmin.f32 %v1296_v9, 0.0  ;;  %v1297_v16 = vadd.f32 %v1291_v38, %v1277_v58  ;;  %v1330_v18 = vsub.f32 %v1294_v50, %v1322_v5 }
 0x16e   :  { %v1327_v13 = vmul.f32 %v1319_v47, %v1308_v8  ;;  %v1309_v15 = vmin.f32 %v1300_v10, 0.0  ;;  %v1301_v17 = vadd.f32 %v1291_v38, %v1281_v11  ;;  %v1334_v20 = vsub.f32 %v1298_v51, %v1326_v6 }
 0x16f   :  { %v1331_v21 = vsub.f32 %v1295_v0, %v1323_v12  ;;  %v1324_v24 = vmul.f32 %v1315_v46, %v1305_v14  ;;  %v1306_v26 = vmin.f32 %v1297_v16, 0.0 }
 0x170   :  { %v1335_v19 = vsub.f32 %v1299_v56, %v1327_v13  ;;  %v1328_v25 = vmul.f32 %v1315_v46, %v1309_v15  ;;  %v1310_v27 = vmin.f32 %v1301_v17, 0.0 }
 0x171   :  { %v1536_v28 = vpack.c.bf16 %v1331_v21, %v1330_v18  ;;  %v1325_v30 = vmul.f32 %v1319_v47, %v1306_v26  ;;  %v1332_v23 = vsub.f32 %v1296_v9, %v1324_v24 }
 0x172   :  { %v1538_v29 = vpack.c.bf16 %v1335_v19, %v1334_v20  ;;  %v1329_v22 = vmul.f32 %v1319_v47, %v1310_v27  ;;  %v1336_v31 = vsub.f32 %v1300_v10, %v1328_v25 }
 0x173   :  { %1362 = vst [vmem:[%s2345_s5] sm:$0xff] %v1536_v28  ;;  %v1333_v32 = vsub.f32 %v1297_v16, %v1325_v30 }
 0x174   :  { %1364 = vst [vmem:[%s2345_s5 + $0x10] sm:$0xff] %v1538_v29  ;;  %v1337_v33 = vsub.f32 %v1301_v17, %v1329_v22 }
 0x175   :  { %v1537_v34 = vpack.c.bf16 %v1333_v32, %v1332_v23 }
 0x176   :  { %v1539_v35 = vpack.c.bf16 %v1337_v33, %v1336_v31 }
 0x177   :  { %1363 = vst [vmem:[%s2345_s5 + $0x8] sm:$0xff] %v1537_v34 }
 0x178   :  { %1365 = vst [vmem:[%s2345_s5 + $0x18] sm:$0xff] %v1539_v35 }

// kernel: forward_pallas.13
= control target key start
LH: loop header
LB: loop body
LE: loop exit
PB: predicated region body
PF: predicated region fallthrough
CT: control target
= control target key end

     0   :  { %s1694_s1 = inlined_call_operand.vmem [shape: bf16[1152,128], index: 1, kind: input, shape index: {}]   ;;  %s1695_s0 = inlined_call_operand.vmem [shape: bf16[32,1152], index: 0, kind: input, shape index: {}]   ;;  %s1696_s2 = inlined_call_operand.vmem [shape: f32[1,128], index: 2, kind: input, shape index: {}]   ;;  %s1697_s4 = inlined_call_operand.vmem [shape: bf16[32,128], index: 4, kind: input, shape index: {}, may-alias: {4,5}]   ;;  %s1698_s3 = inlined_call_operand.vmem [shape: f32[1,128], index: 3, kind: input, shape index: {}]   ;;  %s1699_s5 = inlined_call_operand.vmem [shape: bf16[32,128], index: 5, kind: output, shape index: {}, may-alias: {4,5}]  }
   0x1   :  { %v1278_v0 = vld [vmem:[%s1694_s1 + $0x78] sm:$0xff]   ;;  %v1282_v4 = vld [vmem:[%s1694_s1 + $0x70] sm:$0xff]   ;;  %v1286_v8 = vld [vmem:[%s1694_s1 + $0x68] sm:$0xff]  }
   0x2   :  { %v1279_v1 = vld [vmem:[%s1694_s1 + $0xf8] sm:$0xff]   ;;  %1136 = vmatprep.subr.bf16.mxu0 %v1278_v0  ;;  %v1283_v5 = vld [vmem:[%s1694_s1 + $0xf0] sm:$0xff]   ;;  %v1287_v9 = vld [vmem:[%s1694_s1 + $0xe8] sm:$0xff]  }
   0x3   :  { %v1280_v2 = vld [vmem:[%s1694_s1 + $0x38] sm:$0xff]   ;;  %1164 = vmatprep.subr.bf16.mxu1 %v1279_v1  ;;  %v1284_v6 = vld [vmem:[%s1694_s1 + $0x30] sm:$0xff]   ;;  %v1288_v10 = vld [vmem:[%s1694_s1 + $0x28] sm:$0xff]  }
   0x4   :  { %v1281_v3 = vld [vmem:[%s1694_s1 + $0xb8] sm:$0xff]   ;;  %1137 = vmatpush3.bf16.msra.mxu0 %v1280_v2  ;;  %v1285_v7 = vld [vmem:[%s1694_s1 + $0xb0] sm:$0xff]   ;;  %v1289_v11 = vld [vmem:[%s1694_s1 + $0xa8] sm:$0xff]  }
   0x5   :  { %1165 = vmatpush3.bf16.msra.mxu1 %v1281_v3  ;;  %1138 = vmatprep.subr.bf16.mxu0 %v1282_v4  ;;  %v1290_v12 = vld [vmem:[%s1694_s1 + $0x60] sm:$0xff]   ;;  %v1294_v16 = vld [vmem:[%s1694_s1 + $0x58] sm:$0xff]   ;;  %v1298_v20 = vld [vmem:[%s1694_s1 + $0x50] sm:$0xff]  }
   0x6   :  { %1166 = vmatprep.subr.bf16.mxu1 %v1283_v5  ;;  %v1291_v13 = vld [vmem:[%s1694_s1 + $0xe0] sm:$0xff]   ;;  %v1295_v17 = vld [vmem:[%s1694_s1 + $0xd8] sm:$0xff]   ;;  %v1299_v21 = vld [vmem:[%s1694_s1 + $0xd0] sm:$0xff]  }
   0x7   :  { %v1292_v14 = vld [vmem:[%s1694_s1 + $0x20] sm:$0xff]   ;;  %v1296_v18 = vld [vmem:[%s1694_s1 + $0x18] sm:$0xff]   ;;  %v1300_v22 = vld [vmem:[%s1694_s1 + $0x10] sm:$0xff]  }
   0x8   :  { %1139 = vmatpush3.bf16.msra.mxu0 %v1284_v6  ;;  %v1293_v15 = vld [vmem:[%s1694_s1 + $0xa0] sm:$0xff]   ;;  %v1297_v19 = vld [vmem:[%s1694_s1 + $0x98] sm:$0xff]   ;;  %v1301_v23 = vld [vmem:[%s1694_s1 + $0x90] sm:$0xff]  }
   0x9   :  { %1167 = vmatpush3.bf16.msra.mxu1 %v1285_v7  ;;  %1140 = vmatprep.subr.bf16.mxu0 %v1286_v8  ;;  %v1302_v24 = vld [vmem:[%s1694_s1 + $0x48] sm:$0xff]   ;;  %v1306_v28 = vld [vmem:[%s1694_s1 + $0x40] sm:$0xff]   ;;  %v1316_v36 = vld [vmem:[%s1694_s1 + $0x178] sm:$0xff]  }
   0xa   :  { %1168 = vmatprep.subr.bf16.mxu1 %v1287_v9  ;;  %v1303_v25 = vld [vmem:[%s1694_s1 + $0xc8] sm:$0xff]   ;;  %v1307_v29 = vld [vmem:[%s1694_s1 + $0xc0] sm:$0xff]   ;;  %v1317_v37 = vld [vmem:[%s1694_s1 + $0x138] sm:$0xff]  }
   0xb   :  { %v1304_v26 = vld [vmem:[%s1694_s1 + $0x8] sm:$0xff]   ;;  %v1308_v30 = vld [vmem:[%s1694_s1] sm:$0xff]   ;;  %v1318_v38 = vld [vmem:[%s1694_s1 + $0x1f8] sm:$0xff]  }
   0xc   :  { %1141 = vmatpush3.bf16.msra.mxu0 %v1288_v10  ;;  %v1305_v27 = vld [vmem:[%s1694_s1 + $0x88] sm:$0xff]   ;;  %v1309_v31 = vld [vmem:[%s1694_s1 + $0x80] sm:$0xff]   ;;  %v1319_v39 = vld [vmem:[%s1694_s1 + $0x1b8] sm:$0xff]  }
   0xd   :  { %1169 = vmatpush3.bf16.msra.mxu1 %v1289_v11  ;;  %1142 = vmatprep.subr.bf16.mxu0 %v1290_v12  ;;  %v1310_v32 = vld [vmem:[%s1695_s0] ss:$36 sps:$4 sm:$0xff]   ;;  %v1313_v34 = vld [vmem:[%s1695_s0 + $0x8] ss:$36 sps:$4 sm:$0xff]   ;;  %v1320_v40 = vld [vmem:[%s1694_s1 + $0x170] sm:$0xff]  }
   0xe   :  { %1170 = vmatprep.subr.bf16.mxu1 %v1291_v13  ;;  %v1312_v33 = vld [vmem:[%s1695_s0 + $0x4] ss:$36 sps:$4 sm:$0xff]   ;;  %v1315_v35 = vld [vmem:[%s1695_s0 + $0xc] ss:$36 sps:$4 sm:$0xff]   ;;  %v1332_v52 = vld [vmem:[%s1694_s1 + $0x158] sm:$0xff]  }
   0xf   :  { %741 = vmatprep.mubr.bf16.mxu0 %v1312_v33  ;;  %790 = vmatprep.mubr.bf16.mxu1 %v1315_v35  ;;  %v1321_v41 = vld [vmem:[%s1694_s1 + $0x130] sm:$0xff]   ;;  %v1324_v44 = vld [vmem:[%s1694_s1 + $0x168] sm:$0xff]   ;;  %v1328_v48 = vld [vmem:[%s1694_s1 + $0x160] sm:$0xff]  }
  0x10   :  { %1143 = vmatpush3.bf16.msra.mxu0 %v1292_v14  ;;  %v1322_v42 = vld [vmem:[%s1694_s1 + $0x1f0] sm:$0xff]   ;;  %v1325_v45 = vld [vmem:[%s1694_s1 + $0x128] sm:$0xff]   ;;  %v1329_v49 = vld [vmem:[%s1694_s1 + $0x120] sm:$0xff]  }
  0x11   :  { %1171 = vmatpush3.bf16.msra.mxu1 %v1293_v15  ;;  %1144 = vmatprep.subr.bf16.mxu0 %v1294_v16  ;;  %v1323_v43 = vld [vmem:[%s1694_s1 + $0x1b0] sm:$0xff]   ;;  %v1326_v46 = vld [vmem:[%s1694_s1 + $0x1e8] sm:$0xff]   ;;  %v1330_v50 = vld [vmem:[%s1694_s1 + $0x1e0] sm:$0xff]  }
  0x12   :  { %1172 = vmatprep.subr.bf16.mxu1 %v1295_v17  ;;  %v1327_v47 = vld [vmem:[%s1694_s1 + $0x1a8] sm:$0xff]   ;;  %v1331_v51 = vld [vmem:[%s1694_s1 + $0x1a0] sm:$0xff]   ;;  %v1333_v53 = vld [vmem:[%s1694_s1 + $0x118] sm:$0xff]  }
  0x13   :  { %v1334_v54 = vld [vmem:[%s1695_s0 + $0x4c] ss:$36 sps:$4 sm:$0xff]   ;;  %v1336_v55 = vld [vmem:[%s1695_s0 + $0x54] ss:$36 sps:$4 sm:$0xff]   ;;  %v1350_v4 = vld [vmem:[%s1694_s1 + $0x140] sm:$0xff]  }
  0x14   :  { %1145 = vmatpush3.bf16.msra.mxu0 %v1296_v18  ;;  %v1338_v56 = vld [vmem:[%s1694_s1 + $0x1d8] sm:$0xff]   ;;  %v1339_v57 = vld [vmem:[%s1695_s0 + $0x48] ss:$36 sps:$4 sm:$0xff]   ;;  %v1340_v58 = vld [vmem:[%s1695_s0 + $0x50] ss:$36 sps:$4 sm:$0xff]  }
  0x15   :  { %1173 = vmatpush3.bf16.msra.mxu1 %v1297_v19  ;;  %1146 = vmatprep.subr.bf16.mxu0 %v1298_v20  ;;  %v1341_v59 = vld [vmem:[%s1694_s1 + $0x198] sm:$0xff]   ;;  %v1342_v60 = vld [vmem:[%s1694_s1 + $0x150] sm:$0xff]   ;;  %v1346_v0 = vld [vmem:[%s1694_s1 + $0x148] sm:$0xff]  }
  0x16   :  { %1174 = vmatprep.subr.bf16.mxu1 %v1299_v21  ;;  %v1343_v61 = vld [vmem:[%s1694_s1 + $0x110] sm:$0xff]   ;;  %v1347_v1 = vld [vmem:[%s1694_s1 + $0x108] sm:$0xff]   ;;  %v1351_v5 = vld [vmem:[%s1694_s1 + $0x100] sm:$0xff]  }
  0x17   :  { %v1344_v62 = vld [vmem:[%s1694_s1 + $0x1d0] sm:$0xff]   ;;  %v1348_v2 = vld [vmem:[%s1694_s1 + $0x1c8] sm:$0xff]   ;;  %v1352_v6 = vld [vmem:[%s1694_s1 + $0x1c0] sm:$0xff]  }
  0x18   :  { %1147 = vmatpush3.bf16.msra.mxu0 %v1300_v22  ;;  %v1345_v63 = vld [vmem:[%s1694_s1 + $0x190] sm:$0xff]   ;;  %v1349_v3 = vld [vmem:[%s1694_s1 + $0x188] sm:$0xff]   ;;  %v1356_v9 = vld [vmem:[%s1694_s1 + $0x180] sm:$0xff]  }
  0x19   :  { %1175 = vmatpush3.bf16.msra.mxu1 %v1301_v23  ;;  %1148 = vmatprep.subr.bf16.mxu0 %v1302_v24  ;;  %v1353_v7 = vld [vmem:[%s1695_s0 + $0x10] ss:$36 sps:$4 sm:$0xff]   ;;  %v1357_v10 = vld [vmem:[%s1694_s1 + $0x238] sm:$0xff]   ;;  %v1365_v16 = vld [vmem:[%s1694_s1 + $0x228] sm:$0xff]  }
  0x1a   :  { %1176 = vmatprep.subr.bf16.mxu1 %v1303_v25  ;;  %v1355_v8 = vld [vmem:[%s1695_s0 + $0x14] ss:$36 sps:$4 sm:$0xff]   ;;  %v1360_v12 = vld [vmem:[%s1695_s0 + $0x1c] ss:$36 sps:$4 sm:$0xff]   ;;  %v1366_v17 = vld [vmem:[%s1695_s0 + $0x64] ss:$36 sps:$4 sm:$0xff]  }
  0x1b   :  { %v1358_v11 = vld [vmem:[%s1695_s0 + $0x18] ss:$36 sps:$4 sm:$0xff]   ;;  %v1361_v13 = vld [vmem:[%s1694_s1 + $0x230] sm:$0xff]   ;;  %v1368_v18 = vld [vmem:[%s1695_s0 + $0x60] ss:$36 sps:$4 sm:$0xff]  }
  0x1c   :  { %1149 = vmatpush3.bf16.msra.mxu0 %v1304_v26  ;;  %v1362_v14 = vld [vmem:[%s1695_s0 + $0x5c] ss:$36 sps:$4 sm:$0xff]   ;;  %v1371_v22 = vld [vmem:[%s1694_s1 + $0x210] sm:$0xff]   ;;  %v1372_v23 = vld [vmem:[%s1694_s1 + $0x208] sm:$0xff]  }
  0x1d   :  { %1177 = vmatpush3.bf16.msra.mxu1 %v1305_v27  ;;  %1150 = vmatprep.subr.bf16.mxu0 %v1306_v28  ;;  %v1364_v15 = vld [vmem:[%s1695_s0 + $0x58] ss:$36 sps:$4 sm:$0xff]   ;;  %v1369_v19 = vld [vmem:[%s1694_s1 + $0x220] sm:$0xff]   ;;  %v1375_v25 = vld [vmem:[%s1695_s0 + $0x68] ss:$36 sps:$4 sm:$0xff]  }
  0x1e   :  { %1178 = vmatprep.subr.bf16.mxu1 %v1307_v29  ;;  %v1370_v20 = vld [vmem:[%s1694_s1 + $0x218] sm:$0xff]   ;;  %v1374_v21 = vld [vmem:[%s1695_s0 + $0x20] ss:$36 sps:$4 sm:$0xff]  }
  0x1f   :  { %v1373_v24 = vld [vmem:[%s1694_s1 + $0x200] sm:$0xff]  }
  0x20   :  { %1151 = vmatpush3.bf16.msra.mxu0 %v1308_v30 }
  0x21   :  { %1179 = vmatpush3.bf16.msra.mxu1 %v1309_v31  ;;  %1192 = vmatprep.subr.bf16.mxu0 %v1316_v36 }
  0x22   :  { %1220 = vmatprep.subr.bf16.mxu1 %v1318_v38 }
  0x23   :  { %742 = vmatmul.mubr.bf16.vlgmr.msra.gmra.mxu0 %v1310_v32 }
  0x24   :  { %791 = vmatmul.mubr.bf16.vlgmr.msra.gmra.mxu1 %v1313_v34  ;;  %1193 = vmatpush3.bf16.msra.mxu0 %v1317_v37 }
  0x25   :  { %1221 = vmatpush3.bf16.msra.mxu1 %v1319_v39  ;;  %1194 = vmatprep.subr.bf16.mxu0 %v1320_v40 }
  0x26   :  { %1222 = vmatprep.subr.bf16.mxu1 %v1322_v42  ;;  %749 = vmatprep.mubr.bf16.mxu0 %v1334_v54 }
  0x27   :  { %798 = vmatprep.mubr.bf16.mxu1 %v1336_v55 }
  0x28   :  { %1195 = vmatpush3.bf16.msra.mxu0 %v1321_v41 }
  0x29   :  { %1223 = vmatpush3.bf16.msra.mxu1 %v1323_v43  ;;  %1196 = vmatprep.subr.bf16.mxu0 %v1324_v44 }
  0x2a   :  { %1224 = vmatprep.subr.bf16.mxu1 %v1326_v46 }
  0x2b   :  { %750 = vmatmul.mubr.bf16.gmra.mxu0 %v1339_v57 }
  0x2c   :  { %1197 = vmatpush3.bf16.msra.mxu0 %v1325_v45  ;;  %799 = vmatmul.mubr.bf16.gmra.mxu1 %v1340_v58 }
  0x2d   :  { %1225 = vmatpush3.bf16.msra.mxu1 %v1327_v47  ;;  %1198 = vmatprep.subr.bf16.mxu0 %v1328_v48 }
  0x2e   :  { %1226 = vmatprep.subr.bf16.mxu1 %v1330_v50  ;;  %839 = vmatprep.mubr.bf16.mxu0 %v1355_v8 }
  0x2f   :  { %888 = vmatprep.mubr.bf16.mxu1 %v1360_v12 }
  0x30   :  { %1199 = vmatpush3.bf16.msra.mxu0 %v1329_v49 }
  0x31   :  { %1227 = vmatpush3.bf16.msra.mxu1 %v1331_v51  ;;  %1200 = vmatprep.subr.bf16.mxu0 %v1332_v52 }
  0x32   :  { %1228 = vmatprep.subr.bf16.mxu1 %v1338_v56 }
  0x34   :  { %1201 = vmatpush3.bf16.msra.mxu0 %v1333_v53 }
  0x35   :  { %1229 = vmatpush3.bf16.msra.mxu1 %v1341_v59  ;;  %1202 = vmatprep.subr.bf16.mxu0 %v1342_v60 }
  0x36   :  { %1230 = vmatprep.subr.bf16.mxu1 %v1344_v62 }
  0x38   :  { %1203 = vmatpush3.bf16.msra.mxu0 %v1343_v61 }
  0x39   :  { %1231 = vmatpush3.bf16.msra.mxu1 %v1345_v63  ;;  %1204 = vmatprep.subr.bf16.mxu0 %v1346_v0 }
  0x3a   :  { %1232 = vmatprep.subr.bf16.mxu1 %v1348_v2 }
  0x3c   :  { %1205 = vmatpush3.bf16.msra.mxu0 %v1347_v1 }
  0x3d   :  { %1233 = vmatpush3.bf16.msra.mxu1 %v1349_v3  ;;  %1206 = vmatprep.subr.bf16.mxu0 %v1350_v4 }
  0x3e   :  { %1234 = vmatprep.subr.bf16.mxu1 %v1352_v6 }
  0x40   :  { %1207 = vmatpush3.bf16.msra.mxu0 %v1351_v5 }
  0x41   :  { %1235 = vmatpush3.bf16.msra.mxu1 %v1356_v9  ;;  %1258 = vmatprep.subr.bf16.mxu0 %v1357_v10 }
  0x43   :  { %840 = vmatmul.mubr.bf16.vlgmr.msra.gmra.mxu0 %v1353_v7 }
  0x44   :  { %1259 = vmatpush3.bf16.msra.mxu0 %v1357_v10  ;;  %889 = vmatmul.mubr.bf16.vlgmr.msra.gmra.mxu1 %v1358_v11 }
  0x45   :  { %1260 = vmatprep.subr.bf16.mxu0 %v1361_v13  ;;  %847 = vmatprep.mubr.bf16.mxu0 %v1362_v14 }
  0x46   :  { %896 = vmatprep.mubr.bf16.mxu1 %v1366_v17 }
  0x48   :  { %1261 = vmatpush3.bf16.msra.mxu0 %v1361_v13 }
  0x49   :  { %1262 = vmatprep.subr.bf16.mxu0 %v1365_v16 }
  0x4b   :  { %848 = vmatmul.mubr.bf16.gmra.mxu0 %v1364_v15 }
  0x4c   :  { %1263 = vmatpush3.bf16.msra.mxu0 %v1365_v16  ;;  %897 = vmatmul.mubr.bf16.gmra.mxu1 %v1368_v18  ;;  %v1106_v18 = vld [vmem:[%s1696_s2] ss:$0 sm:$0xff] }
  0x4d   :  { %1264 = vmatprep.subr.bf16.mxu0 %v1369_v19  ;;  %1274 = vmatprep.mubr.bf16.mxu0 %v1374_v21 }
  0x50   :  { %1265 = vmatpush3.bf16.msra.mxu0 %v1369_v19 }
  0x51   :  { %1266 = vmatprep.subr.bf16.mxu0 %v1370_v20 }
  0x54   :  { %1267 = vmatpush3.bf16.msra.mxu0 %v1370_v20 }
  0x55   :  { %1268 = vmatprep.subr.bf16.mxu0 %v1371_v22 }
  0x58   :  { %1269 = vmatpush3.bf16.msra.mxu0 %v1371_v22  ;;  %v1134_v22 = vld [vmem:[%s1697_s4 + $0x8] sm:$0xff]  }
  0x59   :  { %1270 = vmatprep.subr.bf16.mxu0 %v1372_v23 }
  0x5c   :  { %1271 = vmatpush3.bf16.msra.mxu0 %v1372_v23 }
  0x5d   :  { %1272 = vmatprep.subr.bf16.mxu0 %v1373_v24 }
  0x60   :  { %1273 = vmatpush3.bf16.msra.mxu0 %v1373_v24  ;;  %v1107_v24 = vld [vmem:[%s1698_s3] ss:$0 sm:$0xff] }
  0x63   :  { %1275 = vmatmul.mubr.bf16.vlgmr.msra.gmra.mxu0 %v1375_v25 }
  0xe3   :  { %v1152_v26 = vpop.f32.mrf.mxu0 }
  0xe4   :  { %v1180_v27 = vpop.f32.mrf.mxu1 }
  0xe5   :  { %v1153_v28 = vpop.f32.mrf.mxu0 }
  0xe6   :  { %v1181_v29 = vpop.f32.mrf.mxu1  ;;  %v1154_v57 = vadd.f32 %v1153_v28, %v1152_v26  ;;  %v1117_v28 = vld [vmem:[%s1697_s4] sm:$0xff]  }
  0xe7   :  { %v1155_v30 = vpop.f32.mrf.mxu0  ;;  %v1182_v58 = vadd.f32 %v1181_v29, %v1180_v27 }
  0xe8   :  { %v1183_v31 = vpop.f32.mrf.mxu1 }
  0xe9   :  { %v1156_v32 = vpop.f32.mrf.mxu0  ;;  %v793_v2 = vadd.f32 %v1182_v58, %v1154_v57 }
  0xea   :  { %v1184_v34 = vpop.f32.mrf.mxu1  ;;  %v1157_v3 = vadd.f32 %v1156_v32, %v1155_v30  ;;  %v1122_v30 = vunpack.c.l.bf16 %v1134_v22 }
  0xeb   :  { %v1158_v33 = vpop.f32.mrf.mxu0  ;;  %v1185_v4 = vadd.f32 %v1184_v34, %v1183_v31 }
  0xec   :  { %v1186_v35 = vpop.f32.mrf.mxu1 }
  0xed   :  { %v1159_v36 = vpop.f32.mrf.mxu0  ;;  %v796_v13 = vadd.f32 %v1185_v4, %v1157_v3 }
  0xee   :  { %v1187_v37 = vpop.f32.mrf.mxu1  ;;  %v1160_v55 = vadd.f32 %v1159_v36, %v1158_v33  ;;  %v1118_v36 = vunpack.c.l.bf16 %v1117_v28 }
  0xef   :  { %v1161_v38 = vpop.f32.mrf.mxu0  ;;  %v1188_v56 = vadd.f32 %v1187_v37, %v1186_v35 }
  0xf0   :  { %v1189_v39 = vpop.f32.mrf.mxu1 }
  0xf1   :  { %v1162_v40 = vpop.f32.mrf.mxu0  ;;  %v801_v62 = vadd.f32 %v1188_v56, %v1160_v55 }
  0xf2   :  { %v1190_v42 = vpop.f32.mrf.mxu1  ;;  %v1163_v63 = vadd.f32 %v1162_v40, %v1161_v38  ;;  %v1123_v40 = vunpack.c.h.bf16 %v1134_v22 }
  0xf3   :  { %v1191_v0 = vadd.f32 %v1190_v42, %v1189_v39 }
  0xf5   :  { %v804_v9 = vadd.f32 %v1191_v0, %v1163_v63 }
 0x103   :  { %v1208_v41 = vpop.f32.mrf.mxu0 }
 0x104   :  { %v1236_v44 = vpop.f32.mrf.mxu1 }
 0x105   :  { %v1209_v43 = vpop.f32.mrf.mxu0 }
 0x106   :  { %v1237_v46 = vpop.f32.mrf.mxu1  ;;  %v1210_v1 = vadd.f32 %v1209_v43, %v1208_v41 }
 0x107   :  { %v1211_v45 = vpop.f32.mrf.mxu0  ;;  %v1238_v11 = vadd.f32 %v1237_v46, %v1236_v44 }
 0x108   :  { %v1239_v48 = vpop.f32.mrf.mxu1  ;;  %v842_v10 = vadd.f32 %v1210_v1, %v793_v2 }
 0x109   :  { %v1212_v47 = vpop.f32.mrf.mxu0 }
 0x10a   :  { %v1240_v50 = vpop.f32.mrf.mxu1  ;;  %v1213_v12 = vadd.f32 %v1212_v47, %v1211_v45  ;;  %v891_v23 = vadd.f32 %v1238_v11, %v842_v10  ;;  %v1119_v45 = vunpack.c.h.bf16 %v1117_v28 }
 0x10b   :  { %v1214_v49 = vpop.f32.mrf.mxu0  ;;  %v1241_v20 = vadd.f32 %v1240_v50, %v1239_v48 }
 0x10c   :  { %v1242_v52 = vpop.f32.mrf.mxu1  ;;  %v845_v19 = vadd.f32 %v1213_v12, %v796_v13 }
 0x10d   :  { %v1215_v51 = vpop.f32.mrf.mxu0 }
 0x10e   :  { %v1243_v54 = vpop.f32.mrf.mxu1  ;;  %v1216_v59 = vadd.f32 %v1215_v51, %v1214_v49  ;;  %v894_v35 = vadd.f32 %v1241_v20, %v845_v19 }
 0x10f   :  { %v1217_v53 = vpop.f32.mrf.mxu0  ;;  %v1244_v6 = vadd.f32 %v1243_v54, %v1242_v52 }
 0x110   :  { %v1245_v61 = vpop.f32.mrf.mxu1  ;;  %v850_v5 = vadd.f32 %v1216_v59, %v801_v62 }
 0x111   :  { %v1218_v60 = vpop.f32.mrf.mxu0 }
 0x112   :  { %v1219_v7 = vadd.f32 %v1218_v60, %v1217_v53  ;;  %v1246_v8 = vpop.f32.mrf.mxu1  ;;  %v899_v16 = vadd.f32 %v1244_v6, %v850_v5 }
 0x113   :  { %v1247_v15 = vadd.f32 %v1246_v8, %v1245_v61 }
 0x114   :  { %v853_v14 = vadd.f32 %v1219_v7, %v804_v9 }
 0x116   :  { %v902_v29 = vadd.f32 %v1247_v15, %v853_v14 }
 0x123   :  { %v1276_v17 = vpop.f32.mrf.mxu0 }
 0x124   :  { %v948_v21 = vadd.f32 %v1276_v17, %v899_v16 }
 0x125   :  { %v939_v25 = vpop.f32.mrf.mxu0 }
 0x126   :  { %v963_v26 = vmul.f32 %v1106_v18, %v948_v21  ;;  %v940_v27 = vadd.f32 %v939_v25, %v891_v23 }
 0x127   :  { %v1277_v31 = vpop.f32.mrf.mxu0 }
 0x128   :  { %v974_v32 = vadd.f32 %v1107_v24, %v963_v26  ;;  %v961_v33 = vmul.f32 %v1106_v18, %v940_v27  ;;  %v951_v34 = vadd.f32 %v1277_v31, %v902_v29 }
 0x129   :  { %v942_v37 = vpop.f32.mrf.mxu0 }
 0x12a   :  { %v972_v38 = vadd.f32 %v1107_v24, %v961_v33  ;;  %v964_v39 = vmul.f32 %v1106_v18, %v951_v34  ;;  %v943_v41 = vadd.f32 %v942_v37, %v894_v35  ;;  %v986_v42 = vadd.f32 %v1122_v30, %v974_v32 }
 0x12c   :  { %v975_v43 = vadd.f32 %v1107_v24, %v964_v39  ;;  %v962_v44 = vmul.f32 %v1106_v18, %v943_v41  ;;  %v984_v46 = vadd.f32 %v1118_v36, %v972_v38  ;;  %v990_v49 = vmax.f32 %v986_v42, 0.0 }
 0x12e   :  { %v987_v47 = vadd.f32 %v1123_v40, %v975_v43  ;;  %v973_v48 = vadd.f32 %v1107_v24, %v962_v44  ;;  %v988_v52 = vmax.f32 %v984_v46, 0.0 }
 0x130   :  { %v991_v50 = vmax.f32 %v987_v47, 0.0  ;;  %v985_v51 = vadd.f32 %v1119_v45, %v973_v48 }
 0x132   :  { %v1132_v53 = vpack.c.bf16 %v991_v50, %v990_v49  ;;  %v989_v54 = vmax.f32 %v985_v51, 0.0 }
 0x134   :  { %1135 = vst [vmem:[%s1699_s5 + $0x8] sm:$0xff] %v1132_v53   ;;  %v1127_v55 = vpack.c.bf16 %v989_v54, %v988_v52 }
 0x136   :  { %1128 = vst [vmem:[%s1699_s5] sm:$0xff] %v1127_v55  }

// kernel: forward_pallas.14
= control target key start
LH: loop header
LB: loop body
LE: loop exit
PB: predicated region body
PF: predicated region fallthrough
CT: control target
= control target key end

     0   :  { %s2069_s1 = inlined_call_operand.vmem [shape: bf16[1152,256], index: 1, kind: input, shape index: {}]   ;;  %s2070_s0 = inlined_call_operand.vmem [shape: bf16[8,1152], index: 0, kind: input, shape index: {}]   ;;  %s2071_s2 = inlined_call_operand.vmem [shape: f32[1,256], index: 2, kind: input, shape index: {}]   ;;  %s2072_s3 = inlined_call_operand.vmem [shape: f32[1,256], index: 3, kind: input, shape index: {}]   ;;  %s2073_s4 = inlined_call_operand.vmem [shape: f32[1,256], index: 4, kind: input, shape index: {}]   ;;  %s2074_s5 = inlined_call_operand.vmem [shape: bf16[8,256], index: 5, kind: output, shape index: {}]  }
   0x1   :  { %v1342_v0 = vld [vmem:[%s2069_s1 + $0x74] ss:$8 sps:$4 sm:$0xff]   ;;  %v1346_v2 = vld [vmem:[%s2069_s1 + $0x70] ss:$8 sps:$4 sm:$0xff]   ;;  %v1348_v4 = vld [vmem:[%s2069_s1 + $0x64] ss:$8 sps:$4 sm:$0xff]  }
   0x2   :  { %v1344_v1 = vld [vmem:[%s2069_s1 + $0x174] ss:$8 sps:$4 sm:$0xff]   ;;  %922 = vmatprep.subr.bf16.mxu0 %v1342_v0  ;;  %v1347_v3 = vld [vmem:[%s2069_s1 + $0x170] ss:$8 sps:$4 sm:$0xff]   ;;  %v1350_v5 = vld [vmem:[%s2069_s1 + $0x164] ss:$8 sps:$4 sm:$0xff]  }
   0x3   :  { %963 = vmatprep.subr.bf16.mxu1 %v1344_v1  ;;  %923 = vmatpush1.bf16.msra.mxu0 %v1346_v2  ;;  %v1352_v6 = vld [vmem:[%s2069_s1 + $0x60] ss:$8 sps:$4 sm:$0xff]   ;;  %v1354_v8 = vld [vmem:[%s2069_s1 + $0x54] ss:$8 sps:$4 sm:$0xff]   ;;  %v1358_v10 = vld [vmem:[%s2069_s1 + $0x50] ss:$8 sps:$4 sm:$0xff]  }
   0x4   :  { %964 = vmatpush1.bf16.msra.mxu1 %v1347_v3  ;;  %924 = vmatprep.subr.bf16.mxu0 %v1348_v4  ;;  %v1353_v7 = vld [vmem:[%s2069_s1 + $0x160] ss:$8 sps:$4 sm:$0xff]   ;;  %v1356_v9 = vld [vmem:[%s2069_s1 + $0x154] ss:$8 sps:$4 sm:$0xff]   ;;  %v1359_v11 = vld [vmem:[%s2069_s1 + $0x150] ss:$8 sps:$4 sm:$0xff]  }
   0x5   :  { %965 = vmatprep.subr.bf16.mxu1 %v1350_v5  ;;  %v1360_v12 = vld [vmem:[%s2069_s1 + $0x44] ss:$8 sps:$4 sm:$0xff]   ;;  %v1364_v14 = vld [vmem:[%s2069_s1 + $0x40] ss:$8 sps:$4 sm:$0xff]   ;;  %v1366_v16 = vld [vmem:[%s2069_s1 + $0x34] ss:$8 sps:$4 sm:$0xff]  }
   0x6   :  { %v1362_v13 = vld [vmem:[%s2069_s1 + $0x144] ss:$8 sps:$4 sm:$0xff]   ;;  %v1365_v15 = vld [vmem:[%s2069_s1 + $0x140] ss:$8 sps:$4 sm:$0xff]   ;;  %v1368_v17 = vld [vmem:[%s2069_s1 + $0x134] ss:$8 sps:$4 sm:$0xff]  }
   0x7   :  { %925 = vmatpush1.bf16.msra.mxu0 %v1352_v6  ;;  %v1370_v18 = vld [vmem:[%s2069_s1 + $0x30] ss:$8 sps:$4 sm:$0xff]   ;;  %v1372_v20 = vld [vmem:[%s2069_s1 + $0x24] ss:$8 sps:$4 sm:$0xff]   ;;  %v1376_v22 = vld [vmem:[%s2069_s1 + $0x20] ss:$8 sps:$4 sm:$0xff]  }
   0x8   :  { %966 = vmatpush1.bf16.msra.mxu1 %v1353_v7  ;;  %926 = vmatprep.subr.bf16.mxu0 %v1354_v8  ;;  %v1371_v19 = vld [vmem:[%s2069_s1 + $0x130] ss:$8 sps:$4 sm:$0xff]   ;;  %v1374_v21 = vld [vmem:[%s2069_s1 + $0x124] ss:$8 sps:$4 sm:$0xff]   ;;  %v1377_v23 = vld [vmem:[%s2069_s1 + $0x120] ss:$8 sps:$4 sm:$0xff]  }
   0x9   :  { %967 = vmatprep.subr.bf16.mxu1 %v1356_v9  ;;  %v1378_v24 = vld [vmem:[%s2069_s1 + $0x14] ss:$8 sps:$4 sm:$0xff]   ;;  %v1382_v26 = vld [vmem:[%s2069_s1 + $0x10] ss:$8 sps:$4 sm:$0xff]   ;;  %v1384_v28 = vld [vmem:[%s2069_s1 + $0x4] ss:$8 sps:$4 sm:$0xff]  }
   0xa   :  { %v1380_v25 = vld [vmem:[%s2069_s1 + $0x114] ss:$8 sps:$4 sm:$0xff]   ;;  %v1383_v27 = vld [vmem:[%s2069_s1 + $0x110] ss:$8 sps:$4 sm:$0xff]   ;;  %v1386_v29 = vld [vmem:[%s2069_s1 + $0x104] ss:$8 sps:$4 sm:$0xff]  }
   0xb   :  { %927 = vmatpush1.bf16.msra.mxu0 %v1358_v10  ;;  %v1388_v30 = vld [vmem:[%s2069_s1] ss:$8 sps:$4 sm:$0xff]   ;;  %v1390_v32 = vld [vmem:[%s2069_s1 + $0xf4] ss:$8 sps:$4 sm:$0xff]   ;;  %v1394_v34 = vld [vmem:[%s2069_s1 + $0xf0] ss:$8 sps:$4 sm:$0xff]  }
   0xc   :  { %968 = vmatpush1.bf16.msra.mxu1 %v1359_v11  ;;  %928 = vmatprep.subr.bf16.mxu0 %v1360_v12  ;;  %v1389_v31 = vld [vmem:[%s2069_s1 + $0x100] ss:$8 sps:$4 sm:$0xff]   ;;  %v1392_v33 = vld [vmem:[%s2069_s1 + $0x1f4] ss:$8 sps:$4 sm:$0xff]   ;;  %v1395_v35 = vld [vmem:[%s2069_s1 + $0x1f0] ss:$8 sps:$4 sm:$0xff]  }
   0xd   :  { %969 = vmatprep.subr.bf16.mxu1 %v1362_v13  ;;  %v1396_v36 = vld [vmem:[%s2069_s1 + $0xe4] ss:$8 sps:$4 sm:$0xff]   ;;  %v1400_v38 = vld [vmem:[%s2069_s1 + $0xe0] ss:$8 sps:$4 sm:$0xff]   ;;  %v1402_v40 = vld [vmem:[%s2069_s1 + $0xd4] ss:$8 sps:$4 sm:$0xff]  }
   0xe   :  { %v1398_v37 = vld [vmem:[%s2069_s1 + $0x1e4] ss:$8 sps:$4 sm:$0xff]   ;;  %v1401_v39 = vld [vmem:[%s2069_s1 + $0x1e0] ss:$8 sps:$4 sm:$0xff]   ;;  %v1404_v41 = vld [vmem:[%s2069_s1 + $0x1d4] ss:$8 sps:$4 sm:$0xff]  }
   0xf   :  { %929 = vmatpush1.bf16.msra.mxu0 %v1364_v14  ;;  %v1406_v42 = vld [vmem:[%s2069_s1 + $0xd0] ss:$8 sps:$4 sm:$0xff]   ;;  %v1408_v44 = vld [vmem:[%s2069_s1 + $0xc4] ss:$8 sps:$4 sm:$0xff]   ;;  %v1412_v49 = vld [vmem:[%s2069_s1 + $0xc0] ss:$8 sps:$4 sm:$0xff]  }
  0x10   :  { %970 = vmatpush1.bf16.msra.mxu1 %v1365_v15  ;;  %930 = vmatprep.subr.bf16.mxu0 %v1366_v16  ;;  %v1407_v43 = vld [vmem:[%s2069_s1 + $0x1d0] ss:$8 sps:$4 sm:$0xff]   ;;  %v1410_v45 = vld [vmem:[%s2069_s1 + $0x1c4] ss:$8 sps:$4 sm:$0xff]   ;;  %v1413_v50 = vld [vmem:[%s2069_s1 + $0x1c0] ss:$8 sps:$4 sm:$0xff]  }
  0x11   :  { %971 = vmatprep.subr.bf16.mxu1 %v1368_v17  ;;  %v21_v46 = vld [vmem:[%s2070_s0] sm:$0xff]  ;;  %v22_v48 = vld [vmem:[%s2070_s0 + $0x8] sm:$0xff]  ;;  %v1414_v52 = vld [vmem:[%s2069_s1 + $0xb4] ss:$8 sps:$4 sm:$0xff]  }
  0x12   :  { %v1187_v47 = vcombine.high %v21_v46, %v21_v46  ;;  %v1189_v51 = vcombine.high %v22_v48, %v22_v48  ;;  %v1416_v53 = vld [vmem:[%s2069_s1 + $0x1b4] ss:$8 sps:$4 sm:$0xff]   ;;  %v1418_v54 = vld [vmem:[%s2069_s1 + $0xb0] ss:$8 sps:$4 sm:$0xff]   ;;  %v1420_v56 = vld [vmem:[%s2069_s1 + $0xa4] ss:$8 sps:$4 sm:$0xff]   ;;  %v1186_v6 = vcombine.low %v21_v46, %v21_v46  ;;  %v1188_v7 = vcombine.low %v22_v48, %v22_v48 }
  0x13   :  { %931 = vmatpush1.bf16.msra.mxu0 %v1370_v18  ;;  %v1419_v55 = vld [vmem:[%s2069_s1 + $0x1b0] ss:$8 sps:$4 sm:$0xff]   ;;  %v1422_v57 = vld [vmem:[%s2069_s1 + $0x1a4] ss:$8 sps:$4 sm:$0xff]   ;;  %v1424_v58 = vld [vmem:[%s2069_s1 + $0xa0] ss:$8 sps:$4 sm:$0xff]  }
  0x14   :  { %972 = vmatpush1.bf16.msra.mxu1 %v1371_v19  ;;  %932 = vmatprep.subr.bf16.mxu0 %v1372_v20  ;;  %v1425_v59 = vld [vmem:[%s2069_s1 + $0x1a0] ss:$8 sps:$4 sm:$0xff]   ;;  %v1426_v60 = vld [vmem:[%s2069_s1 + $0x94] ss:$8 sps:$4 sm:$0xff]   ;;  %v1430_v62 = vld [vmem:[%s2069_s1 + $0x90] ss:$8 sps:$4 sm:$0xff]  }
  0x15   :  { %973 = vmatprep.subr.bf16.mxu1 %v1374_v21  ;;  %954 = vmatprep.mubr.bf16.mxu0 %v1187_v47  ;;  %v1428_v61 = vld [vmem:[%s2069_s1 + $0x194] ss:$8 sps:$4 sm:$0xff]   ;;  %v1431_v63 = vld [vmem:[%s2069_s1 + $0x190] ss:$8 sps:$4 sm:$0xff]   ;;  %v1432_v0 = vld [vmem:[%s2069_s1 + $0x84] ss:$8 sps:$4 sm:$0xff]  }
  0x16   :  { %995 = vmatprep.mubr.bf16.mxu1 %v1189_v51  ;;  %v1434_v1 = vld [vmem:[%s2069_s1 + $0x184] ss:$8 sps:$4 sm:$0xff]   ;;  %v1436_v2 = vld [vmem:[%s2069_s1 + $0x80] ss:$8 sps:$4 sm:$0xff]   ;;  %v1444_v4 = vld [vmem:[%s2069_s1 + $0x274] ss:$8 sps:$4 sm:$0xff]  }
  0x17   :  { %933 = vmatpush1.bf16.msra.mxu0 %v1376_v22  ;;  %v1437_v3 = vld [vmem:[%s2069_s1 + $0x180] ss:$8 sps:$4 sm:$0xff]   ;;  %v1447_v5 = vld [vmem:[%s2069_s1 + $0x374] ss:$8 sps:$4 sm:$0xff]   ;;  %v1442_v8 = vld [vmem:[%s2069_s1 + $0x270] ss:$8 sps:$4 sm:$0xff]  }
  0x18   :  { %974 = vmatpush1.bf16.msra.mxu1 %v1377_v23  ;;  %934 = vmatprep.subr.bf16.mxu0 %v1378_v24  ;;  %v1445_v9 = vld [vmem:[%s2069_s1 + $0x370] ss:$8 sps:$4 sm:$0xff]   ;;  %v1450_v10 = vld [vmem:[%s2069_s1 + $0x264] ss:$8 sps:$4 sm:$0xff]   ;;  %v1448_v12 = vld [vmem:[%s2069_s1 + $0x260] ss:$8 sps:$4 sm:$0xff]  }
  0x19   :  { %975 = vmatprep.subr.bf16.mxu1 %v1380_v25  ;;  %v1453_v11 = vld [vmem:[%s2069_s1 + $0x364] ss:$8 sps:$4 sm:$0xff]   ;;  %v1451_v13 = vld [vmem:[%s2069_s1 + $0x360] ss:$8 sps:$4 sm:$0xff]   ;;  %v1456_v14 = vld [vmem:[%s2069_s1 + $0x254] ss:$8 sps:$4 sm:$0xff]  }
  0x1a   :  { %v1459_v15 = vld [vmem:[%s2069_s1 + $0x354] ss:$8 sps:$4 sm:$0xff]   ;;  %v1454_v16 = vld [vmem:[%s2069_s1 + $0x250] ss:$8 sps:$4 sm:$0xff]   ;;  %v1462_v18 = vld [vmem:[%s2069_s1 + $0x244] ss:$8 sps:$4 sm:$0xff]  }
  0x1b   :  { %935 = vmatpush1.bf16.msra.mxu0 %v1382_v26  ;;  %v1457_v17 = vld [vmem:[%s2069_s1 + $0x350] ss:$8 sps:$4 sm:$0xff]   ;;  %v1465_v19 = vld [vmem:[%s2069_s1 + $0x344] ss:$8 sps:$4 sm:$0xff]   ;;  %v1460_v20 = vld [vmem:[%s2069_s1 + $0x240] ss:$8 sps:$4 sm:$0xff]  }
  0x1c   :  { %976 = vmatpush1.bf16.msra.mxu1 %v1383_v27  ;;  %936 = vmatprep.subr.bf16.mxu0 %v1384_v28  ;;  %v1463_v21 = vld [vmem:[%s2069_s1 + $0x340] ss:$8 sps:$4 sm:$0xff]   ;;  %v1468_v22 = vld [vmem:[%s2069_s1 + $0x234] ss:$8 sps:$4 sm:$0xff]   ;;  %v1466_v24 = vld [vmem:[%s2069_s1 + $0x230] ss:$8 sps:$4 sm:$0xff]  }
  0x1d   :  { %977 = vmatprep.subr.bf16.mxu1 %v1386_v29  ;;  %v1471_v23 = vld [vmem:[%s2069_s1 + $0x334] ss:$8 sps:$4 sm:$0xff]   ;;  %v1469_v25 = vld [vmem:[%s2069_s1 + $0x330] ss:$8 sps:$4 sm:$0xff]   ;;  %v1474_v26 = vld [vmem:[%s2069_s1 + $0x224] ss:$8 sps:$4 sm:$0xff]  }
  0x1e   :  { %v1477_v27 = vld [vmem:[%s2069_s1 + $0x324] ss:$8 sps:$4 sm:$0xff]   ;;  %v1472_v28 = vld [vmem:[%s2069_s1 + $0x220] ss:$8 sps:$4 sm:$0xff]   ;;  %v1507_v51 = vld [vmem:[%s2069_s1 + $0x3d4] ss:$8 sps:$4 sm:$0xff]  }
  0x1f   :  { %937 = vmatpush1.bf16.msra.mxu0 %v1388_v30  ;;  %v1475_v29 = vld [vmem:[%s2069_s1 + $0x320] ss:$8 sps:$4 sm:$0xff]   ;;  %v1480_v30 = vld [vmem:[%s2069_s1 + $0x214] ss:$8 sps:$4 sm:$0xff]   ;;  %v1498_v46 = vld [vmem:[%s2069_s1 + $0x2e4] ss:$8 sps:$4 sm:$0xff]  }
  0x20   :  { %978 = vmatpush1.bf16.msra.mxu1 %v1389_v31  ;;  %938 = vmatprep.subr.bf16.mxu0 %v1390_v32  ;;  %v1483_v31 = vld [vmem:[%s2069_s1 + $0x314] ss:$8 sps:$4 sm:$0xff]   ;;  %v1501_v47 = vld [vmem:[%s2069_s1 + $0x3e4] ss:$8 sps:$4 sm:$0xff]   ;;  %v1496_v48 = vld [vmem:[%s2069_s1 + $0x2e0] ss:$8 sps:$4 sm:$0xff]  }
  0x21   :  { %979 = vmatprep.subr.bf16.mxu1 %v1392_v33  ;;  %v1877_v32 = vld [vmem:[%s2070_s0 + $0x10] sm:$0xff] }
  0x22   :  { %v1478_v33 = vld [vmem:[%s2069_s1 + $0x210] ss:$8 sps:$4 sm:$0xff]  }
  0x23   :  { %939 = vmatpush2.bf16.msra.mxu0 %v1394_v34  ;;  %v1481_v34 = vld [vmem:[%s2069_s1 + $0x310] ss:$8 sps:$4 sm:$0xff]  }
  0x24   :  { %980 = vmatpush2.bf16.msra.mxu1 %v1395_v35  ;;  %940 = vmatprep.subr.bf16.mxu0 %v1396_v36  ;;  %v1191_v35 = vcombine.high %v1877_v32, %v1877_v32  ;;  %v1890_v36 = vld [vmem:[%s2070_s0 + $0x18] sm:$0xff] }
  0x25   :  { %981 = vmatprep.subr.bf16.mxu1 %v1398_v37  ;;  %v1486_v37 = vld [vmem:[%s2069_s1 + $0x204] ss:$8 sps:$4 sm:$0xff]  }
  0x27   :  { %941 = vmatpush2.bf16.msra.mxu0 %v1400_v38  ;;  %v1193_v38 = vcombine.high %v1890_v36, %v1890_v36 }
  0x28   :  { %982 = vmatpush2.bf16.msra.mxu1 %v1401_v39  ;;  %942 = vmatprep.subr.bf16.mxu0 %v1402_v40  ;;  %v1489_v39 = vld [vmem:[%s2069_s1 + $0x304] ss:$8 sps:$4 sm:$0xff]   ;;  %v1484_v40 = vld [vmem:[%s2069_s1 + $0x200] ss:$8 sps:$4 sm:$0xff]  }
  0x29   :  { %983 = vmatprep.subr.bf16.mxu1 %v1404_v41  ;;  %v1487_v41 = vld [vmem:[%s2069_s1 + $0x300] ss:$8 sps:$4 sm:$0xff]  }
  0x2b   :  { %943 = vmatpush2.bf16.msra.mxu0 %v1406_v42  ;;  %v1492_v42 = vld [vmem:[%s2069_s1 + $0x2f4] ss:$8 sps:$4 sm:$0xff]  }
  0x2c   :  { %984 = vmatpush2.bf16.msra.mxu1 %v1407_v43  ;;  %944 = vmatprep.subr.bf16.mxu0 %v1408_v44  ;;  %v1495_v43 = vld [vmem:[%s2069_s1 + $0x3f4] ss:$8 sps:$4 sm:$0xff]   ;;  %v1490_v44 = vld [vmem:[%s2069_s1 + $0x2f0] ss:$8 sps:$4 sm:$0xff]  }
  0x2d   :  { %985 = vmatprep.subr.bf16.mxu1 %v1410_v45  ;;  %v1493_v45 = vld [vmem:[%s2069_s1 + $0x3f0] ss:$8 sps:$4 sm:$0xff]  }
  0x2f   :  { %945 = vmatpush2.bf16.msra.mxu0 %v1412_v49  ;;  %v1499_v49 = vld [vmem:[%s2069_s1 + $0x3e0] ss:$8 sps:$4 sm:$0xff]  }
  0x30   :  { %986 = vmatpush2.bf16.msra.mxu1 %v1413_v50  ;;  %946 = vmatprep.subr.bf16.mxu0 %v1414_v52  ;;  %v1504_v50 = vld [vmem:[%s2069_s1 + $0x2d4] ss:$8 sps:$4 sm:$0xff]   ;;  %v1502_v52 = vld [vmem:[%s2069_s1 + $0x2d0] ss:$8 sps:$4 sm:$0xff]  }
  0x31   :  { %987 = vmatprep.subr.bf16.mxu1 %v1416_v53  ;;  %v1505_v53 = vld [vmem:[%s2069_s1 + $0x3d0] ss:$8 sps:$4 sm:$0xff]  }
  0x33   :  { %947 = vmatpush2.bf16.msra.mxu0 %v1418_v54  ;;  %v1510_v54 = vld [vmem:[%s2069_s1 + $0x2c4] ss:$8 sps:$4 sm:$0xff]  }
  0x34   :  { %988 = vmatpush2.bf16.msra.mxu1 %v1419_v55  ;;  %948 = vmatprep.subr.bf16.mxu0 %v1420_v56  ;;  %v1513_v55 = vld [vmem:[%s2069_s1 + $0x3c4] ss:$8 sps:$4 sm:$0xff]   ;;  %v1508_v56 = vld [vmem:[%s2069_s1 + $0x2c0] ss:$8 sps:$4 sm:$0xff]  }
  0x35   :  { %989 = vmatprep.subr.bf16.mxu1 %v1422_v57  ;;  %v1511_v57 = vld [vmem:[%s2069_s1 + $0x3c0] ss:$8 sps:$4 sm:$0xff]  }
  0x37   :  { %949 = vmatpush2.bf16.msra.mxu0 %v1424_v58  ;;  %v1516_v58 = vld [vmem:[%s2069_s1 + $0x2b4] ss:$8 sps:$4 sm:$0xff]  }
  0x38   :  { %990 = vmatpush2.bf16.msra.mxu1 %v1425_v59  ;;  %950 = vmatprep.subr.bf16.mxu0 %v1426_v60  ;;  %v1519_v59 = vld [vmem:[%s2069_s1 + $0x3b4] ss:$8 sps:$4 sm:$0xff]   ;;  %v1514_v60 = vld [vmem:[%s2069_s1 + $0x2b0] ss:$8 sps:$4 sm:$0xff]  }
  0x39   :  { %991 = vmatprep.subr.bf16.mxu1 %v1428_v61  ;;  %v1517_v61 = vld [vmem:[%s2069_s1 + $0x3b0] ss:$8 sps:$4 sm:$0xff]  }
  0x3b   :  { %951 = vmatpush2.bf16.msra.mxu0 %v1430_v62  ;;  %v1522_v62 = vld [vmem:[%s2069_s1 + $0x2a4] ss:$8 sps:$4 sm:$0xff]  }
  0x3c   :  { %992 = vmatpush2.bf16.msra.mxu1 %v1431_v63  ;;  %952 = vmatprep.subr.bf16.mxu0 %v1432_v0  ;;  %v1525_v63 = vld [vmem:[%s2069_s1 + $0x3a4] ss:$8 sps:$4 sm:$0xff]   ;;  %v1520_v0 = vld [vmem:[%s2069_s1 + $0x2a0] ss:$8 sps:$4 sm:$0xff]  }
  0x3d   :  { %993 = vmatprep.subr.bf16.mxu1 %v1434_v1  ;;  %v1523_v1 = vld [vmem:[%s2069_s1 + $0x3a0] ss:$8 sps:$4 sm:$0xff]  }
  0x3f   :  { %953 = vmatpush2.bf16.msra.mxu0 %v1436_v2  ;;  %v1528_v2 = vld [vmem:[%s2069_s1 + $0x294] ss:$8 sps:$4 sm:$0xff]  }
  0x40   :  { %994 = vmatpush2.bf16.msra.mxu1 %v1437_v3  ;;  %1004 = vmatprep.subr.bf16.mxu0 %v1444_v4  ;;  %v1531_v3 = vld [vmem:[%s2069_s1 + $0x394] ss:$8 sps:$4 sm:$0xff]   ;;  %v1526_v4 = vld [vmem:[%s2069_s1 + $0x290] ss:$8 sps:$4 sm:$0xff]  }
  0x41   :  { %1045 = vmatprep.subr.bf16.mxu1 %v1447_v5  ;;  %v1529_v5 = vld [vmem:[%s2069_s1 + $0x390] ss:$8 sps:$4 sm:$0xff]  }
  0x42   :  { %955 = vmatmul.mubr.bf16.vlgmr.msra.gmra.mxu0 %v1186_v6  ;;  %v1534_v6 = vld [vmem:[%s2069_s1 + $0x284] ss:$8 sps:$4 sm:$0xff]  }
  0x43   :  { %996 = vmatmul.mubr.bf16.vlgmr.msra.gmra.mxu1 %v1188_v7  ;;  %1005 = vmatpush1.bf16.msra.mxu0 %v1442_v8  ;;  %v1537_v7 = vld [vmem:[%s2069_s1 + $0x384] ss:$8 sps:$4 sm:$0xff]   ;;  %v1532_v8 = vld [vmem:[%s2069_s1 + $0x280] ss:$8 sps:$4 sm:$0xff]  }
  0x44   :  { %1046 = vmatpush1.bf16.msra.mxu1 %v1445_v9  ;;  %1006 = vmatprep.subr.bf16.mxu0 %v1450_v10  ;;  %v1535_v9 = vld [vmem:[%s2069_s1 + $0x380] ss:$8 sps:$4 sm:$0xff]   ;;  %v1542_v10 = vld [vmem:[%s2069_s1 + $0x474] ss:$8 sps:$4 sm:$0xff]  }
  0x45   :  { %1047 = vmatprep.subr.bf16.mxu1 %v1453_v11  ;;  %1036 = vmatprep.mubr.bf16.mxu0 %v1191_v35  ;;  %v1190_v11 = vcombine.low %v1877_v32, %v1877_v32 }
  0x46   :  { %1077 = vmatprep.mubr.bf16.mxu1 %v1193_v38 }
  0x47   :  { %1007 = vmatpush1.bf16.msra.mxu0 %v1448_v12  ;;  %v1192_v12 = vcombine.low %v1890_v36, %v1890_v36 }
  0x48   :  { %1048 = vmatpush1.bf16.msra.mxu1 %v1451_v13  ;;  %1008 = vmatprep.subr.bf16.mxu0 %v1456_v14  ;;  %v1540_v13 = vld [vmem:[%s2069_s1 + $0x470] ss:$8 sps:$4 sm:$0xff]   ;;  %v1547_v14 = vld [vmem:[%s2069_s1 + $0x464] ss:$8 sps:$4 sm:$0xff]  }
  0x49   :  { %1049 = vmatprep.subr.bf16.mxu1 %v1459_v15  ;;  %v1545_v15 = vld [vmem:[%s2069_s1 + $0x460] ss:$8 sps:$4 sm:$0xff]  }
  0x4b   :  { %1009 = vmatpush1.bf16.msra.mxu0 %v1454_v16  ;;  %v1567_v16 = vmov 0  }
  0x4c   :  { %1050 = vmatpush1.bf16.msra.mxu1 %v1457_v17  ;;  %1010 = vmatprep.subr.bf16.mxu0 %v1462_v18  ;;  %v1550_v17 = vld [vmem:[%s2069_s1 + $0x454] ss:$8 sps:$4 sm:$0xff]   ;;  %v1548_v18 = vld [vmem:[%s2069_s1 + $0x450] ss:$8 sps:$4 sm:$0xff]  }
  0x4d   :  { %1051 = vmatprep.subr.bf16.mxu1 %v1465_v19  ;;  %v1553_v19 = vld [vmem:[%s2069_s1 + $0x444] ss:$8 sps:$4 sm:$0xff]  }
  0x4f   :  { %1011 = vmatpush1.bf16.msra.mxu0 %v1460_v20  ;;  %v1551_v20 = vld [vmem:[%s2069_s1 + $0x440] ss:$8 sps:$4 sm:$0xff]  }
  0x50   :  { %1052 = vmatpush1.bf16.msra.mxu1 %v1463_v21  ;;  %1012 = vmatprep.subr.bf16.mxu0 %v1468_v22  ;;  %v1556_v21 = vld [vmem:[%s2069_s1 + $0x434] ss:$8 sps:$4 sm:$0xff]   ;;  %v1554_v22 = vld [vmem:[%s2069_s1 + $0x430] ss:$8 sps:$4 sm:$0xff]  }
  0x51   :  { %1053 = vmatprep.subr.bf16.mxu1 %v1471_v23  ;;  %v1559_v23 = vld [vmem:[%s2069_s1 + $0x424] ss:$8 sps:$4 sm:$0xff]  }
  0x53   :  { %1013 = vmatpush1.bf16.msra.mxu0 %v1466_v24  ;;  %v1557_v24 = vld [vmem:[%s2069_s1 + $0x420] ss:$8 sps:$4 sm:$0xff]  }
  0x54   :  { %1054 = vmatpush1.bf16.msra.mxu1 %v1469_v25  ;;  %1014 = vmatprep.subr.bf16.mxu0 %v1474_v26  ;;  %v1562_v25 = vld [vmem:[%s2069_s1 + $0x414] ss:$8 sps:$4 sm:$0xff]   ;;  %v1560_v26 = vld [vmem:[%s2069_s1 + $0x410] ss:$8 sps:$4 sm:$0xff]  }
  0x55   :  { %1055 = vmatprep.subr.bf16.mxu1 %v1477_v27  ;;  %v1565_v27 = vld [vmem:[%s2069_s1 + $0x404] ss:$8 sps:$4 sm:$0xff]  }
  0x57   :  { %1015 = vmatpush1.bf16.msra.mxu0 %v1472_v28  ;;  %v1563_v28 = vld [vmem:[%s2069_s1 + $0x400] ss:$8 sps:$4 sm:$0xff]  }
  0x58   :  { %1056 = vmatpush1.bf16.msra.mxu1 %v1475_v29  ;;  %1016 = vmatprep.subr.bf16.mxu0 %v1480_v30  ;;  %v1566_v29 = vld [vmem:[%s2070_s0 + $0x20] ss:$0 sps:$4 sm:$0xff]  }
  0x59   :  { %1057 = vmatprep.subr.bf16.mxu1 %v1483_v31 }
  0x5b   :  { %1017 = vmatpush1.bf16.msra.mxu0 %v1478_v33 }
  0x5c   :  { %1058 = vmatpush1.bf16.msra.mxu1 %v1481_v34  ;;  %1018 = vmatprep.subr.bf16.mxu0 %v1486_v37 }
  0x5d   :  { %1059 = vmatprep.subr.bf16.mxu1 %v1489_v39 }
  0x5f   :  { %1019 = vmatpush1.bf16.msra.mxu0 %v1484_v40 }
  0x60   :  { %1060 = vmatpush1.bf16.msra.mxu1 %v1487_v41  ;;  %1020 = vmatprep.subr.bf16.mxu0 %v1492_v42 }
  0x61   :  { %1061 = vmatprep.subr.bf16.mxu1 %v1495_v43 }
  0x63   :  { %1021 = vmatpush2.bf16.msra.mxu0 %v1490_v44 }
  0x64   :  { %1062 = vmatpush2.bf16.msra.mxu1 %v1493_v45  ;;  %1022 = vmatprep.subr.bf16.mxu0 %v1498_v46 }
  0x65   :  { %1063 = vmatprep.subr.bf16.mxu1 %v1501_v47 }
  0x67   :  { %1023 = vmatpush2.bf16.msra.mxu0 %v1496_v48  ;;  %v1129_v48 = vlaneseq }
  0x68   :  { %1064 = vmatpush2.bf16.msra.mxu1 %v1499_v49  ;;  %1024 = vmatprep.subr.bf16.mxu0 %v1504_v50 }
  0x69   :  { %1065 = vmatprep.subr.bf16.mxu1 %v1507_v51  ;;  %v1130_v49 = vshrl.u32 %v1129_v48, 7 }
  0x6b   :  { %1025 = vmatpush2.bf16.msra.mxu0 %v1502_v52  ;;  %v1131_v51 = vsub.s32 0, %v1130_v49  ;;  %v1127_v52 = vld [vmem:[%s2071_s2] sm:$0x3] }
  0x6c   :  { %1066 = vmatpush2.bf16.msra.mxu1 %v1505_v53  ;;  %1026 = vmatprep.subr.bf16.mxu0 %v1510_v54  ;;  %v1135_v54 = vsub.s32 1, %v1130_v49 }
  0x6d   :  { %1067 = vmatprep.subr.bf16.mxu1 %v1513_v55  ;;  %v1141_v55 = vld [vmem:[%s2072_s3] sm:$0x3] }
  0x6f   :  { %1027 = vmatpush2.bf16.msra.mxu0 %v1508_v56 }
  0x70   :  { %1068 = vmatpush2.bf16.msra.mxu1 %v1511_v57  ;;  %1028 = vmatprep.subr.bf16.mxu0 %v1516_v58  ;;  %v1132_v57 = vrot.slane %v1127_v52, %v1131_v51 }
  0x71   :  { %1069 = vmatprep.subr.bf16.mxu1 %v1519_v59 }
  0x73   :  { %1029 = vmatpush2.bf16.msra.mxu0 %v1514_v60 }
  0x74   :  { %1070 = vmatpush2.bf16.msra.mxu1 %v1517_v61  ;;  %1030 = vmatprep.subr.bf16.mxu0 %v1522_v62  ;;  %v1146_v61 = vrot.slane %v1141_v55, %v1131_v51  ;;  %v1136_v62 = vrot.slane %v1127_v52, %v1135_v54 }
  0x75   :  { %1071 = vmatprep.subr.bf16.mxu1 %v1525_v63  ;;  %v1155_v63 = vld [vmem:[%s2073_s4] sm:$0x3] }
  0x77   :  { %1031 = vmatpush2.bf16.msra.mxu0 %v1520_v0 }
  0x78   :  { %1072 = vmatpush2.bf16.msra.mxu1 %v1523_v1  ;;  %1032 = vmatprep.subr.bf16.mxu0 %v1528_v2 }
  0x79   :  { %1073 = vmatprep.subr.bf16.mxu1 %v1531_v3  ;;  %v1150_v3 = vrot.slane %v1141_v55, %v1135_v54 }
  0x7b   :  { %1033 = vmatpush2.bf16.msra.mxu0 %v1526_v4 }
  0x7c   :  { %1074 = vmatpush2.bf16.msra.mxu1 %v1529_v5  ;;  %1034 = vmatprep.subr.bf16.mxu0 %v1534_v6  ;;  %v1162_v6 = vrot.slane %v1155_v63, %v1131_v51 }
  0x7d   :  { %1075 = vmatprep.subr.bf16.mxu1 %v1537_v7 }
  0x7f   :  { %1035 = vmatpush2.bf16.msra.mxu0 %v1532_v8 }
  0x80   :  { %1076 = vmatpush2.bf16.msra.mxu1 %v1535_v9  ;;  %1086 = vmatprep.subr.bf16.mxu0 %v1542_v10 }
  0x82   :  { %1037 = vmatmul.mubr.bf16.vlgmr.msra.gmra.mxu0 %v1190_v11  ;;  %v1166_v11 = vrot.slane %v1155_v63, %v1135_v54 }
  0x83   :  { %1078 = vmatmul.mubr.bf16.vlgmr.msra.gmra.mxu1 %v1192_v12  ;;  %1087 = vmatpush1.bf16.msra.mxu0 %v1540_v13 }
  0x84   :  { %1118 = vmatprep.mubr.bf16.mxu0 %v1567_v16  ;;  %1088 = vmatprep.subr.bf16.mxu0 %v1547_v14 }
  0x87   :  { %1089 = vmatpush1.bf16.msra.mxu0 %v1545_v15 }
  0x88   :  { %1090 = vmatprep.subr.bf16.mxu0 %v1550_v17 }
  0x8b   :  { %1091 = vmatpush1.bf16.msra.mxu0 %v1548_v18 }
  0x8c   :  { %1092 = vmatprep.subr.bf16.mxu0 %v1553_v19 }
  0x8f   :  { %1093 = vmatpush1.bf16.msra.mxu0 %v1551_v20 }
  0x90   :  { %1094 = vmatprep.subr.bf16.mxu0 %v1556_v21 }
  0x93   :  { %1095 = vmatpush1.bf16.msra.mxu0 %v1554_v22 }
  0x94   :  { %1096 = vmatprep.subr.bf16.mxu0 %v1559_v23 }
  0x97   :  { %1097 = vmatpush1.bf16.msra.mxu0 %v1557_v24 }
  0x98   :  { %1098 = vmatprep.subr.bf16.mxu0 %v1562_v25 }
  0x9b   :  { %1099 = vmatpush1.bf16.msra.mxu0 %v1560_v26 }
  0x9c   :  { %1100 = vmatprep.subr.bf16.mxu0 %v1565_v27 }
  0x9f   :  { %1101 = vmatpush1.bf16.msra.mxu0 %v1563_v28 }
  0xa2   :  { %1119 = vmatmul.mubr.bf16.vlgmr.msra.gmra.mxu0 %v1566_v29 }
 0x102   :  { %v956_v30 = vpop.f32.mrf.mxu0 }
 0x103   :  { %v997_v31 = vpop.f32.mrf.mxu1 }
 0x104   :  { %v998_v32 = vadd.f32 %v997_v31, %v956_v30  ;;  %v958_v33 = vpop.f32.mrf.mxu0 }
 0x105   :  { %v999_v34 = vpop.f32.mrf.mxu1 }
 0x106   :  { %v1000_v35 = vadd.f32 %v999_v34, %v958_v33  ;;  %v960_v36 = vpop.f32.mrf.mxu0 }
 0x107   :  { %v1001_v37 = vpop.f32.mrf.mxu1 }
 0x108   :  { %v961_v38 = vpop.f32.mrf.mxu0 }
 0x109   :  { %v1002_v39 = vpop.f32.mrf.mxu1 }
 0x142   :  { %v1038_v40 = vpop.f32.mrf.mxu0 }
 0x143   :  { %v1079_v41 = vpop.f32.mrf.mxu1  ;;  %v1039_v50 = vadd.f32 %v1038_v40, %v998_v32 }
 0x144   :  { %v1040_v42 = vpop.f32.mrf.mxu0 }
 0x145   :  { %v1081_v43 = vpop.f32.mrf.mxu1  ;;  %v1041_v53 = vadd.f32 %v1040_v42, %v1000_v35  ;;  %v1080_v56 = vadd.f32 %v1079_v41, %v1039_v50 }
 0x146   :  { %v1042_v44 = vpop.f32.mrf.mxu0 }
 0x147   :  { %v1083_v45 = vpop.f32.mrf.mxu1  ;;  %v1082_v59 = vadd.f32 %v1081_v43, %v1041_v53 }
 0x148   :  { %v1043_v46 = vpop.f32.mrf.mxu0 }
 0x149   :  { %v1084_v47 = vpop.f32.mrf.mxu1 }
 0x162   :  { %v1120_v58 = vpop.f32.mrf.mxu0 }
 0x163   :  { %v1121_v60 = vadd.f32 %v1120_v58, %v1080_v56 }
 0x164   :  { %v1122_v0 = vpop.f32.mrf.mxu0 }
 0x165   :  { %v1139_v1 = vmul.f32 %v1132_v57, %v1121_v60  ;;  %v1123_v2 = vadd.f32 %v1122_v0, %v1082_v59 }
 0x166   :  { %v1124_v4 = vpop.f32.mrf.mxu0 }
 0x167   :  { %v1153_v5 = vadd.f32 %v1146_v61, %v1139_v1  ;;  %v1140_v7 = vmul.f32 %v1136_v62, %v1123_v2 }
 0x168   :  { %v1125_v8 = vpop.f32.mrf.mxu0 }
 0x169   :  { %v1156_v9 = vmin.f32 %v1153_v5, 0.0  ;;  %v1154_v10 = vadd.f32 %v1150_v3, %v1140_v7 }
 0x16b   :  { %v1169_v12 = vmul.f32 %v1162_v6, %v1156_v9  ;;  %v1157_v13 = vmin.f32 %v1154_v10, 0.0 }
 0x16d   :  { %v1170_v14 = vmul.f32 %v1166_v11, %v1157_v13  ;;  %v1171_v15 = vsub.f32 %v1153_v5, %v1169_v12 }
 0x16f   :  { %v1172_v16 = vsub.f32 %v1154_v10, %v1170_v14 }
 0x171   :  { %v1340_v17 = vpack.c.bf16 %v1172_v16, %v1171_v15 }
 0x173   :  { %1181 = vst [vmem:[%s2074_s5] sm:$0xff] %v1340_v17 }

// kernel: forward_pallas.15
= control target key start
LH: loop header
LB: loop body
LE: loop exit
PB: predicated region body
PF: predicated region fallthrough
CT: control target
= control target key end

     0   :  { %vm1144_vm0 = vmmov 0   ;;  %s1418_s1 = inlined_call_operand.vmem [shape: bf16[1152,128], index: 1, kind: input, shape index: {}]   ;;  %s1419_s0 = inlined_call_operand.vmem [shape: bf16[8,1152], index: 0, kind: input, shape index: {}]   ;;  %s1420_s2 = inlined_call_operand.vmem [shape: f32[1,128], index: 2, kind: input, shape index: {}]   ;;  %s1421_s4 = inlined_call_operand.vmem [shape: bf16[8,128], index: 4, kind: input, shape index: {}, may-alias: {4,5}]   ;;  %s1422_s3 = inlined_call_operand.vmem [shape: f32[1,128], index: 3, kind: input, shape index: {}]   ;;  %s1423_s5 = inlined_call_operand.vmem [shape: bf16[8,128], index: 5, kind: output, shape index: {}, may-alias: {4,5}]  }
   0x1   :  { %v1062_v0 = vld [vmem:[%s1418_s1 + $0x78] sm:$0xff]   ;;  %v1066_v4 = vld [vmem:[%s1418_s1 + $0x70] sm:$0xff]   ;;  %v1070_v8 = vld [vmem:[%s1418_s1 + $0x68] sm:$0xff]  }
   0x2   :  { %v1063_v1 = vld [vmem:[%s1418_s1 + $0xf8] sm:$0xff]   ;;  %943 = vmatprep.subr.bf16.mxu0 %v1062_v0  ;;  %v1067_v5 = vld [vmem:[%s1418_s1 + $0xf0] sm:$0xff]   ;;  %v1071_v9 = vld [vmem:[%s1418_s1 + $0xe8] sm:$0xff]  }
   0x3   :  { %v1064_v2 = vld [vmem:[%s1418_s1 + $0x38] sm:$0xff]   ;;  %965 = vmatprep.subr.bf16.mxu1 %v1063_v1  ;;  %v1068_v6 = vld [vmem:[%s1418_s1 + $0x30] sm:$0xff]   ;;  %v1072_v10 = vld [vmem:[%s1418_s1 + $0x28] sm:$0xff]  }
   0x4   :  { %v1065_v3 = vld [vmem:[%s1418_s1 + $0xb8] sm:$0xff]   ;;  %944 = vmatpush3.bf16.msra.mxu0 %v1064_v2  ;;  %v1069_v7 = vld [vmem:[%s1418_s1 + $0xb0] sm:$0xff]   ;;  %v1073_v11 = vld [vmem:[%s1418_s1 + $0xa8] sm:$0xff]  }
   0x5   :  { %966 = vmatpush3.bf16.msra.mxu1 %v1065_v3  ;;  %945 = vmatprep.subr.bf16.mxu0 %v1066_v4  ;;  %v1074_v12 = vld [vmem:[%s1418_s1 + $0x60] sm:$0xff]   ;;  %v1078_v16 = vld [vmem:[%s1418_s1 + $0x58] sm:$0xff]   ;;  %v1082_v20 = vld [vmem:[%s1418_s1 + $0x50] sm:$0xff]  }
   0x6   :  { %967 = vmatprep.subr.bf16.mxu1 %v1067_v5  ;;  %v1075_v13 = vld [vmem:[%s1418_s1 + $0xe0] sm:$0xff]   ;;  %v1079_v17 = vld [vmem:[%s1418_s1 + $0xd8] sm:$0xff]   ;;  %v1083_v21 = vld [vmem:[%s1418_s1 + $0xd0] sm:$0xff]  }
   0x7   :  { %v1076_v14 = vld [vmem:[%s1418_s1 + $0x20] sm:$0xff]   ;;  %v1080_v18 = vld [vmem:[%s1418_s1 + $0x18] sm:$0xff]   ;;  %v1084_v22 = vld [vmem:[%s1418_s1 + $0x10] sm:$0xff]  }
   0x8   :  { %946 = vmatpush3.bf16.msra.mxu0 %v1068_v6  ;;  %v1077_v15 = vld [vmem:[%s1418_s1 + $0xa0] sm:$0xff]   ;;  %v1081_v19 = vld [vmem:[%s1418_s1 + $0x98] sm:$0xff]   ;;  %v1085_v23 = vld [vmem:[%s1418_s1 + $0x90] sm:$0xff]  }
   0x9   :  { %968 = vmatpush3.bf16.msra.mxu1 %v1069_v7  ;;  %947 = vmatprep.subr.bf16.mxu0 %v1070_v8  ;;  %v1086_v24 = vld [vmem:[%s1418_s1 + $0x48] sm:$0xff]   ;;  %v1090_v28 = vld [vmem:[%s1418_s1 + $0x40] sm:$0xff]   ;;  %v1098_v38 = vld [vmem:[%s1418_s1 + $0x178] sm:$0xff]  }
   0xa   :  { %969 = vmatprep.subr.bf16.mxu1 %v1071_v9  ;;  %v1087_v25 = vld [vmem:[%s1418_s1 + $0xc8] sm:$0xff]   ;;  %v1091_v29 = vld [vmem:[%s1418_s1 + $0xc0] sm:$0xff]   ;;  %v1099_v39 = vld [vmem:[%s1418_s1 + $0x138] sm:$0xff]  }
   0xb   :  { %v1088_v26 = vld [vmem:[%s1418_s1 + $0x8] sm:$0xff]   ;;  %v1092_v30 = vld [vmem:[%s1418_s1] sm:$0xff]   ;;  %v1100_v40 = vld [vmem:[%s1418_s1 + $0x1f8] sm:$0xff]  }
   0xc   :  { %948 = vmatpush3.bf16.msra.mxu0 %v1072_v10  ;;  %v1089_v27 = vld [vmem:[%s1418_s1 + $0x88] sm:$0xff]   ;;  %v1093_v31 = vld [vmem:[%s1418_s1 + $0x80] sm:$0xff]   ;;  %v1101_v41 = vld [vmem:[%s1418_s1 + $0x1b8] sm:$0xff]  }
   0xd   :  { %970 = vmatpush3.bf16.msra.mxu1 %v1073_v11  ;;  %949 = vmatprep.subr.bf16.mxu0 %v1074_v12  ;;  %v21_v32 = vld [vmem:[%s1419_s0] sm:$0xff]  ;;  %v22_v33 = vld [vmem:[%s1419_s0 + $0x8] sm:$0xff]  ;;  %v1102_v42 = vld [vmem:[%s1418_s1 + $0x170] sm:$0xff]  }
   0xe   :  { %971 = vmatprep.subr.bf16.mxu1 %v1075_v13  ;;  %v860_v34 = vcombine.low %v21_v32, %v21_v32  ;;  %v861_v35 = vcombine.high %v21_v32, %v21_v32  ;;  %v862_v36 = vcombine.low %v22_v33, %v22_v33  ;;  %v863_v37 = vcombine.high %v22_v33, %v22_v33  ;;  %v1103_v43 = vld [vmem:[%s1418_s1 + $0x130] sm:$0xff]   ;;  %v1106_v46 = vld [vmem:[%s1418_s1 + $0x168] sm:$0xff]   ;;  %v1110_v50 = vld [vmem:[%s1418_s1 + $0x160] sm:$0xff]  }
   0xf   :  { %v1104_v44 = vld [vmem:[%s1418_s1 + $0x1f0] sm:$0xff]   ;;  %v1107_v47 = vld [vmem:[%s1418_s1 + $0x128] sm:$0xff]   ;;  %v1111_v51 = vld [vmem:[%s1418_s1 + $0x120] sm:$0xff]   ;;  %v1143_v13 = vmov 0.0  }
  0x10   :  { %950 = vmatpush3.bf16.msra.mxu0 %v1076_v14  ;;  %666 = vmatprep.mubr.bf16.mxu0 %v861_v35  ;;  %v1105_v45 = vld [vmem:[%s1418_s1 + $0x1b0] sm:$0xff]   ;;  %v1108_v48 = vld [vmem:[%s1418_s1 + $0x1e8] sm:$0xff]   ;;  %v1112_v52 = vld [vmem:[%s1418_s1 + $0x1e0] sm:$0xff]  }
  0x11   :  { %972 = vmatpush3.bf16.msra.mxu1 %v1077_v15  ;;  %951 = vmatprep.subr.bf16.mxu0 %v1078_v16  ;;  %v1109_v49 = vld [vmem:[%s1418_s1 + $0x1a8] sm:$0xff]   ;;  %v1113_v53 = vld [vmem:[%s1418_s1 + $0x1a0] sm:$0xff]   ;;  %v1114_v54 = vld [vmem:[%s1418_s1 + $0x158] sm:$0xff]  }
  0x12   :  { %973 = vmatprep.subr.bf16.mxu1 %v1079_v17  ;;  %706 = vmatprep.mubr.bf16.mxu1 %v863_v37  ;;  %v1115_v55 = vld [vmem:[%s1418_s1 + $0x118] sm:$0xff]   ;;  %v1118_v58 = vld [vmem:[%s1418_s1 + $0x150] sm:$0xff]   ;;  %v1122_v62 = vld [vmem:[%s1418_s1 + $0x148] sm:$0xff]  }
  0x13   :  { %v1116_v56 = vld [vmem:[%s1418_s1 + $0x1d8] sm:$0xff]   ;;  %v1119_v59 = vld [vmem:[%s1418_s1 + $0x110] sm:$0xff]   ;;  %v1123_v63 = vld [vmem:[%s1418_s1 + $0x108] sm:$0xff]  }
  0x14   :  { %952 = vmatpush3.bf16.msra.mxu0 %v1080_v18  ;;  %v1117_v57 = vld [vmem:[%s1418_s1 + $0x198] sm:$0xff]   ;;  %v1120_v60 = vld [vmem:[%s1418_s1 + $0x1d0] sm:$0xff]   ;;  %v1124_v0 = vld [vmem:[%s1418_s1 + $0x1c8] sm:$0xff]  }
  0x15   :  { %974 = vmatpush3.bf16.msra.mxu1 %v1081_v19  ;;  %953 = vmatprep.subr.bf16.mxu0 %v1082_v20  ;;  %v1121_v61 = vld [vmem:[%s1418_s1 + $0x190] sm:$0xff]   ;;  %v1125_v1 = vld [vmem:[%s1418_s1 + $0x188] sm:$0xff]   ;;  %v1126_v2 = vld [vmem:[%s1418_s1 + $0x140] sm:$0xff]  }
  0x16   :  { %975 = vmatprep.subr.bf16.mxu1 %v1083_v21  ;;  %v1127_v3 = vld [vmem:[%s1418_s1 + $0x100] sm:$0xff]   ;;  %v23_v5 = vld [vmem:[%s1419_s0 + $0x10] sm:$0xff]  ;;  %v24_v9 = vld [vmem:[%s1419_s0 + $0x18] sm:$0xff] }
  0x17   :  { %v1128_v4 = vld [vmem:[%s1418_s1 + $0x1c0] sm:$0xff]   ;;  %v865_v6 = vcombine.high %v23_v5, %v23_v5  ;;  %v864_v8 = vcombine.low %v23_v5, %v23_v5  ;;  %v866_v10 = vcombine.low %v24_v9, %v24_v9  ;;  %v867_v11 = vcombine.high %v24_v9, %v24_v9  ;;  %v1134_v12 = vld [vmem:[%s1418_s1 + $0x238] sm:$0xff]   ;;  %v1135_v14 = vld [vmem:[%s1418_s1 + $0x230] sm:$0xff]  }
  0x18   :  { %954 = vmatpush3.bf16.msra.mxu0 %v1084_v22  ;;  %v1131_v7 = vld [vmem:[%s1418_s1 + $0x180] sm:$0xff]   ;;  %v1136_v15 = vld [vmem:[%s1418_s1 + $0x228] sm:$0xff]   ;;  %v1138_v17 = vld [vmem:[%s1418_s1 + $0x218] sm:$0xff]  }
  0x19   :  { %976 = vmatpush3.bf16.msra.mxu1 %v1085_v23  ;;  %955 = vmatprep.subr.bf16.mxu0 %v1086_v24  ;;  %v1137_v16 = vld [vmem:[%s1418_s1 + $0x220] sm:$0xff]   ;;  %v1139_v18 = vld [vmem:[%s1418_s1 + $0x210] sm:$0xff]   ;;  %v1140_v19 = vld [vmem:[%s1418_s1 + $0x208] sm:$0xff]  }
  0x1a   :  { %977 = vmatprep.subr.bf16.mxu1 %v1087_v25  ;;  %v1141_v20 = vld [vmem:[%s1418_s1 + $0x200] sm:$0xff]  }
  0x1b   :  { %v1142_v21 = vld [vmem:[%s1419_s0 + $0x20] ss:$0 sps:$4 sm:$0xff]  }
  0x1c   :  { %956 = vmatpush3.bf16.msra.mxu0 %v1088_v26 }
  0x1d   :  { %978 = vmatpush3.bf16.msra.mxu1 %v1089_v27  ;;  %957 = vmatprep.subr.bf16.mxu0 %v1090_v28 }
  0x1e   :  { %979 = vmatprep.subr.bf16.mxu1 %v1091_v29 }
  0x20   :  { %958 = vmatpush3.bf16.msra.mxu0 %v1092_v30 }
  0x21   :  { %980 = vmatpush3.bf16.msra.mxu1 %v1093_v31  ;;  %987 = vmatprep.subr.bf16.mxu0 %v1098_v38 }
  0x22   :  { %1009 = vmatprep.subr.bf16.mxu1 %v1100_v40 }
  0x23   :  { %667 = vmatmul.mubr.bf16.vlgmr.msra.gmra.mxu0 %v860_v34 }
  0x24   :  { %707 = vmatmul.mubr.bf16.vlgmr.msra.gmra.mxu1 %v862_v36  ;;  %988 = vmatpush3.bf16.msra.mxu0 %v1099_v39 }
  0x25   :  { %1010 = vmatpush3.bf16.msra.mxu1 %v1101_v41  ;;  %989 = vmatprep.subr.bf16.mxu0 %v1102_v42 }
  0x26   :  { %1011 = vmatprep.subr.bf16.mxu1 %v1104_v44  ;;  %746 = vmatprep.mubr.bf16.mxu0 %v865_v6 }
  0x27   :  { %786 = vmatprep.mubr.bf16.mxu1 %v867_v11 }
  0x28   :  { %990 = vmatpush3.bf16.msra.mxu0 %v1103_v43 }
  0x29   :  { %1012 = vmatpush3.bf16.msra.mxu1 %v1105_v45  ;;  %991 = vmatprep.subr.bf16.mxu0 %v1106_v46  ;;  %v941_v46 = vld [vmem:[%s1420_s2] ss:$0 sm:$0xff] }
  0x2a   :  { %1013 = vmatprep.subr.bf16.mxu1 %v1108_v48 }
  0x2c   :  { %992 = vmatpush3.bf16.msra.mxu0 %v1107_v47  ;;  %v850_v47 = vld [vmem:[%s1421_s4] sm:$0xf] }
  0x2d   :  { %1014 = vmatpush3.bf16.msra.mxu1 %v1109_v49  ;;  %993 = vmatprep.subr.bf16.mxu0 %v1110_v50  ;;  %v942_v49 = vld [vmem:[%s1422_s3] ss:$0 sm:$0xff] }
  0x2e   :  { %1015 = vmatprep.subr.bf16.mxu1 %v1112_v52  ;;  %v851_v52 = vunpack.c.l.bf16 %v850_v47 }
  0x30   :  { %994 = vmatpush3.bf16.msra.mxu0 %v1111_v51 }
  0x31   :  { %1016 = vmatpush3.bf16.msra.mxu1 %v1113_v53  ;;  %995 = vmatprep.subr.bf16.mxu0 %v1114_v54 }
  0x32   :  { %1017 = vmatprep.subr.bf16.mxu1 %v1116_v56 }
  0x34   :  { %996 = vmatpush3.bf16.msra.mxu0 %v1115_v55 }
  0x35   :  { %1018 = vmatpush3.bf16.msra.mxu1 %v1117_v57  ;;  %997 = vmatprep.subr.bf16.mxu0 %v1118_v58 }
  0x36   :  { %1019 = vmatprep.subr.bf16.mxu1 %v1120_v60 }
  0x38   :  { %998 = vmatpush3.bf16.msra.mxu0 %v1119_v59 }
  0x39   :  { %1020 = vmatpush3.bf16.msra.mxu1 %v1121_v61  ;;  %999 = vmatprep.subr.bf16.mxu0 %v1122_v62 }
  0x3a   :  { %1021 = vmatprep.subr.bf16.mxu1 %v1124_v0 }
  0x3c   :  { %1000 = vmatpush3.bf16.msra.mxu0 %v1123_v63 }
  0x3d   :  { %1022 = vmatpush3.bf16.msra.mxu1 %v1125_v1  ;;  %1001 = vmatprep.subr.bf16.mxu0 %v1126_v2 }
  0x3e   :  { %1023 = vmatprep.subr.bf16.mxu1 %v1128_v4 }
  0x40   :  { %1002 = vmatpush3.bf16.msra.mxu0 %v1127_v3 }
  0x41   :  { %1024 = vmatpush3.bf16.msra.mxu1 %v1131_v7  ;;  %1040 = vmatprep.subr.bf16.mxu0 %v1143_v13 }
  0x43   :  { %747 = vmatmul.mubr.bf16.vlgmr.msra.gmra.mxu0 %v864_v8 }
  0x44   :  { %1041 = vmatpush3.bf16.msra.mxu0 %v1134_v12  ;;  %787 = vmatmul.mubr.bf16.vlgmr.msra.gmra.mxu1 %v866_v10 }
  0x45   :  { %1042 = vmatprep.subr.bf16.mxu0 %v1143_v13  ;;  %1056 = vmatprep.mubr.msk.bf16.mxu0 %vm1144_vm0, %v1143_v13 }
  0x48   :  { %1043 = vmatpush3.bf16.msra.mxu0 %v1135_v14 }
  0x49   :  { %1044 = vmatprep.subr.bf16.mxu0 %v1143_v13 }
  0x4c   :  { %1045 = vmatpush3.bf16.msra.mxu0 %v1136_v15 }
  0x4d   :  { %1046 = vmatprep.subr.bf16.mxu0 %v1143_v13 }
  0x50   :  { %1047 = vmatpush3.bf16.msra.mxu0 %v1137_v16 }
  0x51   :  { %1048 = vmatprep.subr.bf16.mxu0 %v1143_v13 }
  0x54   :  { %1049 = vmatpush3.bf16.msra.mxu0 %v1138_v17 }
  0x55   :  { %1050 = vmatprep.subr.bf16.mxu0 %v1143_v13 }
  0x58   :  { %1051 = vmatpush3.bf16.msra.mxu0 %v1139_v18 }
  0x59   :  { %1052 = vmatprep.subr.bf16.mxu0 %v1143_v13 }
  0x5c   :  { %1053 = vmatpush3.bf16.msra.mxu0 %v1140_v19 }
  0x5d   :  { %1054 = vmatprep.subr.bf16.mxu0 %v1143_v13 }
  0x60   :  { %1055 = vmatpush3.bf16.msra.mxu0 %v1141_v20 }
  0x63   :  { %1057 = vmatmul.mubr.bf16.vlgmr.msra.gmra.mxu0 %v1142_v21 }
  0xe3   :  { %v959_v22 = vpop.f32.mrf.mxu0 }
  0xe4   :  { %v981_v23 = vpop.f32.mrf.mxu1 }
  0xe5   :  { %v960_v24 = vpop.f32.mrf.mxu0 }
  0xe6   :  { %v982_v25 = vpop.f32.mrf.mxu1  ;;  %v961_v38 = vadd.f32 %v960_v24, %v959_v22 }
  0xe7   :  { %v962_v26 = vpop.f32.mrf.mxu0  ;;  %v983_v39 = vadd.f32 %v982_v25, %v981_v23 }
  0xe8   :  { %v984_v27 = vpop.f32.mrf.mxu1 }
  0xe9   :  { %v963_v28 = vpop.f32.mrf.mxu0  ;;  %v709_v41 = vadd.f32 %v983_v39, %v961_v38 }
  0xea   :  { %v985_v29 = vpop.f32.mrf.mxu1 }
 0x103   :  { %v1003_v30 = vpop.f32.mrf.mxu0 }
 0x104   :  { %v1025_v31 = vpop.f32.mrf.mxu1 }
 0x105   :  { %v1004_v32 = vpop.f32.mrf.mxu0 }
 0x106   :  { %v1026_v33 = vpop.f32.mrf.mxu1  ;;  %v1005_v40 = vadd.f32 %v1004_v32, %v1003_v30 }
 0x107   :  { %v1006_v34 = vpop.f32.mrf.mxu0  ;;  %v1027_v43 = vadd.f32 %v1026_v33, %v1025_v31 }
 0x108   :  { %v1028_v35 = vpop.f32.mrf.mxu1  ;;  %v749_v42 = vadd.f32 %v1005_v40, %v709_v41 }
 0x109   :  { %v1007_v36 = vpop.f32.mrf.mxu0 }
 0x10a   :  { %v1029_v37 = vpop.f32.mrf.mxu1  ;;  %v789_v44 = vadd.f32 %v1027_v43, %v749_v42 }
 0x123   :  { %v828_v45 = vpop.f32.mrf.mxu0 }
 0x124   :  { %v829_v48 = vadd.f32 %v828_v45, %v789_v44 }
 0x125   :  { %v1058_v50 = vpop.f32.mrf.mxu0 }
 0x126   :  { %v841_v51 = vmul.f32 %v941_v46, %v829_v48 }
 0x127   :  { %v831_v53 = vpop.f32.mrf.mxu0 }
 0x128   :  { %v849_v54 = vadd.f32 %v942_v49, %v841_v51 }
 0x129   :  { %v1059_v55 = vpop.f32.mrf.mxu0 }
 0x12a   :  { %v852_v56 = vadd.f32 %v851_v52, %v849_v54 }
 0x12c   :  { %v853_v57 = vmax.f32 %v852_v56, 0.0 }
 0x12e   :  { %v854_v58 = vpack.c.bf16 %v853_v57, %v853_v57 }
 0x130   :  { %855 = vst [vmem:[%s1423_s5] sm:$0xf] %v854_v58 }

// kernel: forward_pallas.17
= control target key start
LH: loop header
LB: loop body
LE: loop exit
PB: predicated region body
PF: predicated region fallthrough
CT: control target
= control target key end

     0   :  { %v3058_v36 = vmov 1966171168   ;;  %v318_v38 = vlaneseq  ;;  %s4029_s1 = inlined_call_operand.vmem [shape: bf16[2304,256], index: 1, kind: input, shape index: {}]   ;;  %s4030_s0 = inlined_call_operand.vmem [shape: bf16[2,2304], index: 0, kind: input, shape index: {}]   ;;  %s4031_s4 = inlined_call_operand.vmem [shape: bf16[2,256], index: 4, kind: input, shape index: {}, may-alias: {4,5}]   ;;  %s4032_s2 = inlined_call_operand.vmem [shape: f32[1,256], index: 2, kind: input, shape index: {}]   ;;  %s4033_s3 = inlined_call_operand.vmem [shape: f32[1,256], index: 3, kind: input, shape index: {}]   ;;  %s4034_s5 = inlined_call_operand.vmem [shape: bf16[2,256], index: 5, kind: output, shape index: {}, may-alias: {4,5}]  }
   0x1   :  { %v2624_v0 = vld [vmem:[%s4029_s1 + $0x74] ss:$8 sps:$4 sm:$0xff]   ;;  %v2628_v2 = vld [vmem:[%s4029_s1 + $0x70] ss:$8 sps:$4 sm:$0xff]   ;;  %v2630_v4 = vld [vmem:[%s4029_s1 + $0x64] ss:$8 sps:$4 sm:$0xff]   ;;  %v316_v37 = vunpack.c.l.s4 %v3058_v36 }
   0x2   :  { %v2626_v1 = vld [vmem:[%s4029_s1 + $0x174] ss:$8 sps:$4 sm:$0xff]   ;;  %1892 = vmatprep.subr.bf16.mxu0 %v2624_v0  ;;  %v2629_v3 = vld [vmem:[%s4029_s1 + $0x170] ss:$8 sps:$4 sm:$0xff]   ;;  %v2632_v5 = vld [vmem:[%s4029_s1 + $0x164] ss:$8 sps:$4 sm:$0xff]  }
   0x3   :  { %1933 = vmatprep.subr.bf16.mxu1 %v2626_v1  ;;  %1893 = vmatpush1.bf16.msra.mxu0 %v2628_v2  ;;  %v2634_v6 = vld [vmem:[%s4029_s1 + $0x60] ss:$8 sps:$4 sm:$0xff]   ;;  %v2636_v8 = vld [vmem:[%s4029_s1 + $0x54] ss:$8 sps:$4 sm:$0xff]   ;;  %v2640_v10 = vld [vmem:[%s4029_s1 + $0x50] ss:$8 sps:$4 sm:$0xff]   ;;  %v317_v42 = vunpack.c.0.s8 %v316_v37 }
   0x4   :  { %1934 = vmatpush1.bf16.msra.mxu1 %v2629_v3  ;;  %1894 = vmatprep.subr.bf16.mxu0 %v2630_v4  ;;  %v2635_v7 = vld [vmem:[%s4029_s1 + $0x160] ss:$8 sps:$4 sm:$0xff]   ;;  %v2638_v9 = vld [vmem:[%s4029_s1 + $0x154] ss:$8 sps:$4 sm:$0xff]   ;;  %v2641_v11 = vld [vmem:[%s4029_s1 + $0x150] ss:$8 sps:$4 sm:$0xff]  }
   0x5   :  { %1935 = vmatprep.subr.bf16.mxu1 %v2632_v5  ;;  %v2642_v12 = vld [vmem:[%s4029_s1 + $0x44] ss:$8 sps:$4 sm:$0xff]   ;;  %v2646_v14 = vld [vmem:[%s4029_s1 + $0x40] ss:$8 sps:$4 sm:$0xff]   ;;  %v2648_v16 = vld [vmem:[%s4029_s1 + $0x34] ss:$8 sps:$4 sm:$0xff]  }
   0x6   :  { %v2644_v13 = vld [vmem:[%s4029_s1 + $0x144] ss:$8 sps:$4 sm:$0xff]   ;;  %v2647_v15 = vld [vmem:[%s4029_s1 + $0x140] ss:$8 sps:$4 sm:$0xff]   ;;  %v2650_v17 = vld [vmem:[%s4029_s1 + $0x134] ss:$8 sps:$4 sm:$0xff]  }
   0x7   :  { %1895 = vmatpush1.bf16.msra.mxu0 %v2634_v6  ;;  %v2652_v18 = vld [vmem:[%s4029_s1 + $0x30] ss:$8 sps:$4 sm:$0xff]   ;;  %v2654_v20 = vld [vmem:[%s4029_s1 + $0x24] ss:$8 sps:$4 sm:$0xff]   ;;  %v2658_v22 = vld [vmem:[%s4029_s1 + $0x20] ss:$8 sps:$4 sm:$0xff]  }
   0x8   :  { %1936 = vmatpush1.bf16.msra.mxu1 %v2635_v7  ;;  %1896 = vmatprep.subr.bf16.mxu0 %v2636_v8  ;;  %v2653_v19 = vld [vmem:[%s4029_s1 + $0x130] ss:$8 sps:$4 sm:$0xff]   ;;  %v2656_v21 = vld [vmem:[%s4029_s1 + $0x124] ss:$8 sps:$4 sm:$0xff]   ;;  %v2659_v23 = vld [vmem:[%s4029_s1 + $0x120] ss:$8 sps:$4 sm:$0xff]  }
   0x9   :  { %1937 = vmatprep.subr.bf16.mxu1 %v2638_v9  ;;  %v2660_v24 = vld [vmem:[%s4029_s1 + $0x14] ss:$8 sps:$4 sm:$0xff]   ;;  %v2664_v26 = vld [vmem:[%s4029_s1 + $0x10] ss:$8 sps:$4 sm:$0xff]   ;;  %v2666_v28 = vld [vmem:[%s4029_s1 + $0x4] ss:$8 sps:$4 sm:$0xff]  }
   0xa   :  { %v2662_v25 = vld [vmem:[%s4029_s1 + $0x114] ss:$8 sps:$4 sm:$0xff]   ;;  %v2665_v27 = vld [vmem:[%s4029_s1 + $0x110] ss:$8 sps:$4 sm:$0xff]   ;;  %v2668_v29 = vld [vmem:[%s4029_s1 + $0x104] ss:$8 sps:$4 sm:$0xff]  }
   0xb   :  { %1897 = vmatpush1.bf16.msra.mxu0 %v2640_v10  ;;  %v2670_v30 = vld [vmem:[%s4029_s1] ss:$8 sps:$4 sm:$0xff]   ;;  %v2672_v32 = vld [vmem:[%s4029_s1 + $0xf4] ss:$8 sps:$4 sm:$0xff]   ;;  %v2676_v34 = vld [vmem:[%s4029_s1 + $0xf0] ss:$8 sps:$4 sm:$0xff]  }
   0xc   :  { %1938 = vmatpush1.bf16.msra.mxu1 %v2641_v11  ;;  %1898 = vmatprep.subr.bf16.mxu0 %v2642_v12  ;;  %v2671_v31 = vld [vmem:[%s4029_s1 + $0x100] ss:$8 sps:$4 sm:$0xff]   ;;  %v2674_v33 = vld [vmem:[%s4029_s1 + $0x1f4] ss:$8 sps:$4 sm:$0xff]   ;;  %v2677_v35 = vld [vmem:[%s4029_s1 + $0x1f0] ss:$8 sps:$4 sm:$0xff]  }
   0xd   :  { %1939 = vmatprep.subr.bf16.mxu1 %v2644_v13  ;;  %v2678_v39 = vld [vmem:[%s4029_s1 + $0xe4] ss:$8 sps:$4 sm:$0xff]   ;;  %v2682_v41 = vld [vmem:[%s4029_s1 + $0xe0] ss:$8 sps:$4 sm:$0xff]   ;;  %v3207_v43 = vshrl.u32 %v318_v38, 7 }
   0xe   :  { %v2680_v40 = vld [vmem:[%s4029_s1 + $0x1e4] ss:$8 sps:$4 sm:$0xff]   ;;  %v2683_v44 = vld [vmem:[%s4029_s1 + $0x1e0] ss:$8 sps:$4 sm:$0xff]   ;;  %v2684_v45 = vld [vmem:[%s4029_s1 + $0xd4] ss:$8 sps:$4 sm:$0xff]  }
   0xf   :  { %1899 = vmatpush1.bf16.msra.mxu0 %v2646_v14  ;;  %v2686_v46 = vld [vmem:[%s4029_s1 + $0x1d4] ss:$8 sps:$4 sm:$0xff]   ;;  %v2688_v47 = vld [vmem:[%s4029_s1 + $0xd0] ss:$8 sps:$4 sm:$0xff]   ;;  %v3225_v49 = vsub.s32 %v317_v42, %v3207_v43  ;;  %v2690_v50 = vld [vmem:[%s4029_s1 + $0xc4] ss:$8 sps:$4 sm:$0xff]  }
  0x10   :  { %1940 = vmatpush1.bf16.msra.mxu1 %v2647_v15  ;;  %1900 = vmatprep.subr.bf16.mxu0 %v2648_v16  ;;  %v2689_v48 = vld [vmem:[%s4029_s1 + $0x1d0] ss:$8 sps:$4 sm:$0xff]   ;;  %v2692_v51 = vld [vmem:[%s4029_s1 + $0x1c4] ss:$8 sps:$4 sm:$0xff]   ;;  %v2694_v53 = vld [vmem:[%s4029_s1 + $0xc0] ss:$8 sps:$4 sm:$0xff]  }
  0x11   :  { %1941 = vmatprep.subr.bf16.mxu1 %v2650_v17  ;;  %v20_v52 = vld [vmem:[%s4030_s0] sm:$0xff]  ;;  %v2696_v56 = vld [vmem:[%s4029_s1 + $0xb4] ss:$8 sps:$4 sm:$0xff]   ;;  %v2700_v59 = vld [vmem:[%s4029_s1 + $0xb0] ss:$8 sps:$4 sm:$0xff]  }
  0x12   :  { %v321_v54 = vrot.slane %v20_v52, %v3225_v49  ;;  %v2695_v55 = vld [vmem:[%s4029_s1 + $0x1c0] ss:$8 sps:$4 sm:$0xff]   ;;  %v2698_v57 = vld [vmem:[%s4029_s1 + $0x1b4] ss:$8 sps:$4 sm:$0xff]   ;;  %v2701_v61 = vld [vmem:[%s4029_s1 + $0x1b0] ss:$8 sps:$4 sm:$0xff]   ;;  %v314_v1 = vcombine.high %v20_v52, %v20_v52 }
  0x13   :  { %1901 = vmatpush1.bf16.msra.mxu0 %v2652_v18  ;;  %v2702_v62 = vld [vmem:[%s4029_s1 + $0xa4] ss:$8 sps:$4 sm:$0xff]   ;;  %v2706_v2 = vld [vmem:[%s4029_s1 + $0xa0] ss:$8 sps:$4 sm:$0xff]   ;;  %v2708_v4 = vld [vmem:[%s4029_s1 + $0x94] ss:$8 sps:$4 sm:$0xff]  }
  0x14   :  { %1942 = vmatpush1.bf16.msra.mxu1 %v2653_v19  ;;  %1902 = vmatprep.subr.bf16.mxu0 %v2654_v20  ;;  %v329_v58 = vcombine.high %v321_v54, %v321_v54  ;;  %v2704_v63 = vld [vmem:[%s4029_s1 + $0x1a4] ss:$8 sps:$4 sm:$0xff]   ;;  %v2707_v3 = vld [vmem:[%s4029_s1 + $0x1a0] ss:$8 sps:$4 sm:$0xff]   ;;  %v2710_v5 = vld [vmem:[%s4029_s1 + $0x194] ss:$8 sps:$4 sm:$0xff]   ;;  %v3275_v6 = vrot.slane %v314_v1, %v3225_v49  ;;  %v337_v13 = vrot.slane %v321_v54, %v3225_v49 }
  0x15   :  { %1943 = vmatprep.subr.bf16.mxu1 %v2656_v21  ;;  %v2712_v7 = vld [vmem:[%s4029_s1 + $0x90] ss:$8 sps:$4 sm:$0xff]   ;;  %v2714_v9 = vld [vmem:[%s4029_s1 + $0x84] ss:$8 sps:$4 sm:$0xff]   ;;  %v2718_v12 = vld [vmem:[%s4029_s1 + $0x80] ss:$8 sps:$4 sm:$0xff]  }
  0x16   :  { %v351_v60 = vrot.slane %v329_v58, %v3225_v49  ;;  %v2713_v8 = vld [vmem:[%s4029_s1 + $0x190] ss:$8 sps:$4 sm:$0xff]   ;;  %v2716_v10 = vld [vmem:[%s4029_s1 + $0x184] ss:$8 sps:$4 sm:$0xff]   ;;  %v330_v11 = vcombine.high %v3275_v6, %v3275_v6  ;;  %v2719_v14 = vld [vmem:[%s4029_s1 + $0x180] ss:$8 sps:$4 sm:$0xff]   ;;  %v359_v18 = vcombine.high %v337_v13, %v337_v13 }
  0x17   :  { %1903 = vmatpush1.bf16.msra.mxu0 %v2658_v22  ;;  %v2723_v15 = vld [vmem:[%s4029_s1 + $0x274] ss:$8 sps:$4 sm:$0xff]   ;;  %v2721_v19 = vld [vmem:[%s4029_s1 + $0x270] ss:$8 sps:$4 sm:$0xff]   ;;  %v2729_v21 = vld [vmem:[%s4029_s1 + $0x264] ss:$8 sps:$4 sm:$0xff]  }
  0x18   :  { %1944 = vmatpush1.bf16.msra.mxu1 %v2659_v23  ;;  %1904 = vmatprep.subr.bf16.mxu0 %v2660_v24  ;;  %v361_v0 = vcombine.high %v351_v60, %v351_v60  ;;  %v2726_v16 = vld [vmem:[%s4029_s1 + $0x374] ss:$8 sps:$4 sm:$0xff]   ;;  %v358_v17 = vrot.slane %v330_v11, %v3225_v49  ;;  %v2724_v20 = vld [vmem:[%s4029_s1 + $0x370] ss:$8 sps:$4 sm:$0xff]   ;;  %v2732_v22 = vld [vmem:[%s4029_s1 + $0x364] ss:$8 sps:$4 sm:$0xff]  }
  0x19   :  { %1945 = vmatprep.subr.bf16.mxu1 %v2662_v25  ;;  %1924 = vmatprep.mubr.bf16.mxu0 %v351_v60  ;;  %v2727_v24 = vld [vmem:[%s4029_s1 + $0x260] ss:$8 sps:$4 sm:$0xff]   ;;  %v2745_v36 = vld [vmem:[%s4029_s1 + $0x230] ss:$8 sps:$4 sm:$0xff]   ;;  %v2753_v38 = vld [vmem:[%s4029_s1 + $0x224] ss:$8 sps:$4 sm:$0xff]  }
  0x1a   :  { %1965 = vmatprep.mubr.bf16.mxu1 %v361_v0  ;;  %v362_v23 = vcombine.high %v358_v17, %v358_v17  ;;  %v2730_v25 = vld [vmem:[%s4029_s1 + $0x360] ss:$8 sps:$4 sm:$0xff]   ;;  %v2748_v37 = vld [vmem:[%s4029_s1 + $0x330] ss:$8 sps:$4 sm:$0xff]   ;;  %v2759_v42 = vld [vmem:[%s4029_s1 + $0x214] ss:$8 sps:$4 sm:$0xff]  }
  0x1b   :  { %1905 = vmatpush1.bf16.msra.mxu0 %v2664_v26  ;;  %v2735_v26 = vld [vmem:[%s4029_s1 + $0x254] ss:$8 sps:$4 sm:$0xff]   ;;  %v2769_v54 = vld [vmem:[%s4029_s1 + $0x2f0] ss:$8 sps:$4 sm:$0xff]   ;;  %v2775_v58 = vld [vmem:[%s4029_s1 + $0x2e0] ss:$8 sps:$4 sm:$0xff]  }
  0x1c   :  { %1946 = vmatpush1.bf16.msra.mxu1 %v2665_v27  ;;  %1906 = vmatprep.subr.bf16.mxu0 %v2666_v28  ;;  %v2738_v27 = vld [vmem:[%s4029_s1 + $0x354] ss:$8 sps:$4 sm:$0xff]   ;;  %v2733_v28 = vld [vmem:[%s4029_s1 + $0x250] ss:$8 sps:$4 sm:$0xff]   ;;  %v2789_v0 = vld [vmem:[%s4029_s1 + $0x2c4] ss:$8 sps:$4 sm:$0xff]  }
  0x1d   :  { %1947 = vmatprep.subr.bf16.mxu1 %v2668_v29  ;;  %v2736_v29 = vld [vmem:[%s4029_s1 + $0x350] ss:$8 sps:$4 sm:$0xff]   ;;  %v2771_v52 = vld [vmem:[%s4029_s1 + $0x2f4] ss:$8 sps:$4 sm:$0xff]   ;;  %v2792_v1 = vld [vmem:[%s4029_s1 + $0x3c4] ss:$8 sps:$4 sm:$0xff]  }
  0x1e   :  { %v2783_v60 = vld [vmem:[%s4029_s1 + $0x2d4] ss:$8 sps:$4 sm:$0xff]   ;;  %v2799_v11 = vld [vmem:[%s4029_s1 + $0x2a0] ss:$8 sps:$4 sm:$0xff]  }
  0x1f   :  { %1907 = vmatpush1.bf16.msra.mxu0 %v2670_v30  ;;  %v2741_v30 = vld [vmem:[%s4029_s1 + $0x244] ss:$8 sps:$4 sm:$0xff]  }
  0x20   :  { %1948 = vmatpush1.bf16.msra.mxu1 %v2671_v31  ;;  %1908 = vmatprep.subr.bf16.mxu0 %v2672_v32  ;;  %v2744_v31 = vld [vmem:[%s4029_s1 + $0x344] ss:$8 sps:$4 sm:$0xff]   ;;  %v2739_v32 = vld [vmem:[%s4029_s1 + $0x240] ss:$8 sps:$4 sm:$0xff]  }
  0x21   :  { %1949 = vmatprep.subr.bf16.mxu1 %v2674_v33  ;;  %v2742_v33 = vld [vmem:[%s4029_s1 + $0x340] ss:$8 sps:$4 sm:$0xff]  }
  0x23   :  { %1909 = vmatpush2.bf16.msra.mxu0 %v2676_v34  ;;  %v2747_v34 = vld [vmem:[%s4029_s1 + $0x234] ss:$8 sps:$4 sm:$0xff]  }
  0x24   :  { %1950 = vmatpush2.bf16.msra.mxu1 %v2677_v35  ;;  %1910 = vmatprep.subr.bf16.mxu0 %v2678_v39  ;;  %v2750_v35 = vld [vmem:[%s4029_s1 + $0x334] ss:$8 sps:$4 sm:$0xff]   ;;  %v2756_v39 = vld [vmem:[%s4029_s1 + $0x324] ss:$8 sps:$4 sm:$0xff]  }
  0x25   :  { %1951 = vmatprep.subr.bf16.mxu1 %v2680_v40  ;;  %v2751_v40 = vld [vmem:[%s4029_s1 + $0x220] ss:$8 sps:$4 sm:$0xff]  }
  0x27   :  { %1911 = vmatpush2.bf16.msra.mxu0 %v2682_v41  ;;  %v2754_v41 = vld [vmem:[%s4029_s1 + $0x320] ss:$8 sps:$4 sm:$0xff]  }
  0x28   :  { %1952 = vmatpush2.bf16.msra.mxu1 %v2683_v44  ;;  %1912 = vmatprep.subr.bf16.mxu0 %v2684_v45  ;;  %v2762_v44 = vld [vmem:[%s4029_s1 + $0x314] ss:$8 sps:$4 sm:$0xff]   ;;  %v2757_v45 = vld [vmem:[%s4029_s1 + $0x210] ss:$8 sps:$4 sm:$0xff]  }
  0x29   :  { %1953 = vmatprep.subr.bf16.mxu1 %v2686_v46  ;;  %v2760_v46 = vld [vmem:[%s4029_s1 + $0x310] ss:$8 sps:$4 sm:$0xff]  }
  0x2b   :  { %1913 = vmatpush2.bf16.msra.mxu0 %v2688_v47  ;;  %v2765_v47 = vld [vmem:[%s4029_s1 + $0x204] ss:$8 sps:$4 sm:$0xff]  }
  0x2c   :  { %1954 = vmatpush2.bf16.msra.mxu1 %v2689_v48  ;;  %1914 = vmatprep.subr.bf16.mxu0 %v2690_v50  ;;  %v2768_v48 = vld [vmem:[%s4029_s1 + $0x304] ss:$8 sps:$4 sm:$0xff]   ;;  %v2763_v50 = vld [vmem:[%s4029_s1 + $0x200] ss:$8 sps:$4 sm:$0xff]  }
  0x2d   :  { %1955 = vmatprep.subr.bf16.mxu1 %v2692_v51  ;;  %v2766_v51 = vld [vmem:[%s4029_s1 + $0x300] ss:$8 sps:$4 sm:$0xff]  }
  0x2f   :  { %1915 = vmatpush2.bf16.msra.mxu0 %v2694_v53  ;;  %v2774_v53 = vld [vmem:[%s4029_s1 + $0x3f4] ss:$8 sps:$4 sm:$0xff]  }
  0x30   :  { %1956 = vmatpush2.bf16.msra.mxu1 %v2695_v55  ;;  %1916 = vmatprep.subr.bf16.mxu0 %v2696_v56  ;;  %v2772_v55 = vld [vmem:[%s4029_s1 + $0x3f0] ss:$8 sps:$4 sm:$0xff]   ;;  %v2777_v56 = vld [vmem:[%s4029_s1 + $0x2e4] ss:$8 sps:$4 sm:$0xff]  }
  0x31   :  { %1957 = vmatprep.subr.bf16.mxu1 %v2698_v57  ;;  %v2780_v57 = vld [vmem:[%s4029_s1 + $0x3e4] ss:$8 sps:$4 sm:$0xff]  }
  0x33   :  { %1917 = vmatpush2.bf16.msra.mxu0 %v2700_v59  ;;  %v2778_v59 = vld [vmem:[%s4029_s1 + $0x3e0] ss:$8 sps:$4 sm:$0xff]  }
  0x34   :  { %1958 = vmatpush2.bf16.msra.mxu1 %v2701_v61  ;;  %1918 = vmatprep.subr.bf16.mxu0 %v2702_v62  ;;  %v2786_v61 = vld [vmem:[%s4029_s1 + $0x3d4] ss:$8 sps:$4 sm:$0xff]   ;;  %v2781_v62 = vld [vmem:[%s4029_s1 + $0x2d0] ss:$8 sps:$4 sm:$0xff]  }
  0x35   :  { %1959 = vmatprep.subr.bf16.mxu1 %v2704_v63  ;;  %v2784_v63 = vld [vmem:[%s4029_s1 + $0x3d0] ss:$8 sps:$4 sm:$0xff]  }
  0x37   :  { %1919 = vmatpush2.bf16.msra.mxu0 %v2706_v2  ;;  %v2787_v2 = vld [vmem:[%s4029_s1 + $0x2c0] ss:$8 sps:$4 sm:$0xff]  }
  0x38   :  { %1960 = vmatpush2.bf16.msra.mxu1 %v2707_v3  ;;  %1920 = vmatprep.subr.bf16.mxu0 %v2708_v4  ;;  %v2790_v3 = vld [vmem:[%s4029_s1 + $0x3c0] ss:$8 sps:$4 sm:$0xff]   ;;  %v2795_v4 = vld [vmem:[%s4029_s1 + $0x2b4] ss:$8 sps:$4 sm:$0xff]  }
  0x39   :  { %1961 = vmatprep.subr.bf16.mxu1 %v2710_v5  ;;  %v2798_v5 = vld [vmem:[%s4029_s1 + $0x3b4] ss:$8 sps:$4 sm:$0xff]  }
  0x3b   :  { %1921 = vmatpush2.bf16.msra.mxu0 %v2712_v7  ;;  %v2793_v7 = vld [vmem:[%s4029_s1 + $0x2b0] ss:$8 sps:$4 sm:$0xff]  }
  0x3c   :  { %1962 = vmatpush2.bf16.msra.mxu1 %v2713_v8  ;;  %1922 = vmatprep.subr.bf16.mxu0 %v2714_v9  ;;  %v2796_v8 = vld [vmem:[%s4029_s1 + $0x3b0] ss:$8 sps:$4 sm:$0xff]   ;;  %v2801_v9 = vld [vmem:[%s4029_s1 + $0x2a4] ss:$8 sps:$4 sm:$0xff]  }
  0x3d   :  { %1963 = vmatprep.subr.bf16.mxu1 %v2716_v10  ;;  %v2804_v10 = vld [vmem:[%s4029_s1 + $0x3a4] ss:$8 sps:$4 sm:$0xff]  }
  0x3f   :  { %1923 = vmatpush2.bf16.msra.mxu0 %v2718_v12  ;;  %v2802_v12 = vld [vmem:[%s4029_s1 + $0x3a0] ss:$8 sps:$4 sm:$0xff]  }
  0x40   :  { %1964 = vmatpush2.bf16.msra.mxu1 %v2719_v14  ;;  %1974 = vmatprep.subr.bf16.mxu0 %v2723_v15  ;;  %v2810_v14 = vld [vmem:[%s4029_s1 + $0x394] ss:$8 sps:$4 sm:$0xff]   ;;  %v2805_v15 = vld [vmem:[%s4029_s1 + $0x290] ss:$8 sps:$4 sm:$0xff]  }
  0x41   :  { %2015 = vmatprep.subr.bf16.mxu1 %v2726_v16  ;;  %v2808_v16 = vld [vmem:[%s4029_s1 + $0x390] ss:$8 sps:$4 sm:$0xff]  }
  0x42   :  { %1925 = vmatmul.mubr.bf16.vlgmr.msra.gmra.mxu0 %v337_v13  ;;  %v2807_v13 = vld [vmem:[%s4029_s1 + $0x294] ss:$8 sps:$4 sm:$0xff]  }
  0x43   :  { %1966 = vmatmul.mubr.bf16.vlgmr.msra.gmra.mxu1 %v359_v18  ;;  %1975 = vmatpush1.bf16.msra.mxu0 %v2721_v19  ;;  %v2816_v18 = vld [vmem:[%s4029_s1 + $0x384] ss:$8 sps:$4 sm:$0xff]   ;;  %v2811_v19 = vld [vmem:[%s4029_s1 + $0x280] ss:$8 sps:$4 sm:$0xff]  }
  0x44   :  { %2016 = vmatpush1.bf16.msra.mxu1 %v2724_v20  ;;  %1976 = vmatprep.subr.bf16.mxu0 %v2729_v21  ;;  %v344_v20 = vrot.slane %v3275_v6, %v3225_v49  ;;  %v2814_v21 = vld [vmem:[%s4029_s1 + $0x380] ss:$8 sps:$4 sm:$0xff]   ;;  %v2817_v6 = vld [vmem:[%s4029_s1 + $0x470] ss:$8 sps:$4 sm:$0xff]  }
  0x45   :  { %2017 = vmatprep.subr.bf16.mxu1 %v2732_v22  ;;  %2006 = vmatprep.mubr.bf16.mxu0 %v358_v17  ;;  %v2813_v17 = vld [vmem:[%s4029_s1 + $0x284] ss:$8 sps:$4 sm:$0xff]   ;;  %v2819_v22 = vld [vmem:[%s4029_s1 + $0x474] ss:$8 sps:$4 sm:$0xff]  }
  0x46   :  { %2047 = vmatprep.mubr.bf16.mxu1 %v362_v23  ;;  %v2822_v23 = vld [vmem:[%s4029_s1 + $0x574] ss:$8 sps:$4 sm:$0xff]  }
  0x47   :  { %1977 = vmatpush1.bf16.msra.mxu0 %v2727_v24  ;;  %v360_v24 = vcombine.high %v344_v20, %v344_v20 }
  0x48   :  { %2018 = vmatpush1.bf16.msra.mxu1 %v2730_v25  ;;  %1978 = vmatprep.subr.bf16.mxu0 %v2735_v26  ;;  %v2820_v25 = vld [vmem:[%s4029_s1 + $0x570] ss:$8 sps:$4 sm:$0xff]   ;;  %v3508_v26 = vld [vmem:[%s4030_s0 + $0x8] sm:$0xff] }
  0x49   :  { %2019 = vmatprep.subr.bf16.mxu1 %v2738_v27  ;;  %v2825_v27 = vld [vmem:[%s4029_s1 + $0x464] ss:$8 sps:$4 sm:$0xff]  }
  0x4b   :  { %1979 = vmatpush1.bf16.msra.mxu0 %v2733_v28  ;;  %v2828_v28 = vld [vmem:[%s4029_s1 + $0x564] ss:$8 sps:$4 sm:$0xff]  }
  0x4c   :  { %2020 = vmatpush1.bf16.msra.mxu1 %v2736_v29  ;;  %1980 = vmatprep.subr.bf16.mxu0 %v2741_v30  ;;  %v3518_v29 = vrot.slane %v3508_v26, %v3225_v49 }
  0x4d   :  { %2021 = vmatprep.subr.bf16.mxu1 %v2744_v31  ;;  %v2823_v31 = vld [vmem:[%s4029_s1 + $0x460] ss:$8 sps:$4 sm:$0xff]  }
  0x4e   :  { %v378_v30 = vcombine.high %v3518_v29, %v3518_v29 }
  0x4f   :  { %1981 = vmatpush1.bf16.msra.mxu0 %v2739_v32  ;;  %v2826_v32 = vld [vmem:[%s4029_s1 + $0x560] ss:$8 sps:$4 sm:$0xff]  }
  0x50   :  { %2022 = vmatpush1.bf16.msra.mxu1 %v2742_v33  ;;  %1982 = vmatprep.subr.bf16.mxu0 %v2747_v34  ;;  %v2831_v33 = vld [vmem:[%s4029_s1 + $0x454] ss:$8 sps:$4 sm:$0xff]  }
  0x51   :  { %2023 = vmatprep.subr.bf16.mxu1 %v2750_v35  ;;  %v2834_v34 = vld [vmem:[%s4029_s1 + $0x554] ss:$8 sps:$4 sm:$0xff]   ;;  %v400_v35 = vrot.slane %v378_v30, %v3225_v49 }
  0x53   :  { %1983 = vmatpush1.bf16.msra.mxu0 %v2745_v36  ;;  %v410_v36 = vcombine.high %v400_v35, %v400_v35 }
  0x54   :  { %2024 = vmatpush1.bf16.msra.mxu1 %v2748_v37  ;;  %1984 = vmatprep.subr.bf16.mxu0 %v2753_v38  ;;  %v2829_v37 = vld [vmem:[%s4029_s1 + $0x450] ss:$8 sps:$4 sm:$0xff]  }
  0x55   :  { %2025 = vmatprep.subr.bf16.mxu1 %v2756_v39  ;;  %v2832_v38 = vld [vmem:[%s4029_s1 + $0x550] ss:$8 sps:$4 sm:$0xff]   ;;  %v2837_v39 = vld [vmem:[%s4029_s1 + $0x444] ss:$8 sps:$4 sm:$0xff]  }
  0x57   :  { %1985 = vmatpush1.bf16.msra.mxu0 %v2751_v40  ;;  %v2840_v40 = vld [vmem:[%s4029_s1 + $0x544] ss:$8 sps:$4 sm:$0xff]  }
  0x58   :  { %2026 = vmatpush1.bf16.msra.mxu1 %v2754_v41  ;;  %1986 = vmatprep.subr.bf16.mxu0 %v2759_v42  ;;  %v2835_v41 = vld [vmem:[%s4029_s1 + $0x440] ss:$8 sps:$4 sm:$0xff]  }
  0x59   :  { %2027 = vmatprep.subr.bf16.mxu1 %v2762_v44  ;;  %v2838_v42 = vld [vmem:[%s4029_s1 + $0x540] ss:$8 sps:$4 sm:$0xff]   ;;  %v2843_v44 = vld [vmem:[%s4029_s1 + $0x434] ss:$8 sps:$4 sm:$0xff]  }
  0x5b   :  { %1987 = vmatpush1.bf16.msra.mxu0 %v2757_v45  ;;  %v2846_v45 = vld [vmem:[%s4029_s1 + $0x534] ss:$8 sps:$4 sm:$0xff]  }
  0x5c   :  { %2028 = vmatpush1.bf16.msra.mxu1 %v2760_v46  ;;  %1988 = vmatprep.subr.bf16.mxu0 %v2765_v47  ;;  %v2841_v46 = vld [vmem:[%s4029_s1 + $0x430] ss:$8 sps:$4 sm:$0xff]  }
  0x5d   :  { %2029 = vmatprep.subr.bf16.mxu1 %v2768_v48  ;;  %v2844_v47 = vld [vmem:[%s4029_s1 + $0x530] ss:$8 sps:$4 sm:$0xff]   ;;  %v2849_v48 = vld [vmem:[%s4029_s1 + $0x424] ss:$8 sps:$4 sm:$0xff]  }
  0x5f   :  { %1989 = vmatpush1.bf16.msra.mxu0 %v2763_v50  ;;  %v2852_v50 = vld [vmem:[%s4029_s1 + $0x524] ss:$8 sps:$4 sm:$0xff]  }
  0x60   :  { %2030 = vmatpush1.bf16.msra.mxu1 %v2766_v51  ;;  %1990 = vmatprep.subr.bf16.mxu0 %v2771_v52  ;;  %v2847_v51 = vld [vmem:[%s4029_s1 + $0x420] ss:$8 sps:$4 sm:$0xff]  }
  0x61   :  { %2031 = vmatprep.subr.bf16.mxu1 %v2774_v53  ;;  %v2850_v52 = vld [vmem:[%s4029_s1 + $0x520] ss:$8 sps:$4 sm:$0xff]   ;;  %v2855_v53 = vld [vmem:[%s4029_s1 + $0x414] ss:$8 sps:$4 sm:$0xff]  }
  0x63   :  { %1991 = vmatpush2.bf16.msra.mxu0 %v2769_v54  ;;  %v2858_v54 = vld [vmem:[%s4029_s1 + $0x514] ss:$8 sps:$4 sm:$0xff]  }
  0x64   :  { %2032 = vmatpush2.bf16.msra.mxu1 %v2772_v55  ;;  %1992 = vmatprep.subr.bf16.mxu0 %v2777_v56  ;;  %v2853_v55 = vld [vmem:[%s4029_s1 + $0x410] ss:$8 sps:$4 sm:$0xff]  }
  0x65   :  { %2033 = vmatprep.subr.bf16.mxu1 %v2780_v57  ;;  %v2856_v56 = vld [vmem:[%s4029_s1 + $0x510] ss:$8 sps:$4 sm:$0xff]   ;;  %v2861_v57 = vld [vmem:[%s4029_s1 + $0x404] ss:$8 sps:$4 sm:$0xff]  }
  0x67   :  { %1993 = vmatpush2.bf16.msra.mxu0 %v2775_v58  ;;  %v2864_v58 = vld [vmem:[%s4029_s1 + $0x504] ss:$8 sps:$4 sm:$0xff]  }
  0x68   :  { %2034 = vmatpush2.bf16.msra.mxu1 %v2778_v59  ;;  %1994 = vmatprep.subr.bf16.mxu0 %v2783_v60  ;;  %v2859_v59 = vld [vmem:[%s4029_s1 + $0x400] ss:$8 sps:$4 sm:$0xff]  }
  0x69   :  { %2035 = vmatprep.subr.bf16.mxu1 %v2786_v61  ;;  %v2862_v60 = vld [vmem:[%s4029_s1 + $0x500] ss:$8 sps:$4 sm:$0xff]   ;;  %v2867_v61 = vld [vmem:[%s4029_s1 + $0x4f4] ss:$8 sps:$4 sm:$0xff]  }
  0x6b   :  { %1995 = vmatpush2.bf16.msra.mxu0 %v2781_v62  ;;  %v2870_v62 = vld [vmem:[%s4029_s1 + $0x5f4] ss:$8 sps:$4 sm:$0xff]  }
  0x6c   :  { %2036 = vmatpush2.bf16.msra.mxu1 %v2784_v63  ;;  %1996 = vmatprep.subr.bf16.mxu0 %v2789_v0  ;;  %v2865_v63 = vld [vmem:[%s4029_s1 + $0x4f0] ss:$8 sps:$4 sm:$0xff]  }
  0x6d   :  { %2037 = vmatprep.subr.bf16.mxu1 %v2792_v1  ;;  %v2868_v0 = vld [vmem:[%s4029_s1 + $0x5f0] ss:$8 sps:$4 sm:$0xff]   ;;  %v2873_v1 = vld [vmem:[%s4029_s1 + $0x4e4] ss:$8 sps:$4 sm:$0xff]  }
  0x6f   :  { %1997 = vmatpush2.bf16.msra.mxu0 %v2787_v2  ;;  %v2876_v2 = vld [vmem:[%s4029_s1 + $0x5e4] ss:$8 sps:$4 sm:$0xff]  }
  0x70   :  { %2038 = vmatpush2.bf16.msra.mxu1 %v2790_v3  ;;  %1998 = vmatprep.subr.bf16.mxu0 %v2795_v4  ;;  %v2871_v3 = vld [vmem:[%s4029_s1 + $0x4e0] ss:$8 sps:$4 sm:$0xff]  }
  0x71   :  { %2039 = vmatprep.subr.bf16.mxu1 %v2798_v5  ;;  %v2874_v4 = vld [vmem:[%s4029_s1 + $0x5e0] ss:$8 sps:$4 sm:$0xff]   ;;  %v2879_v5 = vld [vmem:[%s4029_s1 + $0x4d4] ss:$8 sps:$4 sm:$0xff]  }
  0x73   :  { %1999 = vmatpush2.bf16.msra.mxu0 %v2793_v7  ;;  %v2882_v7 = vld [vmem:[%s4029_s1 + $0x5d4] ss:$8 sps:$4 sm:$0xff]  }
  0x74   :  { %2040 = vmatpush2.bf16.msra.mxu1 %v2796_v8  ;;  %2000 = vmatprep.subr.bf16.mxu0 %v2801_v9  ;;  %v2877_v8 = vld [vmem:[%s4029_s1 + $0x4d0] ss:$8 sps:$4 sm:$0xff]  }
  0x75   :  { %2041 = vmatprep.subr.bf16.mxu1 %v2804_v10  ;;  %v2880_v9 = vld [vmem:[%s4029_s1 + $0x5d0] ss:$8 sps:$4 sm:$0xff]   ;;  %v2885_v10 = vld [vmem:[%s4029_s1 + $0x4c4] ss:$8 sps:$4 sm:$0xff]  }
  0x77   :  { %2001 = vmatpush2.bf16.msra.mxu0 %v2799_v11  ;;  %v2888_v11 = vld [vmem:[%s4029_s1 + $0x5c4] ss:$8 sps:$4 sm:$0xff]  }
  0x78   :  { %2042 = vmatpush2.bf16.msra.mxu1 %v2802_v12  ;;  %2002 = vmatprep.subr.bf16.mxu0 %v2807_v13  ;;  %v2883_v12 = vld [vmem:[%s4029_s1 + $0x4c0] ss:$8 sps:$4 sm:$0xff]  }
  0x79   :  { %2043 = vmatprep.subr.bf16.mxu1 %v2810_v14  ;;  %v2886_v13 = vld [vmem:[%s4029_s1 + $0x5c0] ss:$8 sps:$4 sm:$0xff]   ;;  %v2891_v14 = vld [vmem:[%s4029_s1 + $0x4b4] ss:$8 sps:$4 sm:$0xff]  }
  0x7b   :  { %2003 = vmatpush2.bf16.msra.mxu0 %v2805_v15  ;;  %v2894_v15 = vld [vmem:[%s4029_s1 + $0x5b4] ss:$8 sps:$4 sm:$0xff]  }
  0x7c   :  { %2044 = vmatpush2.bf16.msra.mxu1 %v2808_v16  ;;  %2004 = vmatprep.subr.bf16.mxu0 %v2813_v17  ;;  %v2889_v16 = vld [vmem:[%s4029_s1 + $0x4b0] ss:$8 sps:$4 sm:$0xff]  }
  0x7d   :  { %2045 = vmatprep.subr.bf16.mxu1 %v2816_v18  ;;  %v2892_v17 = vld [vmem:[%s4029_s1 + $0x5b0] ss:$8 sps:$4 sm:$0xff]   ;;  %v2897_v18 = vld [vmem:[%s4029_s1 + $0x4a4] ss:$8 sps:$4 sm:$0xff]  }
  0x7f   :  { %2005 = vmatpush2.bf16.msra.mxu0 %v2811_v19  ;;  %v2900_v19 = vld [vmem:[%s4029_s1 + $0x5a4] ss:$8 sps:$4 sm:$0xff]  }
  0x80   :  { %2046 = vmatpush2.bf16.msra.mxu1 %v2814_v21  ;;  %2056 = vmatprep.subr.bf16.mxu0 %v2819_v22  ;;  %v2895_v21 = vld [vmem:[%s4029_s1 + $0x4a0] ss:$8 sps:$4 sm:$0xff]  }
  0x81   :  { %2097 = vmatprep.subr.bf16.mxu1 %v2822_v23  ;;  %v2898_v22 = vld [vmem:[%s4029_s1 + $0x5a0] ss:$8 sps:$4 sm:$0xff]   ;;  %v2903_v23 = vld [vmem:[%s4029_s1 + $0x494] ss:$8 sps:$4 sm:$0xff]  }
  0x82   :  { %2007 = vmatmul.mubr.bf16.vlgmr.msra.gmra.mxu0 %v344_v20  ;;  %v363_v20 = vcombine.high %v3508_v26, %v3508_v26  ;;  %v2904_v26 = vld [vmem:[%s4029_s1 + $0x590] ss:$8 sps:$4 sm:$0xff]  }
  0x83   :  { %2048 = vmatmul.mubr.bf16.vlgmr.msra.gmra.mxu1 %v360_v24  ;;  %2057 = vmatpush1.bf16.msra.mxu0 %v2817_v6  ;;  %v2906_v6 = vld [vmem:[%s4029_s1 + $0x594] ss:$8 sps:$4 sm:$0xff]  }
  0x84   :  { %2098 = vmatpush1.bf16.msra.mxu1 %v2820_v25  ;;  %2058 = vmatprep.subr.bf16.mxu0 %v2825_v27  ;;  %v3682_v24 = vrot.slane %v363_v20, %v3225_v49  ;;  %v2901_v25 = vld [vmem:[%s4029_s1 + $0x490] ss:$8 sps:$4 sm:$0xff]   ;;  %v2909_v27 = vld [vmem:[%s4029_s1 + $0x484] ss:$8 sps:$4 sm:$0xff]  }
  0x85   :  { %2099 = vmatprep.subr.bf16.mxu1 %v2828_v28  ;;  %2088 = vmatprep.mubr.bf16.mxu0 %v400_v35  ;;  %v2912_v28 = vld [vmem:[%s4029_s1 + $0x584] ss:$8 sps:$4 sm:$0xff]  }
  0x86   :  { %2129 = vmatprep.mubr.bf16.mxu1 %v410_v36  ;;  %v379_v30 = vcombine.high %v3682_v24, %v3682_v24  ;;  %v2984_v20 = vld [vmem:[%s4029_s1 + $0x7c4] ss:$8 sps:$4 sm:$0xff]  }
  0x87   :  { %2059 = vmatpush1.bf16.msra.mxu0 %v2823_v31  ;;  %v386_v31 = vrot.slane %v3518_v29, %v3225_v49  ;;  %v2918_v29 = vld [vmem:[%s4029_s1 + $0x774] ss:$8 sps:$4 sm:$0xff]  }
  0x88   :  { %2100 = vmatpush1.bf16.msra.mxu1 %v2826_v32  ;;  %2060 = vmatprep.subr.bf16.mxu0 %v2831_v33  ;;  %v2907_v32 = vld [vmem:[%s4029_s1 + $0x480] ss:$8 sps:$4 sm:$0xff]   ;;  %v407_v35 = vrot.slane %v379_v30, %v3225_v49 }
  0x89   :  { %2101 = vmatprep.subr.bf16.mxu1 %v2834_v34  ;;  %v2910_v33 = vld [vmem:[%s4029_s1 + $0x580] ss:$8 sps:$4 sm:$0xff]   ;;  %v2915_v34 = vld [vmem:[%s4029_s1 + $0x674] ss:$8 sps:$4 sm:$0xff]   ;;  %v408_v36 = vcombine.high %v386_v31, %v386_v31 }
  0x8a   :  { %v2991_v30 = vld [vmem:[%s4029_s1 + $0x6a0] ss:$8 sps:$4 sm:$0xff]  }
  0x8b   :  { %2061 = vmatpush1.bf16.msra.mxu0 %v2829_v37  ;;  %v2913_v37 = vld [vmem:[%s4029_s1 + $0x670] ss:$8 sps:$4 sm:$0xff]  }
  0x8c   :  { %2102 = vmatpush1.bf16.msra.mxu1 %v2832_v38  ;;  %2062 = vmatprep.subr.bf16.mxu0 %v2837_v39  ;;  %v2916_v38 = vld [vmem:[%s4029_s1 + $0x770] ss:$8 sps:$4 sm:$0xff]   ;;  %v2921_v39 = vld [vmem:[%s4029_s1 + $0x664] ss:$8 sps:$4 sm:$0xff]  }
  0x8d   :  { %2103 = vmatprep.subr.bf16.mxu1 %v2840_v40  ;;  %v2924_v40 = vld [vmem:[%s4029_s1 + $0x764] ss:$8 sps:$4 sm:$0xff]  }
  0x8f   :  { %2063 = vmatpush1.bf16.msra.mxu0 %v2835_v41  ;;  %v411_v41 = vcombine.high %v407_v35, %v407_v35 }
  0x90   :  { %2104 = vmatpush1.bf16.msra.mxu1 %v2838_v42  ;;  %2064 = vmatprep.subr.bf16.mxu0 %v2843_v44  ;;  %v2919_v42 = vld [vmem:[%s4029_s1 + $0x660] ss:$8 sps:$4 sm:$0xff]  }
  0x91   :  { %2105 = vmatprep.subr.bf16.mxu1 %v2846_v45  ;;  %v2922_v44 = vld [vmem:[%s4029_s1 + $0x760] ss:$8 sps:$4 sm:$0xff]   ;;  %v2927_v45 = vld [vmem:[%s4029_s1 + $0x654] ss:$8 sps:$4 sm:$0xff]  }
  0x93   :  { %2065 = vmatpush1.bf16.msra.mxu0 %v2841_v46  ;;  %v2930_v46 = vld [vmem:[%s4029_s1 + $0x754] ss:$8 sps:$4 sm:$0xff]  }
  0x94   :  { %2106 = vmatpush1.bf16.msra.mxu1 %v2844_v47  ;;  %2066 = vmatprep.subr.bf16.mxu0 %v2849_v48  ;;  %v2925_v47 = vld [vmem:[%s4029_s1 + $0x650] ss:$8 sps:$4 sm:$0xff]  }
  0x95   :  { %2107 = vmatprep.subr.bf16.mxu1 %v2852_v50  ;;  %v2928_v48 = vld [vmem:[%s4029_s1 + $0x750] ss:$8 sps:$4 sm:$0xff]   ;;  %v2933_v50 = vld [vmem:[%s4029_s1 + $0x644] ss:$8 sps:$4 sm:$0xff]  }
  0x97   :  { %2067 = vmatpush1.bf16.msra.mxu0 %v2847_v51  ;;  %v2936_v51 = vld [vmem:[%s4029_s1 + $0x744] ss:$8 sps:$4 sm:$0xff]  }
  0x98   :  { %2108 = vmatpush1.bf16.msra.mxu1 %v2850_v52  ;;  %2068 = vmatprep.subr.bf16.mxu0 %v2855_v53  ;;  %v2931_v52 = vld [vmem:[%s4029_s1 + $0x640] ss:$8 sps:$4 sm:$0xff]  }
  0x99   :  { %2109 = vmatprep.subr.bf16.mxu1 %v2858_v54  ;;  %v2934_v53 = vld [vmem:[%s4029_s1 + $0x740] ss:$8 sps:$4 sm:$0xff]   ;;  %v2939_v54 = vld [vmem:[%s4029_s1 + $0x634] ss:$8 sps:$4 sm:$0xff]  }
  0x9b   :  { %2069 = vmatpush1.bf16.msra.mxu0 %v2853_v55  ;;  %v2942_v55 = vld [vmem:[%s4029_s1 + $0x734] ss:$8 sps:$4 sm:$0xff]  }
  0x9c   :  { %2110 = vmatpush1.bf16.msra.mxu1 %v2856_v56  ;;  %2070 = vmatprep.subr.bf16.mxu0 %v2861_v57  ;;  %v2937_v56 = vld [vmem:[%s4029_s1 + $0x630] ss:$8 sps:$4 sm:$0xff]  }
  0x9d   :  { %2111 = vmatprep.subr.bf16.mxu1 %v2864_v58  ;;  %v2940_v57 = vld [vmem:[%s4029_s1 + $0x730] ss:$8 sps:$4 sm:$0xff]   ;;  %v2945_v58 = vld [vmem:[%s4029_s1 + $0x624] ss:$8 sps:$4 sm:$0xff]  }
  0x9f   :  { %2071 = vmatpush1.bf16.msra.mxu0 %v2859_v59  ;;  %v2948_v59 = vld [vmem:[%s4029_s1 + $0x724] ss:$8 sps:$4 sm:$0xff]  }
  0xa0   :  { %2112 = vmatpush1.bf16.msra.mxu1 %v2862_v60  ;;  %2072 = vmatprep.subr.bf16.mxu0 %v2867_v61  ;;  %v2943_v60 = vld [vmem:[%s4029_s1 + $0x620] ss:$8 sps:$4 sm:$0xff]  }
  0xa1   :  { %2113 = vmatprep.subr.bf16.mxu1 %v2870_v62  ;;  %v2946_v61 = vld [vmem:[%s4029_s1 + $0x720] ss:$8 sps:$4 sm:$0xff]   ;;  %v2951_v62 = vld [vmem:[%s4029_s1 + $0x614] ss:$8 sps:$4 sm:$0xff]  }
  0xa3   :  { %2073 = vmatpush2.bf16.msra.mxu0 %v2865_v63  ;;  %v2954_v63 = vld [vmem:[%s4029_s1 + $0x714] ss:$8 sps:$4 sm:$0xff]  }
  0xa4   :  { %2114 = vmatpush2.bf16.msra.mxu1 %v2868_v0  ;;  %2074 = vmatprep.subr.bf16.mxu0 %v2873_v1  ;;  %v2949_v0 = vld [vmem:[%s4029_s1 + $0x610] ss:$8 sps:$4 sm:$0xff]  }
  0xa5   :  { %2115 = vmatprep.subr.bf16.mxu1 %v2876_v2  ;;  %v2952_v1 = vld [vmem:[%s4029_s1 + $0x710] ss:$8 sps:$4 sm:$0xff]   ;;  %v2957_v2 = vld [vmem:[%s4029_s1 + $0x604] ss:$8 sps:$4 sm:$0xff]  }
  0xa7   :  { %2075 = vmatpush2.bf16.msra.mxu0 %v2871_v3  ;;  %v2960_v3 = vld [vmem:[%s4029_s1 + $0x704] ss:$8 sps:$4 sm:$0xff]  }
  0xa8   :  { %2116 = vmatpush2.bf16.msra.mxu1 %v2874_v4  ;;  %2076 = vmatprep.subr.bf16.mxu0 %v2879_v5  ;;  %v2955_v4 = vld [vmem:[%s4029_s1 + $0x600] ss:$8 sps:$4 sm:$0xff]  }
  0xa9   :  { %2117 = vmatprep.subr.bf16.mxu1 %v2882_v7  ;;  %v2958_v5 = vld [vmem:[%s4029_s1 + $0x700] ss:$8 sps:$4 sm:$0xff]   ;;  %v2963_v7 = vld [vmem:[%s4029_s1 + $0x6f4] ss:$8 sps:$4 sm:$0xff]  }
  0xab   :  { %2077 = vmatpush2.bf16.msra.mxu0 %v2877_v8  ;;  %v2966_v8 = vld [vmem:[%s4029_s1 + $0x7f4] ss:$8 sps:$4 sm:$0xff]  }
  0xac   :  { %2118 = vmatpush2.bf16.msra.mxu1 %v2880_v9  ;;  %2078 = vmatprep.subr.bf16.mxu0 %v2885_v10  ;;  %v2961_v9 = vld [vmem:[%s4029_s1 + $0x6f0] ss:$8 sps:$4 sm:$0xff]  }
  0xad   :  { %2119 = vmatprep.subr.bf16.mxu1 %v2888_v11  ;;  %v2964_v10 = vld [vmem:[%s4029_s1 + $0x7f0] ss:$8 sps:$4 sm:$0xff]   ;;  %v2969_v11 = vld [vmem:[%s4029_s1 + $0x6e4] ss:$8 sps:$4 sm:$0xff]  }
  0xaf   :  { %2079 = vmatpush2.bf16.msra.mxu0 %v2883_v12  ;;  %v2972_v12 = vld [vmem:[%s4029_s1 + $0x7e4] ss:$8 sps:$4 sm:$0xff]  }
  0xb0   :  { %2120 = vmatpush2.bf16.msra.mxu1 %v2886_v13  ;;  %2080 = vmatprep.subr.bf16.mxu0 %v2891_v14  ;;  %v2967_v13 = vld [vmem:[%s4029_s1 + $0x6e0] ss:$8 sps:$4 sm:$0xff]  }
  0xb1   :  { %2121 = vmatprep.subr.bf16.mxu1 %v2894_v15  ;;  %v2970_v14 = vld [vmem:[%s4029_s1 + $0x7e0] ss:$8 sps:$4 sm:$0xff]   ;;  %v2975_v15 = vld [vmem:[%s4029_s1 + $0x6d4] ss:$8 sps:$4 sm:$0xff]  }
  0xb3   :  { %2081 = vmatpush2.bf16.msra.mxu0 %v2889_v16  ;;  %v2978_v16 = vld [vmem:[%s4029_s1 + $0x7d4] ss:$8 sps:$4 sm:$0xff]  }
  0xb4   :  { %2122 = vmatpush2.bf16.msra.mxu1 %v2892_v17  ;;  %2082 = vmatprep.subr.bf16.mxu0 %v2897_v18  ;;  %v2973_v17 = vld [vmem:[%s4029_s1 + $0x6d0] ss:$8 sps:$4 sm:$0xff]  }
  0xb5   :  { %2123 = vmatprep.subr.bf16.mxu1 %v2900_v19  ;;  %v2976_v18 = vld [vmem:[%s4029_s1 + $0x7d0] ss:$8 sps:$4 sm:$0xff]   ;;  %v2981_v19 = vld [vmem:[%s4029_s1 + $0x6c4] ss:$8 sps:$4 sm:$0xff]  }
  0xb7   :  { %2083 = vmatpush2.bf16.msra.mxu0 %v2895_v21  ;;  %v2979_v21 = vld [vmem:[%s4029_s1 + $0x6c0] ss:$8 sps:$4 sm:$0xff]  }
  0xb8   :  { %2124 = vmatpush2.bf16.msra.mxu1 %v2898_v22  ;;  %2084 = vmatprep.subr.bf16.mxu0 %v2903_v23  ;;  %v2982_v22 = vld [vmem:[%s4029_s1 + $0x7c0] ss:$8 sps:$4 sm:$0xff]   ;;  %v2987_v23 = vld [vmem:[%s4029_s1 + $0x6b4] ss:$8 sps:$4 sm:$0xff]  }
  0xb9   :  { %2125 = vmatprep.subr.bf16.mxu1 %v2906_v6  ;;  %v2990_v6 = vld [vmem:[%s4029_s1 + $0x7b4] ss:$8 sps:$4 sm:$0xff]  }
  0xbb   :  { %2085 = vmatpush2.bf16.msra.mxu0 %v2901_v25  ;;  %v2985_v25 = vld [vmem:[%s4029_s1 + $0x6b0] ss:$8 sps:$4 sm:$0xff]  }
  0xbc   :  { %2126 = vmatpush2.bf16.msra.mxu1 %v2904_v26  ;;  %2086 = vmatprep.subr.bf16.mxu0 %v2909_v27  ;;  %v2988_v26 = vld [vmem:[%s4029_s1 + $0x7b0] ss:$8 sps:$4 sm:$0xff]   ;;  %v2993_v27 = vld [vmem:[%s4029_s1 + $0x6a4] ss:$8 sps:$4 sm:$0xff]  }
  0xbd   :  { %2127 = vmatprep.subr.bf16.mxu1 %v2912_v28  ;;  %v2996_v28 = vld [vmem:[%s4029_s1 + $0x7a4] ss:$8 sps:$4 sm:$0xff]  }
  0xbf   :  { %2087 = vmatpush2.bf16.msra.mxu0 %v2907_v32  ;;  %v2999_v32 = vld [vmem:[%s4029_s1 + $0x694] ss:$8 sps:$4 sm:$0xff]  }
  0xc0   :  { %2128 = vmatpush2.bf16.msra.mxu1 %v2910_v33  ;;  %2138 = vmatprep.subr.bf16.mxu0 %v2915_v34  ;;  %v3002_v33 = vld [vmem:[%s4029_s1 + $0x794] ss:$8 sps:$4 sm:$0xff]   ;;  %v2997_v34 = vld [vmem:[%s4029_s1 + $0x690] ss:$8 sps:$4 sm:$0xff]  }
  0xc1   :  { %2179 = vmatprep.subr.bf16.mxu1 %v2918_v29  ;;  %v3000_v29 = vld [vmem:[%s4029_s1 + $0x790] ss:$8 sps:$4 sm:$0xff]  }
  0xc2   :  { %2089 = vmatmul.mubr.bf16.vlgmr.msra.gmra.mxu0 %v386_v31  ;;  %v2994_v31 = vld [vmem:[%s4029_s1 + $0x7a0] ss:$8 sps:$4 sm:$0xff]  }
  0xc3   :  { %2130 = vmatmul.mubr.bf16.vlgmr.msra.gmra.mxu1 %v408_v36  ;;  %2139 = vmatpush1.bf16.msra.mxu0 %v2913_v37  ;;  %v3008_v36 = vld [vmem:[%s4029_s1 + $0x784] ss:$8 sps:$4 sm:$0xff]   ;;  %v3896_v37 = vld.sshfl [vmem:[%s4030_s0 + $0x10] sm:$0x11 pattern:$0x75316420] }
  0xc4   :  { %2180 = vmatpush1.bf16.msra.mxu1 %v2916_v38  ;;  %2140 = vmatprep.subr.bf16.mxu0 %v2921_v39  ;;  %v393_v38 = vrot.slane %v3682_v24, %v3225_v49  ;;  %v3003_v39 = vld [vmem:[%s4029_s1 + $0x680] ss:$8 sps:$4 sm:$0xff]  }
  0xc5   :  { %2181 = vmatprep.subr.bf16.mxu1 %v2924_v40  ;;  %2170 = vmatprep.mubr.bf16.mxu0 %v407_v35  ;;  %v3005_v35 = vld [vmem:[%s4029_s1 + $0x684] ss:$8 sps:$4 sm:$0xff]   ;;  %v3006_v40 = vld [vmem:[%s4029_s1 + $0x780] ss:$8 sps:$4 sm:$0xff]  }
  0xc6   :  { %2211 = vmatprep.mubr.bf16.mxu1 %v411_v41  ;;  %v419_v41 = vcombine.high %v3896_v37, %v3896_v37  ;;  %v409_v24 = vcombine.high %v393_v38, %v393_v38 }
  0xc7   :  { %2141 = vmatpush1.bf16.msra.mxu0 %v2919_v42  ;;  %v3012_v42 = vld [vmem:[%s4029_s1 + $0x874] ss:$8 sps:$4 sm:$0xff]  }
  0xc8   :  { %2182 = vmatpush1.bf16.msra.mxu1 %v2922_v44  ;;  %2142 = vmatprep.subr.bf16.mxu0 %v2927_v45  ;;  %v3010_v44 = vld [vmem:[%s4029_s1 + $0x870] ss:$8 sps:$4 sm:$0xff]   ;;  %v433_v45 = vrot.slane %v419_v41, %v3225_v49 }
  0xc9   :  { %2183 = vmatprep.subr.bf16.mxu1 %v2930_v46  ;;  %v3015_v46 = vld [vmem:[%s4029_s1 + $0x864] ss:$8 sps:$4 sm:$0xff]  }
  0xcb   :  { %2143 = vmatpush1.bf16.msra.mxu0 %v2925_v47 }
  0xcc   :  { %2184 = vmatpush1.bf16.msra.mxu1 %v2928_v48  ;;  %2144 = vmatprep.subr.bf16.mxu0 %v2933_v50 }
  0xcd   :  { %2185 = vmatprep.subr.bf16.mxu1 %v2936_v51  ;;  %v3013_v51 = vld [vmem:[%s4029_s1 + $0x860] ss:$8 sps:$4 sm:$0xff]  }
  0xcf   :  { %2145 = vmatpush1.bf16.msra.mxu0 %v2931_v52 }
  0xd0   :  { %2186 = vmatpush1.bf16.msra.mxu1 %v2934_v53  ;;  %2146 = vmatprep.subr.bf16.mxu0 %v2939_v54  ;;  %v3018_v54 = vld [vmem:[%s4029_s1 + $0x854] ss:$8 sps:$4 sm:$0xff]  }
  0xd1   :  { %2187 = vmatprep.subr.bf16.mxu1 %v2942_v55 }
  0xd3   :  { %2147 = vmatpush1.bf16.msra.mxu0 %v2937_v56 }
  0xd4   :  { %2188 = vmatpush1.bf16.msra.mxu1 %v2940_v57  ;;  %2148 = vmatprep.subr.bf16.mxu0 %v2945_v58  ;;  %v3016_v58 = vld [vmem:[%s4029_s1 + $0x850] ss:$8 sps:$4 sm:$0xff]  }
  0xd5   :  { %2189 = vmatprep.subr.bf16.mxu1 %v2948_v59 }
  0xd7   :  { %2149 = vmatpush1.bf16.msra.mxu0 %v2943_v60  ;;  %v3021_v60 = vld [vmem:[%s4029_s1 + $0x844] ss:$8 sps:$4 sm:$0xff]  }
  0xd8   :  { %2190 = vmatpush1.bf16.msra.mxu1 %v2946_v61  ;;  %2150 = vmatprep.subr.bf16.mxu0 %v2951_v62  ;;  %v3019_v62 = vld [vmem:[%s4029_s1 + $0x840] ss:$8 sps:$4 sm:$0xff]  }
  0xd9   :  { %2191 = vmatprep.subr.bf16.mxu1 %v2954_v63  ;;  %v3024_v63 = vld [vmem:[%s4029_s1 + $0x834] ss:$8 sps:$4 sm:$0xff]  }
  0xdb   :  { %2151 = vmatpush1.bf16.msra.mxu0 %v2949_v0  ;;  %v3022_v0 = vld [vmem:[%s4029_s1 + $0x830] ss:$8 sps:$4 sm:$0xff]  }
  0xdc   :  { %2192 = vmatpush1.bf16.msra.mxu1 %v2952_v1  ;;  %2152 = vmatprep.subr.bf16.mxu0 %v2957_v2  ;;  %v3027_v1 = vld [vmem:[%s4029_s1 + $0x824] ss:$8 sps:$4 sm:$0xff]   ;;  %v3025_v2 = vld [vmem:[%s4029_s1 + $0x820] ss:$8 sps:$4 sm:$0xff]  }
  0xdd   :  { %2193 = vmatprep.subr.bf16.mxu1 %v2960_v3  ;;  %v3030_v3 = vld [vmem:[%s4029_s1 + $0x814] ss:$8 sps:$4 sm:$0xff]  }
  0xdf   :  { %2153 = vmatpush1.bf16.msra.mxu0 %v2955_v4  ;;  %v3028_v4 = vld [vmem:[%s4029_s1 + $0x810] ss:$8 sps:$4 sm:$0xff]  }
  0xe0   :  { %2194 = vmatpush1.bf16.msra.mxu1 %v2958_v5  ;;  %2154 = vmatprep.subr.bf16.mxu0 %v2963_v7  ;;  %v3033_v5 = vld [vmem:[%s4029_s1 + $0x804] ss:$8 sps:$4 sm:$0xff]   ;;  %v3031_v7 = vld [vmem:[%s4029_s1 + $0x800] ss:$8 sps:$4 sm:$0xff]  }
  0xe1   :  { %2195 = vmatprep.subr.bf16.mxu1 %v2966_v8  ;;  %v3036_v8 = vld [vmem:[%s4029_s1 + $0x8f4] ss:$8 sps:$4 sm:$0xff]  }
  0xe3   :  { %2155 = vmatpush2.bf16.msra.mxu0 %v2961_v9  ;;  %v3034_v9 = vld [vmem:[%s4029_s1 + $0x8f0] ss:$8 sps:$4 sm:$0xff]  }
  0xe4   :  { %2196 = vmatpush2.bf16.msra.mxu1 %v2964_v10  ;;  %2156 = vmatprep.subr.bf16.mxu0 %v2969_v11  ;;  %v3039_v10 = vld [vmem:[%s4029_s1 + $0x8e4] ss:$8 sps:$4 sm:$0xff]   ;;  %v3037_v11 = vld [vmem:[%s4029_s1 + $0x8e0] ss:$8 sps:$4 sm:$0xff]  }
  0xe5   :  { %2197 = vmatprep.subr.bf16.mxu1 %v2972_v12  ;;  %v3042_v12 = vld [vmem:[%s4029_s1 + $0x8d4] ss:$8 sps:$4 sm:$0xff]  }
  0xe7   :  { %2157 = vmatpush2.bf16.msra.mxu0 %v2967_v13  ;;  %v3040_v13 = vld [vmem:[%s4029_s1 + $0x8d0] ss:$8 sps:$4 sm:$0xff]  }
  0xe8   :  { %2198 = vmatpush2.bf16.msra.mxu1 %v2970_v14  ;;  %2158 = vmatprep.subr.bf16.mxu0 %v2975_v15  ;;  %v3045_v14 = vld [vmem:[%s4029_s1 + $0x8c4] ss:$8 sps:$4 sm:$0xff]   ;;  %v3043_v15 = vld [vmem:[%s4029_s1 + $0x8c0] ss:$8 sps:$4 sm:$0xff]  }
  0xe9   :  { %2199 = vmatprep.subr.bf16.mxu1 %v2978_v16  ;;  %v3048_v16 = vld [vmem:[%s4029_s1 + $0x8b4] ss:$8 sps:$4 sm:$0xff]  }
  0xeb   :  { %2159 = vmatpush2.bf16.msra.mxu0 %v2973_v17  ;;  %v3046_v17 = vld [vmem:[%s4029_s1 + $0x8b0] ss:$8 sps:$4 sm:$0xff]  }
  0xec   :  { %2200 = vmatpush2.bf16.msra.mxu1 %v2976_v18  ;;  %2160 = vmatprep.subr.bf16.mxu0 %v2981_v19  ;;  %v3051_v18 = vld [vmem:[%s4029_s1 + $0x8a4] ss:$8 sps:$4 sm:$0xff]   ;;  %v3049_v19 = vld [vmem:[%s4029_s1 + $0x8a0] ss:$8 sps:$4 sm:$0xff]  }
  0xed   :  { %2201 = vmatprep.subr.bf16.mxu1 %v2984_v20  ;;  %v3054_v20 = vld [vmem:[%s4029_s1 + $0x894] ss:$8 sps:$4 sm:$0xff]  }
  0xef   :  { %2161 = vmatpush2.bf16.msra.mxu0 %v2979_v21  ;;  %v3052_v21 = vld [vmem:[%s4029_s1 + $0x890] ss:$8 sps:$4 sm:$0xff]  }
  0xf0   :  { %2202 = vmatpush2.bf16.msra.mxu1 %v2982_v22  ;;  %2162 = vmatprep.subr.bf16.mxu0 %v2987_v23  ;;  %v3057_v22 = vld [vmem:[%s4029_s1 + $0x884] ss:$8 sps:$4 sm:$0xff]   ;;  %v3055_v23 = vld [vmem:[%s4029_s1 + $0x880] ss:$8 sps:$4 sm:$0xff]  }
  0xf1   :  { %2203 = vmatprep.subr.bf16.mxu1 %v2990_v6  ;;  %v426_v6 = vrot.slane %v3896_v37, %v3225_v49 }
  0xf3   :  { %2163 = vmatpush2.bf16.msra.mxu0 %v2985_v25 }
  0xf4   :  { %2204 = vmatpush2.bf16.msra.mxu1 %v2988_v26  ;;  %2164 = vmatprep.subr.bf16.mxu0 %v2993_v27 }
  0xf5   :  { %2205 = vmatprep.subr.bf16.mxu1 %v2996_v28 }
  0xf7   :  { %2165 = vmatpush2.bf16.msra.mxu0 %v2991_v30 }
  0xf8   :  { %2206 = vmatpush2.bf16.msra.mxu1 %v2994_v31  ;;  %2166 = vmatprep.subr.bf16.mxu0 %v2999_v32 }
  0xf9   :  { %2207 = vmatprep.subr.bf16.mxu1 %v3002_v33 }
  0xfb   :  { %2167 = vmatpush2.bf16.msra.mxu0 %v2997_v34 }
  0xfc   :  { %2208 = vmatpush2.bf16.msra.mxu1 %v3000_v29  ;;  %2168 = vmatprep.subr.bf16.mxu0 %v3005_v35 }
  0xfd   :  { %2209 = vmatprep.subr.bf16.mxu1 %v3008_v36 }
  0xff   :  { %2169 = vmatpush2.bf16.msra.mxu0 %v3003_v39 }
 0x100   :  { %2210 = vmatpush2.bf16.msra.mxu1 %v3006_v40  ;;  %2220 = vmatprep.subr.bf16.mxu0 %v3012_v42 }
 0x102   :  { %v1926_v47 = vpop.f32.mrf.mxu0  ;;  %2171 = vmatmul.mubr.bf16.vlgmr.msra.gmra.mxu0 %v393_v38 }
 0x103   :  { %v1967_v48 = vpop.f32.mrf.mxu1  ;;  %2212 = vmatmul.mubr.bf16.vlgmr.msra.gmra.mxu1 %v409_v24  ;;  %2221 = vmatpush1.bf16.msra.mxu0 %v3010_v44 }
 0x104   :  { %v3918_v50 = vadd.f32 %v1967_v48, %v1926_v47  ;;  %2252 = vmatprep.mubr.bf16.mxu0 %v433_v45  ;;  %v1928_v52 = vpop.f32.mrf.mxu0  ;;  %2222 = vmatprep.subr.bf16.mxu0 %v3015_v46 }
 0x105   :  { %v1969_v53 = vpop.f32.mrf.mxu1 }
 0x106   :  { %v3926_v55 = vadd.f32 %v1969_v53, %v1928_v52  ;;  %v1930_v56 = vpop.f32.mrf.mxu0 }
 0x107   :  { %v1971_v57 = vpop.f32.mrf.mxu1  ;;  %2223 = vmatpush1.bf16.msra.mxu0 %v3013_v51 }
 0x108   :  { %v1931_v59 = vpop.f32.mrf.mxu0  ;;  %2224 = vmatprep.subr.bf16.mxu0 %v3018_v54 }
 0x109   :  { %v1972_v61 = vpop.f32.mrf.mxu1 }
 0x10b   :  { %2225 = vmatpush1.bf16.msra.mxu0 %v3016_v58 }
 0x10c   :  { %2226 = vmatprep.subr.bf16.mxu0 %v3021_v60  ;;  %v3059_v60 = vmov 1983009808  }
 0x10d   :  { %v2293_v61 = vunpack.c.l.s4 %v3059_v60 }
 0x10f   :  { %2227 = vmatpush1.bf16.msra.mxu0 %v3019_v62  ;;  %v2294_v62 = vunpack.c.0.s8 %v2293_v61 }
 0x110   :  { %2228 = vmatprep.subr.bf16.mxu0 %v3024_v63  ;;  %v2289_v63 = vld [vmem:[%s4031_s4] sm:$0x3] }
 0x113   :  { %2229 = vmatpush1.bf16.msra.mxu0 %v3022_v0  ;;  %v2265_v0 = vsub.s32 0, %v3207_v43 }
 0x114   :  { %2230 = vmatprep.subr.bf16.mxu0 %v3027_v1  ;;  %v2261_v1 = vld [vmem:[%s4032_s2] sm:$0x3] }
 0x117   :  { %2231 = vmatpush1.bf16.msra.mxu0 %v3025_v2 }
 0x118   :  { %2232 = vmatprep.subr.bf16.mxu0 %v3030_v3  ;;  %v2275_v3 = vld [vmem:[%s4033_s3] sm:$0x3] }
 0x11b   :  { %2233 = vmatpush1.bf16.msra.mxu0 %v3028_v4  ;;  %v2290_v4 = vunpack.c.l.bf16 %v2289_v63 }
 0x11c   :  { %2234 = vmatprep.subr.bf16.mxu0 %v3033_v5  ;;  %v2297_v5 = vsub.s32 %v2294_v62, %v3207_v43 }
 0x11f   :  { %2235 = vmatpush1.bf16.msra.mxu0 %v3031_v7  ;;  %v2269_v7 = vsub.s32 1, %v3207_v43 }
 0x120   :  { %2236 = vmatprep.subr.bf16.mxu0 %v3036_v8  ;;  %v2266_v8 = vrot.slane %v2261_v1, %v2265_v0 }
 0x123   :  { %2237 = vmatpush2.bf16.msra.mxu0 %v3034_v9 }
 0x124   :  { %2238 = vmatprep.subr.bf16.mxu0 %v3039_v10  ;;  %v2280_v10 = vrot.slane %v2275_v3, %v2265_v0 }
 0x127   :  { %2239 = vmatpush2.bf16.msra.mxu0 %v3037_v11 }
 0x128   :  { %2240 = vmatprep.subr.bf16.mxu0 %v3042_v12 }
 0x12b   :  { %2241 = vmatpush2.bf16.msra.mxu0 %v3040_v13  ;;  %v2298_v13 = vrot.slane %v2290_v4, %v2297_v5 }
 0x12c   :  { %2242 = vmatprep.subr.bf16.mxu0 %v3045_v14  ;;  %v2270_v14 = vrot.slane %v2261_v1, %v2269_v7 }
 0x12f   :  { %2243 = vmatpush2.bf16.msra.mxu0 %v3043_v15 }
 0x130   :  { %2244 = vmatprep.subr.bf16.mxu0 %v3048_v16 }
 0x133   :  { %2245 = vmatpush2.bf16.msra.mxu0 %v3046_v17 }
 0x134   :  { %2246 = vmatprep.subr.bf16.mxu0 %v3051_v18  ;;  %v2284_v18 = vrot.slane %v2275_v3, %v2269_v7 }
 0x137   :  { %2247 = vmatpush2.bf16.msra.mxu0 %v3049_v19 }
 0x138   :  { %2248 = vmatprep.subr.bf16.mxu0 %v3054_v20 }
 0x13b   :  { %2249 = vmatpush2.bf16.msra.mxu0 %v3052_v21 }
 0x13c   :  { %2250 = vmatprep.subr.bf16.mxu0 %v3057_v22  ;;  %v2299_v22 = vcombine.high %v2298_v13, %v2298_v13 }
 0x13f   :  { %2251 = vmatpush2.bf16.msra.mxu0 %v3055_v23 }
 0x142   :  { %v2008_v25 = vpop.f32.mrf.mxu0  ;;  %2253 = vmatmul.mubr.bf16.vlgmr.msra.gmra.mxu0 %v426_v6 }
 0x143   :  { %v2049_v26 = vpop.f32.mrf.mxu1  ;;  %v2009_v27 = vadd.f32 %v2008_v25, %v3918_v50 }
 0x144   :  { %v2010_v28 = vpop.f32.mrf.mxu0 }
 0x145   :  { %v2051_v30 = vpop.f32.mrf.mxu1  ;;  %v2011_v31 = vadd.f32 %v2010_v28, %v3926_v55  ;;  %v2050_v32 = vadd.f32 %v2049_v26, %v2009_v27 }
 0x146   :  { %v2012_v33 = vpop.f32.mrf.mxu0 }
 0x147   :  { %v2053_v34 = vpop.f32.mrf.mxu1  ;;  %v2052_v29 = vadd.f32 %v2051_v30, %v2011_v31 }
 0x148   :  { %v2013_v35 = vpop.f32.mrf.mxu0 }
 0x149   :  { %v2054_v36 = vpop.f32.mrf.mxu1 }
 0x182   :  { %v2090_v38 = vpop.f32.mrf.mxu0 }
 0x183   :  { %v2131_v39 = vpop.f32.mrf.mxu1  ;;  %v2091_v40 = vadd.f32 %v2090_v38, %v2050_v32 }
 0x184   :  { %v2092_v37 = vpop.f32.mrf.mxu0 }
 0x185   :  { %v2133_v41 = vpop.f32.mrf.mxu1  ;;  %v2093_v42 = vadd.f32 %v2092_v37, %v2052_v29  ;;  %v2132_v24 = vadd.f32 %v2131_v39, %v2091_v40 }
 0x186   :  { %v2094_v44 = vpop.f32.mrf.mxu0 }
 0x187   :  { %v2135_v45 = vpop.f32.mrf.mxu1  ;;  %v2134_v46 = vadd.f32 %v2133_v41, %v2093_v42 }
 0x188   :  { %v2095_v47 = vpop.f32.mrf.mxu0 }
 0x189   :  { %v2136_v48 = vpop.f32.mrf.mxu1 }
 0x1c2   :  { %v2172_v50 = vpop.f32.mrf.mxu0 }
 0x1c3   :  { %v2213_v51 = vpop.f32.mrf.mxu1  ;;  %v2173_v52 = vadd.f32 %v2172_v50, %v2132_v24 }
 0x1c4   :  { %v2174_v53 = vpop.f32.mrf.mxu0 }
 0x1c5   :  { %v2215_v54 = vpop.f32.mrf.mxu1  ;;  %v2214_v55 = vadd.f32 %v2213_v51, %v2173_v52  ;;  %v2175_v2 = vadd.f32 %v2174_v53, %v2134_v46 }
 0x1c6   :  { %v2176_v56 = vpop.f32.mrf.mxu0 }
 0x1c7   :  { %v2217_v57 = vpop.f32.mrf.mxu1  ;;  %v2216_v11 = vadd.f32 %v2215_v54, %v2175_v2 }
 0x1c8   :  { %v2177_v58 = vpop.f32.mrf.mxu0 }
 0x1c9   :  { %v2218_v59 = vpop.f32.mrf.mxu1 }
 0x202   :  { %v2254_v9 = vpop.f32.mrf.mxu0 }
 0x203   :  { %v2255_v12 = vadd.f32 %v2254_v9, %v2214_v55 }
 0x204   :  { %v2256_v15 = vpop.f32.mrf.mxu0 }
 0x205   :  { %v2273_v16 = vmul.f32 %v2266_v8, %v2255_v12  ;;  %v2257_v17 = vadd.f32 %v2256_v15, %v2216_v11 }
 0x206   :  { %v2258_v19 = vpop.f32.mrf.mxu0 }
 0x207   :  { %v2287_v20 = vadd.f32 %v2280_v10, %v2273_v16  ;;  %v2274_v21 = vmul.f32 %v2270_v14, %v2257_v17 }
 0x208   :  { %v2259_v23 = vpop.f32.mrf.mxu0 }
 0x209   :  { %v2302_v6 = vadd.f32 %v2298_v13, %v2287_v20  ;;  %v2288_v25 = vadd.f32 %v2284_v18, %v2274_v21 }
 0x20b   :  { %v2303_v26 = vadd.f32 %v2299_v22, %v2288_v25  ;;  %v2304_v43 = vmax.f32 %v2302_v6, 0.0 }
 0x20d   :  { %v2305_v27 = vmax.f32 %v2303_v26, 0.0 }
 0x20f   :  { %v2620_v28 = vpack.c.bf16 %v2305_v27, %v2304_v43 }
 0x211   :  { %v2317_v30 = vrot.slane %v2620_v28, %v3225_v49 }
 0x213   :  { %2621 = vst.sshfl [vmem:[%s4034_s5] sm:$0x5 pattern:$0x73625140] %v2317_v30 }

// kernel: forward_pallas.16
= control target key start
LH: loop header
LB: loop body
LE: loop exit
PB: predicated region body
PF: predicated region fallthrough
CT: control target
= control target key end

     0   :  { %v3086_v36 = vmov 1966171168   ;;  %v317_v38 = vlaneseq  ;;  %s4090_s1 = inlined_call_operand.vmem [shape: bf16[1152,512], index: 1, kind: input, shape index: {}]   ;;  %s4091_s0 = inlined_call_operand.vmem [shape: bf16[2,1152], index: 0, kind: input, shape index: {}]   ;;  %s4092_s2 = inlined_call_operand.vmem [shape: f32[1,512], index: 2, kind: input, shape index: {}]   ;;  %s4093_s3 = inlined_call_operand.vmem [shape: f32[1,512], index: 3, kind: input, shape index: {}]   ;;  %s4094_s4 = inlined_call_operand.vmem [shape: f32[1,512], index: 4, kind: input, shape index: {}]   ;;  %s4095_s5 = inlined_call_operand.vmem [shape: bf16[2,512], index: 5, kind: output, shape index: {}]  }
   0x1   :  { %v2653_v0 = vld [vmem:[%s4090_s1 + $0xe4] ss:$16 sps:$4 sm:$0xff]   ;;  %v2657_v2 = vld [vmem:[%s4090_s1 + $0xe0] ss:$16 sps:$4 sm:$0xff]   ;;  %v315_v37 = vunpack.c.l.s4 %v3086_v36 }
   0x2   :  { %v2655_v1 = vld [vmem:[%s4090_s1 + $0x2e4] ss:$16 sps:$4 sm:$0xff]   ;;  %1825 = vmatprep.subr.bf16.mxu0 %v2653_v0  ;;  %v2658_v3 = vld [vmem:[%s4090_s1 + $0x2e0] ss:$16 sps:$4 sm:$0xff]   ;;  %v3235_v43 = vshrl.u32 %v317_v38, 7 }
   0x3   :  { %1866 = vmatprep.subr.bf16.mxu1 %v2655_v1  ;;  %v2659_v4 = vld [vmem:[%s4090_s1 + $0xc4] ss:$16 sps:$4 sm:$0xff]   ;;  %1826 = vmatpush1.bf16.msra.mxu0 %v2657_v2  ;;  %v2663_v6 = vld [vmem:[%s4090_s1 + $0xc0] ss:$16 sps:$4 sm:$0xff]   ;;  %v316_v42 = vunpack.c.0.s8 %v315_v37 }
   0x4   :  { %1867 = vmatpush1.bf16.msra.mxu1 %v2658_v3  ;;  %v2661_v5 = vld [vmem:[%s4090_s1 + $0x2c4] ss:$16 sps:$4 sm:$0xff]   ;;  %1827 = vmatprep.subr.bf16.mxu0 %v2659_v4  ;;  %v2664_v7 = vld [vmem:[%s4090_s1 + $0x2c0] ss:$16 sps:$4 sm:$0xff]  }
   0x5   :  { %1868 = vmatprep.subr.bf16.mxu1 %v2661_v5  ;;  %v2665_v8 = vld [vmem:[%s4090_s1 + $0xa4] ss:$16 sps:$4 sm:$0xff]   ;;  %v2669_v10 = vld [vmem:[%s4090_s1 + $0xa0] ss:$16 sps:$4 sm:$0xff]   ;;  %v3253_v49 = vsub.s32 %v316_v42, %v3235_v43 }
   0x6   :  { %v2667_v9 = vld [vmem:[%s4090_s1 + $0x2a4] ss:$16 sps:$4 sm:$0xff]   ;;  %v2670_v11 = vld [vmem:[%s4090_s1 + $0x2a0] ss:$16 sps:$4 sm:$0xff]  }
   0x7   :  { %1828 = vmatpush1.bf16.msra.mxu0 %v2663_v6  ;;  %v2671_v12 = vld [vmem:[%s4090_s1 + $0x84] ss:$16 sps:$4 sm:$0xff]   ;;  %v2675_v14 = vld [vmem:[%s4090_s1 + $0x80] ss:$16 sps:$4 sm:$0xff]  }
   0x8   :  { %1869 = vmatpush1.bf16.msra.mxu1 %v2664_v7  ;;  %1829 = vmatprep.subr.bf16.mxu0 %v2665_v8  ;;  %v2673_v13 = vld [vmem:[%s4090_s1 + $0x284] ss:$16 sps:$4 sm:$0xff]   ;;  %v2676_v15 = vld [vmem:[%s4090_s1 + $0x280] ss:$16 sps:$4 sm:$0xff]  }
   0x9   :  { %1870 = vmatprep.subr.bf16.mxu1 %v2667_v9  ;;  %v2677_v16 = vld [vmem:[%s4090_s1 + $0x64] ss:$16 sps:$4 sm:$0xff]   ;;  %v2681_v18 = vld [vmem:[%s4090_s1 + $0x60] ss:$16 sps:$4 sm:$0xff]  }
   0xa   :  { %v2679_v17 = vld [vmem:[%s4090_s1 + $0x264] ss:$16 sps:$4 sm:$0xff]   ;;  %v2682_v19 = vld [vmem:[%s4090_s1 + $0x260] ss:$16 sps:$4 sm:$0xff]  }
   0xb   :  { %1830 = vmatpush1.bf16.msra.mxu0 %v2669_v10  ;;  %v2683_v20 = vld [vmem:[%s4090_s1 + $0x44] ss:$16 sps:$4 sm:$0xff]   ;;  %v2687_v22 = vld [vmem:[%s4090_s1 + $0x40] ss:$16 sps:$4 sm:$0xff]  }
   0xc   :  { %1871 = vmatpush1.bf16.msra.mxu1 %v2670_v11  ;;  %1831 = vmatprep.subr.bf16.mxu0 %v2671_v12  ;;  %v2685_v21 = vld [vmem:[%s4090_s1 + $0x244] ss:$16 sps:$4 sm:$0xff]   ;;  %v2688_v23 = vld [vmem:[%s4090_s1 + $0x240] ss:$16 sps:$4 sm:$0xff]  }
   0xd   :  { %1872 = vmatprep.subr.bf16.mxu1 %v2673_v13  ;;  %v2689_v24 = vld [vmem:[%s4090_s1 + $0x24] ss:$16 sps:$4 sm:$0xff]   ;;  %v2693_v26 = vld [vmem:[%s4090_s1 + $0x20] ss:$16 sps:$4 sm:$0xff]  }
   0xe   :  { %v2691_v25 = vld [vmem:[%s4090_s1 + $0x224] ss:$16 sps:$4 sm:$0xff]   ;;  %v2694_v27 = vld [vmem:[%s4090_s1 + $0x220] ss:$16 sps:$4 sm:$0xff]  }
   0xf   :  { %1832 = vmatpush1.bf16.msra.mxu0 %v2675_v14  ;;  %v2695_v28 = vld [vmem:[%s4090_s1 + $0x4] ss:$16 sps:$4 sm:$0xff]   ;;  %v2699_v30 = vld [vmem:[%s4090_s1] ss:$16 sps:$4 sm:$0xff]  }
  0x10   :  { %1873 = vmatpush1.bf16.msra.mxu1 %v2676_v15  ;;  %1833 = vmatprep.subr.bf16.mxu0 %v2677_v16  ;;  %v2697_v29 = vld [vmem:[%s4090_s1 + $0x204] ss:$16 sps:$4 sm:$0xff]   ;;  %v2700_v31 = vld [vmem:[%s4090_s1 + $0x200] ss:$16 sps:$4 sm:$0xff]  }
  0x11   :  { %1874 = vmatprep.subr.bf16.mxu1 %v2679_v17  ;;  %v2701_v32 = vld [vmem:[%s4090_s1 + $0x1e4] ss:$16 sps:$4 sm:$0xff]   ;;  %v2705_v34 = vld [vmem:[%s4090_s1 + $0x1e0] ss:$16 sps:$4 sm:$0xff]  }
  0x12   :  { %v2703_v33 = vld [vmem:[%s4090_s1 + $0x3e4] ss:$16 sps:$4 sm:$0xff]   ;;  %v2706_v35 = vld [vmem:[%s4090_s1 + $0x3e0] ss:$16 sps:$4 sm:$0xff]  }
  0x13   :  { %1834 = vmatpush1.bf16.msra.mxu0 %v2681_v18  ;;  %v2707_v39 = vld [vmem:[%s4090_s1 + $0x1c4] ss:$16 sps:$4 sm:$0xff]   ;;  %v2711_v41 = vld [vmem:[%s4090_s1 + $0x1c0] ss:$16 sps:$4 sm:$0xff]  }
  0x14   :  { %1875 = vmatpush1.bf16.msra.mxu1 %v2682_v19  ;;  %1835 = vmatprep.subr.bf16.mxu0 %v2683_v20  ;;  %v2709_v40 = vld [vmem:[%s4090_s1 + $0x3c4] ss:$16 sps:$4 sm:$0xff]   ;;  %v2712_v44 = vld [vmem:[%s4090_s1 + $0x3c0] ss:$16 sps:$4 sm:$0xff]  }
  0x15   :  { %1876 = vmatprep.subr.bf16.mxu1 %v2685_v21  ;;  %v2713_v45 = vld [vmem:[%s4090_s1 + $0x1a4] ss:$16 sps:$4 sm:$0xff]   ;;  %v2717_v47 = vld [vmem:[%s4090_s1 + $0x1a0] ss:$16 sps:$4 sm:$0xff]  }
  0x16   :  { %v2715_v46 = vld [vmem:[%s4090_s1 + $0x3a4] ss:$16 sps:$4 sm:$0xff]   ;;  %v2718_v48 = vld [vmem:[%s4090_s1 + $0x3a0] ss:$16 sps:$4 sm:$0xff]  }
  0x17   :  { %1836 = vmatpush1.bf16.msra.mxu0 %v2687_v22  ;;  %v2719_v50 = vld [vmem:[%s4090_s1 + $0x184] ss:$16 sps:$4 sm:$0xff]   ;;  %v2723_v53 = vld [vmem:[%s4090_s1 + $0x180] ss:$16 sps:$4 sm:$0xff]  }
  0x18   :  { %1877 = vmatpush1.bf16.msra.mxu1 %v2688_v23  ;;  %1837 = vmatprep.subr.bf16.mxu0 %v2689_v24  ;;  %v2721_v51 = vld [vmem:[%s4090_s1 + $0x384] ss:$16 sps:$4 sm:$0xff]   ;;  %v2724_v55 = vld [vmem:[%s4090_s1 + $0x380] ss:$16 sps:$4 sm:$0xff]  }
  0x19   :  { %1878 = vmatprep.subr.bf16.mxu1 %v2691_v25  ;;  %v21_v52 = vld [vmem:[%s4091_s0] sm:$0xff] }
  0x1a   :  { %v320_v54 = vrot.slane %v21_v52, %v3253_v49  ;;  %v2725_v56 = vld [vmem:[%s4090_s1 + $0x164] ss:$16 sps:$4 sm:$0xff]   ;;  %v2729_v59 = vld [vmem:[%s4090_s1 + $0x160] ss:$16 sps:$4 sm:$0xff]   ;;  %v313_v1 = vcombine.high %v21_v52, %v21_v52 }
  0x1b   :  { %1838 = vmatpush1.bf16.msra.mxu0 %v2693_v26  ;;  %v2727_v57 = vld [vmem:[%s4090_s1 + $0x364] ss:$16 sps:$4 sm:$0xff]   ;;  %v2730_v61 = vld [vmem:[%s4090_s1 + $0x360] ss:$16 sps:$4 sm:$0xff]  }
  0x1c   :  { %1879 = vmatpush1.bf16.msra.mxu1 %v2694_v27  ;;  %1839 = vmatprep.subr.bf16.mxu0 %v2695_v28  ;;  %v328_v58 = vcombine.high %v320_v54, %v320_v54  ;;  %v2731_v62 = vld [vmem:[%s4090_s1 + $0x144] ss:$16 sps:$4 sm:$0xff]   ;;  %v2735_v2 = vld [vmem:[%s4090_s1 + $0x140] ss:$16 sps:$4 sm:$0xff]   ;;  %v3311_v6 = vrot.slane %v313_v1, %v3253_v49  ;;  %v3331_v13 = vrot.slane %v320_v54, %v3253_v49 }
  0x1d   :  { %1880 = vmatprep.subr.bf16.mxu1 %v2697_v29  ;;  %v2733_v63 = vld [vmem:[%s4090_s1 + $0x344] ss:$16 sps:$4 sm:$0xff]   ;;  %v2736_v3 = vld [vmem:[%s4090_s1 + $0x340] ss:$16 sps:$4 sm:$0xff]  }
  0x1e   :  { %v3281_v60 = vrot.slane %v328_v58, %v3253_v49  ;;  %v2737_v4 = vld [vmem:[%s4090_s1 + $0x124] ss:$16 sps:$4 sm:$0xff]   ;;  %v2741_v7 = vld [vmem:[%s4090_s1 + $0x120] ss:$16 sps:$4 sm:$0xff]   ;;  %v329_v11 = vcombine.high %v3311_v6, %v3311_v6  ;;  %v3347_v18 = vcombine.high %v3331_v13, %v3331_v13 }
  0x1f   :  { %1840 = vmatpush1.bf16.msra.mxu0 %v2699_v30  ;;  %v2739_v5 = vld [vmem:[%s4090_s1 + $0x324] ss:$16 sps:$4 sm:$0xff]   ;;  %v2742_v8 = vld [vmem:[%s4090_s1 + $0x320] ss:$16 sps:$4 sm:$0xff]  }
  0x20   :  { %1881 = vmatpush1.bf16.msra.mxu1 %v2700_v31  ;;  %1841 = vmatprep.subr.bf16.mxu0 %v2701_v32  ;;  %v3294_v0 = vcombine.high %v3281_v60, %v3281_v60  ;;  %v2743_v9 = vld [vmem:[%s4090_s1 + $0x104] ss:$16 sps:$4 sm:$0xff]   ;;  %v2747_v12 = vld [vmem:[%s4090_s1 + $0x100] ss:$16 sps:$4 sm:$0xff]   ;;  %v3343_v17 = vrot.slane %v329_v11, %v3253_v49 }
  0x21   :  { %1882 = vmatprep.subr.bf16.mxu1 %v2703_v33  ;;  %1857 = vmatprep.mubr.bf16.mxu0 %v3281_v60  ;;  %v2745_v10 = vld [vmem:[%s4090_s1 + $0x304] ss:$16 sps:$4 sm:$0xff]   ;;  %v2748_v14 = vld [vmem:[%s4090_s1 + $0x300] ss:$16 sps:$4 sm:$0xff]  }
  0x22   :  { %1898 = vmatprep.mubr.bf16.mxu1 %v3294_v0  ;;  %v2751_v15 = vld [vmem:[%s4090_s1 + $0x4e4] ss:$16 sps:$4 sm:$0xff]   ;;  %v2749_v19 = vld [vmem:[%s4090_s1 + $0x4e0] ss:$16 sps:$4 sm:$0xff]   ;;  %v3363_v23 = vcombine.high %v3343_v17, %v3343_v17 }
  0x23   :  { %1842 = vmatpush2.bf16.msra.mxu0 %v2705_v34  ;;  %v2754_v16 = vld [vmem:[%s4090_s1 + $0x6e4] ss:$16 sps:$4 sm:$0xff]   ;;  %v2752_v20 = vld [vmem:[%s4090_s1 + $0x6e0] ss:$16 sps:$4 sm:$0xff]  }
  0x24   :  { %1883 = vmatpush2.bf16.msra.mxu1 %v2706_v35  ;;  %1843 = vmatprep.subr.bf16.mxu0 %v2707_v39  ;;  %v2757_v21 = vld [vmem:[%s4090_s1 + $0x4c4] ss:$16 sps:$4 sm:$0xff]   ;;  %v2755_v24 = vld [vmem:[%s4090_s1 + $0x4c0] ss:$16 sps:$4 sm:$0xff]  }
  0x25   :  { %1884 = vmatprep.subr.bf16.mxu1 %v2709_v40  ;;  %v2760_v22 = vld [vmem:[%s4090_s1 + $0x6c4] ss:$16 sps:$4 sm:$0xff]   ;;  %v2758_v25 = vld [vmem:[%s4090_s1 + $0x6c0] ss:$16 sps:$4 sm:$0xff]  }
  0x26   :  { %v2763_v26 = vld [vmem:[%s4090_s1 + $0x4a4] ss:$16 sps:$4 sm:$0xff]   ;;  %v2761_v28 = vld [vmem:[%s4090_s1 + $0x4a0] ss:$16 sps:$4 sm:$0xff]  }
  0x27   :  { %1844 = vmatpush2.bf16.msra.mxu0 %v2711_v41  ;;  %v2766_v27 = vld [vmem:[%s4090_s1 + $0x6a4] ss:$16 sps:$4 sm:$0xff]   ;;  %v2764_v29 = vld [vmem:[%s4090_s1 + $0x6a0] ss:$16 sps:$4 sm:$0xff]  }
  0x28   :  { %1885 = vmatpush2.bf16.msra.mxu1 %v2712_v44  ;;  %1845 = vmatprep.subr.bf16.mxu0 %v2713_v45  ;;  %v2769_v30 = vld [vmem:[%s4090_s1 + $0x484] ss:$16 sps:$4 sm:$0xff]   ;;  %v2767_v32 = vld [vmem:[%s4090_s1 + $0x480] ss:$16 sps:$4 sm:$0xff]  }
  0x29   :  { %1886 = vmatprep.subr.bf16.mxu1 %v2715_v46  ;;  %v2772_v31 = vld [vmem:[%s4090_s1 + $0x684] ss:$16 sps:$4 sm:$0xff]   ;;  %v2770_v33 = vld [vmem:[%s4090_s1 + $0x680] ss:$16 sps:$4 sm:$0xff]  }
  0x2a   :  { %v2775_v34 = vld [vmem:[%s4090_s1 + $0x464] ss:$16 sps:$4 sm:$0xff]   ;;  %v2773_v36 = vld [vmem:[%s4090_s1 + $0x460] ss:$16 sps:$4 sm:$0xff]  }
  0x2b   :  { %1846 = vmatpush2.bf16.msra.mxu0 %v2717_v47  ;;  %v2778_v35 = vld [vmem:[%s4090_s1 + $0x664] ss:$16 sps:$4 sm:$0xff]   ;;  %v2776_v37 = vld [vmem:[%s4090_s1 + $0x660] ss:$16 sps:$4 sm:$0xff]  }
  0x2c   :  { %1887 = vmatpush2.bf16.msra.mxu1 %v2718_v48  ;;  %1847 = vmatprep.subr.bf16.mxu0 %v2719_v50  ;;  %v2781_v38 = vld [vmem:[%s4090_s1 + $0x444] ss:$16 sps:$4 sm:$0xff]   ;;  %v2779_v40 = vld [vmem:[%s4090_s1 + $0x440] ss:$16 sps:$4 sm:$0xff]  }
  0x2d   :  { %1888 = vmatprep.subr.bf16.mxu1 %v2721_v51  ;;  %v2784_v39 = vld [vmem:[%s4090_s1 + $0x644] ss:$16 sps:$4 sm:$0xff]   ;;  %v2782_v41 = vld [vmem:[%s4090_s1 + $0x640] ss:$16 sps:$4 sm:$0xff]  }
  0x2e   :  { %v2787_v42 = vld [vmem:[%s4090_s1 + $0x424] ss:$16 sps:$4 sm:$0xff]   ;;  %v2785_v45 = vld [vmem:[%s4090_s1 + $0x420] ss:$16 sps:$4 sm:$0xff]  }
  0x2f   :  { %1848 = vmatpush2.bf16.msra.mxu0 %v2723_v53  ;;  %v2790_v44 = vld [vmem:[%s4090_s1 + $0x624] ss:$16 sps:$4 sm:$0xff]   ;;  %v2788_v46 = vld [vmem:[%s4090_s1 + $0x620] ss:$16 sps:$4 sm:$0xff]  }
  0x30   :  { %1889 = vmatpush2.bf16.msra.mxu1 %v2724_v55  ;;  %1849 = vmatprep.subr.bf16.mxu0 %v2725_v56  ;;  %v2793_v47 = vld [vmem:[%s4090_s1 + $0x404] ss:$16 sps:$4 sm:$0xff]   ;;  %v2791_v50 = vld [vmem:[%s4090_s1 + $0x400] ss:$16 sps:$4 sm:$0xff]  }
  0x31   :  { %1890 = vmatprep.subr.bf16.mxu1 %v2727_v57  ;;  %v2796_v48 = vld [vmem:[%s4090_s1 + $0x604] ss:$16 sps:$4 sm:$0xff]   ;;  %v2794_v51 = vld [vmem:[%s4090_s1 + $0x600] ss:$16 sps:$4 sm:$0xff]  }
  0x32   :  { %v2799_v52 = vld [vmem:[%s4090_s1 + $0x5e4] ss:$16 sps:$4 sm:$0xff]   ;;  %v2797_v54 = vld [vmem:[%s4090_s1 + $0x5e0] ss:$16 sps:$4 sm:$0xff]  }
  0x33   :  { %1850 = vmatpush2.bf16.msra.mxu0 %v2729_v59  ;;  %v2802_v53 = vld [vmem:[%s4090_s1 + $0x7e4] ss:$16 sps:$4 sm:$0xff]   ;;  %v2800_v55 = vld [vmem:[%s4090_s1 + $0x7e0] ss:$16 sps:$4 sm:$0xff]  }
  0x34   :  { %1891 = vmatpush2.bf16.msra.mxu1 %v2730_v61  ;;  %1851 = vmatprep.subr.bf16.mxu0 %v2731_v62  ;;  %v2805_v56 = vld [vmem:[%s4090_s1 + $0x5c4] ss:$16 sps:$4 sm:$0xff]   ;;  %v2803_v58 = vld [vmem:[%s4090_s1 + $0x5c0] ss:$16 sps:$4 sm:$0xff]  }
  0x35   :  { %1892 = vmatprep.subr.bf16.mxu1 %v2733_v63  ;;  %v2808_v57 = vld [vmem:[%s4090_s1 + $0x7c4] ss:$16 sps:$4 sm:$0xff]   ;;  %v2806_v59 = vld [vmem:[%s4090_s1 + $0x7c0] ss:$16 sps:$4 sm:$0xff]  }
  0x36   :  { %v2811_v61 = vld [vmem:[%s4090_s1 + $0x5a4] ss:$16 sps:$4 sm:$0xff]   ;;  %v2809_v63 = vld [vmem:[%s4090_s1 + $0x5a0] ss:$16 sps:$4 sm:$0xff]  }
  0x37   :  { %1852 = vmatpush2.bf16.msra.mxu0 %v2735_v2  ;;  %v2814_v62 = vld [vmem:[%s4090_s1 + $0x7a4] ss:$16 sps:$4 sm:$0xff]   ;;  %v2812_v1 = vld [vmem:[%s4090_s1 + $0x7a0] ss:$16 sps:$4 sm:$0xff]  }
  0x38   :  { %1893 = vmatpush2.bf16.msra.mxu1 %v2736_v3  ;;  %1853 = vmatprep.subr.bf16.mxu0 %v2737_v4  ;;  %v2817_v2 = vld [vmem:[%s4090_s1 + $0x584] ss:$16 sps:$4 sm:$0xff]   ;;  %v2815_v4 = vld [vmem:[%s4090_s1 + $0x580] ss:$16 sps:$4 sm:$0xff]  }
  0x39   :  { %1894 = vmatprep.subr.bf16.mxu1 %v2739_v5  ;;  %v2820_v3 = vld [vmem:[%s4090_s1 + $0x784] ss:$16 sps:$4 sm:$0xff]   ;;  %v2818_v5 = vld [vmem:[%s4090_s1 + $0x780] ss:$16 sps:$4 sm:$0xff]  }
  0x3a   :  { %v2829_v11 = vld [vmem:[%s4090_s1 + $0x544] ss:$16 sps:$4 sm:$0xff]  }
  0x3b   :  { %1854 = vmatpush2.bf16.msra.mxu0 %v2741_v7  ;;  %v2823_v7 = vld [vmem:[%s4090_s1 + $0x564] ss:$16 sps:$4 sm:$0xff]  }
  0x3c   :  { %1895 = vmatpush2.bf16.msra.mxu1 %v2742_v8  ;;  %1855 = vmatprep.subr.bf16.mxu0 %v2743_v9  ;;  %v2826_v8 = vld [vmem:[%s4090_s1 + $0x764] ss:$16 sps:$4 sm:$0xff]   ;;  %v2821_v9 = vld [vmem:[%s4090_s1 + $0x560] ss:$16 sps:$4 sm:$0xff]  }
  0x3d   :  { %1896 = vmatprep.subr.bf16.mxu1 %v2745_v10  ;;  %v2824_v10 = vld [vmem:[%s4090_s1 + $0x760] ss:$16 sps:$4 sm:$0xff]  }
  0x3f   :  { %1856 = vmatpush2.bf16.msra.mxu0 %v2747_v12  ;;  %v2832_v12 = vld [vmem:[%s4090_s1 + $0x744] ss:$16 sps:$4 sm:$0xff]  }
  0x40   :  { %1897 = vmatpush2.bf16.msra.mxu1 %v2748_v14  ;;  %1907 = vmatprep.subr.bf16.mxu0 %v2751_v15  ;;  %v2827_v14 = vld [vmem:[%s4090_s1 + $0x540] ss:$16 sps:$4 sm:$0xff]  }
  0x41   :  { %1948 = vmatprep.subr.bf16.mxu1 %v2754_v16  ;;  %v2830_v15 = vld [vmem:[%s4090_s1 + $0x740] ss:$16 sps:$4 sm:$0xff]   ;;  %v2835_v16 = vld [vmem:[%s4090_s1 + $0x524] ss:$16 sps:$4 sm:$0xff]  }
  0x42   :  { %1858 = vmatmul.mubr.bf16.vlgmr.msra.gmra.mxu0 %v3331_v13 }
  0x43   :  { %1899 = vmatmul.mubr.bf16.vlgmr.msra.gmra.mxu1 %v3347_v18  ;;  %1908 = vmatpush1.bf16.msra.mxu0 %v2749_v19  ;;  %v2838_v19 = vld [vmem:[%s4090_s1 + $0x724] ss:$16 sps:$4 sm:$0xff]  }
  0x44   :  { %1949 = vmatpush1.bf16.msra.mxu1 %v2752_v20  ;;  %1909 = vmatprep.subr.bf16.mxu0 %v2757_v21  ;;  %v2833_v20 = vld [vmem:[%s4090_s1 + $0x520] ss:$16 sps:$4 sm:$0xff]  }
  0x45   :  { %1950 = vmatprep.subr.bf16.mxu1 %v2760_v22  ;;  %1939 = vmatprep.mubr.bf16.mxu0 %v3343_v17  ;;  %v2836_v21 = vld [vmem:[%s4090_s1 + $0x720] ss:$16 sps:$4 sm:$0xff]   ;;  %v2841_v22 = vld [vmem:[%s4090_s1 + $0x504] ss:$16 sps:$4 sm:$0xff]  }
  0x46   :  { %1980 = vmatprep.mubr.bf16.mxu1 %v3363_v23 }
  0x47   :  { %1910 = vmatpush1.bf16.msra.mxu0 %v2755_v24  ;;  %v2844_v24 = vld [vmem:[%s4090_s1 + $0x704] ss:$16 sps:$4 sm:$0xff]  }
  0x48   :  { %1951 = vmatpush1.bf16.msra.mxu1 %v2758_v25  ;;  %1911 = vmatprep.subr.bf16.mxu0 %v2763_v26  ;;  %v3539_v25 = vrot.slane %v3311_v6, %v3253_v49  ;;  %v2839_v26 = vld [vmem:[%s4090_s1 + $0x500] ss:$16 sps:$4 sm:$0xff]   ;;  %v2851_v6 = vld [vmem:[%s4090_s1 + $0xec] ss:$16 sps:$4 sm:$0xff]  }
  0x49   :  { %1952 = vmatprep.subr.bf16.mxu1 %v2766_v27  ;;  %v2842_v27 = vld [vmem:[%s4090_s1 + $0x700] ss:$16 sps:$4 sm:$0xff]  }
  0x4b   :  { %1912 = vmatpush1.bf16.msra.mxu0 %v2761_v28  ;;  %v2848_v28 = vld [vmem:[%s4090_s1 + $0x8e4] ss:$16 sps:$4 sm:$0xff]  }
  0x4c   :  { %1953 = vmatpush1.bf16.msra.mxu1 %v2764_v29  ;;  %1913 = vmatprep.subr.bf16.mxu0 %v2769_v30  ;;  %v3555_v29 = vcombine.high %v3539_v25, %v3539_v25  ;;  %v2846_v30 = vld [vmem:[%s4090_s1 + $0x8e0] ss:$16 sps:$4 sm:$0xff]  }
  0x4d   :  { %1954 = vmatprep.subr.bf16.mxu1 %v2772_v31  ;;  %v2849_v31 = vld [vmem:[%s4090_s1 + $0xe8] ss:$16 sps:$4 sm:$0xff]  }
  0x4f   :  { %1914 = vmatpush1.bf16.msra.mxu0 %v2767_v32  ;;  %v2854_v32 = vld [vmem:[%s4090_s1 + $0x8c4] ss:$16 sps:$4 sm:$0xff]  }
  0x50   :  { %1955 = vmatpush1.bf16.msra.mxu1 %v2770_v33  ;;  %1915 = vmatprep.subr.bf16.mxu0 %v2775_v34  ;;  %v2857_v33 = vld [vmem:[%s4090_s1 + $0xcc] ss:$16 sps:$4 sm:$0xff]   ;;  %v2852_v34 = vld [vmem:[%s4090_s1 + $0x8c0] ss:$16 sps:$4 sm:$0xff]  }
  0x51   :  { %1956 = vmatprep.subr.bf16.mxu1 %v2778_v35  ;;  %v2855_v35 = vld [vmem:[%s4090_s1 + $0xc8] ss:$16 sps:$4 sm:$0xff]  }
  0x53   :  { %1916 = vmatpush1.bf16.msra.mxu0 %v2773_v36  ;;  %v2860_v36 = vld [vmem:[%s4090_s1 + $0x8a4] ss:$16 sps:$4 sm:$0xff]  }
  0x54   :  { %1957 = vmatpush1.bf16.msra.mxu1 %v2776_v37  ;;  %1917 = vmatprep.subr.bf16.mxu0 %v2781_v38  ;;  %v2863_v37 = vld [vmem:[%s4090_s1 + $0xac] ss:$16 sps:$4 sm:$0xff]   ;;  %v3087_v38 = vmov 0  }
  0x55   :  { %1958 = vmatprep.subr.bf16.mxu1 %v2784_v39  ;;  %v2858_v39 = vld [vmem:[%s4090_s1 + $0x8a0] ss:$16 sps:$4 sm:$0xff]  }
  0x57   :  { %1918 = vmatpush1.bf16.msra.mxu0 %v2779_v40  ;;  %v2861_v40 = vld [vmem:[%s4090_s1 + $0xa8] ss:$16 sps:$4 sm:$0xff]  }
  0x58   :  { %1959 = vmatpush1.bf16.msra.mxu1 %v2782_v41  ;;  %1919 = vmatprep.subr.bf16.mxu0 %v2787_v42  ;;  %v2866_v41 = vld [vmem:[%s4090_s1 + $0x884] ss:$16 sps:$4 sm:$0xff]   ;;  %v2864_v42 = vld [vmem:[%s4090_s1 + $0x880] ss:$16 sps:$4 sm:$0xff]  }
  0x59   :  { %1960 = vmatprep.subr.bf16.mxu1 %v2790_v44  ;;  %v2867_v44 = vld [vmem:[%s4090_s1 + $0x88] ss:$16 sps:$4 sm:$0xff]  }
  0x5b   :  { %1920 = vmatpush1.bf16.msra.mxu0 %v2785_v45  ;;  %v2872_v45 = vld [vmem:[%s4090_s1 + $0x864] ss:$16 sps:$4 sm:$0xff]  }
  0x5c   :  { %1961 = vmatpush1.bf16.msra.mxu1 %v2788_v46  ;;  %1921 = vmatprep.subr.bf16.mxu0 %v2793_v47  ;;  %v2875_v46 = vld [vmem:[%s4090_s1 + $0x6c] ss:$16 sps:$4 sm:$0xff]   ;;  %v2870_v47 = vld [vmem:[%s4090_s1 + $0x860] ss:$16 sps:$4 sm:$0xff]  }
  0x5d   :  { %1962 = vmatprep.subr.bf16.mxu1 %v2796_v48  ;;  %v2873_v48 = vld [vmem:[%s4090_s1 + $0x68] ss:$16 sps:$4 sm:$0xff]  }
  0x5f   :  { %1922 = vmatpush1.bf16.msra.mxu0 %v2791_v50  ;;  %v2878_v50 = vld [vmem:[%s4090_s1 + $0x844] ss:$16 sps:$4 sm:$0xff]  }
  0x60   :  { %1963 = vmatpush1.bf16.msra.mxu1 %v2794_v51  ;;  %1923 = vmatprep.subr.bf16.mxu0 %v2799_v52  ;;  %v2881_v51 = vld [vmem:[%s4090_s1 + $0x4c] ss:$16 sps:$4 sm:$0xff]   ;;  %v2876_v52 = vld [vmem:[%s4090_s1 + $0x840] ss:$16 sps:$4 sm:$0xff]  }
  0x61   :  { %1964 = vmatprep.subr.bf16.mxu1 %v2802_v53  ;;  %v2879_v53 = vld [vmem:[%s4090_s1 + $0x48] ss:$16 sps:$4 sm:$0xff]  }
  0x63   :  { %1924 = vmatpush2.bf16.msra.mxu0 %v2797_v54  ;;  %v2884_v54 = vld [vmem:[%s4090_s1 + $0x824] ss:$16 sps:$4 sm:$0xff]  }
  0x64   :  { %1965 = vmatpush2.bf16.msra.mxu1 %v2800_v55  ;;  %1925 = vmatprep.subr.bf16.mxu0 %v2805_v56  ;;  %v2887_v55 = vld [vmem:[%s4090_s1 + $0x2c] ss:$16 sps:$4 sm:$0xff]   ;;  %v2882_v56 = vld [vmem:[%s4090_s1 + $0x820] ss:$16 sps:$4 sm:$0xff]  }
  0x65   :  { %1966 = vmatprep.subr.bf16.mxu1 %v2808_v57  ;;  %v2885_v57 = vld [vmem:[%s4090_s1 + $0x28] ss:$16 sps:$4 sm:$0xff]  }
  0x67   :  { %1926 = vmatpush2.bf16.msra.mxu0 %v2803_v58  ;;  %v2890_v58 = vld [vmem:[%s4090_s1 + $0x804] ss:$16 sps:$4 sm:$0xff]  }
  0x68   :  { %1967 = vmatpush2.bf16.msra.mxu1 %v2806_v59  ;;  %1927 = vmatprep.subr.bf16.mxu0 %v2811_v61  ;;  %v2893_v59 = vld [vmem:[%s4090_s1 + $0xc] ss:$16 sps:$4 sm:$0xff]   ;;  %v2888_v61 = vld [vmem:[%s4090_s1 + $0x800] ss:$16 sps:$4 sm:$0xff]  }
  0x69   :  { %1968 = vmatprep.subr.bf16.mxu1 %v2814_v62  ;;  %v2891_v62 = vld [vmem:[%s4090_s1 + $0x8] ss:$16 sps:$4 sm:$0xff]  }
  0x6b   :  { %1928 = vmatpush2.bf16.msra.mxu0 %v2809_v63  ;;  %v2359_v63 = vld.sshfl [vmem:[%s4091_s0 + $0x8] sm:$0x1 pattern:$0x75316420] }
  0x6c   :  { %1969 = vmatpush2.bf16.msra.mxu1 %v2812_v1  ;;  %1929 = vmatprep.subr.bf16.mxu0 %v2817_v2  ;;  %v2896_v1 = vld [vmem:[%s4090_s1 + $0x1ec] ss:$16 sps:$4 sm:$0xff]  }
  0x6d   :  { %1970 = vmatprep.subr.bf16.mxu1 %v2820_v3  ;;  %v2899_v2 = vld [vmem:[%s4090_s1 + $0x2ec] ss:$16 sps:$4 sm:$0xff]   ;;  %v3661_v3 = vrot.slane %v2359_v63, %v3253_v49  ;;  %v2975_v63 = vld [vmem:[%s4090_s1 + $0x448] ss:$16 sps:$4 sm:$0xff]  }
  0x6f   :  { %1930 = vmatpush2.bf16.msra.mxu0 %v2815_v4  ;;  %v2894_v4 = vld [vmem:[%s4090_s1 + $0x1e8] ss:$16 sps:$4 sm:$0xff]  }
  0x70   :  { %1971 = vmatpush2.bf16.msra.mxu1 %v2818_v5  ;;  %1931 = vmatprep.subr.bf16.mxu0 %v2823_v7  ;;  %v2897_v5 = vld [vmem:[%s4090_s1 + $0x2e8] ss:$16 sps:$4 sm:$0xff]   ;;  %v2902_v7 = vld [vmem:[%s4090_s1 + $0x1cc] ss:$16 sps:$4 sm:$0xff]  }
  0x71   :  { %1972 = vmatprep.subr.bf16.mxu1 %v2826_v8  ;;  %v2905_v8 = vld [vmem:[%s4090_s1 + $0x2cc] ss:$16 sps:$4 sm:$0xff]  }
  0x73   :  { %1932 = vmatpush2.bf16.msra.mxu0 %v2821_v9  ;;  %v2900_v9 = vld [vmem:[%s4090_s1 + $0x1c8] ss:$16 sps:$4 sm:$0xff]  }
  0x74   :  { %1973 = vmatpush2.bf16.msra.mxu1 %v2824_v10  ;;  %1933 = vmatprep.subr.bf16.mxu0 %v2829_v11  ;;  %v2903_v10 = vld [vmem:[%s4090_s1 + $0x2c8] ss:$16 sps:$4 sm:$0xff]   ;;  %v2908_v11 = vld [vmem:[%s4090_s1 + $0x1ac] ss:$16 sps:$4 sm:$0xff]  }
  0x75   :  { %1974 = vmatprep.subr.bf16.mxu1 %v2832_v12  ;;  %v2911_v12 = vld [vmem:[%s4090_s1 + $0x2ac] ss:$16 sps:$4 sm:$0xff]  }
  0x77   :  { %1934 = vmatpush2.bf16.msra.mxu0 %v2827_v14  ;;  %v2906_v14 = vld [vmem:[%s4090_s1 + $0x1a8] ss:$16 sps:$4 sm:$0xff]  }
  0x78   :  { %1975 = vmatpush2.bf16.msra.mxu1 %v2830_v15  ;;  %1935 = vmatprep.subr.bf16.mxu0 %v2835_v16  ;;  %v2909_v15 = vld [vmem:[%s4090_s1 + $0x2a8] ss:$16 sps:$4 sm:$0xff]   ;;  %v2914_v16 = vld [vmem:[%s4090_s1 + $0x18c] ss:$16 sps:$4 sm:$0xff]  }
  0x79   :  { %1976 = vmatprep.subr.bf16.mxu1 %v2838_v19  ;;  %v2912_v19 = vld [vmem:[%s4090_s1 + $0x188] ss:$16 sps:$4 sm:$0xff]  }
  0x7b   :  { %1936 = vmatpush2.bf16.msra.mxu0 %v2833_v20  ;;  %v2915_v20 = vld [vmem:[%s4090_s1 + $0x288] ss:$16 sps:$4 sm:$0xff]  }
  0x7c   :  { %1977 = vmatpush2.bf16.msra.mxu1 %v2836_v21  ;;  %1937 = vmatprep.subr.bf16.mxu0 %v2841_v22  ;;  %v2920_v21 = vld [vmem:[%s4090_s1 + $0x16c] ss:$16 sps:$4 sm:$0xff]  }
  0x7d   :  { %1978 = vmatprep.subr.bf16.mxu1 %v2844_v24  ;;  %v2923_v22 = vld [vmem:[%s4090_s1 + $0x26c] ss:$16 sps:$4 sm:$0xff]   ;;  %v2918_v24 = vld [vmem:[%s4090_s1 + $0x168] ss:$16 sps:$4 sm:$0xff]  }
  0x7f   :  { %1938 = vmatpush2.bf16.msra.mxu0 %v2839_v26  ;;  %v2921_v26 = vld [vmem:[%s4090_s1 + $0x268] ss:$16 sps:$4 sm:$0xff]  }
  0x80   :  { %1979 = vmatpush2.bf16.msra.mxu1 %v2842_v27  ;;  %1989 = vmatprep.subr.bf16.mxu0 %v2848_v28  ;;  %v2926_v27 = vld [vmem:[%s4090_s1 + $0x14c] ss:$16 sps:$4 sm:$0xff]  }
  0x81   :  { %2030 = vmatprep.subr.bf16.mxu1 %v2851_v6  ;;  %v2929_v28 = vld [vmem:[%s4090_s1 + $0x24c] ss:$16 sps:$4 sm:$0xff]   ;;  %v2924_v6 = vld [vmem:[%s4090_s1 + $0x148] ss:$16 sps:$4 sm:$0xff]  }
  0x82   :  { %1940 = vmatmul.mubr.bf16.vlgmr.msra.gmra.mxu0 %v3539_v25 }
  0x83   :  { %1981 = vmatmul.mubr.bf16.vlgmr.msra.gmra.mxu1 %v3555_v29  ;;  %1990 = vmatpush1.bf16.msra.mxu0 %v2846_v30  ;;  %v2927_v30 = vld [vmem:[%s4090_s1 + $0x248] ss:$16 sps:$4 sm:$0xff]  }
  0x84   :  { %2031 = vmatpush1.bf16.msra.mxu1 %v2849_v31  ;;  %1991 = vmatprep.subr.bf16.mxu0 %v2854_v32  ;;  %v2932_v31 = vld [vmem:[%s4090_s1 + $0x12c] ss:$16 sps:$4 sm:$0xff]  }
  0x85   :  { %2032 = vmatprep.subr.bf16.mxu1 %v2857_v33  ;;  %2021 = vmatprep.mubr.bf16.mxu0 %v3087_v38  ;;  %v2935_v32 = vld [vmem:[%s4090_s1 + $0x22c] ss:$16 sps:$4 sm:$0xff]   ;;  %v2930_v33 = vld [vmem:[%s4090_s1 + $0x128] ss:$16 sps:$4 sm:$0xff]  }
  0x86   :  { %2062 = vmatprep.mubr.bf16.mxu1 %v3281_v60  ;;  %v2869_v60 = vld [vmem:[%s4090_s1 + $0x8c] ss:$16 sps:$4 sm:$0xff]  }
  0x87   :  { %1992 = vmatpush1.bf16.msra.mxu0 %v2852_v34  ;;  %v2933_v34 = vld [vmem:[%s4090_s1 + $0x228] ss:$16 sps:$4 sm:$0xff]  }
  0x88   :  { %2033 = vmatpush1.bf16.msra.mxu1 %v2855_v35  ;;  %1993 = vmatprep.subr.bf16.mxu0 %v2860_v36  ;;  %v2938_v35 = vld [vmem:[%s4090_s1 + $0x10c] ss:$16 sps:$4 sm:$0xff]  }
  0x89   :  { %2034 = vmatprep.subr.bf16.mxu1 %v2863_v37  ;;  %v2941_v36 = vld [vmem:[%s4090_s1 + $0x20c] ss:$16 sps:$4 sm:$0xff]   ;;  %v2936_v37 = vld [vmem:[%s4090_s1 + $0x108] ss:$16 sps:$4 sm:$0xff]  }
  0x8b   :  { %1994 = vmatpush1.bf16.msra.mxu0 %v2858_v39  ;;  %v2939_v39 = vld [vmem:[%s4090_s1 + $0x208] ss:$16 sps:$4 sm:$0xff]  }
  0x8c   :  { %2035 = vmatpush1.bf16.msra.mxu1 %v2861_v40  ;;  %1995 = vmatprep.subr.bf16.mxu0 %v2866_v41  ;;  %v2944_v40 = vld [vmem:[%s4090_s1 + $0x3ec] ss:$16 sps:$4 sm:$0xff]  }
  0x8d   :  { %2036 = vmatprep.subr.bf16.mxu1 %v2869_v60  ;;  %v2947_v41 = vld [vmem:[%s4090_s1 + $0x4ec] ss:$16 sps:$4 sm:$0xff]   ;;  %v2942_v60 = vld [vmem:[%s4090_s1 + $0x3e8] ss:$16 sps:$4 sm:$0xff]  }
  0x8f   :  { %1996 = vmatpush1.bf16.msra.mxu0 %v2864_v42  ;;  %v2945_v42 = vld [vmem:[%s4090_s1 + $0x4e8] ss:$16 sps:$4 sm:$0xff]  }
  0x90   :  { %2037 = vmatpush1.bf16.msra.mxu1 %v2867_v44  ;;  %1997 = vmatprep.subr.bf16.mxu0 %v2872_v45  ;;  %v2950_v44 = vld [vmem:[%s4090_s1 + $0x3cc] ss:$16 sps:$4 sm:$0xff]  }
  0x91   :  { %2038 = vmatprep.subr.bf16.mxu1 %v2875_v46  ;;  %v2953_v45 = vld [vmem:[%s4090_s1 + $0x4cc] ss:$16 sps:$4 sm:$0xff]   ;;  %v2948_v46 = vld [vmem:[%s4090_s1 + $0x3c8] ss:$16 sps:$4 sm:$0xff]  }
  0x93   :  { %1998 = vmatpush1.bf16.msra.mxu0 %v2870_v47  ;;  %v2951_v47 = vld [vmem:[%s4090_s1 + $0x4c8] ss:$16 sps:$4 sm:$0xff]  }
  0x94   :  { %2039 = vmatpush1.bf16.msra.mxu1 %v2873_v48  ;;  %1999 = vmatprep.subr.bf16.mxu0 %v2878_v50  ;;  %v2956_v48 = vld [vmem:[%s4090_s1 + $0x3ac] ss:$16 sps:$4 sm:$0xff]   ;;  %v2954_v50 = vld [vmem:[%s4090_s1 + $0x3a8] ss:$16 sps:$4 sm:$0xff]  }
  0x95   :  { %2040 = vmatprep.subr.bf16.mxu1 %v2881_v51  ;;  %v2957_v51 = vld [vmem:[%s4090_s1 + $0x4a8] ss:$16 sps:$4 sm:$0xff]  }
  0x97   :  { %2000 = vmatpush1.bf16.msra.mxu0 %v2876_v52  ;;  %v2962_v52 = vld [vmem:[%s4090_s1 + $0x38c] ss:$16 sps:$4 sm:$0xff]  }
  0x98   :  { %2041 = vmatpush1.bf16.msra.mxu1 %v2879_v53  ;;  %2001 = vmatprep.subr.bf16.mxu0 %v2884_v54  ;;  %v2960_v53 = vld [vmem:[%s4090_s1 + $0x388] ss:$16 sps:$4 sm:$0xff]  }
  0x99   :  { %2042 = vmatprep.subr.bf16.mxu1 %v2887_v55  ;;  %v2963_v54 = vld [vmem:[%s4090_s1 + $0x488] ss:$16 sps:$4 sm:$0xff]   ;;  %v2968_v55 = vld [vmem:[%s4090_s1 + $0x36c] ss:$16 sps:$4 sm:$0xff]  }
  0x9b   :  { %2002 = vmatpush1.bf16.msra.mxu0 %v2882_v56  ;;  %v2971_v56 = vld [vmem:[%s4090_s1 + $0x46c] ss:$16 sps:$4 sm:$0xff]  }
  0x9c   :  { %2043 = vmatpush1.bf16.msra.mxu1 %v2885_v57  ;;  %2003 = vmatprep.subr.bf16.mxu0 %v2890_v58  ;;  %v2966_v57 = vld [vmem:[%s4090_s1 + $0x368] ss:$16 sps:$4 sm:$0xff]  }
  0x9d   :  { %2044 = vmatprep.subr.bf16.mxu1 %v2893_v59  ;;  %v2969_v58 = vld [vmem:[%s4090_s1 + $0x468] ss:$16 sps:$4 sm:$0xff]   ;;  %v2974_v59 = vld [vmem:[%s4090_s1 + $0x34c] ss:$16 sps:$4 sm:$0xff]  }
  0x9f   :  { %2004 = vmatpush1.bf16.msra.mxu0 %v2888_v61  ;;  %v2977_v61 = vld [vmem:[%s4090_s1 + $0x44c] ss:$16 sps:$4 sm:$0xff]  }
  0xa0   :  { %2045 = vmatpush1.bf16.msra.mxu1 %v2891_v62  ;;  %2071 = vmatprep.subr.bf16.mxu0 %v2899_v2  ;;  %v2972_v62 = vld [vmem:[%s4090_s1 + $0x348] ss:$16 sps:$4 sm:$0xff]   ;;  %v2983_v2 = vld [vmem:[%s4090_s1 + $0x42c] ss:$16 sps:$4 sm:$0xff]  }
  0xa1   :  { %2046 = vmatprep.subr.bf16.mxu1 %v2896_v1  ;;  %v2980_v1 = vld [vmem:[%s4090_s1 + $0x32c] ss:$16 sps:$4 sm:$0xff]  }
  0xa2   :  { %2022 = vmatmul.mubr.bf16.vlgmr.msra.gmra.mxu0 %v3661_v3 }
  0xa3   :  { %2072 = vmatpush1.bf16.msra.mxu0 %v2897_v5  ;;  %2103 = vmatprep.mubr.bf16.mxu0 %v3294_v0  ;;  %v2917_v0 = vld [vmem:[%s4090_s1 + $0x28c] ss:$16 sps:$4 sm:$0xff]   ;;  %v2981_v5 = vld [vmem:[%s4090_s1 + $0x428] ss:$16 sps:$4 sm:$0xff]  }
  0xa4   :  { %2047 = vmatpush2.bf16.msra.mxu1 %v2894_v4  ;;  %2073 = vmatprep.subr.bf16.mxu0 %v2905_v8  ;;  %v2978_v4 = vld [vmem:[%s4090_s1 + $0x328] ss:$16 sps:$4 sm:$0xff]   ;;  %v2989_v8 = vld [vmem:[%s4090_s1 + $0x40c] ss:$16 sps:$4 sm:$0xff]  }
  0xa5   :  { %2048 = vmatprep.subr.bf16.mxu1 %v2902_v7  ;;  %v2986_v7 = vld [vmem:[%s4090_s1 + $0x30c] ss:$16 sps:$4 sm:$0xff]  }
  0xa7   :  { %2074 = vmatpush1.bf16.msra.mxu0 %v2903_v10  ;;  %v2987_v10 = vld [vmem:[%s4090_s1 + $0x408] ss:$16 sps:$4 sm:$0xff]  }
  0xa8   :  { %2049 = vmatpush2.bf16.msra.mxu1 %v2900_v9  ;;  %2075 = vmatprep.subr.bf16.mxu0 %v2911_v12  ;;  %v2984_v9 = vld [vmem:[%s4090_s1 + $0x308] ss:$16 sps:$4 sm:$0xff]   ;;  %v2995_v12 = vld [vmem:[%s4090_s1 + $0x6ec] ss:$16 sps:$4 sm:$0xff]  }
  0xa9   :  { %2050 = vmatprep.subr.bf16.mxu1 %v2908_v11  ;;  %v2992_v11 = vld [vmem:[%s4090_s1 + $0x5ec] ss:$16 sps:$4 sm:$0xff]  }
  0xab   :  { %2076 = vmatpush1.bf16.msra.mxu0 %v2909_v15  ;;  %v2993_v15 = vld [vmem:[%s4090_s1 + $0x6e8] ss:$16 sps:$4 sm:$0xff]  }
  0xac   :  { %2051 = vmatpush2.bf16.msra.mxu1 %v2906_v14  ;;  %2077 = vmatprep.subr.bf16.mxu0 %v2917_v0  ;;  %v2990_v14 = vld [vmem:[%s4090_s1 + $0x5e8] ss:$16 sps:$4 sm:$0xff]   ;;  %v3001_v0 = vld [vmem:[%s4090_s1 + $0x6cc] ss:$16 sps:$4 sm:$0xff]  }
  0xad   :  { %2052 = vmatprep.subr.bf16.mxu1 %v2914_v16  ;;  %v2998_v16 = vld [vmem:[%s4090_s1 + $0x5cc] ss:$16 sps:$4 sm:$0xff]  }
  0xaf   :  { %2078 = vmatpush1.bf16.msra.mxu0 %v2915_v20  ;;  %v2999_v20 = vld [vmem:[%s4090_s1 + $0x6c8] ss:$16 sps:$4 sm:$0xff]  }
  0xb0   :  { %2053 = vmatpush2.bf16.msra.mxu1 %v2912_v19  ;;  %2079 = vmatprep.subr.bf16.mxu0 %v2923_v22  ;;  %v2996_v19 = vld [vmem:[%s4090_s1 + $0x5c8] ss:$16 sps:$4 sm:$0xff]  }
  0xb1   :  { %2054 = vmatprep.subr.bf16.mxu1 %v2920_v21  ;;  %v3004_v21 = vld [vmem:[%s4090_s1 + $0x5ac] ss:$16 sps:$4 sm:$0xff]   ;;  %v3002_v22 = vld [vmem:[%s4090_s1 + $0x5a8] ss:$16 sps:$4 sm:$0xff]  }
  0xb3   :  { %2080 = vmatpush1.bf16.msra.mxu0 %v2921_v26  ;;  %v3010_v26 = vld [vmem:[%s4090_s1 + $0x58c] ss:$16 sps:$4 sm:$0xff]  }
  0xb4   :  { %2055 = vmatpush2.bf16.msra.mxu1 %v2918_v24  ;;  %2081 = vmatprep.subr.bf16.mxu0 %v2929_v28  ;;  %v3005_v24 = vld [vmem:[%s4090_s1 + $0x6a8] ss:$16 sps:$4 sm:$0xff]  }
  0xb5   :  { %2056 = vmatprep.subr.bf16.mxu1 %v2926_v27  ;;  %v3008_v27 = vld [vmem:[%s4090_s1 + $0x588] ss:$16 sps:$4 sm:$0xff]  }
  0xb6   :  { %v3011_v28 = vld [vmem:[%s4090_s1 + $0x688] ss:$16 sps:$4 sm:$0xff]  }
  0xb7   :  { %2082 = vmatpush1.bf16.msra.mxu0 %v2927_v30  ;;  %v3019_v30 = vld [vmem:[%s4090_s1 + $0x66c] ss:$16 sps:$4 sm:$0xff]  }
  0xb8   :  { %2057 = vmatpush2.bf16.msra.mxu1 %v2924_v6  ;;  %2083 = vmatprep.subr.bf16.mxu0 %v2935_v32  ;;  %v3016_v6 = vld [vmem:[%s4090_s1 + $0x56c] ss:$16 sps:$4 sm:$0xff]   ;;  %v3017_v32 = vld [vmem:[%s4090_s1 + $0x668] ss:$16 sps:$4 sm:$0xff]  }
  0xb9   :  { %2058 = vmatprep.subr.bf16.mxu1 %v2932_v31  ;;  %v3014_v31 = vld [vmem:[%s4090_s1 + $0x568] ss:$16 sps:$4 sm:$0xff]  }
  0xbb   :  { %2084 = vmatpush1.bf16.msra.mxu0 %v2933_v34  ;;  %v3025_v34 = vld [vmem:[%s4090_s1 + $0x64c] ss:$16 sps:$4 sm:$0xff]  }
  0xbc   :  { %2059 = vmatpush2.bf16.msra.mxu1 %v2930_v33  ;;  %2085 = vmatprep.subr.bf16.mxu0 %v2941_v36  ;;  %v3022_v33 = vld [vmem:[%s4090_s1 + $0x54c] ss:$16 sps:$4 sm:$0xff]   ;;  %v3023_v36 = vld [vmem:[%s4090_s1 + $0x648] ss:$16 sps:$4 sm:$0xff]  }
  0xbd   :  { %2060 = vmatprep.subr.bf16.mxu1 %v2938_v35  ;;  %v3020_v35 = vld [vmem:[%s4090_s1 + $0x548] ss:$16 sps:$4 sm:$0xff]  }
  0xbf   :  { %2086 = vmatpush1.bf16.msra.mxu0 %v2939_v39  ;;  %v3031_v39 = vld [vmem:[%s4090_s1 + $0x62c] ss:$16 sps:$4 sm:$0xff]  }
  0xc0   :  { %2061 = vmatpush2.bf16.msra.mxu1 %v2936_v37  ;;  %2087 = vmatprep.subr.bf16.mxu0 %v2944_v40  ;;  %v3028_v37 = vld [vmem:[%s4090_s1 + $0x52c] ss:$16 sps:$4 sm:$0xff]   ;;  %v3026_v40 = vld [vmem:[%s4090_s1 + $0x528] ss:$16 sps:$4 sm:$0xff]  }
  0xc1   :  { %2112 = vmatprep.subr.bf16.mxu1 %v2947_v41  ;;  %v3029_v41 = vld [vmem:[%s4090_s1 + $0x628] ss:$16 sps:$4 sm:$0xff]  }
  0xc3   :  { %2063 = vmatmul.mubr.bf16.vlgmr.msra.gmra.mxu1 %v3331_v13  ;;  %2088 = vmatpush2.bf16.msra.mxu0 %v2942_v60  ;;  %v2959_v13 = vld [vmem:[%s4090_s1 + $0x4ac] ss:$16 sps:$4 sm:$0xff]  }
  0xc4   :  { %2113 = vmatpush1.bf16.msra.mxu1 %v2945_v42  ;;  %2089 = vmatprep.subr.bf16.mxu0 %v2950_v44  ;;  %v3034_v60 = vld [vmem:[%s4090_s1 + $0x50c] ss:$16 sps:$4 sm:$0xff]   ;;  %v3032_v44 = vld [vmem:[%s4090_s1 + $0x508] ss:$16 sps:$4 sm:$0xff]  }
  0xc5   :  { %2114 = vmatprep.subr.bf16.mxu1 %v2953_v45  ;;  %2144 = vmatprep.mubr.bf16.mxu1 %v3343_v17  ;;  %v2965_v17 = vld [vmem:[%s4090_s1 + $0x48c] ss:$16 sps:$4 sm:$0xff]   ;;  %v3035_v45 = vld [vmem:[%s4090_s1 + $0x608] ss:$16 sps:$4 sm:$0xff]  }
  0xc6   :  { %v3037_v42 = vld [vmem:[%s4090_s1 + $0x60c] ss:$16 sps:$4 sm:$0xff]  }
  0xc7   :  { %2090 = vmatpush2.bf16.msra.mxu0 %v2948_v46  ;;  %v3040_v46 = vld [vmem:[%s4090_s1 + $0x7ec] ss:$16 sps:$4 sm:$0xff]  }
  0xc8   :  { %2115 = vmatpush1.bf16.msra.mxu1 %v2951_v47  ;;  %2091 = vmatprep.subr.bf16.mxu0 %v2956_v48  ;;  %v3043_v47 = vld [vmem:[%s4090_s1 + $0x8ec] ss:$16 sps:$4 sm:$0xff]   ;;  %v3038_v48 = vld [vmem:[%s4090_s1 + $0x7e8] ss:$16 sps:$4 sm:$0xff]  }
  0xc9   :  { %2116 = vmatprep.subr.bf16.mxu1 %v2959_v13  ;;  %v3041_v13 = vld [vmem:[%s4090_s1 + $0x8e8] ss:$16 sps:$4 sm:$0xff]  }
  0xcb   :  { %2092 = vmatpush2.bf16.msra.mxu0 %v2954_v50  ;;  %v3046_v50 = vld [vmem:[%s4090_s1 + $0x7cc] ss:$16 sps:$4 sm:$0xff]  }
  0xcc   :  { %2117 = vmatpush1.bf16.msra.mxu1 %v2957_v51  ;;  %2093 = vmatprep.subr.bf16.mxu0 %v2962_v52  ;;  %v3049_v51 = vld [vmem:[%s4090_s1 + $0x8cc] ss:$16 sps:$4 sm:$0xff]  }
  0xcd   :  { %2118 = vmatprep.subr.bf16.mxu1 %v2965_v17 }
  0xcf   :  { %2094 = vmatpush2.bf16.msra.mxu0 %v2960_v53 }
  0xd0   :  { %2119 = vmatpush1.bf16.msra.mxu1 %v2963_v54  ;;  %2095 = vmatprep.subr.bf16.mxu0 %v2968_v55  ;;  %v3044_v54 = vld [vmem:[%s4090_s1 + $0x7c8] ss:$16 sps:$4 sm:$0xff]  }
  0xd1   :  { %2120 = vmatprep.subr.bf16.mxu1 %v2971_v56  ;;  %v3047_v55 = vld [vmem:[%s4090_s1 + $0x8c8] ss:$16 sps:$4 sm:$0xff]  }
  0xd3   :  { %2096 = vmatpush2.bf16.msra.mxu0 %v2966_v57 }
  0xd4   :  { %2121 = vmatpush1.bf16.msra.mxu1 %v2969_v58  ;;  %2097 = vmatprep.subr.bf16.mxu0 %v2974_v59  ;;  %v3055_v58 = vld [vmem:[%s4090_s1 + $0x8ac] ss:$16 sps:$4 sm:$0xff]  }
  0xd5   :  { %2122 = vmatprep.subr.bf16.mxu1 %v2977_v61 }
  0xd7   :  { %2098 = vmatpush2.bf16.msra.mxu0 %v2972_v62 }
  0xd8   :  { %2123 = vmatpush1.bf16.msra.mxu1 %v2975_v63  ;;  %2099 = vmatprep.subr.bf16.mxu0 %v2980_v1  ;;  %v3050_v63 = vld [vmem:[%s4090_s1 + $0x7a8] ss:$16 sps:$4 sm:$0xff]  }
  0xd9   :  { %2124 = vmatprep.subr.bf16.mxu1 %v2983_v2  ;;  %v3053_v1 = vld [vmem:[%s4090_s1 + $0x8a8] ss:$16 sps:$4 sm:$0xff]  }
  0xdb   :  { %2100 = vmatpush2.bf16.msra.mxu0 %v2978_v4 }
  0xdc   :  { %2125 = vmatpush1.bf16.msra.mxu1 %v2981_v5  ;;  %2101 = vmatprep.subr.bf16.mxu0 %v2986_v7  ;;  %v3061_v5 = vld [vmem:[%s4090_s1 + $0x88c] ss:$16 sps:$4 sm:$0xff]   ;;  %v3056_v7 = vld [vmem:[%s4090_s1 + $0x788] ss:$16 sps:$4 sm:$0xff]  }
  0xdd   :  { %2126 = vmatprep.subr.bf16.mxu1 %v2989_v8  ;;  %v3059_v8 = vld [vmem:[%s4090_s1 + $0x888] ss:$16 sps:$4 sm:$0xff]  }
  0xdf   :  { %2102 = vmatpush2.bf16.msra.mxu0 %v2984_v9  ;;  %v3064_v9 = vld [vmem:[%s4090_s1 + $0x76c] ss:$16 sps:$4 sm:$0xff]  }
  0xe0   :  { %2127 = vmatpush1.bf16.msra.mxu1 %v2987_v10  ;;  %2153 = vmatprep.subr.bf16.mxu0 %v2995_v12  ;;  %v3067_v10 = vld [vmem:[%s4090_s1 + $0x86c] ss:$16 sps:$4 sm:$0xff]   ;;  %v3065_v12 = vld [vmem:[%s4090_s1 + $0x868] ss:$16 sps:$4 sm:$0xff]  }
  0xe1   :  { %2128 = vmatprep.subr.bf16.mxu1 %v2992_v11  ;;  %v3062_v11 = vld [vmem:[%s4090_s1 + $0x768] ss:$16 sps:$4 sm:$0xff]  }
  0xe2   :  { %2104 = vmatmul.mubr.bf16.vlgmr.msra.gmra.mxu0 %v3347_v18  ;;  %v3007_v18 = vld [vmem:[%s4090_s1 + $0x6ac] ss:$16 sps:$4 sm:$0xff]  }
  0xe3   :  { %2154 = vmatpush1.bf16.msra.mxu0 %v2993_v15  ;;  %2185 = vmatprep.mubr.bf16.mxu0 %v3363_v23  ;;  %v3013_v23 = vld [vmem:[%s4090_s1 + $0x68c] ss:$16 sps:$4 sm:$0xff]  }
  0xe4   :  { %2129 = vmatpush2.bf16.msra.mxu1 %v2990_v14  ;;  %2155 = vmatprep.subr.bf16.mxu0 %v3001_v0  ;;  %v3070_v14 = vld [vmem:[%s4090_s1 + $0x74c] ss:$16 sps:$4 sm:$0xff]   ;;  %v3071_v0 = vld [vmem:[%s4090_s1 + $0x848] ss:$16 sps:$4 sm:$0xff]  }
  0xe5   :  { %2130 = vmatprep.subr.bf16.mxu1 %v2998_v16  ;;  %v3073_v15 = vld [vmem:[%s4090_s1 + $0x84c] ss:$16 sps:$4 sm:$0xff]   ;;  %v3068_v16 = vld [vmem:[%s4090_s1 + $0x748] ss:$16 sps:$4 sm:$0xff]  }
  0xe7   :  { %2156 = vmatpush1.bf16.msra.mxu0 %v2999_v20  ;;  %v3079_v20 = vld [vmem:[%s4090_s1 + $0x82c] ss:$16 sps:$4 sm:$0xff]  }
  0xe8   :  { %2131 = vmatpush2.bf16.msra.mxu1 %v2996_v19  ;;  %2157 = vmatprep.subr.bf16.mxu0 %v3007_v18  ;;  %v3076_v19 = vld [vmem:[%s4090_s1 + $0x72c] ss:$16 sps:$4 sm:$0xff]   ;;  %v3077_v18 = vld [vmem:[%s4090_s1 + $0x828] ss:$16 sps:$4 sm:$0xff]  }
  0xe9   :  { %2132 = vmatprep.subr.bf16.mxu1 %v3004_v21  ;;  %v3074_v21 = vld [vmem:[%s4090_s1 + $0x728] ss:$16 sps:$4 sm:$0xff]  }
  0xeb   :  { %2158 = vmatpush1.bf16.msra.mxu0 %v3005_v24  ;;  %v3085_v24 = vld [vmem:[%s4090_s1 + $0x80c] ss:$16 sps:$4 sm:$0xff]  }
  0xec   :  { %2133 = vmatpush2.bf16.msra.mxu1 %v3002_v22  ;;  %2159 = vmatprep.subr.bf16.mxu0 %v3013_v23  ;;  %v3082_v22 = vld [vmem:[%s4090_s1 + $0x70c] ss:$16 sps:$4 sm:$0xff]   ;;  %v3083_v23 = vld [vmem:[%s4090_s1 + $0x808] ss:$16 sps:$4 sm:$0xff]  }
  0xed   :  { %2134 = vmatprep.subr.bf16.mxu1 %v3010_v26  ;;  %v3080_v26 = vld [vmem:[%s4090_s1 + $0x708] ss:$16 sps:$4 sm:$0xff]  }
  0xef   :  { %2160 = vmatpush1.bf16.msra.mxu0 %v3011_v28 }
  0xf0   :  { %2135 = vmatpush2.bf16.msra.mxu1 %v3008_v27  ;;  %2161 = vmatprep.subr.bf16.mxu0 %v3019_v30 }
  0xf1   :  { %2136 = vmatprep.subr.bf16.mxu1 %v3016_v6 }
  0xf3   :  { %2162 = vmatpush1.bf16.msra.mxu0 %v3017_v32 }
  0xf4   :  { %2137 = vmatpush2.bf16.msra.mxu1 %v3014_v31  ;;  %2163 = vmatprep.subr.bf16.mxu0 %v3025_v34 }
  0xf5   :  { %2138 = vmatprep.subr.bf16.mxu1 %v3022_v33 }
  0xf7   :  { %2164 = vmatpush1.bf16.msra.mxu0 %v3023_v36 }
  0xf8   :  { %2139 = vmatpush2.bf16.msra.mxu1 %v3020_v35  ;;  %2165 = vmatprep.subr.bf16.mxu0 %v3031_v39 }
  0xf9   :  { %2140 = vmatprep.subr.bf16.mxu1 %v3028_v37 }
  0xfb   :  { %2166 = vmatpush1.bf16.msra.mxu0 %v3029_v41  ;;  %v4064_v41 = vld [vmem:[%s4093_s3] sm:$0xf] }
  0xfc   :  { %2141 = vmatpush2.bf16.msra.mxu1 %v3026_v40  ;;  %2167 = vmatprep.subr.bf16.mxu0 %v3037_v42  ;;  %v2239_v40 = vsub.s32 0, %v3235_v43 }
  0xfd   :  { %2142 = vmatprep.subr.bf16.mxu1 %v3034_v60 }
  0xff   :  { %2168 = vmatpush1.bf16.msra.mxu0 %v3035_v45  ;;  %v2266_v45 = vrot.slane %v4064_v41, %v2239_v40 }
 0x100   :  { %2143 = vmatpush2.bf16.msra.mxu1 %v3032_v44  ;;  %2169 = vmatprep.subr.bf16.mxu0 %v3040_v46 }
 0x101   :  { %2194 = vmatprep.subr.bf16.mxu1 %v3043_v47  ;;  %v4072_v47 = vld [vmem:[%s4094_s4] sm:$0xf] }
 0x102   :  { %v1859_v52 = vpop.f32.mrf.mxu0 }
 0x103   :  { %v1900_v17 = vpop.f32.mrf.mxu1  ;;  %2145 = vmatmul.mubr.bf16.vlgmr.msra.gmra.mxu1 %v3539_v25  ;;  %2170 = vmatpush2.bf16.msra.mxu0 %v3038_v48  ;;  %v3052_v25 = vld [vmem:[%s4090_s1 + $0x7ac] ss:$16 sps:$4 sm:$0xff]  }
 0x104   :  { %v3970_v53 = vadd.f32 %v1900_v17, %v1859_v52  ;;  %2195 = vmatpush1.bf16.msra.mxu1 %v3041_v13  ;;  %v1861_v56 = vpop.f32.mrf.mxu0  ;;  %2171 = vmatprep.subr.bf16.mxu0 %v3046_v50 }
 0x105   :  { %v1902_v57 = vpop.f32.mrf.mxu1  ;;  %2196 = vmatprep.subr.bf16.mxu1 %v3049_v51  ;;  %2226 = vmatprep.mubr.bf16.mxu1 %v3087_v38  ;;  %v3058_v38 = vld [vmem:[%s4090_s1 + $0x78c] ss:$16 sps:$4 sm:$0xff]  }
 0x106   :  { %v1903_v59 = vadd.f32 %v1902_v57, %v1861_v56  ;;  %v1863_v61 = vpop.f32.mrf.mxu0 }
 0x107   :  { %v1904_v62 = vpop.f32.mrf.mxu1  ;;  %2172 = vmatpush2.bf16.msra.mxu0 %v3044_v54 }
 0x108   :  { %2197 = vmatpush1.bf16.msra.mxu1 %v3047_v55  ;;  %v1864_v2 = vpop.f32.mrf.mxu0  ;;  %2173 = vmatprep.subr.bf16.mxu0 %v3052_v25 }
 0x109   :  { %v1905_v4 = vpop.f32.mrf.mxu1  ;;  %2198 = vmatprep.subr.bf16.mxu1 %v3055_v58 }
 0x10b   :  { %2174 = vmatpush2.bf16.msra.mxu0 %v3050_v63 }
 0x10c   :  { %2199 = vmatpush1.bf16.msra.mxu1 %v3053_v1  ;;  %2175 = vmatprep.subr.bf16.mxu0 %v3058_v38 }
 0x10d   :  { %2200 = vmatprep.subr.bf16.mxu1 %v3061_v5 }
 0x10f   :  { %2176 = vmatpush2.bf16.msra.mxu0 %v3056_v7 }
 0x110   :  { %2201 = vmatpush1.bf16.msra.mxu1 %v3059_v8  ;;  %2177 = vmatprep.subr.bf16.mxu0 %v3064_v9 }
 0x111   :  { %2202 = vmatprep.subr.bf16.mxu1 %v3067_v10 }
 0x113   :  { %2178 = vmatpush2.bf16.msra.mxu0 %v3062_v11 }
 0x114   :  { %2203 = vmatpush1.bf16.msra.mxu1 %v3065_v12  ;;  %2179 = vmatprep.subr.bf16.mxu0 %v3070_v14 }
 0x115   :  { %2204 = vmatprep.subr.bf16.mxu1 %v3073_v15 }
 0x117   :  { %2180 = vmatpush2.bf16.msra.mxu0 %v3068_v16 }
 0x118   :  { %2205 = vmatpush1.bf16.msra.mxu1 %v3071_v0  ;;  %2181 = vmatprep.subr.bf16.mxu0 %v3076_v19  ;;  %v2247_v0 = vsub.s32 2, %v3235_v43 }
 0x119   :  { %2206 = vmatprep.subr.bf16.mxu1 %v3079_v20 }
 0x11b   :  { %2182 = vmatpush2.bf16.msra.mxu0 %v3074_v21  ;;  %v2251_v21 = vsub.s32 3, %v3235_v43 }
 0x11c   :  { %2207 = vmatpush1.bf16.msra.mxu1 %v3077_v18  ;;  %2183 = vmatprep.subr.bf16.mxu0 %v3082_v22 }
 0x11d   :  { %2208 = vmatprep.subr.bf16.mxu1 %v3085_v24 }
 0x11f   :  { %2184 = vmatpush2.bf16.msra.mxu0 %v3080_v26 }
 0x120   :  { %2209 = vmatpush1.bf16.msra.mxu1 %v3083_v23 }
 0x122   :  { %2186 = vmatmul.mubr.bf16.vlgmr.msra.gmra.mxu0 %v3555_v29  ;;  %v4058_v29 = vld [vmem:[%s4092_s2] sm:$0xf] }
 0x123   :  { %2227 = vmatmul.mubr.bf16.vlgmr.msra.gmra.mxu1 %v3661_v3  ;;  %v2243_v3 = vsub.s32 1, %v3235_v43  ;;  %v2240_v60 = vrot.slane %v4058_v29, %v2239_v40  ;;  %v2248_v23 = vrot.slane %v4058_v29, %v2247_v0  ;;  %v2278_v43 = vrot.slane %v4064_v41, %v2251_v21 }
 0x125   :  { %v2244_v46 = vrot.slane %v4058_v29, %v2243_v3  ;;  %v2270_v51 = vrot.slane %v4064_v41, %v2243_v3  ;;  %v2300_v25 = vrot.slane %v4072_v47, %v2243_v3  ;;  %v2304_v3 = vrot.slane %v4072_v47, %v2247_v0 }
 0x142   :  { %v1941_v27 = vpop.f32.mrf.mxu0 }
 0x143   :  { %v1982_v28 = vpop.f32.mrf.mxu1  ;;  %v1942_v6 = vadd.f32 %v1941_v27, %v3970_v53  ;;  %v2296_v53 = vrot.slane %v4072_v47, %v2239_v40 }
 0x144   :  { %v1943_v30 = vpop.f32.mrf.mxu0 }
 0x145   :  { %v1984_v31 = vpop.f32.mrf.mxu1  ;;  %v1983_v32 = vadd.f32 %v1982_v28, %v1942_v6  ;;  %v1944_v33 = vadd.f32 %v1943_v30, %v1903_v59  ;;  %v2274_v30 = vrot.slane %v4064_v41, %v2247_v0 }
 0x146   :  { %v1945_v34 = vpop.f32.mrf.mxu0 }
 0x147   :  { %v1986_v35 = vpop.f32.mrf.mxu1  ;;  %v1985_v36 = vadd.f32 %v1984_v31, %v1944_v33 }
 0x148   :  { %v1946_v37 = vpop.f32.mrf.mxu0 }
 0x149   :  { %v1987_v39 = vpop.f32.mrf.mxu1 }
 0x162   :  { %v2023_v42 = vpop.f32.mrf.mxu0 }
 0x163   :  { %v2024_v44 = vadd.f32 %v2023_v42, %v1983_v32  ;;  %v2252_v32 = vrot.slane %v4058_v29, %v2251_v21 }
 0x164   :  { %v2025_v48 = vpop.f32.mrf.mxu0 }
 0x165   :  { %v2257_v13 = vmul.f32 %v2240_v60, %v2024_v44  ;;  %v2026_v50 = vadd.f32 %v2025_v48, %v1985_v36 }
 0x166   :  { %v2027_v52 = vpop.f32.mrf.mxu0 }
 0x167   :  { %v2283_v17 = vadd.f32 %v2266_v45, %v2257_v13  ;;  %v2258_v54 = vmul.f32 %v2244_v46, %v2026_v50  ;;  %v2308_v45 = vrot.slane %v4072_v47, %v2251_v21 }
 0x168   :  { %v2028_v55 = vpop.f32.mrf.mxu0 }
 0x169   :  { %v2288_v56 = vmin.f32 %v2283_v17, 0.0  ;;  %v2284_v57 = vadd.f32 %v2270_v51, %v2258_v54 }
 0x16b   :  { %v2313_v58 = vmul.f32 %v2296_v53, %v2288_v56  ;;  %v2289_v59 = vmin.f32 %v2284_v57, 0.0 }
 0x16d   :  { %v2314_v61 = vmul.f32 %v2300_v25, %v2289_v59  ;;  %v2317_v62 = vsub.f32 %v2283_v17, %v2313_v58 }
 0x16f   :  { %v2318_v63 = vsub.f32 %v2284_v57, %v2314_v61 }
 0x171   :  { %v2648_v1 = vpack.c.bf16 %v2318_v63, %v2317_v62 }
 0x173   :  { %v2337_v52 = vrot.slane %v2648_v1, %v3253_v49 }
 0x183   :  { %v2064_v2 = vpop.f32.mrf.mxu1 }
 0x185   :  { %v2066_v4 = vpop.f32.mrf.mxu1 }
 0x187   :  { %v2068_v38 = vpop.f32.mrf.mxu1 }
 0x189   :  { %v2069_v5 = vpop.f32.mrf.mxu1 }
 0x1a2   :  { %v2105_v7 = vpop.f32.mrf.mxu0 }
 0x1a3   :  { %v2106_v16 = vadd.f32 %v2105_v7, %v2064_v2 }
 0x1a4   :  { %v2107_v8 = vpop.f32.mrf.mxu0 }
 0x1a5   :  { %v2108_v19 = vadd.f32 %v2107_v8, %v2066_v4 }
 0x1a6   :  { %v2109_v9 = vpop.f32.mrf.mxu0 }
 0x1a8   :  { %v2110_v10 = vpop.f32.mrf.mxu0 }
 0x1c3   :  { %v2146_v11 = vpop.f32.mrf.mxu1 }
 0x1c4   :  { %v2147_v20 = vadd.f32 %v2146_v11, %v2106_v16 }
 0x1c5   :  { %v2148_v12 = vpop.f32.mrf.mxu1 }
 0x1c6   :  { %v2149_v24 = vadd.f32 %v2148_v12, %v2108_v19 }
 0x1c7   :  { %v2150_v14 = vpop.f32.mrf.mxu1 }
 0x1c9   :  { %v2151_v15 = vpop.f32.mrf.mxu1 }
 0x1e2   :  { %v2187_v18 = vpop.f32.mrf.mxu0 }
 0x1e3   :  { %v2228_v22 = vpop.f32.mrf.mxu1  ;;  %v2188_v26 = vadd.f32 %v2187_v18, %v2147_v20 }
 0x1e4   :  { %v2189_v27 = vpop.f32.mrf.mxu0 }
 0x1e5   :  { %v2230_v28 = vpop.f32.mrf.mxu1  ;;  %v2229_v6 = vadd.f32 %v2228_v22, %v2188_v26  ;;  %v2190_v31 = vadd.f32 %v2189_v27, %v2149_v24 }
 0x1e6   :  { %v2191_v33 = vpop.f32.mrf.mxu0 }
 0x1e7   :  { %v2232_v34 = vpop.f32.mrf.mxu1  ;;  %v2259_v35 = vmul.f32 %v2248_v23, %v2229_v6  ;;  %v2231_v36 = vadd.f32 %v2230_v28, %v2190_v31 }
 0x1e8   :  { %v2192_v37 = vpop.f32.mrf.mxu0 }
 0x1e9   :  { %v2233_v39 = vpop.f32.mrf.mxu1  ;;  %v2285_v40 = vadd.f32 %v2274_v30, %v2259_v35  ;;  %v2260_v60 = vmul.f32 %v2252_v32, %v2231_v36 }
 0x1eb   :  { %v2290_v42 = vmin.f32 %v2285_v40, 0.0  ;;  %v2286_v44 = vadd.f32 %v2278_v43, %v2260_v60 }
 0x1ed   :  { %v2315_v46 = vmul.f32 %v2304_v3, %v2290_v42  ;;  %v2291_v48 = vmin.f32 %v2286_v44, 0.0 }
 0x1ef   :  { %v2316_v13 = vmul.f32 %v2308_v45, %v2291_v48  ;;  %v2319_v29 = vsub.f32 %v2285_v40, %v2315_v46 }
 0x1f1   :  { %v2320_v50 = vsub.f32 %v2286_v44, %v2316_v13 }
 0x1f3   :  { %v2649_v51 = vpack.c.bf16 %v2320_v50, %v2319_v29 }
 0x1f5   :  { %v2344_v41 = vrot.slane %v2649_v51, %v3253_v49 }
 0x1f7   :  { %v2345_v17 = vcombine.low %v2337_v52, %v2344_v41 }
 0x1f9   :  { %2650 = vst.sshfl [vmem:[%s4095_s5] sm:$0x55 pattern:$0x73625140] %v2345_v17 }

</bundles_post_ra>
